<compile_context>
chip_gen: v7x
topology: tpu7x:2x2x1
jax: 0.10.0
libtpu: 0.0.40
codegen_flags: <defaults>
</compile_context>

<pallas_src>
import jax
import jax.numpy as jnp
from jax.experimental import pallas as pl
from jax.experimental.pallas import tpu as pltpu

_LANE = 128


def _round_up(n, m):
    return ((n + m - 1) // m) * m


def _fc_kernel(x_ref, w1_ref, b1_ref, w2_ref, b2_ref, w3_ref, b3_ref, o_ref):
    # Layer 1: (TM, in_dim) @ (in_dim, 256) + b1, ReLU   (MXU, f32 accumulation)
    x = x_ref[...].astype(w1_ref.dtype)
    h = jnp.dot(x, w1_ref[...], preferred_element_type=jnp.float32)
    h = jnp.maximum(h + b1_ref[...], 0.0)
    # Layer 2: (TM, 256) @ (256, 256) + b2, ReLU
    h = jnp.dot(h.astype(w2_ref.dtype), w2_ref[...],
                preferred_element_type=jnp.float32)
    h = jnp.maximum(h + b2_ref[...], 0.0)
    # Layer 3: (TM, 256) @ (256, NPAD) + b3   (lane-dense padded output)
    out = jnp.dot(h.astype(w3_ref.dtype), w3_ref[...],
                  preferred_element_type=jnp.float32)
    o_ref[...] = (out + b3_ref[...]).astype(o_ref.dtype)


def prepare_params(params, use_bf16_weights=False):
    """One-time conversion of PyTorch-layout (out, in) params.

    Transposes weights to (in, out) and zero-pads the classifier to a
    lane-dense multiple of 128 columns.  Do this ONCE outside the hot path.
    NOTE: use_bf16_weights quantizes the weights (and, inside the kernel, the
    activations feeding each matmul); accuracy impact ~1e-3 on these logits.
    """
    num_classes = params["fc3_w"].shape[0]
    npad = _round_up(num_classes, _LANE)
    wdt = jnp.bfloat16 if use_bf16_weights else jnp.float32

    w1 = params["fc1_w"].T.astype(wdt)                         # (in_dim, 256)
    w2 = params["fc2_w"].T.astype(wdt)                         # (256, 256)
    w3 = jnp.pad(params["fc3_w"].T.astype(wdt),
                 ((0, 0), (0, npad - num_classes)))            # (256, NPAD)
    b1 = params["fc1_b"].astype(jnp.float32)[None, :]          # (1, 256)
    b2 = params["fc2_b"].astype(jnp.float32)[None, :]          # (1, 256)
    b3 = jnp.pad(params["fc3_b"].astype(jnp.float32),
                 (0, npad - num_classes))[None, :]             # (1, NPAD)
    return {"w1": w1, "b1": b1, "w2": w2, "b2": b2, "w3": w3, "b3": b3}


def fc_forward(x, prepped, num_classes, *, block_m=None, slice_output=True):
    """x: (B, C, H, W), f32 or bf16.  prepped: output of prepare_params."""
    B = x.shape[0]
    # Same row-major flatten as torch .view; keep the producer's dtype so a
    # bf16 producer halves the dominant per-step x DMA (do NOT force f32 here,
    # and do NOT downcast an f32 HBM array here either -- extra HBM pass).
    x_flat = x.reshape(B, -1)
    in_dim = x_flat.shape[1]

    w1, b1 = prepped["w1"], prepped["b1"]
    w2, b2 = prepped["w2"], prepped["b2"]
    w3, b3 = prepped["w3"], prepped["b3"]
    npad = w3.shape[1]

    # ----- Batch tiling ------------------------------------------------------
    act_is_bf16 = x_flat.dtype == jnp.bfloat16
    mult = 16 if act_is_bf16 else 8                 # sublane packing multiple
    if block_m is None:
        block_m = 1024 if act_is_bf16 else 512      # f32 tiles kept v7x-safe
    block_m = max(mult, (block_m // mult) * mult)

    if B < 2 * mult:
        # Tiny batch: one full-dim tile (legal even when B < 8 because the
        # block equals the full array dim -- keep this invariant).
        tm = B
    elif B <= 2 * block_m:
        # Split into >= 2 tiles so both TensorCores get work on v7x megacore.
        tm = min(_round_up(pl.cdiv(B, 2), mult), block_m)
    else:
        tm = block_m
    grid = (pl.cdiv(B, tm),)

    # ----- VMEM budget (derived from the tile footprint) ---------------------
    x_bytes = int(x_flat.dtype.itemsize)
    resident_bytes = sum(int(a.size) * int(a.dtype.itemsize)
                         for a in (w1, b1, w2, b2, w3, b3))
    vmem_est = (2 * tm * in_dim * x_bytes      # double-buffered x tiles
                + 2 * resident_bytes           # worst case: weights 2x buffered
                + 2 * tm * npad * 4            # double-buffered output tiles
                + (4 << 20))                   # headroom for internal scratch
    vmem_limit = int(min(max(32 << 20, vmem_est), 64 << 20))  # v7x: 64 MiB phys

    def _call(single_buffer_weights):
        if single_buffer_weights:
            # Weights/biases have constant block indices -> keep one VMEM copy.
            resident = lambda a: pl.BlockSpec(a.shape, lambda i: (0,) * a.ndim,
                                              pipeline_mode=pl.Buffered(1))
        else:
            resident = lambda a: pl.BlockSpec(a.shape, lambda i: (0,) * a.ndim)
        return pl.pallas_call(
            _fc_kernel,
            out_shape=jax.ShapeDtypeStruct((B, npad), jnp.float32),
            grid_spec=pl.GridSpec(
                grid=grid,
                in_specs=[
                    pl.BlockSpec((tm, in_dim), lambda i: (i, 0)),  # x (pipelined)
                    resident(w1), resident(b1),
                    resident(w2), resident(b2),
                    resident(w3), resident(b3),
                ],
                out_specs=pl.BlockSpec((tm, npad), lambda i: (i, 0)),
            ),
            compiler_params=pltpu.CompilerParams(
                dimension_semantics=("parallel",),   # megacore sharding on v7x
                vmem_limit_bytes=vmem_limit,
            ),
        )(x_flat, w1, b1, w2, b2, w3, b3)

    try:
        out = _call(True)
    except Exception:
        # Fallback if this JAX build does not accept pipeline_mode=Buffered(1)
        # on pallas_call inputs; only costs the extra weight buffer in VMEM.
        out = _call(False)

    if slice_output:
        return out[:, :num_classes]
    return out  # padded (B, NPAD) lane-dense logits; consumer slices/fuses


def init_params(key, num_classes, inputs=3):
    """Deterministic PyTorch-layout parameter init matching the module's shapes."""
    in_dim = inputs * 32 * 32
    ks = jax.random.split(key, 6)

    def lin(kw, kb, fan_in, fan_out):
        bound = 1.0 / jnp.sqrt(fan_in)
        w = jax.random.uniform(kw, (fan_out, fan_in), jnp.float32, -bound, bound)
        b = jax.random.uniform(kb, (fan_out,), jnp.float32, -bound, bound)
        return w, b

    w1, b1 = lin(ks[0], ks[1], in_dim, 256)
    w2, b2 = lin(ks[2], ks[3], 256, 256)
    w3, b3 = lin(ks[4], ks[5], 256, num_classes)
    return {"fc1_w": w1, "fc1_b": b1,
            "fc2_w": w2, "fc2_b": b2,
            "fc3_w": w3, "fc3_b": b3}


def fc_reference(x, params):
    """Pure-JAX reference mirroring the PyTorch forward (true-f32 matmuls)."""
    p = jax.lax.Precision.HIGHEST
    h = x.reshape(x.shape[0], -1).astype(jnp.float32)
    h = jnp.maximum(jnp.dot(h, params["fc1_w"].T, precision=p) + params["fc1_b"], 0.0)
    h = jnp.maximum(jnp.dot(h, params["fc2_w"].T, precision=p) + params["fc2_b"], 0.0)
    return jnp.dot(h, params["fc3_w"].T, precision=p) + params["fc3_b"]


if __name__ == "__main__":
    num_classes = 10
    inputs = 3

    key = jax.random.PRNGKey(0)
    kp, kx1, kx2, kx3 = jax.random.split(key, 4)
    params = init_params(kp, num_classes, inputs)

    # Tolerances: the f32-weight kernel uses the MXU's default f32 matmul path,
    # so allow a small slack vs the Precision.HIGHEST reference; bf16 weights +
    # bf16 activations quantize both matmul operands (intentional fast path).
    F32_TOL = dict(atol=1e-2, rtol=1e-2)
    BF16_TOL = dict(atol=5e-2, rtol=5e-2)

    # --- f32 weights + f32 activations, tiny batch (single full-dim tile) ---
    prepped_f32 = prepare_params(params, use_bf16_weights=False)
    x_small = jax.random.normal(kx1, (2, inputs, 32, 32), jnp.float32)
    out = jax.block_until_ready(fc_forward(x_small, prepped_f32, num_classes))
    assert out.shape == (2, num_classes)
    assert jnp.allclose(out, fc_reference(x_small, params), **F32_TOL)

    # --- f32 weights, medium batch -> >= 2 grid steps (pipelined / megacore) ---
    x_med = jax.random.normal(kx2, (64, inputs, 32, 32), jnp.float32)
    out_med = jax.block_until_ready(fc_forward(x_med, prepped_f32, num_classes))
    assert out_med.shape == (64, num_classes)
    assert jnp.allclose(out_med, fc_reference(x_med, params), **F32_TOL)

    # --- bf16 weights + bf16 activations (producer-emitted), padded output ---
    prepped_bf16 = prepare_params(params, use_bf16_weights=True)
    x_bf16 = jax.random.normal(kx3, (32, inputs, 32, 32),
                               jnp.float32).astype(jnp.bfloat16)
    out_pad = jax.block_until_ready(
        fc_forward(x_bf16, prepped_bf16, num_classes, slice_output=False))
    assert out_pad.shape == (32, 128)
    assert jnp.allclose(out_pad[:, :num_classes],
                        fc_reference(x_bf16, params), **BF16_TOL)

    print("KERNEL_OK")
</pallas_src>

<mosaic_0001>
module attributes {stable_mosaic.version = 11 : i64} {
  func.func @_fc_kernel(%arg0: i32, %arg1: memref<2x3072xf32, #tpu.memory_space<vmem>>, %arg2: memref<3072x256xf32, #tpu.memory_space<vmem>>, %arg3: memref<1x256xf32, #tpu.memory_space<vmem>>, %arg4: memref<256x256xf32, #tpu.memory_space<vmem>>, %arg5: memref<1x256xf32, #tpu.memory_space<vmem>>, %arg6: memref<256x128xf32, #tpu.memory_space<vmem>>, %arg7: memref<1x128xf32, #tpu.memory_space<vmem>>, %arg8: memref<2x128xf32, #tpu.memory_space<vmem>>) attributes {dimension_semantics = [#tpu.dimension_semantics<parallel>], iteration_bounds = array<i64: 1>, scalar_prefetch = 0 : i64, scratch_operands = 0 : i64, tpu.core_type = #tpu.core_type<tc>, window_params = [{transform_indices = @transform_0, window_bounds = array<i64: 2, 3072>}, {pipeline_mode = #tpu.pipeline_mode<synchronous>, transform_indices = @transform_1, window_bounds = array<i64: 3072, 256>}, {pipeline_mode = #tpu.pipeline_mode<synchronous>, transform_indices = @transform_2, window_bounds = array<i64: 1, 256>}, {pipeline_mode = #tpu.pipeline_mode<synchronous>, transform_indices = @transform_3, window_bounds = array<i64: 256, 256>}, {pipeline_mode = #tpu.pipeline_mode<synchronous>, transform_indices = @transform_4, window_bounds = array<i64: 1, 256>}, {pipeline_mode = #tpu.pipeline_mode<synchronous>, transform_indices = @transform_5, window_bounds = array<i64: 256, 128>}, {pipeline_mode = #tpu.pipeline_mode<synchronous>, transform_indices = @transform_6, window_bounds = array<i64: 1, 128>}, {transform_indices = @transform_7, window_bounds = array<i64: 2, 128>}]} {
    %c0 = arith.constant 0 : index
    %c0_0 = arith.constant 0 : index
    %0 = vector.load %arg1[%c0, %c0_0] : memref<2x3072xf32, #tpu.memory_space<vmem>>, vector<2x3072xf32>
    %c0_1 = arith.constant 0 : index
    %c0_2 = arith.constant 0 : index
    %1 = vector.load %arg2[%c0_1, %c0_2] : memref<3072x256xf32, #tpu.memory_space<vmem>>, vector<3072x256xf32>
    %cst = arith.constant dense<0.000000e+00> : vector<2x256xf32>
    %2 = tpu.matmul %0, %1, %cst {dimension_numbers = #tpu.dot_dimension_numbers<[1], [0], [0], [1], [0, 0, 1, 1], [], []>} : vector<2x3072xf32>, vector<3072x256xf32>, vector<2x256xf32> -> vector<2x256xf32>
    %c0_3 = arith.constant 0 : index
    %c0_4 = arith.constant 0 : index
    %3 = vector.load %arg3[%c0_3, %c0_4] : memref<1x256xf32, #tpu.memory_space<vmem>>, vector<1x256xf32>
    %4 = vector.broadcast %3 : vector<1x256xf32> to vector<2x256xf32>
    %5 = arith.addf %2, %4 : vector<2x256xf32>
    %cst_5 = arith.constant 0.000000e+00 : f32
    %6 = vector.broadcast %cst_5 : f32 to vector<2x256xf32>
    %7 = arith.maximumf %5, %6 : vector<2x256xf32>
    %c0_6 = arith.constant 0 : index
    %c0_7 = arith.constant 0 : index
    %8 = vector.load %arg4[%c0_6, %c0_7] : memref<256x256xf32, #tpu.memory_space<vmem>>, vector<256x256xf32>
    %cst_8 = arith.constant dense<0.000000e+00> : vector<2x256xf32>
    %9 = tpu.matmul %7, %8, %cst_8 {dimension_numbers = #tpu.dot_dimension_numbers<[1], [0], [0], [1], [0, 0, 1, 1], [], []>} : vector<2x256xf32>, vector<256x256xf32>, vector<2x256xf32> -> vector<2x256xf32>
    %c0_9 = arith.constant 0 : index
    %c0_10 = arith.constant 0 : index
    %10 = vector.load %arg5[%c0_9, %c0_10] : memref<1x256xf32, #tpu.memory_space<vmem>>, vector<1x256xf32>
    %11 = vector.broadcast %10 : vector<1x256xf32> to vector<2x256xf32>
    %12 = arith.addf %9, %11 : vector<2x256xf32>
    %cst_11 = arith.constant 0.000000e+00 : f32
    %13 = vector.broadcast %cst_11 : f32 to vector<2x256xf32>
    %14 = arith.maximumf %12, %13 : vector<2x256xf32>
    %c0_12 = arith.constant 0 : index
    %c0_13 = arith.constant 0 : index
    %15 = vector.load %arg6[%c0_12, %c0_13] : memref<256x128xf32, #tpu.memory_space<vmem>>, vector<256x128xf32>
    %cst_14 = arith.constant dense<0.000000e+00> : vector<2x128xf32>
    %16 = tpu.matmul %14, %15, %cst_14 {dimension_numbers = #tpu.dot_dimension_numbers<[1], [0], [0], [1], [0, 0, 1, 1], [], []>} : vector<2x256xf32>, vector<256x128xf32>, vector<2x128xf32> -> vector<2x128xf32>
    %c0_15 = arith.constant 0 : index
    %c0_16 = arith.constant 0 : index
    %17 = vector.load %arg7[%c0_15, %c0_16] : memref<1x128xf32, #tpu.memory_space<vmem>>, vector<1x128xf32>
    %18 = vector.broadcast %17 : vector<1x128xf32> to vector<2x128xf32>
    %19 = arith.addf %16, %18 : vector<2x128xf32>
    %c0_17 = arith.constant 0 : index
    %c0_18 = arith.constant 0 : index
    %20 = vector.load %arg8[%c0_17, %c0_18] : memref<2x128xf32, #tpu.memory_space<vmem>>, vector<2x128xf32>
    tpu.vector_store %arg8[%c0_17, %c0_18], %19 {strides = array<i32>} : memref<2x128xf32, #tpu.memory_space<vmem>>, vector<2x128xf32>,
    return
  }
  func.func @transform_0(%arg0: i32) -> (i32, i32) {
    %c0_i32 = arith.constant 0 : i32
    %c0_i32_0 = arith.constant 0 : i32
    return %arg0, %c0_i32 : i32, i32
  }
  func.func @transform_1(%arg0: i32) -> (i32, i32) {
    %c0_i32 = arith.constant 0 : i32
    %c0_i32_0 = arith.constant 0 : i32
    %c0_i32_1 = arith.constant 0 : i32
    return %c0_i32, %c0_i32_0 : i32, i32
  }
  func.func @transform_2(%arg0: i32) -> (i32, i32) {
    %c0_i32 = arith.constant 0 : i32
    %c0_i32_0 = arith.constant 0 : i32
    %c0_i32_1 = arith.constant 0 : i32
    return %c0_i32, %c0_i32_0 : i32, i32
  }
  func.func @transform_3(%arg0: i32) -> (i32, i32) {
    %c0_i32 = arith.constant 0 : i32
    %c0_i32_0 = arith.constant 0 : i32
    %c0_i32_1 = arith.constant 0 : i32
    return %c0_i32, %c0_i32_0 : i32, i32
  }
  func.func @transform_4(%arg0: i32) -> (i32, i32) {
    %c0_i32 = arith.constant 0 : i32
    %c0_i32_0 = arith.constant 0 : i32
    %c0_i32_1 = arith.constant 0 : i32
    return %c0_i32, %c0_i32_0 : i32, i32
  }
  func.func @transform_5(%arg0: i32) -> (i32, i32) {
    %c0_i32 = arith.constant 0 : i32
    %c0_i32_0 = arith.constant 0 : i32
    %c0_i32_1 = arith.constant 0 : i32
    return %c0_i32, %c0_i32_0 : i32, i32
  }
  func.func @transform_6(%arg0: i32) -> (i32, i32) {
    %c0_i32 = arith.constant 0 : i32
    %c0_i32_0 = arith.constant 0 : i32
    %c0_i32_1 = arith.constant 0 : i32
    return %c0_i32, %c0_i32_0 : i32, i32
  }
  func.func @transform_7(%arg0: i32) -> (i32, i32) {
    %c0_i32 = arith.constant 0 : i32
    %c0_i32_0 = arith.constant 0 : i32
    return %arg0, %c0_i32 : i32, i32
  }
}

module attributes {stable_mosaic.version = 11 : i64} {
  func.func @_fc_kernel(%arg0: i32, %arg1: memref<2x3072xf32, #tpu.memory_space<vmem>>, %arg2: memref<3072x256xf32, #tpu.memory_space<vmem>>, %arg3: memref<1x256xf32, #tpu.memory_space<vmem>>, %arg4: memref<256x256xf32, #tpu.memory_space<vmem>>, %arg5: memref<1x256xf32, #tpu.memory_space<vmem>>, %arg6: memref<256x128xf32, #tpu.memory_space<vmem>>, %arg7: memref<1x128xf32, #tpu.memory_space<vmem>>, %arg8: memref<2x128xf32, #tpu.memory_space<vmem>>) attributes {dimension_semantics = [#tpu.dimension_semantics<parallel>], iteration_bounds = array<i64: 1>, scalar_prefetch = 0 : i64, scratch_operands = 0 : i64, tpu.core_type = #tpu.core_type<tc>, window_params = [{transform_indices = @transform_0, window_bounds = array<i64: 2, 3072>}, {pipeline_mode = #tpu.pipeline_mode<synchronous>, transform_indices = @transform_1, window_bounds = array<i64: 3072, 256>}, {pipeline_mode = #tpu.pipeline_mode<synchronous>, transform_indices = @transform_2, window_bounds = array<i64: 1, 256>}, {pipeline_mode = #tpu.pipeline_mode<synchronous>, transform_indices = @transform_3, window_bounds = array<i64: 256, 256>}, {pipeline_mode = #tpu.pipeline_mode<synchronous>, transform_indices = @transform_4, window_bounds = array<i64: 1, 256>}, {pipeline_mode = #tpu.pipeline_mode<synchronous>, transform_indices = @transform_5, window_bounds = array<i64: 256, 128>}, {pipeline_mode = #tpu.pipeline_mode<synchronous>, transform_indices = @transform_6, window_bounds = array<i64: 1, 128>}, {transform_indices = @transform_7, window_bounds = array<i64: 2, 128>}]} {
    %c0 = arith.constant 0 : index
    %c0_0 = arith.constant 0 : index
    %0 = vector.load %arg1[%c0, %c0_0] : memref<2x3072xf32, #tpu.memory_space<vmem>>, vector<2x3072xf32>
    %c0_1 = arith.constant 0 : index
    %c0_2 = arith.constant 0 : index
    %1 = vector.load %arg2[%c0_1, %c0_2] : memref<3072x256xf32, #tpu.memory_space<vmem>>, vector<3072x256xf32>
    %cst = arith.constant dense<0.000000e+00> : vector<2x256xf32>
    %2 = tpu.matmul %0, %1, %cst {dimension_numbers = #tpu.dot_dimension_numbers<[1], [0], [0], [1], [0, 0, 1, 1], [], []>} : vector<2x3072xf32>, vector<3072x256xf32>, vector<2x256xf32> -> vector<2x256xf32>
    %c0_3 = arith.constant 0 : index
    %c0_4 = arith.constant 0 : index
    %3 = vector.load %arg3[%c0_3, %c0_4] : memref<1x256xf32, #tpu.memory_space<vmem>>, vector<1x256xf32>
    %4 = vector.broadcast %3 : vector<1x256xf32> to vector<2x256xf32>
    %5 = arith.addf %2, %4 : vector<2x256xf32>
    %cst_5 = arith.constant 0.000000e+00 : f32
    %6 = vector.broadcast %cst_5 : f32 to vector<2x256xf32>
    %7 = arith.maximumf %5, %6 : vector<2x256xf32>
    %c0_6 = arith.constant 0 : index
    %c0_7 = arith.constant 0 : index
    %8 = vector.load %arg4[%c0_6, %c0_7] : memref<256x256xf32, #tpu.memory_space<vmem>>, vector<256x256xf32>
    %cst_8 = arith.constant dense<0.000000e+00> : vector<2x256xf32>
    %9 = tpu.matmul %7, %8, %cst_8 {dimension_numbers = #tpu.dot_dimension_numbers<[1], [0], [0], [1], [0, 0, 1, 1], [], []>} : vector<2x256xf32>, vector<256x256xf32>, vector<2x256xf32> -> vector<2x256xf32>
    %c0_9 = arith.constant 0 : index
    %c0_10 = arith.constant 0 : index
    %10 = vector.load %arg5[%c0_9, %c0_10] : memref<1x256xf32, #tpu.memory_space<vmem>>, vector<1x256xf32>
    %11 = vector.broadcast %10 : vector<1x256xf32> to vector<2x256xf32>
    %12 = arith.addf %9, %11 : vector<2x256xf32>
    %cst_11 = arith.constant 0.000000e+00 : f32
    %13 = vector.broadcast %cst_11 : f32 to vector<2x256xf32>
    %14 = arith.maximumf %12, %13 : vector<2x256xf32>
    %c0_12 = arith.constant 0 : index
    %c0_13 = arith.constant 0 : index
    %15 = vector.load %arg6[%c0_12, %c0_13] : memref<256x128xf32, #tpu.memory_space<vmem>>, vector<256x128xf32>
    %cst_14 = arith.constant dense<0.000000e+00> : vector<2x128xf32>
    %16 = tpu.matmul %14, %15, %cst_14 {dimension_numbers = #tpu.dot_dimension_numbers<[1], [0], [0], [1], [0, 0, 1, 1], [], []>} : vector<2x256xf32>, vector<256x128xf32>, vector<2x128xf32> -> vector<2x128xf32>
    %c0_15 = arith.constant 0 : index
    %c0_16 = arith.constant 0 : index
    %17 = vector.load %arg7[%c0_15, %c0_16] : memref<1x128xf32, #tpu.memory_space<vmem>>, vector<1x128xf32>
    %18 = vector.broadcast %17 : vector<1x128xf32> to vector<2x128xf32>
    %19 = arith.addf %16, %18 : vector<2x128xf32>
    %c0_17 = arith.constant 0 : index
    %c0_18 = arith.constant 0 : index
    %20 = vector.load %arg8[%c0_17, %c0_18] : memref<2x128xf32, #tpu.memory_space<vmem>>, vector<2x128xf32>
    tpu.vector_store %arg8[%c0_17, %c0_18], %19 {strides = array<i32>} : memref<2x128xf32, #tpu.memory_space<vmem>>, vector<2x128xf32>,
    return
  }
  func.func @transform_0(%arg0: i32) -> (i32, i32) {
    %c0_i32 = arith.constant 0 : i32
    %c0_i32_0 = arith.constant 0 : i32
    return %arg0, %c0_i32 : i32, i32
  }
  func.func @transform_1(%arg0: i32) -> (i32, i32) {
    %c0_i32 = arith.constant 0 : i32
    %c0_i32_0 = arith.constant 0 : i32
    %c0_i32_1 = arith.constant 0 : i32
    return %c0_i32, %c0_i32_0 : i32, i32
  }
  func.func @transform_2(%arg0: i32) -> (i32, i32) {
    %c0_i32 = arith.constant 0 : i32
    %c0_i32_0 = arith.constant 0 : i32
    %c0_i32_1 = arith.constant 0 : i32
    return %c0_i32, %c0_i32_0 : i32, i32
  }
  func.func @transform_3(%arg0: i32) -> (i32, i32) {
    %c0_i32 = arith.constant 0 : i32
    %c0_i32_0 = arith.constant 0 : i32
    %c0_i32_1 = arith.constant 0 : i32
    return %c0_i32, %c0_i32_0 : i32, i32
  }
  func.func @transform_4(%arg0: i32) -> (i32, i32) {
    %c0_i32 = arith.constant 0 : i32
    %c0_i32_0 = arith.constant 0 : i32
    %c0_i32_1 = arith.constant 0 : i32
    return %c0_i32, %c0_i32_0 : i32, i32
  }
  func.func @transform_5(%arg0: i32) -> (i32, i32) {
    %c0_i32 = arith.constant 0 : i32
    %c0_i32_0 = arith.constant 0 : i32
    %c0_i32_1 = arith.constant 0 : i32
    return %c0_i32, %c0_i32_0 : i32, i32
  }
  func.func @transform_6(%arg0: i32) -> (i32, i32) {
    %c0_i32 = arith.constant 0 : i32
    %c0_i32_0 = arith.constant 0 : i32
    %c0_i32_1 = arith.constant 0 : i32
    return %c0_i32, %c0_i32_0 : i32, i32
  }
  func.func @transform_7(%arg0: i32) -> (i32, i32) {
    %c0_i32 = arith.constant 0 : i32
    %c0_i32_0 = arith.constant 0 : i32
    return %arg0, %c0_i32 : i32, i32
  }
}

</mosaic_0001>

<bundles_post_ra>
// kernel: tpu_custom_call.1
= control target key start
LH: loop header
LB: loop body
LE: loop exit
PB: predicated region body
PF: predicated region fallthrough
CT: control target
= control target key end

     0   :  { %12 = vsyncpa [#allocation3], 0  ;;  %s3554_s0 = inlined_call_operand.hbm [shape: f32[2,3072], index: 0, kind: input, shape index: {}]   ;;  %s3555_s1 = inlined_call_operand.hbm [shape: f32[3072,256], index: 1, kind: input, shape index: {}]   ;;  %s3556_s2 = inlined_call_operand.hbm [shape: f32[1,256], index: 2, kind: input, shape index: {}]   ;;  %s3557_s3 = inlined_call_operand.hbm [shape: f32[256,256], index: 3, kind: input, shape index: {}]   ;;  %s3558_s4 = inlined_call_operand.hbm [shape: f32[1,256], index: 4, kind: input, shape index: {}]   ;;  %s3559_s5 = inlined_call_operand.hbm [shape: f32[256,128], index: 5, kind: input, shape index: {}]   ;;  %s3560_s6 = inlined_call_operand.hbm [shape: f32[1,128], index: 6, kind: input, shape index: {}]   ;;  %s3561_s7 = inlined_call_operand.hbm [shape: f32[2,128], index: 7, kind: output, shape index: {}]  }
   0x1   :  { %13 = vsyncpa [#allocation6], 0 }
   0x2   :  { %14 = vsyncpa [#allocation9], 0 }
   0x3   :  { %15 = vsyncpa [#allocation12], 0 }
   0x4   :  { %16 = vsyncpa [#allocation4], 0  ;;  %s3294_s24 = smov [#allocation5]   ;;  %s3108_s28 = scalar_lea.hbm %s3555_s1, 98304 }
   0x5   :  { %s32_s25 = sshll.u32 %s3294_s24, 4  ;;  %p3109_p0 = scmp.ne.s32.totalorder %s3555_s1, %s3108_s28  ;;  %s33_s25 = int_to_ptr.vmem [resolvable:$true] %s32_s25 }
   0x6   :  { %p3112_p1 = scmp.lt.u32.totalorder %s3108_s28, %s3555_s1 }
   0x8   :  { %p3114_p2 = pnand %p3112_p1, %p3109_p0 }
   0xa   :  { %3117 = shalt.err (!%p3114_p2)
}
   0xb   :  { %s3118_s10 = scalar_lea.vmem %s33_s25, 98304  ;;  %p3123_p4 = scmp.lt.s32.totalorder %s33_s25, %s33_s25 }
   0xc   :  { %p3119_p3 = scmp.ne.s32.totalorder %s33_s25, %s3118_s10  ;;  %p3124_p5 = scmp.lt.s32.totalorder %s3118_s10, %s3118_s10 }
   0xe   :  { %p3125_p6 = por %p3124_p5, %p3123_p4 }
  0x10   :  { %p3126_p7 = pnand %p3125_p6, %p3119_p3 }
  0x12   :  { %3129 = shalt.err (!%p3126_p7)
}
  0x13   :  { %s3295_s11 = smov 256   ;;  %s3296_s12 = smov 16  }
  0x14   :  { %38 = dma.hbm_to_vmem [thread:$0]  %s3555_s1, 98304, %s33_s25, [#allocation6], %s3295_s11, %s3295_s11, %s3296_s12  }
  0x15   :  { %s3297_s15 = smov [#allocation8]   ;;  %s3298_s17 = smov [#allocation11]  }
  0x16   :  { %s54_s16 = sshll.u32 %s3297_s15, 4  ;;  %s76_s18 = sshll.u32 %s3298_s17, 4  ;;  %s55_s16 = int_to_ptr.vmem [resolvable:$true] %s54_s16  ;;  %s77_s18 = int_to_ptr.vmem [resolvable:$true] %s76_s18 }
  0x17   :  { %s3130_s21 = scalar_lea.hbm %s3557_s3, 8192 }
  0x18   :  { %p3131_p8 = scmp.ne.s32.totalorder %s3557_s3, %s3130_s21  ;;  %p3134_p9 = scmp.lt.u32.totalorder %s3130_s21, %s3557_s3 }
  0x1a   :  { %p3136_p10 = pnand %p3134_p9, %p3131_p8 }
  0x1c   :  { %3139 = shalt.err (!%p3136_p10)
}
  0x1d   :  { %s3140_s1 = scalar_lea.vmem %s55_s16, 8192  ;;  %p3145_p12 = scmp.lt.s32.totalorder %s55_s16, %s55_s16 }
  0x1e   :  { %p3141_p11 = scmp.ne.s32.totalorder %s55_s16, %s3140_s1  ;;  %p3146_p13 = scmp.lt.s32.totalorder %s3140_s1, %s3140_s1 }
  0x20   :  { %p3147_p0 = por %p3146_p13, %p3145_p12 }
  0x22   :  { %p3148_p1 = pnand %p3147_p0, %p3141_p11 }
  0x24   :  { %3151 = shalt.err (!%p3148_p1)
}
  0x25   :  { %60 = dma.hbm_to_vmem [thread:$0]  %s3557_s3, 8192, %s55_s16, [#allocation9], %s3295_s11, %s3295_s11, %s3296_s12  }
  0x26   :  { %s3152_s30 = scalar_lea.hbm %s3559_s5, 4096 }
  0x27   :  { %p3153_p2 = scmp.ne.s32.totalorder %s3559_s5, %s3152_s30  ;;  %p3156_p3 = scmp.lt.u32.totalorder %s3152_s30, %s3559_s5 }
  0x29   :  { %p3158_p4 = pnand %p3156_p3, %p3153_p2 }
  0x2b   :  { %3161 = shalt.err (!%p3158_p4)
}
  0x2c   :  { %s3162_s14 = scalar_lea.vmem %s77_s18, 4096  ;;  %p3167_p6 = scmp.lt.s32.totalorder %s77_s18, %s77_s18 }
  0x2d   :  { %p3163_p5 = scmp.ne.s32.totalorder %s77_s18, %s3162_s14  ;;  %p3168_p7 = scmp.lt.s32.totalorder %s3162_s14, %s3162_s14 }
  0x2f   :  { %p3169_p8 = por %p3168_p7, %p3167_p6 }
  0x31   :  { %p3170_p9 = pnand %p3169_p8, %p3163_p5 }
  0x33   :  { %3173 = shalt.err (!%p3170_p9)
}
  0x34   :  { %s3299_s3 = smov 128   ;;  %s3300_s11 = smov 8  }
  0x35   :  { %82 = dma.hbm_to_vmem [thread:$0]  %s3559_s5, 4096, %s77_s18, [#allocation12], %s3299_s3, %s3299_s3, %s3300_s11  }
  0x36   :  { %s3301_s16 = smov [#allocation2]   ;;  %s3302_s19 = smov [#allocation7]  }
  0x37   :  { %s23_s17 = sshll.u32 %s3301_s16, 4  ;;  %s45_s20 = sshll.u32 %s3302_s19, 4  ;;  %s24_s17 = int_to_ptr.vmem [resolvable:$true] %s23_s17  ;;  %s46_s20 = int_to_ptr.vmem [resolvable:$true] %s45_s20 }
  0x38   :  { %s3174_s23 = scalar_lea.hbm %s3554_s0, 768 }
  0x39   :  { %p3175_p10 = scmp.ne.s32.totalorder %s3554_s0, %s3174_s23  ;;  %p3178_p11 = scmp.lt.u32.totalorder %s3174_s23, %s3554_s0 }
  0x3b   :  { %p3180_p12 = pnand %p3178_p11, %p3175_p10 }
  0x3d   :  { %3183 = shalt.err (!%p3180_p12)
}
  0x3e   :  { %s3184_s5 = scalar_lea.vmem %s24_s17, 768  ;;  %p3189_p0 = scmp.lt.s32.totalorder %s24_s17, %s24_s17 }
  0x3f   :  { %p3185_p13 = scmp.ne.s32.totalorder %s24_s17, %s3184_s5  ;;  %p3190_p1 = scmp.lt.s32.totalorder %s3184_s5, %s3184_s5 }
  0x41   :  { %p3191_p2 = por %p3190_p1, %p3189_p0 }
  0x43   :  { %p3192_p3 = pnand %p3191_p2, %p3185_p13 }
  0x45   :  { %3195 = shalt.err (!%p3192_p3)
}
  0x46   :  { %26 = dma.hbm_to_vmem [thread:$0]  %s3554_s0, 768, %s24_s17, [#allocation3]  }
  0x47   :  { %s3196_s30 = scalar_lea.hbm %s3556_s2, 32 }
  0x48   :  { %p3197_p4 = scmp.ne.s32.totalorder %s3556_s2, %s3196_s30  ;;  %p3200_p5 = scmp.lt.u32.totalorder %s3196_s30, %s3556_s2 }
  0x4a   :  { %p3202_p6 = pnand %p3200_p5, %p3197_p4 }
  0x4c   :  { %3205 = shalt.err (!%p3202_p6)
}
  0x4d   :  { %s3206_s14 = scalar_lea.vmem %s46_s20, 32  ;;  %p3211_p8 = scmp.lt.s32.totalorder %s46_s20, %s46_s20 }
  0x4e   :  { %p3207_p7 = scmp.ne.s32.totalorder %s46_s20, %s3206_s14  ;;  %p3212_p9 = scmp.lt.s32.totalorder %s3206_s14, %s3206_s14 }
  0x50   :  { %p3213_p10 = por %p3212_p9, %p3211_p8 }
  0x52   :  { %p3214_p11 = pnand %p3213_p10, %p3207_p7 }
  0x54   :  { %3217 = shalt.err (!%p3214_p11)
}
  0x55   :  { %48 = dma.hbm_to_vmem [thread:$0]  %s3556_s2, 32, %s46_s20, [#allocation6]  }
  0x56   :  { %s3303_s11 = smov [#allocation10]   ;;  %s3304_s15 = smov [#allocation13]  }
  0x57   :  { %s67_s12 = sshll.u32 %s3303_s11, 4  ;;  %s89_s16 = sshll.u32 %s3304_s15, 4  ;;  %s68_s12 = int_to_ptr.vmem [resolvable:$true] %s67_s12  ;;  %s90_s16 = int_to_ptr.vmem [resolvable:$true] %s89_s16 }
  0x58   :  { %s3218_s21 = scalar_lea.hbm %s3558_s4, 32 }
  0x59   :  { %p3219_p12 = scmp.ne.s32.totalorder %s3558_s4, %s3218_s21  ;;  %p3222_p13 = scmp.lt.u32.totalorder %s3218_s21, %s3558_s4 }
  0x5b   :  { %p3224_p0 = pnand %p3222_p13, %p3219_p12 }
  0x5d   :  { %3227 = shalt.err (!%p3224_p0)
}
  0x5e   :  { %s3228_s2 = scalar_lea.vmem %s68_s12, 32  ;;  %p3233_p2 = scmp.lt.s32.totalorder %s68_s12, %s68_s12 }
  0x5f   :  { %p3229_p1 = scmp.ne.s32.totalorder %s68_s12, %s3228_s2  ;;  %p3234_p3 = scmp.lt.s32.totalorder %s3228_s2, %s3228_s2 }
  0x61   :  { %p3235_p4 = por %p3234_p3, %p3233_p2 }
  0x63   :  { %p3236_p5 = pnand %p3235_p4, %p3229_p1 }
  0x65   :  { %3239 = shalt.err (!%p3236_p5)
}
  0x66   :  { %70 = dma.hbm_to_vmem [thread:$0]  %s3558_s4, 32, %s68_s12, [#allocation9]  }
  0x67   :  { %s3240_s18 = scalar_lea.hbm %s3560_s6, 16 }
  0x68   :  { %p3241_p6 = scmp.ne.s32.totalorder %s3560_s6, %s3240_s18  ;;  %p3244_p7 = scmp.lt.u32.totalorder %s3240_s18, %s3560_s6 }
  0x6a   :  { %p3246_p8 = pnand %p3244_p7, %p3241_p6 }
  0x6c   :  { %3249 = shalt.err (!%p3246_p8)
}
  0x6d   :  { %s3250_s8 = scalar_lea.vmem %s90_s16, 16  ;;  %s3254_s9 = scalar_lea.vmem %s90_s16, 32 }
  0x6e   :  { %p3251_p9 = scmp.ne.s32.totalorder %s90_s16, %s3250_s8  ;;  %p3255_p10 = scmp.lt.s32.totalorder %s90_s16, %s90_s16 }
  0x6f   :  { %p3256_p11 = scmp.lt.s32.totalorder %s3254_s9, %s3250_s8 }
  0x71   :  { %p3257_p12 = por %p3256_p11, %p3255_p10 }
  0x73   :  { %p3258_p13 = pnand %p3257_p12, %p3251_p9 }
  0x75   :  { %3261 = shalt.err (!%p3258_p13)
}
  0x76   :  { %92 = dma.hbm_to_vmem [thread:$0]  %s3560_s6, 16, %s90_s16, [#allocation12]  }
  0x77   :  { %3284 = dma.done.wait [#allocation3], 768  }
  0x78   :  { %3285 = vsyncadd [#allocation3], 4294966528 }
  0x79   :  { %3286 = dma.done.wait [#allocation6], 98336  }
  0x7a   :  { %3287 = vsyncadd [#allocation6], 4294868960 }
  0x7b   :  { %3288 = dma.done.wait [#allocation9], 8224  }
  0x7c   :  { %3289 = vsyncadd [#allocation9], 4294959072 }
  0x7d   :  { %3290 = dma.done.wait [#allocation12], 4112  }
  0x7e   :  { %3291 = vsyncadd [#allocation12], 4294963184  ;;  %v121_v0 = vld [vmem:[#allocation5 + $0x8] sm:$0xff]  ;;  %v123_v1 = vld [vmem:[#allocation5 + $0x18] sm:$0xff]  ;;  %s3306_s6 = smov [#allocation14]  }
  0x7f   :  { %v441_v2 = vld [vmem:[#allocation5 + $0xa08] sm:$0xff]  ;;  %v2199_v3 = vpack.c.bf16 %v123_v1, %v121_v0  ;;  %v443_v4 = vld [vmem:[#allocation5 + $0xa18] sm:$0xff]  ;;  %v120_v5 = vld [vmem:[#allocation5] sm:$0xff]  ;;  %s2151_s13 = sshll.u32 %s3306_s6, 4  ;;  %s2152_s13 = int_to_ptr.vmem [resolvable:$true] %s2151_s13 }
  0x80   :  { %v122_v6 = vld [vmem:[#allocation5 + $0x10] sm:$0xff]  ;;  %v2519_v7 = vpack.c.bf16 %v443_v4, %v441_v2  ;;  %v440_v9 = vld [vmem:[#allocation5 + $0xa00] sm:$0xff]  ;;  %v125_v11 = vld [vmem:[#allocation5 + $0x28] sm:$0xff]  ;;  %s3262_s14 = scalar_lea.vmem %s2152_s13, 32  ;;  %p3267_p1 = scmp.lt.s32.totalorder %s2152_s13, %s2152_s13 }
  0x81   :  { %v2201_v8 = vpack.c.bf16 %v122_v6, %v120_v5  ;;  %v442_v10 = vld [vmem:[#allocation5 + $0xa10] sm:$0xff]  ;;  %2200 = vmatprep.subr.bf16.mxu1 %v2199_v3  ;;  %v127_v13 = vld [vmem:[#allocation5 + $0x38] sm:$0xff]  ;;  %v445_v14 = vld [vmem:[#allocation5 + $0xa28] sm:$0xff]  ;;  %p3263_p0 = scmp.ne.s32.totalorder %s2152_s13, %s3262_s14  ;;  %p3268_p2 = scmp.lt.s32.totalorder %s3262_s14, %s3262_s14 }
  0x82   :  { %v2521_v12 = vpack.c.bf16 %v442_v10, %v440_v9  ;;  %v447_v15 = vld [vmem:[#allocation5 + $0xa38] sm:$0xff]  ;;  %2520 = vmatprep.subr.bf16.mxu0 %v2519_v7  ;;  %v2203_v16 = vpack.c.bf16 %v127_v13, %v125_v11  ;;  %v124_v18 = vld [vmem:[#allocation5 + $0x20] sm:$0xff]  ;;  %v126_v19 = vld [vmem:[#allocation5 + $0x30] sm:$0xff] }
  0x83   :  { %2202 = vmatpush1.bf16.msra.mxu1 %v2201_v8  ;;  %v2523_v17 = vpack.c.bf16 %v447_v15, %v445_v14  ;;  %v444_v20 = vld [vmem:[#allocation5 + $0xa20] sm:$0xff]  ;;  %v2205_v21 = vpack.c.bf16 %v126_v19, %v124_v18  ;;  %v446_v22 = vld [vmem:[#allocation5 + $0xa30] sm:$0xff]  ;;  %v129_v23 = vld [vmem:[#allocation5 + $0x48] sm:$0xff]  ;;  %p3269_p3 = por %p3268_p2, %p3267_p1 }
  0x84   :  { %2522 = vmatpush1.bf16.msra.mxu0 %v2521_v12  ;;  %v131_v24 = vld [vmem:[#allocation5 + $0x58] sm:$0xff]  ;;  %2204 = vmatprep.subr.bf16.mxu1 %v2203_v16  ;;  %v2525_v25 = vpack.c.bf16 %v446_v22, %v444_v20  ;;  %v449_v27 = vld [vmem:[#allocation5 + $0xa48] sm:$0xff]  ;;  %v128_v29 = vld [vmem:[#allocation5 + $0x40] sm:$0xff] }
  0x85   :  { %2524 = vmatprep.subr.bf16.mxu0 %v2523_v17  ;;  %v2207_v26 = vpack.c.bf16 %v131_v24, %v129_v23  ;;  %v451_v28 = vld [vmem:[#allocation5 + $0xa58] sm:$0xff]  ;;  %v130_v31 = vld [vmem:[#allocation5 + $0x50] sm:$0xff]  ;;  %v448_v32 = vld [vmem:[#allocation5 + $0xa40] sm:$0xff]  ;;  %p3270_p4 = pnand %p3269_p3, %p3263_p0 }
  0x86   :  { %v2527_v30 = vpack.c.bf16 %v451_v28, %v449_v27  ;;  %v450_v33 = vld [vmem:[#allocation5 + $0xa50] sm:$0xff]  ;;  %v2209_v34 = vpack.c.bf16 %v130_v31, %v128_v29  ;;  %v133_v35 = vld [vmem:[#allocation5 + $0x68] sm:$0xff]  ;;  %v135_v36 = vld [vmem:[#allocation5 + $0x78] sm:$0xff] }
  0x87   :  { %2206 = vmatpush1.bf16.msra.mxu1 %v2205_v21  ;;  %v453_v37 = vld [vmem:[#allocation5 + $0xa68] sm:$0xff]  ;;  %v2529_v38 = vpack.c.bf16 %v450_v33, %v448_v32  ;;  %v2211_v39 = vpack.c.bf16 %v135_v36, %v133_v35  ;;  %v455_v40 = vld [vmem:[#allocation5 + $0xa78] sm:$0xff]  ;;  %v132_v41 = vld [vmem:[#allocation5 + $0x60] sm:$0xff] }
  0x88   :  { %2526 = vmatpush1.bf16.msra.mxu0 %v2525_v25  ;;  %2208 = vmatprep.subr.bf16.mxu1 %v2207_v26  ;;  %v134_v42 = vld [vmem:[#allocation5 + $0x70] sm:$0xff]  ;;  %v2531_v43 = vpack.c.bf16 %v455_v40, %v453_v37  ;;  %v452_v44 = vld [vmem:[#allocation5 + $0xa60] sm:$0xff]  ;;  %v137_v46 = vld [vmem:[#allocation5 + $0x88] sm:$0xff] }
  0x89   :  { %2528 = vmatprep.subr.bf16.mxu0 %v2527_v30  ;;  %v454_v45 = vld [vmem:[#allocation5 + $0xa70] sm:$0xff]  ;;  %v139_v47 = vld [vmem:[#allocation5 + $0x98] sm:$0xff]  ;;  %v457_v48 = vld [vmem:[#allocation5 + $0xa88] sm:$0xff]  ;;  %v2213_v50 = vpack.c.bf16 %v134_v42, %v132_v41 }
  0x8a   :  { %v459_v49 = vld [vmem:[#allocation5 + $0xa98] sm:$0xff]  ;;  %v2533_v51 = vpack.c.bf16 %v454_v45, %v452_v44  ;;  %v2215_v52 = vpack.c.bf16 %v139_v47, %v137_v46  ;;  %v136_v53 = vld [vmem:[#allocation5 + $0x80] sm:$0xff]  ;;  %v138_v54 = vld [vmem:[#allocation5 + $0x90] sm:$0xff]  ;;  %v890_v46 = vlaneseq  ;;  %v3305_v47 = vmov 1983009808  }
  0x8b   :  { %2210 = vmatpush1.bf16.msra.mxu1 %v2209_v34  ;;  %v456_v55 = vld [vmem:[#allocation5 + $0xa80] sm:$0xff]  ;;  %v2535_v56 = vpack.c.bf16 %v459_v49, %v457_v48  ;;  %v458_v57 = vld [vmem:[#allocation5 + $0xa90] sm:$0xff]  ;;  %v141_v58 = vld [vmem:[#allocation5 + $0xa8] sm:$0xff]  ;;  %v2217_v62 = vpack.c.bf16 %v138_v54, %v136_v53  ;;  %v908_v48 = vunpack.c.l.s4 %v3305_v47 }
  0x8c   :  { %2530 = vmatpush1.bf16.msra.mxu0 %v2529_v38  ;;  %2212 = vmatprep.subr.bf16.mxu1 %v2211_v39  ;;  %v143_v59 = vld [vmem:[#allocation5 + $0xb8] sm:$0xff]  ;;  %v461_v60 = vld [vmem:[#allocation5 + $0xaa8] sm:$0xff]  ;;  %v2537_v63 = vpack.c.bf16 %v458_v57, %v456_v55  ;;  %v140_v1 = vld [vmem:[#allocation5 + $0xa0] sm:$0xff] }
  0x8d   :  { %2532 = vmatprep.subr.bf16.mxu0 %v2531_v43  ;;  %v463_v61 = vld [vmem:[#allocation5 + $0xab8] sm:$0xff]  ;;  %v2219_v0 = vpack.c.bf16 %v143_v59, %v141_v58  ;;  %v142_v2 = vld [vmem:[#allocation5 + $0xb0] sm:$0xff]  ;;  %v460_v3 = vld [vmem:[#allocation5 + $0xaa0] sm:$0xff] }
  0x8e   :  { %v2539_v4 = vpack.c.bf16 %v463_v61, %v461_v60  ;;  %v462_v5 = vld [vmem:[#allocation5 + $0xab0] sm:$0xff]  ;;  %v145_v6 = vld [vmem:[#allocation5 + $0xc8] sm:$0xff]  ;;  %v147_v7 = vld [vmem:[#allocation5 + $0xd8] sm:$0xff]  ;;  %v2221_v10 = vpack.c.bf16 %v142_v2, %v140_v1  ;;  %v3431_v61 = vshrl.u32 %v890_v46, 7 }
  0x8f   :  { %2214 = vmatpush1.bf16.msra.mxu1 %v2213_v50  ;;  %v465_v8 = vld [vmem:[#allocation5 + $0xac8] sm:$0xff]  ;;  %v467_v9 = vld [vmem:[#allocation5 + $0xad8] sm:$0xff]  ;;  %v2541_v11 = vpack.c.bf16 %v462_v5, %v460_v3  ;;  %v2223_v12 = vpack.c.bf16 %v147_v7, %v145_v6  ;;  %v144_v13 = vld [vmem:[#allocation5 + $0xc0] sm:$0xff] }
  0x90   :  { %2534 = vmatpush1.bf16.msra.mxu0 %v2533_v51  ;;  %2216 = vmatprep.subr.bf16.mxu1 %v2215_v52  ;;  %v146_v14 = vld [vmem:[#allocation5 + $0xd0] sm:$0xff]  ;;  %v464_v15 = vld [vmem:[#allocation5 + $0xac0] sm:$0xff]  ;;  %v2543_v16 = vpack.c.bf16 %v467_v9, %v465_v8  ;;  %v149_v18 = vld [vmem:[#allocation5 + $0xe8] sm:$0xff] }
  0x91   :  { %2536 = vmatprep.subr.bf16.mxu0 %v2535_v56  ;;  %v466_v17 = vld [vmem:[#allocation5 + $0xad0] sm:$0xff]  ;;  %v151_v19 = vld [vmem:[#allocation5 + $0xf8] sm:$0xff]  ;;  %v469_v20 = vld [vmem:[#allocation5 + $0xae8] sm:$0xff]  ;;  %v2225_v22 = vpack.c.bf16 %v146_v14, %v144_v13 }
  0x92   :  { %v471_v21 = vld [vmem:[#allocation5 + $0xaf8] sm:$0xff]  ;;  %v2545_v23 = vpack.c.bf16 %v466_v17, %v464_v15  ;;  %v2227_v24 = vpack.c.bf16 %v151_v19, %v149_v18  ;;  %v148_v25 = vld [vmem:[#allocation5 + $0xe0] sm:$0xff]  ;;  %v150_v26 = vld [vmem:[#allocation5 + $0xf0] sm:$0xff] }
  0x93   :  { %2218 = vmatpush1.bf16.msra.mxu1 %v2217_v62  ;;  %v468_v27 = vld [vmem:[#allocation5 + $0xae0] sm:$0xff]  ;;  %v2547_v28 = vpack.c.bf16 %v471_v21, %v469_v20  ;;  %v470_v29 = vld [vmem:[#allocation5 + $0xaf0] sm:$0xff]  ;;  %v153_v30 = vld [vmem:[#allocation5 + $0x108] sm:$0xff]  ;;  %v2229_v34 = vpack.c.bf16 %v150_v26, %v148_v25  ;;  %v909_v62 = vunpack.c.0.s8 %v908_v48 }
  0x94   :  { %2538 = vmatpush1.bf16.msra.mxu0 %v2537_v63  ;;  %2220 = vmatprep.subr.bf16.mxu1 %v2219_v0  ;;  %v155_v31 = vld [vmem:[#allocation5 + $0x118] sm:$0xff]  ;;  %v473_v32 = vld [vmem:[#allocation5 + $0xb08] sm:$0xff]  ;;  %v2549_v35 = vpack.c.bf16 %v470_v29, %v468_v27  ;;  %v152_v37 = vld [vmem:[#allocation5 + $0x100] sm:$0xff] }
  0x95   :  { %2540 = vmatprep.subr.bf16.mxu0 %v2539_v4  ;;  %v475_v33 = vld [vmem:[#allocation5 + $0xb18] sm:$0xff]  ;;  %v2231_v36 = vpack.c.bf16 %v155_v31, %v153_v30  ;;  %v154_v38 = vld [vmem:[#allocation5 + $0x110] sm:$0xff]  ;;  %v472_v39 = vld [vmem:[#allocation5 + $0xb00] sm:$0xff] }
  0x96   :  { %v2551_v40 = vpack.c.bf16 %v475_v33, %v473_v32  ;;  %v474_v41 = vld [vmem:[#allocation5 + $0xb10] sm:$0xff]  ;;  %v157_v42 = vld [vmem:[#allocation5 + $0x128] sm:$0xff]  ;;  %v159_v43 = vld [vmem:[#allocation5 + $0x138] sm:$0xff]  ;;  %v2233_v49 = vpack.c.bf16 %v154_v38, %v152_v37 }
  0x97   :  { %2222 = vmatpush1.bf16.msra.mxu1 %v2221_v10  ;;  %v477_v44 = vld [vmem:[#allocation5 + $0xb28] sm:$0xff]  ;;  %v479_v45 = vld [vmem:[#allocation5 + $0xb38] sm:$0xff]  ;;  %v2553_v50 = vpack.c.bf16 %v474_v41, %v472_v39  ;;  %v2235_v51 = vpack.c.bf16 %v159_v43, %v157_v42  ;;  %v156_v52 = vld [vmem:[#allocation5 + $0x120] sm:$0xff] }
  0x98   :  { %2542 = vmatpush1.bf16.msra.mxu0 %v2541_v11  ;;  %2224 = vmatprep.subr.bf16.mxu1 %v2223_v12  ;;  %v158_v53 = vld [vmem:[#allocation5 + $0x130] sm:$0xff]  ;;  %v476_v54 = vld [vmem:[#allocation5 + $0xb20] sm:$0xff]  ;;  %v2555_v55 = vpack.c.bf16 %v479_v45, %v477_v44  ;;  %v161_v57 = vld [vmem:[#allocation5 + $0x148] sm:$0xff]  ;;  %v3434_v11 = vsub.s32 %v909_v62, %v3431_v61 }
  0x99   :  { %2544 = vmatprep.subr.bf16.mxu0 %v2543_v16  ;;  %v478_v56 = vld [vmem:[#allocation5 + $0xb30] sm:$0xff]  ;;  %v163_v58 = vld [vmem:[#allocation5 + $0x158] sm:$0xff]  ;;  %v481_v59 = vld [vmem:[#allocation5 + $0xb48] sm:$0xff]  ;;  %v2237_v63 = vpack.c.bf16 %v158_v53, %v156_v52 }
  0x9a   :  { %v483_v60 = vld [vmem:[#allocation5 + $0xb58] sm:$0xff]  ;;  %v2557_v0 = vpack.c.bf16 %v478_v56, %v476_v54  ;;  %v2239_v1 = vpack.c.bf16 %v163_v58, %v161_v57  ;;  %v160_v2 = vld [vmem:[#allocation5 + $0x140] sm:$0xff]  ;;  %v162_v3 = vld [vmem:[#allocation5 + $0x150] sm:$0xff] }
  0x9b   :  { %2226 = vmatpush1.bf16.msra.mxu1 %v2225_v22  ;;  %v480_v4 = vld [vmem:[#allocation5 + $0xb40] sm:$0xff]  ;;  %v2559_v5 = vpack.c.bf16 %v483_v60, %v481_v59  ;;  %v482_v6 = vld [vmem:[#allocation5 + $0xb50] sm:$0xff]  ;;  %v165_v7 = vld [vmem:[#allocation5 + $0x168] sm:$0xff]  ;;  %v2241_v12 = vpack.c.bf16 %v162_v3, %v160_v2 }
  0x9c   :  { %2546 = vmatpush1.bf16.msra.mxu0 %v2545_v23  ;;  %2228 = vmatprep.subr.bf16.mxu1 %v2227_v24  ;;  %v167_v8 = vld [vmem:[#allocation5 + $0x178] sm:$0xff]  ;;  %v485_v9 = vld [vmem:[#allocation5 + $0xb68] sm:$0xff]  ;;  %v164_v13 = vld [vmem:[#allocation5 + $0x160] sm:$0xff]  ;;  %v2561_v14 = vpack.c.bf16 %v482_v6, %v480_v4 }
  0x9d   :  { %2548 = vmatprep.subr.bf16.mxu0 %v2547_v28  ;;  %v487_v10 = vld [vmem:[#allocation5 + $0xb78] sm:$0xff]  ;;  %v2243_v15 = vpack.c.bf16 %v167_v8, %v165_v7  ;;  %v166_v16 = vld [vmem:[#allocation5 + $0x170] sm:$0xff]  ;;  %v484_v17 = vld [vmem:[#allocation5 + $0xb60] sm:$0xff] }
  0x9e   :  { %v486_v18 = vld [vmem:[#allocation5 + $0xb70] sm:$0xff]  ;;  %v2563_v19 = vpack.c.bf16 %v487_v10, %v485_v9  ;;  %v169_v20 = vld [vmem:[#allocation5 + $0x188] sm:$0xff]  ;;  %v171_v21 = vld [vmem:[#allocation5 + $0x198] sm:$0xff]  ;;  %v2245_v27 = vpack.c.bf16 %v166_v16, %v164_v13 }
  0x9f   :  { %2230 = vmatpush1.bf16.msra.mxu1 %v2229_v34  ;;  %v3436_v22 = vld [vmem:[#allocation2] sm:$0xff]  ;;  %v489_v23 = vld [vmem:[#allocation5 + $0xb88] sm:$0xff]  ;;  %v491_v24 = vld [vmem:[#allocation5 + $0xb98] sm:$0xff]  ;;  %v2565_v29 = vpack.c.bf16 %v486_v18, %v484_v17  ;;  %v2247_v30 = vpack.c.bf16 %v171_v21, %v169_v20 }
  0xa0   :  { %2550 = vmatpush1.bf16.msra.mxu0 %v2549_v35  ;;  %2232 = vmatprep.subr.bf16.mxu1 %v2231_v36  ;;  %v3440_v25 = vrot.slane %v3436_v22, %v3434_v11  ;;  %v116_v26 = vld [vmem:[#allocation2 + $0x10] sm:$0xff]  ;;  %v170_v32 = vld [vmem:[#allocation5 + $0x190] sm:$0xff]  ;;  %v2567_v35 = vpack.c.bf16 %v491_v24, %v489_v23  ;;  %v173_v37 = vld [vmem:[#allocation5 + $0x1a8] sm:$0xff]  ;;  %v906_v13 = vcombine.high %v3436_v22, %v3436_v22 }
  0xa1   :  { %2552 = vmatprep.subr.bf16.mxu0 %v2551_v40  ;;  %v940_v28 = vcombine.high %v116_v26, %v116_v26  ;;  %v168_v31 = vld [vmem:[#allocation5 + $0x180] sm:$0xff]  ;;  %v490_v36 = vld [vmem:[#allocation5 + $0xb90] sm:$0xff]  ;;  %v175_v38 = vld [vmem:[#allocation5 + $0x1b8] sm:$0xff] }
  0xa2   :  { %v488_v33 = vld [vmem:[#allocation5 + $0xb80] sm:$0xff]  ;;  %v921_v34 = vcombine.high %v3440_v25, %v3440_v25  ;;  %v493_v40 = vld [vmem:[#allocation5 + $0xba8] sm:$0xff]  ;;  %v495_v41 = vld [vmem:[#allocation5 + $0xbb8] sm:$0xff]  ;;  %v2249_v42 = vpack.c.bf16 %v170_v32, %v168_v31  ;;  %v2251_v45 = vpack.c.bf16 %v175_v38, %v173_v37  ;;  %v3452_v22 = vrot.slane %v906_v13, %v3434_v11 }
  0xa3   :  { %2234 = vmatpush1.bf16.msra.mxu1 %v2233_v49  ;;  %v3445_v39 = vrot.slane %v940_v28, %v3434_v11  ;;  %v2569_v44 = vpack.c.bf16 %v490_v36, %v488_v33  ;;  %v172_v46 = vld [vmem:[#allocation5 + $0x1a0] sm:$0xff]  ;;  %v174_v47 = vld [vmem:[#allocation5 + $0x1b0] sm:$0xff]  ;;  %v2571_v49 = vpack.c.bf16 %v495_v41, %v493_v40  ;;  %v179_v52 = vld [vmem:[#allocation5 + $0x1d8] sm:$0xff] }
  0xa4   :  { %2554 = vmatpush1.bf16.msra.mxu0 %v2553_v50  ;;  %2236 = vmatprep.subr.bf16.mxu1 %v2235_v51  ;;  %v492_v48 = vld [vmem:[#allocation5 + $0xba0] sm:$0xff]  ;;  %v494_v50 = vld [vmem:[#allocation5 + $0xbb0] sm:$0xff]  ;;  %v177_v51 = vld [vmem:[#allocation5 + $0x1c8] sm:$0xff] }
  0xa5   :  { %2556 = vmatprep.subr.bf16.mxu0 %v2555_v55  ;;  %1096 = vmatprep.mubr.f32.mxu1 %v921_v34  ;;  %v956_v43 = vcombine.high %v3445_v39, %v3445_v39  ;;  %v497_v53 = vld [vmem:[#allocation5 + $0xbc8] sm:$0xff]  ;;  %v499_v54 = vld [vmem:[#allocation5 + $0xbd8] sm:$0xff]  ;;  %v2253_v55 = vpack.c.bf16 %v174_v47, %v172_v46  ;;  %v2573_v56 = vpack.c.bf16 %v494_v50, %v492_v48  ;;  %v176_v58 = vld [vmem:[#allocation5 + $0x1c0] sm:$0xff] }
  0xa6   :  { %v2255_v57 = vpack.c.bf16 %v179_v52, %v177_v51  ;;  %v178_v59 = vld [vmem:[#allocation5 + $0x1d0] sm:$0xff]  ;;  %v496_v60 = vld [vmem:[#allocation5 + $0xbc0] sm:$0xff]  ;;  %v2575_v62 = vpack.c.bf16 %v499_v54, %v497_v53  ;;  %v501_v2 = vld [vmem:[#allocation5 + $0xbe8] sm:$0xff] }
  0xa7   :  { %2238 = vmatpush1.bf16.msra.mxu1 %v2237_v63  ;;  %1451 = vmatprep.mubr.f32.mxu0 %v956_v43  ;;  %v498_v63 = vld [vmem:[#allocation5 + $0xbd0] sm:$0xff]  ;;  %v503_v3 = vld [vmem:[#allocation5 + $0xbf8] sm:$0xff]  ;;  %v2257_v4 = vpack.c.bf16 %v178_v59, %v176_v58  ;;  %v180_v7 = vld [vmem:[#allocation5 + $0x1e0] sm:$0xff]  ;;  %v922_v43 = vcombine.high %v3452_v22, %v3452_v22 }
  0xa8   :  { %2558 = vmatpush1.bf16.msra.mxu0 %v2557_v0  ;;  %2240 = vmatprep.subr.bf16.mxu1 %v2239_v1  ;;  %v181_v0 = vld [vmem:[#allocation5 + $0x1e8] sm:$0xff]  ;;  %v183_v1 = vld [vmem:[#allocation5 + $0x1f8] sm:$0xff]  ;;  %v182_v8 = vld [vmem:[#allocation5 + $0x1f0] sm:$0xff]  ;;  %v2579_v10 = vpack.c.bf16 %v503_v3, %v501_v2 }
  0xa9   :  { %2560 = vmatprep.subr.bf16.mxu0 %v2559_v5  ;;  %v2577_v5 = vpack.c.bf16 %v498_v63, %v496_v60  ;;  %v2259_v6 = vpack.c.bf16 %v183_v1, %v181_v0  ;;  %v500_v9 = vld [vmem:[#allocation5 + $0xbe0] sm:$0xff]  ;;  %v505_v16 = vld [vmem:[#allocation5 + $0xc08] sm:$0xff]  ;;  %v507_v17 = vld [vmem:[#allocation5 + $0xc18] sm:$0xff]  ;;  %v2261_v18 = vpack.c.bf16 %v182_v8, %v180_v7 }
  0xaa   :  { %v184_v21 = vld [vmem:[#allocation5 + $0x200] sm:$0xff]  ;;  %v186_v23 = vld [vmem:[#allocation5 + $0x210] sm:$0xff]  ;;  %v2583_v26 = vpack.c.bf16 %v507_v17, %v505_v16  ;;  %v189_v28 = vld [vmem:[#allocation5 + $0x228] sm:$0xff] }
  0xab   :  { %2242 = vmatpush1.bf16.msra.mxu1 %v2241_v12  ;;  %v502_v12 = vld [vmem:[#allocation5 + $0xbf0] sm:$0xff]  ;;  %v504_v24 = vld [vmem:[#allocation5 + $0xc00] sm:$0xff]  ;;  %v511_v31 = vld [vmem:[#allocation5 + $0xc38] sm:$0xff]  ;;  %v2265_v32 = vpack.c.bf16 %v186_v23, %v184_v21 }
  0xac   :  { %2562 = vmatpush1.bf16.msra.mxu0 %v2561_v14  ;;  %2244 = vmatprep.subr.bf16.mxu1 %v2243_v15  ;;  %v185_v14 = vld [vmem:[#allocation5 + $0x208] sm:$0xff]  ;;  %v187_v15 = vld [vmem:[#allocation5 + $0x218] sm:$0xff]  ;;  %v190_v36 = vld [vmem:[#allocation5 + $0x230] sm:$0xff] }
  0xad   :  { %2564 = vmatprep.subr.bf16.mxu0 %v2563_v19  ;;  %v2581_v19 = vpack.c.bf16 %v502_v12, %v500_v9  ;;  %v2263_v20 = vpack.c.bf16 %v187_v15, %v185_v14  ;;  %v508_v37 = vld [vmem:[#allocation5 + $0xc20] sm:$0xff]  ;;  %v510_v40 = vld [vmem:[#allocation5 + $0xc30] sm:$0xff]  ;;  %v193_v41 = vld [vmem:[#allocation5 + $0x248] sm:$0xff] }
  0xae   :  { %v2589_v47 = vpack.c.bf16 %v510_v40, %v508_v37  ;;  %v194_v50 = vld [vmem:[#allocation5 + $0x250] sm:$0xff]  ;;  %v512_v51 = vld [vmem:[#allocation5 + $0xc40] sm:$0xff]  ;;  %v197_v54 = vld [vmem:[#allocation5 + $0x268] sm:$0xff] }
  0xaf   :  { %2246 = vmatpush1.bf16.msra.mxu1 %v2245_v27  ;;  %v506_v27 = vld [vmem:[#allocation5 + $0xc10] sm:$0xff]  ;;  %v196_v59 = vld [vmem:[#allocation5 + $0x260] sm:$0xff]  ;;  %v201_v1 = vld [vmem:[#allocation5 + $0x288] sm:$0xff] }
  0xb0   :  { %2566 = vmatpush1.bf16.msra.mxu0 %v2565_v29  ;;  %2248 = vmatprep.subr.bf16.mxu1 %v2247_v30  ;;  %v191_v29 = vld [vmem:[#allocation5 + $0x238] sm:$0xff]  ;;  %v509_v30 = vld [vmem:[#allocation5 + $0xc28] sm:$0xff]  ;;  %v2585_v33 = vpack.c.bf16 %v506_v27, %v504_v24  ;;  %v514_v53 = vld [vmem:[#allocation5 + $0xc50] sm:$0xff] }
  0xb1   :  { %2568 = vmatprep.subr.bf16.mxu0 %v2567_v35  ;;  %v2267_v34 = vpack.c.bf16 %v191_v29, %v189_v28  ;;  %v188_v35 = vld [vmem:[#allocation5 + $0x220] sm:$0xff]  ;;  %v2587_v38 = vpack.c.bf16 %v511_v31, %v509_v30  ;;  %v198_v60 = vld [vmem:[#allocation5 + $0x270] sm:$0xff]  ;;  %v203_v2 = vld [vmem:[#allocation5 + $0x298] sm:$0xff] }
  0xb2   :  { %v2269_v46 = vpack.c.bf16 %v190_v36, %v188_v35  ;;  %v518_v0 = vld [vmem:[#allocation5 + $0xc70] sm:$0xff]  ;;  %v521_v3 = vld [vmem:[#allocation5 + $0xc88] sm:$0xff]  ;;  %v2279_v7 = vpack.c.bf16 %v203_v2, %v201_v1  ;;  %v200_v8 = vld [vmem:[#allocation5 + $0x280] sm:$0xff] }
  0xb3   :  { %2250 = vmatpush1.bf16.msra.mxu1 %v2249_v42  ;;  %v195_v42 = vld [vmem:[#allocation5 + $0x258] sm:$0xff]  ;;  %v202_v9 = vld [vmem:[#allocation5 + $0x290] sm:$0xff]  ;;  %v205_v14 = vld [vmem:[#allocation5 + $0x2a8] sm:$0xff] }
  0xb4   :  { %2570 = vmatpush1.bf16.msra.mxu0 %v2569_v44  ;;  %2252 = vmatprep.subr.bf16.mxu1 %v2251_v45  ;;  %v513_v44 = vld [vmem:[#allocation5 + $0xc48] sm:$0xff]  ;;  %v515_v45 = vld [vmem:[#allocation5 + $0xc58] sm:$0xff]  ;;  %v2271_v48 = vpack.c.bf16 %v195_v42, %v193_v41  ;;  %v522_v13 = vld [vmem:[#allocation5 + $0xc90] sm:$0xff] }
  0xb5   :  { %2572 = vmatprep.subr.bf16.mxu0 %v2571_v49  ;;  %v192_v49 = vld [vmem:[#allocation5 + $0x240] sm:$0xff]  ;;  %v2591_v52 = vpack.c.bf16 %v515_v45, %v513_v44  ;;  %v207_v15 = vld [vmem:[#allocation5 + $0x2b8] sm:$0xff]  ;;  %v525_v16 = vld [vmem:[#allocation5 + $0xca8] sm:$0xff] }
  0xb6   :  { %v527_v17 = vld [vmem:[#allocation5 + $0xcb8] sm:$0xff]  ;;  %v204_v21 = vld [vmem:[#allocation5 + $0x2a0] sm:$0xff]  ;;  %v206_v23 = vld [vmem:[#allocation5 + $0x2b0] sm:$0xff] }
  0xb7   :  { %2254 = vmatpush1.bf16.msra.mxu1 %v2253_v55  ;;  %v199_v55 = vld [vmem:[#allocation5 + $0x278] sm:$0xff]  ;;  %v524_v24 = vld [vmem:[#allocation5 + $0xca0] sm:$0xff]  ;;  %v526_v27 = vld [vmem:[#allocation5 + $0xcb0] sm:$0xff] }
  0xb8   :  { %2574 = vmatpush1.bf16.msra.mxu0 %v2573_v56  ;;  %2256 = vmatprep.subr.bf16.mxu1 %v2255_v57  ;;  %v519_v56 = vld [vmem:[#allocation5 + $0xc78] sm:$0xff]  ;;  %v2273_v57 = vpack.c.bf16 %v194_v50, %v192_v49  ;;  %v2275_v58 = vpack.c.bf16 %v199_v55, %v197_v54  ;;  %v209_v28 = vld [vmem:[#allocation5 + $0x2c8] sm:$0xff]  ;;  %v210_v36 = vld [vmem:[#allocation5 + $0x2d0] sm:$0xff] }
  0xb9   :  { %2576 = vmatprep.subr.bf16.mxu0 %v2575_v62  ;;  %v516_v62 = vld [vmem:[#allocation5 + $0xc60] sm:$0xff]  ;;  %v211_v29 = vld [vmem:[#allocation5 + $0x2d8] sm:$0xff]  ;;  %v529_v30 = vld [vmem:[#allocation5 + $0xcc8] sm:$0xff] }
  0xba   :  { %v531_v31 = vld [vmem:[#allocation5 + $0xcd8] sm:$0xff]  ;;  %v2287_v35 = vpack.c.bf16 %v211_v29, %v209_v28  ;;  %v528_v37 = vld [vmem:[#allocation5 + $0xcc0] sm:$0xff]  ;;  %v213_v41 = vld [vmem:[#allocation5 + $0x2e8] sm:$0xff] }
  0xbb   :  { %2258 = vmatpush1.bf16.msra.mxu1 %v2257_v4  ;;  %v523_v4 = vld [vmem:[#allocation5 + $0xc98] sm:$0xff]  ;;  %v2607_v40 = vpack.c.bf16 %v531_v31, %v529_v30  ;;  %v533_v44 = vld [vmem:[#allocation5 + $0xce8] sm:$0xff]  ;;  %v212_v50 = vld [vmem:[#allocation5 + $0x2e0] sm:$0xff] }
  0xbc   :  { %2578 = vmatpush1.bf16.msra.mxu0 %v2577_v5  ;;  %2260 = vmatprep.subr.bf16.mxu1 %v2259_v6  ;;  %v2277_v5 = vpack.c.bf16 %v198_v60, %v196_v59  ;;  %v2597_v6 = vpack.c.bf16 %v518_v0, %v516_v62  ;;  %v2599_v12 = vpack.c.bf16 %v523_v4, %v521_v3  ;;  %v215_v42 = vld [vmem:[#allocation5 + $0x2f8] sm:$0xff]  ;;  %v534_v55 = vld [vmem:[#allocation5 + $0xcf0] sm:$0xff]  ;;  %v216_v62 = vld [vmem:[#allocation5 + $0x300] sm:$0xff] }
  0xbd   :  { %2580 = vmatprep.subr.bf16.mxu0 %v2579_v10  ;;  %v520_v10 = vld [vmem:[#allocation5 + $0xc80] sm:$0xff]  ;;  %v535_v45 = vld [vmem:[#allocation5 + $0xcf8] sm:$0xff]  ;;  %v2291_v49 = vpack.c.bf16 %v215_v42, %v213_v41  ;;  %v538_v2 = vld [vmem:[#allocation5 + $0xd10] sm:$0xff] }
  0xbe   :  { %v2611_v54 = vpack.c.bf16 %v535_v45, %v533_v44  ;;  %v536_v0 = vld [vmem:[#allocation5 + $0xd00] sm:$0xff]  ;;  %v221_v3 = vld [vmem:[#allocation5 + $0x328] sm:$0xff]  ;;  %v223_v4 = vld [vmem:[#allocation5 + $0x338] sm:$0xff] }
  0xbf   :  { %2262 = vmatpush1.bf16.msra.mxu1 %v2261_v18  ;;  %v2281_v18 = vpack.c.bf16 %v202_v9, %v200_v8  ;;  %v2617_v8 = vpack.c.bf16 %v538_v2, %v536_v0  ;;  %v2299_v9 = vpack.c.bf16 %v223_v4, %v221_v3  ;;  %v546_v29 = vld [vmem:[#allocation5 + $0xd50] sm:$0xff]  ;;  %v229_v30 = vld [vmem:[#allocation5 + $0x368] sm:$0xff]  ;;  %v231_v31 = vld [vmem:[#allocation5 + $0x378] sm:$0xff] }
  0xc0   :  { %2582 = vmatpush1.bf16.msra.mxu0 %v2581_v19  ;;  %2264 = vmatprep.subr.bf16.mxu1 %v2263_v20  ;;  %v2601_v19 = vpack.c.bf16 %v522_v13, %v520_v10  ;;  %v2283_v20 = vpack.c.bf16 %v207_v15, %v205_v14  ;;  %v220_v10 = vld [vmem:[#allocation5 + $0x320] sm:$0xff]  ;;  %v542_v15 = vld [vmem:[#allocation5 + $0xd30] sm:$0xff]  ;;  %v233_v44 = vld [vmem:[#allocation5 + $0x388] sm:$0xff] }
  0xc1   :  { %2584 = vmatprep.subr.bf16.mxu0 %v2583_v26  ;;  %v2603_v26 = vpack.c.bf16 %v527_v17, %v525_v16  ;;  %v540_v13 = vld [vmem:[#allocation5 + $0xd20] sm:$0xff]  ;;  %v225_v16 = vld [vmem:[#allocation5 + $0x348] sm:$0xff]  ;;  %v227_v17 = vld [vmem:[#allocation5 + $0x358] sm:$0xff] }
  0xc2   :  { %1097 = vmatmul.mubr.f32.vlgmr.msra.gmra.mrb[0].mxu1 %v3440_v25  ;;  %v517_v25 = vld [vmem:[#allocation5 + $0xc68] sm:$0xff]  ;;  %v550_v42 = vld [vmem:[#allocation5 + $0xd70] sm:$0xff]  ;;  %v235_v45 = vld [vmem:[#allocation5 + $0x398] sm:$0xff] }
  0xc3   :  { %2266 = vmatpush1.bf16.msra.mxu1 %v2265_v32  ;;  %1452 = vmatmul.mubr.f32.vlgmr.msra.gmra.mrb[0].mxu0 %v3445_v39  ;;  %v2593_v39 = vpack.c.bf16 %v514_v53, %v512_v51  ;;  %v2595_v63 = vpack.c.bf16 %v519_v56, %v517_v25  ;;  %v2285_v32 = vpack.c.bf16 %v206_v23, %v204_v21  ;;  %v214_v51 = vld [vmem:[#allocation5 + $0x2f0] sm:$0xff]  ;;  %v217_v25 = vld [vmem:[#allocation5 + $0x308] sm:$0xff]  ;;  %v219_v56 = vld [vmem:[#allocation5 + $0x318] sm:$0xff] }
  0xc4   :  { %2586 = vmatpush1.bf16.msra.mxu0 %v2585_v33  ;;  %2268 = vmatprep.subr.bf16.mxu1 %v2267_v34  ;;  %v208_v33 = vld [vmem:[#allocation5 + $0x2c0] sm:$0xff]  ;;  %v2605_v34 = vpack.c.bf16 %v526_v27, %v524_v24  ;;  %v2295_v60 = vpack.c.bf16 %v219_v56, %v217_v25  ;;  %v2621_v21 = vpack.c.bf16 %v542_v15, %v540_v13  ;;  %v554_v25 = vld [vmem:[#allocation5 + $0xd90] sm:$0xff]  ;;  %v237_v56 = vld [vmem:[#allocation5 + $0x3a8] sm:$0xff] }
  0xc5   :  { %2588 = vmatprep.subr.bf16.mxu0 %v2587_v38  ;;  %1167 = vmatprep.mubr.f32.mxu1 %v922_v43  ;;  %v530_v38 = vld [vmem:[#allocation5 + $0xcd0] sm:$0xff]  ;;  %v3458_v43 = vld [vmem:[#allocation2 + $0x18] sm:$0xff]  ;;  %v2303_v23 = vpack.c.bf16 %v227_v17, %v225_v16  ;;  %v224_v24 = vld [vmem:[#allocation5 + $0x340] sm:$0xff] }
  0xc6   :  { %v544_v27 = vld [vmem:[#allocation5 + $0xd40] sm:$0xff]  ;;  %v238_v0 = vld [vmem:[#allocation5 + $0x3b0] sm:$0xff]  ;;  %v241_v4 = vld [vmem:[#allocation5 + $0x3c8] sm:$0xff] }
  0xc7   :  { %2270 = vmatpush1.bf16.msra.mxu1 %v2269_v46  ;;  %v3462_v46 = vrot.slane %v3458_v43, %v3434_v11  ;;  %v558_v3 = vld [vmem:[#allocation5 + $0xdb0] sm:$0xff]  ;;  %v245_v17 = vld [vmem:[#allocation5 + $0x3e8] sm:$0xff] }
  0xc8   :  { %2590 = vmatpush1.bf16.msra.mxu0 %v2589_v47  ;;  %2272 = vmatprep.subr.bf16.mxu1 %v2271_v48  ;;  %v2289_v47 = vpack.c.bf16 %v210_v36, %v208_v33  ;;  %v2609_v48 = vpack.c.bf16 %v530_v38, %v528_v37  ;;  %v551_v33 = vld [vmem:[#allocation5 + $0xd78] sm:$0xff]  ;;  %v2307_v36 = vpack.c.bf16 %v231_v31, %v229_v30  ;;  %v228_v37 = vld [vmem:[#allocation5 + $0x360] sm:$0xff]  ;;  %v230_v38 = vld [vmem:[#allocation5 + $0x370] sm:$0xff] }
  0xc9   :  { %2592 = vmatprep.subr.bf16.mxu0 %v2591_v52  ;;  %v532_v52 = vld [vmem:[#allocation5 + $0xce0] sm:$0xff]  ;;  %v972_v53 = vcombine.high %v3462_v46, %v3462_v46  ;;  %v242_v13 = vld [vmem:[#allocation5 + $0x3d0] sm:$0xff]  ;;  %v249_v31 = vld [vmem:[#allocation5 + $0x408] sm:$0xff] }
  0xca   :  { %v2613_v59 = vpack.c.bf16 %v534_v55, %v532_v52  ;;  %v232_v52 = vld [vmem:[#allocation5 + $0x380] sm:$0xff]  ;;  %v562_v16 = vld [vmem:[#allocation5 + $0xdd0] sm:$0xff] }
  0xcb   :  { %2274 = vmatpush1.bf16.msra.mxu1 %v2273_v57  ;;  %v537_v57 = vld [vmem:[#allocation5 + $0xd08] sm:$0xff]  ;;  %1522 = vmatprep.mubr.f32.mxu0 %v972_v53  ;;  %v234_v53 = vld [vmem:[#allocation5 + $0x390] sm:$0xff] }
  0xcc   :  { %2594 = vmatpush1.bf16.msra.mxu0 %v2593_v39  ;;  %2276 = vmatprep.subr.bf16.mxu1 %v2275_v58  ;;  %v539_v39 = vld [vmem:[#allocation5 + $0xd18] sm:$0xff]  ;;  %v2293_v58 = vpack.c.bf16 %v214_v51, %v212_v50  ;;  %v2311_v51 = vpack.c.bf16 %v235_v45, %v233_v44  ;;  %v566_v30 = vld [vmem:[#allocation5 + $0xdf0] sm:$0xff] }
  0xcd   :  { %2596 = vmatprep.subr.bf16.mxu0 %v2595_v63  ;;  %v218_v63 = vld [vmem:[#allocation5 + $0x310] sm:$0xff]  ;;  %v2615_v1 = vpack.c.bf16 %v539_v39, %v537_v57  ;;  %v239_v57 = vld [vmem:[#allocation5 + $0x3b8] sm:$0xff]  ;;  %v557_v39 = vld [vmem:[#allocation5 + $0xda8] sm:$0xff] }
  0xce   :  { %v570_v45 = vld [vmem:[#allocation5 + $0xe10] sm:$0xff] }
  0xcf   :  { %2278 = vmatpush1.bf16.msra.mxu1 %v2277_v5  ;;  %v541_v5 = vld [vmem:[#allocation5 + $0xd28] sm:$0xff] }
  0xd0   :  { %2598 = vmatpush1.bf16.msra.mxu0 %v2597_v6  ;;  %2280 = vmatprep.subr.bf16.mxu1 %v2279_v7  ;;  %v543_v6 = vld [vmem:[#allocation5 + $0xd38] sm:$0xff]  ;;  %v2297_v7 = vpack.c.bf16 %v218_v63, %v216_v62  ;;  %v2315_v62 = vpack.c.bf16 %v239_v57, %v237_v56  ;;  %v236_v63 = vld [vmem:[#allocation5 + $0x3a0] sm:$0xff] }
  0xd1   :  { %2600 = vmatprep.subr.bf16.mxu0 %v2599_v12  ;;  %v222_v12 = vld [vmem:[#allocation5 + $0x330] sm:$0xff]  ;;  %v2619_v14 = vpack.c.bf16 %v543_v6, %v541_v5  ;;  %v243_v5 = vld [vmem:[#allocation5 + $0x3d8] sm:$0xff]  ;;  %v561_v6 = vld [vmem:[#allocation5 + $0xdc8] sm:$0xff] }
  0xd2   :  { %v3471_v56 = vld [vmem:[#allocation2 + $0x8] sm:$0xff] }
  0xd3   :  { %2282 = vmatpush1.bf16.msra.mxu1 %v2281_v18  ;;  %v545_v18 = vld [vmem:[#allocation5 + $0xd48] sm:$0xff] }
  0xd4   :  { %2602 = vmatpush1.bf16.msra.mxu0 %v2601_v19  ;;  %2284 = vmatprep.subr.bf16.mxu1 %v2283_v20  ;;  %v547_v19 = vld [vmem:[#allocation5 + $0xd58] sm:$0xff]  ;;  %v2301_v20 = vpack.c.bf16 %v222_v12, %v220_v10  ;;  %v2319_v10 = vpack.c.bf16 %v243_v5, %v241_v4  ;;  %v240_v12 = vld [vmem:[#allocation5 + $0x3c0] sm:$0xff] }
  0xd5   :  { %2604 = vmatprep.subr.bf16.mxu0 %v2603_v26  ;;  %v226_v26 = vld [vmem:[#allocation5 + $0x350] sm:$0xff]  ;;  %v2623_v28 = vpack.c.bf16 %v547_v19, %v545_v18  ;;  %v247_v18 = vld [vmem:[#allocation5 + $0x3f8] sm:$0xff]  ;;  %v565_v19 = vld [vmem:[#allocation5 + $0xde8] sm:$0xff] }
  0xd6   :  { %v256_v5 = vld [vmem:[#allocation5 + $0x440] sm:$0xff] }
  0xd7   :  { %2286 = vmatpush1.bf16.msra.mxu1 %v2285_v32  ;;  %v549_v32 = vld [vmem:[#allocation5 + $0xd68] sm:$0xff] }
  0xd8   :  { %2606 = vmatpush1.bf16.msra.mxu0 %v2605_v34  ;;  %2288 = vmatprep.subr.bf16.mxu1 %v2287_v35  ;;  %v2305_v34 = vpack.c.bf16 %v226_v26, %v224_v24  ;;  %v2625_v35 = vpack.c.bf16 %v546_v29, %v544_v27  ;;  %v2627_v41 = vpack.c.bf16 %v551_v33, %v549_v32  ;;  %v244_v26 = vld [vmem:[#allocation5 + $0x3e0] sm:$0xff]  ;;  %v246_v27 = vld [vmem:[#allocation5 + $0x3f0] sm:$0xff]  ;;  %v251_v32 = vld [vmem:[#allocation5 + $0x418] sm:$0xff] }
  0xd9   :  { %2608 = vmatprep.subr.bf16.mxu0 %v2607_v40  ;;  %v548_v40 = vld [vmem:[#allocation5 + $0xd60] sm:$0xff]  ;;  %v2323_v24 = vpack.c.bf16 %v247_v18, %v245_v17  ;;  %v569_v33 = vld [vmem:[#allocation5 + $0xe08] sm:$0xff]  ;;  %v262_v17 = vld [vmem:[#allocation5 + $0x470] sm:$0xff] }
  0xda   :  { %v2629_v50 = vpack.c.bf16 %v550_v42, %v548_v40  ;;  %v248_v40 = vld [vmem:[#allocation5 + $0x400] sm:$0xff] }
  0xdb   :  { %2290 = vmatpush1.bf16.msra.mxu1 %v2289_v47  ;;  %v553_v47 = vld [vmem:[#allocation5 + $0xd88] sm:$0xff]  ;;  %v568_v42 = vld [vmem:[#allocation5 + $0xe00] sm:$0xff] }
  0xdc   :  { %2610 = vmatpush1.bf16.msra.mxu0 %v2609_v48  ;;  %2292 = vmatprep.subr.bf16.mxu1 %v2291_v49  ;;  %v555_v48 = vld [vmem:[#allocation5 + $0xd98] sm:$0xff]  ;;  %v2309_v49 = vpack.c.bf16 %v230_v38, %v228_v37  ;;  %v2327_v38 = vpack.c.bf16 %v251_v32, %v249_v31  ;;  %v580_v18 = vld [vmem:[#allocation5 + $0xe60] sm:$0xff]  ;;  %v266_v31 = vld [vmem:[#allocation5 + $0x490] sm:$0xff] }
  0xdd   :  { %2612 = vmatprep.subr.bf16.mxu0 %v2611_v54  ;;  %v552_v54 = vld [vmem:[#allocation5 + $0xd80] sm:$0xff]  ;;  %v2631_v55 = vpack.c.bf16 %v555_v48, %v553_v47  ;;  %v253_v47 = vld [vmem:[#allocation5 + $0x428] sm:$0xff]  ;;  %v255_v48 = vld [vmem:[#allocation5 + $0x438] sm:$0xff] }
  0xde   :  { %v584_v32 = vld [vmem:[#allocation5 + $0xe80] sm:$0xff] }
  0xdf   :  { %2294 = vmatpush1.bf16.msra.mxu1 %v2293_v58  ;;  %v559_v58 = vld [vmem:[#allocation5 + $0xdb8] sm:$0xff] }
  0xe0   :  { %2614 = vmatpush1.bf16.msra.mxu0 %v2613_v59  ;;  %2296 = vmatprep.subr.bf16.mxu1 %v2295_v60  ;;  %v2313_v59 = vpack.c.bf16 %v234_v53, %v232_v52  ;;  %v2633_v60 = vpack.c.bf16 %v554_v25, %v552_v54  ;;  %v2635_v2 = vpack.c.bf16 %v559_v58, %v557_v39  ;;  %v252_v52 = vld [vmem:[#allocation5 + $0x420] sm:$0xff]  ;;  %v574_v39 = vld [vmem:[#allocation5 + $0xe30] sm:$0xff]  ;;  %v257_v58 = vld [vmem:[#allocation5 + $0x448] sm:$0xff] }
  0xe1   :  { %2616 = vmatprep.subr.bf16.mxu0 %v2615_v1  ;;  %v556_v1 = vld [vmem:[#allocation5 + $0xda0] sm:$0xff]  ;;  %v2649_v53 = vpack.c.bf16 %v570_v45, %v568_v42  ;;  %v2331_v54 = vpack.c.bf16 %v255_v48, %v253_v47  ;;  %v270_v45 = vld [vmem:[#allocation5 + $0x4b0] sm:$0xff] }
  0xe2   :  { %v572_v25 = vld [vmem:[#allocation5 + $0xe20] sm:$0xff] }
  0xe3   :  { %2298 = vmatpush1.bf16.msra.mxu1 %v2297_v7  ;;  %v563_v7 = vld [vmem:[#allocation5 + $0xdd8] sm:$0xff]  ;;  %v588_v47 = vld [vmem:[#allocation5 + $0xea0] sm:$0xff] }
  0xe4   :  { %2618 = vmatpush1.bf16.msra.mxu0 %v2617_v8  ;;  %2300 = vmatprep.subr.bf16.mxu1 %v2299_v9  ;;  %v2317_v8 = vpack.c.bf16 %v238_v0, %v236_v63  ;;  %v2637_v9 = vpack.c.bf16 %v558_v3, %v556_v1  ;;  %v2639_v15 = vpack.c.bf16 %v563_v7, %v561_v6  ;;  %v579_v63 = vld [vmem:[#allocation5 + $0xe58] sm:$0xff]  ;;  %v258_v6 = vld [vmem:[#allocation5 + $0x450] sm:$0xff]  ;;  %v576_v7 = vld [vmem:[#allocation5 + $0xe40] sm:$0xff] }
  0xe5   :  { %2620 = vmatprep.subr.bf16.mxu0 %v2619_v14  ;;  %v560_v14 = vld [vmem:[#allocation5 + $0xdc0] sm:$0xff]  ;;  %v2653_v3 = vpack.c.bf16 %v574_v39, %v572_v25  ;;  %v274_v39 = vld [vmem:[#allocation5 + $0x4d0] sm:$0xff] }
  0xe7   :  { %2302 = vmatpush1.bf16.msra.mxu1 %v2301_v20  ;;  %v567_v20 = vld [vmem:[#allocation5 + $0xdf8] sm:$0xff] }
  0xe8   :  { %2622 = vmatpush1.bf16.msra.mxu0 %v2621_v21  ;;  %2304 = vmatprep.subr.bf16.mxu1 %v2303_v23  ;;  %v2321_v21 = vpack.c.bf16 %v242_v13, %v240_v12  ;;  %v2641_v23 = vpack.c.bf16 %v562_v16, %v560_v14  ;;  %v2643_v29 = vpack.c.bf16 %v567_v20, %v565_v19  ;;  %v581_v12 = vld [vmem:[#allocation5 + $0xe68] sm:$0xff]  ;;  %v583_v13 = vld [vmem:[#allocation5 + $0xe78] sm:$0xff]  ;;  %v260_v16 = vld [vmem:[#allocation5 + $0x460] sm:$0xff] }
  0xe9   :  { %2624 = vmatprep.subr.bf16.mxu0 %v2623_v28  ;;  %v564_v28 = vld [vmem:[#allocation5 + $0xde0] sm:$0xff]  ;;  %v2659_v19 = vpack.c.bf16 %v583_v13, %v581_v12  ;;  %v582_v20 = vld [vmem:[#allocation5 + $0xe70] sm:$0xff]  ;;  %v283_v12 = vld [vmem:[#allocation5 + $0x518] sm:$0xff] }
  0xea   :  { %v2645_v37 = vpack.c.bf16 %v566_v30, %v564_v28  ;;  %v2661_v28 = vpack.c.bf16 %v582_v20, %v580_v18  ;;  %v264_v30 = vld [vmem:[#allocation5 + $0x480] sm:$0xff]  ;;  %v601_v13 = vld [vmem:[#allocation5 + $0xf08] sm:$0xff]  ;;  %v282_v18 = vld [vmem:[#allocation5 + $0x510] sm:$0xff] }
  0xeb   :  { %2306 = vmatpush1.bf16.msra.mxu1 %v2305_v34  ;;  %v571_v34 = vld [vmem:[#allocation5 + $0xe18] sm:$0xff] }
  0xec   :  { %2626 = vmatpush1.bf16.msra.mxu0 %v2625_v35  ;;  %2308 = vmatprep.subr.bf16.mxu1 %v2307_v36  ;;  %v957_v35 = vcombine.high %v3458_v43, %v3458_v43  ;;  %v2325_v36 = vpack.c.bf16 %v246_v27, %v244_v26  ;;  %v2647_v44 = vpack.c.bf16 %v571_v34, %v569_v33  ;;  %v587_v26 = vld [vmem:[#allocation5 + $0xe98] sm:$0xff]  ;;  %v586_v34 = vld [vmem:[#allocation5 + $0xe90] sm:$0xff] }
  0xed   :  { %2628 = vmatprep.subr.bf16.mxu0 %v2627_v41  ;;  %v250_v41 = vld [vmem:[#allocation5 + $0x410] sm:$0xff]  ;;  %v2341_v27 = vpack.c.bf16 %v262_v17, %v260_v16  ;;  %v280_v17 = vld [vmem:[#allocation5 + $0x500] sm:$0xff] }
  0xee   :  { %v2329_v43 = vpack.c.bf16 %v250_v41, %v248_v40  ;;  %v2345_v40 = vpack.c.bf16 %v266_v31, %v264_v30  ;;  %v2665_v41 = vpack.c.bf16 %v586_v34, %v584_v32  ;;  %v284_v31 = vld [vmem:[#allocation5 + $0x520] sm:$0xff]  ;;  %v286_v32 = vld [vmem:[#allocation5 + $0x530] sm:$0xff] }
  0xef   :  { %2310 = vmatpush1.bf16.msra.mxu1 %v2309_v49  ;;  %v573_v49 = vld [vmem:[#allocation5 + $0xe28] sm:$0xff] }
  0xf0   :  { %2630 = vmatpush1.bf16.msra.mxu0 %v2629_v50  ;;  %2312 = vmatprep.subr.bf16.mxu1 %v2311_v51  ;;  %v575_v50 = vld [vmem:[#allocation5 + $0xe38] sm:$0xff]  ;;  %v3469_v51 = vrot.slane %v957_v35, %v3434_v11  ;;  %v269_v35 = vld [vmem:[#allocation5 + $0x4a8] sm:$0xff] }
  0xf1   :  { %2632 = vmatprep.subr.bf16.mxu0 %v2631_v55  ;;  %v254_v55 = vld [vmem:[#allocation5 + $0x430] sm:$0xff]  ;;  %v2651_v57 = vpack.c.bf16 %v575_v50, %v573_v49  ;;  %v273_v50 = vld [vmem:[#allocation5 + $0x4c8] sm:$0xff] }
  0xf2   :  { %v973_v0 = vcombine.high %v3469_v51, %v3469_v51  ;;  %v2333_v1 = vpack.c.bf16 %v254_v55, %v252_v52  ;;  %v590_v49 = vld [vmem:[#allocation5 + $0xeb0] sm:$0xff]  ;;  %v593_v52 = vld [vmem:[#allocation5 + $0xec8] sm:$0xff] }
  0xf3   :  { %2314 = vmatpush1.bf16.msra.mxu1 %v2313_v59  ;;  %v259_v59 = vld [vmem:[#allocation5 + $0x458] sm:$0xff]  ;;  %v2669_v55 = vpack.c.bf16 %v590_v49, %v588_v47  ;;  %v290_v47 = vld [vmem:[#allocation5 + $0x550] sm:$0xff] }
  0xf4   :  { %2634 = vmatpush1.bf16.msra.mxu0 %v2633_v60  ;;  %2316 = vmatprep.subr.bf16.mxu1 %v2315_v62  ;;  %v3475_v60 = vrot.slane %v3471_v56, %v3434_v11  ;;  %v577_v62 = vld [vmem:[#allocation5 + $0xe48] sm:$0xff]  ;;  %v2335_v4 = vpack.c.bf16 %v259_v59, %v257_v58  ;;  %v592_v58 = vld [vmem:[#allocation5 + $0xec0] sm:$0xff] }
  0xf5   :  { %2636 = vmatprep.subr.bf16.mxu0 %v2635_v2 }
  0xf6   :  { %v938_v2 = vcombine.high %v3475_v60, %v3475_v60 }
  0xf7   :  { %2318 = vmatpush1.bf16.msra.mxu1 %v2317_v8  ;;  %v578_v8 = vld [vmem:[#allocation5 + $0xe50] sm:$0xff] }
  0xf8   :  { %2638 = vmatpush1.bf16.msra.mxu0 %v2637_v9  ;;  %2320 = vmatprep.subr.bf16.mxu1 %v2319_v10  ;;  %v261_v9 = vld [vmem:[#allocation5 + $0x468] sm:$0xff]  ;;  %v263_v10 = vld [vmem:[#allocation5 + $0x478] sm:$0xff]  ;;  %v2657_v14 = vpack.c.bf16 %v578_v8, %v576_v7  ;;  %v278_v7 = vld [vmem:[#allocation5 + $0x4f0] sm:$0xff] }
  0xf9   :  { %2640 = vmatprep.subr.bf16.mxu0 %v2639_v15  ;;  %v2339_v15 = vpack.c.bf16 %v263_v10, %v261_v9  ;;  %v598_v9 = vld [vmem:[#allocation5 + $0xef0] sm:$0xff]  ;;  %v281_v10 = vld [vmem:[#allocation5 + $0x508] sm:$0xff] }
  0xfa   :  { %v2359_v16 = vpack.c.bf16 %v283_v12, %v281_v10  ;;  %v618_v10 = vld [vmem:[#allocation5 + $0xf90] sm:$0xff]  ;;  %v301_v12 = vld [vmem:[#allocation5 + $0x5a8] sm:$0xff] }
  0xfb   :  { %2322 = vmatpush1.bf16.msra.mxu1 %v2321_v21  ;;  %v265_v21 = vld [vmem:[#allocation5 + $0x488] sm:$0xff] }
  0xfc   :  { %2642 = vmatpush1.bf16.msra.mxu0 %v2641_v23  ;;  %2324 = vmatprep.subr.bf16.mxu1 %v2323_v24  ;;  %v267_v23 = vld [vmem:[#allocation5 + $0x498] sm:$0xff]  ;;  %v585_v24 = vld [vmem:[#allocation5 + $0xe88] sm:$0xff] }
  0xfd   :  { %2644 = vmatprep.subr.bf16.mxu0 %v2643_v29  ;;  %v2343_v29 = vpack.c.bf16 %v267_v23, %v265_v21  ;;  %v2663_v33 = vpack.c.bf16 %v587_v26, %v585_v24  ;;  %v602_v21 = vld [vmem:[#allocation5 + $0xf10] sm:$0xff]  ;;  %v285_v23 = vld [vmem:[#allocation5 + $0x528] sm:$0xff]  ;;  %v287_v24 = vld [vmem:[#allocation5 + $0x538] sm:$0xff] }
  0xfe   :  { %v605_v26 = vld [vmem:[#allocation5 + $0xf28] sm:$0xff]  ;;  %v2363_v30 = vpack.c.bf16 %v287_v24, %v285_v23  ;;  %v622_v23 = vld [vmem:[#allocation5 + $0xfb0] sm:$0xff] }
  0xff   :  { %2326 = vmatpush1.bf16.msra.mxu1 %v2325_v36  ;;  %v271_v36 = vld [vmem:[#allocation5 + $0x4b8] sm:$0xff]  ;;  %v305_v24 = vld [vmem:[#allocation5 + $0x5c8] sm:$0xff] }
 0x100   :  { %2646 = vmatpush1.bf16.msra.mxu0 %v2645_v37  ;;  %2328 = vmatprep.subr.bf16.mxu1 %v2327_v38  ;;  %v589_v37 = vld [vmem:[#allocation5 + $0xea8] sm:$0xff]  ;;  %v591_v38 = vld [vmem:[#allocation5 + $0xeb8] sm:$0xff]  ;;  %v2347_v42 = vpack.c.bf16 %v271_v36, %v269_v35  ;;  %v606_v35 = vld [vmem:[#allocation5 + $0xf30] sm:$0xff] }
 0x101   :  { %2648 = vmatprep.subr.bf16.mxu0 %v2647_v44  ;;  %v268_v44 = vld [vmem:[#allocation5 + $0x4a0] sm:$0xff]  ;;  %v2667_v48 = vpack.c.bf16 %v591_v38, %v589_v37  ;;  %v289_v36 = vld [vmem:[#allocation5 + $0x548] sm:$0xff]  ;;  %v291_v37 = vld [vmem:[#allocation5 + $0x558] sm:$0xff] }
 0x102   :  { %1168 = vmatmul.mubr.f32.vlgmr.msra.gmra.mrb[0].mxu1 %v3452_v22  ;;  %v2655_v22 = vpack.c.bf16 %v579_v63, %v577_v62  ;;  %v594_v62 = vld [vmem:[#allocation5 + $0xed0] sm:$0xff]  ;;  %v277_v63 = vld [vmem:[#allocation5 + $0x4e8] sm:$0xff] }
 0x103   :  { %2330 = vmatpush1.bf16.msra.mxu1 %v2329_v43  ;;  %1523 = vmatmul.mubr.f32.vlgmr.msra.gmra.mrb[0].mxu0 %v3462_v46  ;;  %v2337_v46 = vpack.c.bf16 %v258_v6, %v256_v5  ;;  %v275_v43 = vld [vmem:[#allocation5 + $0x4d8] sm:$0xff]  ;;  %v276_v6 = vld [vmem:[#allocation5 + $0x4e0] sm:$0xff]  ;;  %v609_v38 = vld [vmem:[#allocation5 + $0xf48] sm:$0xff] }
 0x104   :  { %2650 = vmatpush1.bf16.msra.mxu0 %v2649_v53  ;;  %2332 = vmatprep.subr.bf16.mxu1 %v2331_v54  ;;  %v595_v53 = vld [vmem:[#allocation5 + $0xed8] sm:$0xff]  ;;  %v2349_v54 = vpack.c.bf16 %v270_v45, %v268_v44  ;;  %v2351_v25 = vpack.c.bf16 %v275_v43, %v273_v50  ;;  %v2367_v44 = vpack.c.bf16 %v291_v37, %v289_v36  ;;  %v288_v45 = vld [vmem:[#allocation5 + $0x540] sm:$0xff]  ;;  %v610_v50 = vld [vmem:[#allocation5 + $0xf50] sm:$0xff] }
 0x105   :  { %2652 = vmatprep.subr.bf16.mxu0 %v2651_v57  ;;  %1238 = vmatprep.mubr.f32.mxu1 %v938_v2  ;;  %v272_v57 = vld [vmem:[#allocation5 + $0x4c0] sm:$0xff]  ;;  %v2671_v59 = vpack.c.bf16 %v595_v53, %v593_v52  ;;  %v599_v2 = vld [vmem:[#allocation5 + $0xef8] sm:$0xff]  ;;  %v293_v43 = vld [vmem:[#allocation5 + $0x568] sm:$0xff] }
 0x106   :  { %1593 = vmatprep.mubr.f32.mxu0 %v973_v0  ;;  %v279_v0 = vld [vmem:[#allocation5 + $0x4f8] sm:$0xff]  ;;  %v613_v53 = vld [vmem:[#allocation5 + $0xf68] sm:$0xff]  ;;  %v626_v36 = vld [vmem:[#allocation5 + $0xfd0] sm:$0xff] }
 0x107   :  { %2334 = vmatpush1.bf16.msra.mxu1 %v2333_v1  ;;  %v597_v1 = vld [vmem:[#allocation5 + $0xee8] sm:$0xff]  ;;  %v2355_v5 = vpack.c.bf16 %v279_v0, %v277_v63  ;;  %v295_v52 = vld [vmem:[#allocation5 + $0x578] sm:$0xff]  ;;  %v614_v63 = vld [vmem:[#allocation5 + $0xf70] sm:$0xff] }
 0x108   :  { %2654 = vmatpush1.bf16.msra.mxu0 %v2653_v3  ;;  %2336 = vmatprep.subr.bf16.mxu1 %v2335_v4  ;;  %v2353_v3 = vpack.c.bf16 %v274_v39, %v272_v57  ;;  %v2673_v4 = vpack.c.bf16 %v594_v62, %v592_v58  ;;  %v2675_v8 = vpack.c.bf16 %v599_v2, %v597_v1  ;;  %v292_v39 = vld [vmem:[#allocation5 + $0x560] sm:$0xff]  ;;  %v294_v58 = vld [vmem:[#allocation5 + $0x570] sm:$0xff]  ;;  %v297_v0 = vld [vmem:[#allocation5 + $0x588] sm:$0xff] }
 0x109   :  { %2656 = vmatprep.subr.bf16.mxu0 %v2655_v22  ;;  %v596_v22 = vld [vmem:[#allocation5 + $0xee0] sm:$0xff]  ;;  %v2371_v57 = vpack.c.bf16 %v295_v52, %v293_v43  ;;  %v299_v1 = vld [vmem:[#allocation5 + $0x598] sm:$0xff]  ;;  %v617_v2 = vld [vmem:[#allocation5 + $0xf88] sm:$0xff] }
 0x10a   :  { %v309_v37 = vld [vmem:[#allocation5 + $0x5e8] sm:$0xff]  ;;  %v630_v43 = vld [vmem:[#allocation5 + $0xff0] sm:$0xff] }
 0x10b   :  { %2338 = vmatpush1.bf16.msra.mxu1 %v2337_v46  ;;  %v603_v46 = vld [vmem:[#allocation5 + $0xf18] sm:$0xff]  ;;  %v313_v52 = vld [vmem:[#allocation5 + $0x608] sm:$0xff] }
 0x10c   :  { %2658 = vmatpush1.bf16.msra.mxu0 %v2657_v14  ;;  %2340 = vmatprep.subr.bf16.mxu1 %v2339_v15  ;;  %v2357_v14 = vpack.c.bf16 %v278_v7, %v276_v6  ;;  %v2677_v15 = vpack.c.bf16 %v598_v9, %v596_v22  ;;  %v2679_v20 = vpack.c.bf16 %v603_v46, %v601_v13  ;;  %v296_v7 = vld [vmem:[#allocation5 + $0x580] sm:$0xff]  ;;  %v298_v22 = vld [vmem:[#allocation5 + $0x590] sm:$0xff]  ;;  %v303_v13 = vld [vmem:[#allocation5 + $0x5b8] sm:$0xff] }
 0x10d   :  { %2660 = vmatprep.subr.bf16.mxu0 %v2659_v19  ;;  %v600_v19 = vld [vmem:[#allocation5 + $0xf00] sm:$0xff]  ;;  %v2375_v6 = vpack.c.bf16 %v299_v1, %v297_v0  ;;  %v621_v46 = vld [vmem:[#allocation5 + $0xfa8] sm:$0xff] }
 0x10e   :  { %v632_v0 = vld [vmem:[#allocation5 + $0x1000] sm:$0xff] }
 0x10f   :  { %2342 = vmatpush1.bf16.msra.mxu1 %v2341_v27  ;;  %v607_v27 = vld [vmem:[#allocation5 + $0xf38] sm:$0xff] }
 0x110   :  { %2662 = vmatpush1.bf16.msra.mxu0 %v2661_v28  ;;  %2344 = vmatprep.subr.bf16.mxu1 %v2343_v29  ;;  %v2361_v28 = vpack.c.bf16 %v282_v18, %v280_v17  ;;  %v2681_v29 = vpack.c.bf16 %v602_v21, %v600_v19  ;;  %v2683_v34 = vpack.c.bf16 %v607_v27, %v605_v26  ;;  %v300_v18 = vld [vmem:[#allocation5 + $0x5a0] sm:$0xff]  ;;  %v302_v19 = vld [vmem:[#allocation5 + $0x5b0] sm:$0xff]  ;;  %v307_v26 = vld [vmem:[#allocation5 + $0x5d8] sm:$0xff] }
 0x111   :  { %2664 = vmatprep.subr.bf16.mxu0 %v2663_v33  ;;  %v604_v33 = vld [vmem:[#allocation5 + $0xf20] sm:$0xff]  ;;  %v2379_v17 = vpack.c.bf16 %v303_v13, %v301_v12  ;;  %v625_v27 = vld [vmem:[#allocation5 + $0xfc8] sm:$0xff]  ;;  %v318_v12 = vld [vmem:[#allocation5 + $0x630] sm:$0xff] }
 0x112   :  { %v636_v13 = vld [vmem:[#allocation5 + $0x1020] sm:$0xff] }
 0x113   :  { %2346 = vmatpush1.bf16.msra.mxu1 %v2345_v40  ;;  %v611_v40 = vld [vmem:[#allocation5 + $0xf58] sm:$0xff] }
 0x114   :  { %2666 = vmatpush1.bf16.msra.mxu0 %v2665_v41  ;;  %2348 = vmatprep.subr.bf16.mxu1 %v2347_v42  ;;  %v2365_v41 = vpack.c.bf16 %v286_v32, %v284_v31  ;;  %v2685_v42 = vpack.c.bf16 %v606_v35, %v604_v33  ;;  %v2687_v49 = vpack.c.bf16 %v611_v40, %v609_v38  ;;  %v304_v32 = vld [vmem:[#allocation5 + $0x5c0] sm:$0xff]  ;;  %v306_v33 = vld [vmem:[#allocation5 + $0x5d0] sm:$0xff]  ;;  %v311_v38 = vld [vmem:[#allocation5 + $0x5f8] sm:$0xff] }
 0x115   :  { %2668 = vmatprep.subr.bf16.mxu0 %v2667_v48  ;;  %v608_v48 = vld [vmem:[#allocation5 + $0xf40] sm:$0xff]  ;;  %v2383_v31 = vpack.c.bf16 %v307_v26, %v305_v24  ;;  %v629_v40 = vld [vmem:[#allocation5 + $0xfe8] sm:$0xff] }
 0x116   :  { %v320_v26 = vld [vmem:[#allocation5 + $0x640] sm:$0xff] }
 0x117   :  { %2350 = vmatpush1.bf16.msra.mxu1 %v2349_v54  ;;  %v615_v54 = vld [vmem:[#allocation5 + $0xf78] sm:$0xff] }
 0x118   :  { %2670 = vmatpush1.bf16.msra.mxu0 %v2669_v55  ;;  %2352 = vmatprep.subr.bf16.mxu1 %v2351_v25  ;;  %v2369_v55 = vpack.c.bf16 %v290_v47, %v288_v45  ;;  %v2689_v25 = vpack.c.bf16 %v610_v50, %v608_v48  ;;  %v2691_v62 = vpack.c.bf16 %v615_v54, %v613_v53  ;;  %v308_v47 = vld [vmem:[#allocation5 + $0x5e0] sm:$0xff]  ;;  %v310_v48 = vld [vmem:[#allocation5 + $0x5f0] sm:$0xff]  ;;  %v315_v53 = vld [vmem:[#allocation5 + $0x618] sm:$0xff] }
 0x119   :  { %2672 = vmatprep.subr.bf16.mxu0 %v2671_v59  ;;  %v612_v59 = vld [vmem:[#allocation5 + $0xf60] sm:$0xff]  ;;  %v2387_v45 = vpack.c.bf16 %v311_v38, %v309_v37  ;;  %v923_v54 = vcombine.high %v3471_v56, %v3471_v56  ;;  %v326_v37 = vld [vmem:[#allocation5 + $0x670] sm:$0xff] }
 0x11a   :  { %v644_v38 = vld [vmem:[#allocation5 + $0x1060] sm:$0xff] }
 0x11b   :  { %2354 = vmatpush1.bf16.msra.mxu1 %v2353_v3  ;;  %v619_v3 = vld [vmem:[#allocation5 + $0xf98] sm:$0xff]  ;;  %v3488_v56 = vrot.slane %v923_v54, %v3434_v11 }
 0x11c   :  { %2674 = vmatpush1.bf16.msra.mxu0 %v2673_v4  ;;  %2356 = vmatprep.subr.bf16.mxu1 %v2355_v5  ;;  %v2373_v4 = vpack.c.bf16 %v294_v58, %v292_v39  ;;  %v2693_v5 = vpack.c.bf16 %v614_v63, %v612_v59  ;;  %v2695_v9 = vpack.c.bf16 %v619_v3, %v617_v2  ;;  %v3485_v39 = vld [vmem:[#allocation2 + $0x20] sm:$0xff]  ;;  %v317_v3 = vld [vmem:[#allocation5 + $0x628] sm:$0xff] }
 0x11d   :  { %2676 = vmatprep.subr.bf16.mxu0 %v2675_v8  ;;  %v616_v8 = vld [vmem:[#allocation5 + $0xf80] sm:$0xff]  ;;  %v2391_v59 = vpack.c.bf16 %v315_v53, %v313_v52  ;;  %v314_v63 = vld [vmem:[#allocation5 + $0x610] sm:$0xff] }
 0x11e   :  { %v634_v2 = vld [vmem:[#allocation5 + $0x1010] sm:$0xff]  ;;  %v648_v53 = vld [vmem:[#allocation5 + $0x1080] sm:$0xff] }
 0x11f   :  { %2358 = vmatpush1.bf16.msra.mxu1 %v2357_v14  ;;  %v623_v14 = vld [vmem:[#allocation5 + $0xfb8] sm:$0xff]  ;;  %v330_v52 = vld [vmem:[#allocation5 + $0x690] sm:$0xff] }
 0x120   :  { %2678 = vmatpush1.bf16.msra.mxu0 %v2677_v15  ;;  %2360 = vmatprep.subr.bf16.mxu1 %v2359_v16  ;;  %v2377_v15 = vpack.c.bf16 %v298_v22, %v296_v7  ;;  %v2697_v16 = vpack.c.bf16 %v618_v10, %v616_v8  ;;  %v2699_v21 = vpack.c.bf16 %v623_v14, %v621_v46  ;;  %v316_v10 = vld [vmem:[#allocation5 + $0x620] sm:$0xff]  ;;  %v638_v14 = vld [vmem:[#allocation5 + $0x1030] sm:$0xff] }
 0x121   :  { %2680 = vmatprep.subr.bf16.mxu0 %v2679_v20  ;;  %v620_v20 = vld [vmem:[#allocation5 + $0xfa0] sm:$0xff]  ;;  %v3492_v7 = vrot.slane %v3485_v39, %v3434_v11  ;;  %v2713_v8 = vpack.c.bf16 %v634_v2, %v632_v0  ;;  %v334_v2 = vld [vmem:[#allocation5 + $0x6b0] sm:$0xff] }
 0x123   :  { %2362 = vmatpush1.bf16.msra.mxu1 %v2361_v28  ;;  %v627_v28 = vld [vmem:[#allocation5 + $0xfd8] sm:$0xff] }
 0x124   :  { %2682 = vmatpush1.bf16.msra.mxu0 %v2681_v29  ;;  %2364 = vmatprep.subr.bf16.mxu1 %v2363_v30  ;;  %v2381_v29 = vpack.c.bf16 %v302_v19, %v300_v18  ;;  %v2701_v30 = vpack.c.bf16 %v622_v23, %v620_v20  ;;  %v2703_v35 = vpack.c.bf16 %v627_v28, %v625_v27  ;;  %v641_v18 = vld [vmem:[#allocation5 + $0x1048] sm:$0xff]  ;;  %v643_v19 = vld [vmem:[#allocation5 + $0x1058] sm:$0xff]  ;;  %v322_v27 = vld [vmem:[#allocation5 + $0x650] sm:$0xff] }
 0x125   :  { %2684 = vmatprep.subr.bf16.mxu0 %v2683_v34  ;;  %v624_v34 = vld [vmem:[#allocation5 + $0xfc0] sm:$0xff]  ;;  %v989_v20 = vcombine.high %v3492_v7, %v3492_v7  ;;  %v2717_v23 = vpack.c.bf16 %v638_v14, %v636_v13  ;;  %v338_v14 = vld [vmem:[#allocation5 + $0x6d0] sm:$0xff] }
 0x126   :  { %v640_v28 = vld [vmem:[#allocation5 + $0x1040] sm:$0xff] }
 0x127   :  { %2366 = vmatpush1.bf16.msra.mxu1 %v2365_v41  ;;  %v631_v41 = vld [vmem:[#allocation5 + $0xff8] sm:$0xff] }
 0x128   :  { %2686 = vmatpush1.bf16.msra.mxu0 %v2685_v42  ;;  %2368 = vmatprep.subr.bf16.mxu1 %v2367_v44  ;;  %v2385_v42 = vpack.c.bf16 %v306_v33, %v304_v32  ;;  %v2705_v44 = vpack.c.bf16 %v626_v36, %v624_v34  ;;  %v2707_v50 = vpack.c.bf16 %v631_v41, %v629_v40  ;;  %v645_v32 = vld [vmem:[#allocation5 + $0x1068] sm:$0xff]  ;;  %v647_v33 = vld [vmem:[#allocation5 + $0x1078] sm:$0xff]  ;;  %v324_v36 = vld [vmem:[#allocation5 + $0x660] sm:$0xff] }
 0x129   :  { %2688 = vmatprep.subr.bf16.mxu0 %v2687_v49  ;;  %v628_v49 = vld [vmem:[#allocation5 + $0xfe0] sm:$0xff]  ;;  %v2401_v34 = vpack.c.bf16 %v322_v27, %v320_v26  ;;  %v2723_v40 = vpack.c.bf16 %v647_v33, %v645_v32  ;;  %v646_v41 = vld [vmem:[#allocation5 + $0x1070] sm:$0xff]  ;;  %v347_v32 = vld [vmem:[#allocation5 + $0x718] sm:$0xff] }
 0x12a   :  { %v2709_v58 = vpack.c.bf16 %v630_v43, %v628_v49  ;;  %v2725_v49 = vpack.c.bf16 %v646_v41, %v644_v38  ;;  %v328_v43 = vld [vmem:[#allocation5 + $0x680] sm:$0xff]  ;;  %v665_v33 = vld [vmem:[#allocation5 + $0x1108] sm:$0xff]  ;;  %v346_v38 = vld [vmem:[#allocation5 + $0x710] sm:$0xff] }
 0x12b   :  { %2370 = vmatpush1.bf16.msra.mxu1 %v2369_v55  ;;  %v633_v55 = vld [vmem:[#allocation5 + $0x1008] sm:$0xff]  ;;  %v340_v27 = vld [vmem:[#allocation5 + $0x6e0] sm:$0xff] }
 0x12c   :  { %2690 = vmatpush1.bf16.msra.mxu0 %v2689_v25  ;;  %2372 = vmatprep.subr.bf16.mxu1 %v2371_v57  ;;  %v635_v25 = vld [vmem:[#allocation5 + $0x1018] sm:$0xff]  ;;  %v2389_v57 = vpack.c.bf16 %v310_v48, %v308_v47  ;;  %v2405_v48 = vpack.c.bf16 %v326_v37, %v324_v36  ;;  %v344_v37 = vld [vmem:[#allocation5 + $0x700] sm:$0xff] }
 0x12d   :  { %2692 = vmatprep.subr.bf16.mxu0 %v2691_v62  ;;  %v312_v62 = vld [vmem:[#allocation5 + $0x600] sm:$0xff]  ;;  %v2711_v1 = vpack.c.bf16 %v635_v25, %v633_v55  ;;  %v651_v47 = vld [vmem:[#allocation5 + $0x1098] sm:$0xff]  ;;  %v650_v55 = vld [vmem:[#allocation5 + $0x1090] sm:$0xff] }
 0x12e   :  { %v2393_v22 = vpack.c.bf16 %v314_v63, %v312_v62  ;;  %v333_v25 = vld [vmem:[#allocation5 + $0x6a8] sm:$0xff]  ;;  %v2409_v62 = vpack.c.bf16 %v330_v52, %v328_v43  ;;  %v2729_v63 = vpack.c.bf16 %v650_v55, %v648_v53  ;;  %v348_v52 = vld [vmem:[#allocation5 + $0x720] sm:$0xff]  ;;  %v350_v53 = vld [vmem:[#allocation5 + $0x730] sm:$0xff] }
 0x12f   :  { %2374 = vmatpush1.bf16.msra.mxu1 %v2373_v4  ;;  %v319_v4 = vld [vmem:[#allocation5 + $0x638] sm:$0xff] }
 0x130   :  { %2694 = vmatpush1.bf16.msra.mxu0 %v2693_v5  ;;  %2376 = vmatprep.subr.bf16.mxu1 %v2375_v6  ;;  %v637_v5 = vld [vmem:[#allocation5 + $0x1028] sm:$0xff]  ;;  %v639_v6 = vld [vmem:[#allocation5 + $0x1038] sm:$0xff] }
 0x131   :  { %2696 = vmatprep.subr.bf16.mxu0 %v2695_v9  ;;  %v2395_v9 = vpack.c.bf16 %v319_v4, %v317_v3  ;;  %v2715_v46 = vpack.c.bf16 %v639_v6, %v637_v5  ;;  %v652_v3 = vld [vmem:[#allocation5 + $0x10a0] sm:$0xff]  ;;  %v654_v5 = vld [vmem:[#allocation5 + $0x10b0] sm:$0xff]  ;;  %v337_v6 = vld [vmem:[#allocation5 + $0x6c8] sm:$0xff] }
 0x133   :  { %2378 = vmatpush1.bf16.msra.mxu1 %v2377_v15  ;;  %v321_v15 = vld [vmem:[#allocation5 + $0x648] sm:$0xff] }
 0x134   :  { %2698 = vmatpush1.bf16.msra.mxu0 %v2697_v16  ;;  %2380 = vmatprep.subr.bf16.mxu1 %v2379_v17  ;;  %v323_v16 = vld [vmem:[#allocation5 + $0x658] sm:$0xff]  ;;  %v939_v17 = vcombine.high %v3488_v56, %v3488_v56 }
 0x135   :  { %2700 = vmatprep.subr.bf16.mxu0 %v2699_v21  ;;  %v2397_v21 = vpack.c.bf16 %v318_v12, %v316_v10  ;;  %v2399_v24 = vpack.c.bf16 %v323_v16, %v321_v15  ;;  %v2733_v12 = vpack.c.bf16 %v654_v5, %v652_v3  ;;  %v656_v15 = vld [vmem:[#allocation5 + $0x10c0] sm:$0xff]  ;;  %v354_v3 = vld [vmem:[#allocation5 + $0x750] sm:$0xff] }
 0x137   :  { %2382 = vmatpush1.bf16.msra.mxu1 %v2381_v29  ;;  %v2719_v29 = vpack.c.bf16 %v643_v19, %v641_v18  ;;  %v341_v18 = vld [vmem:[#allocation5 + $0x6e8] sm:$0xff]  ;;  %v343_v19 = vld [vmem:[#allocation5 + $0x6f8] sm:$0xff] }
 0x138   :  { %2702 = vmatpush1.bf16.msra.mxu0 %v2701_v30  ;;  %2384 = vmatprep.subr.bf16.mxu1 %v2383_v31  ;;  %v642_v30 = vld [vmem:[#allocation5 + $0x1050] sm:$0xff]  ;;  %v327_v31 = vld [vmem:[#allocation5 + $0x678] sm:$0xff]  ;;  %v2419_v26 = vpack.c.bf16 %v343_v19, %v341_v18  ;;  %v361_v19 = vld [vmem:[#allocation5 + $0x788] sm:$0xff] }
 0x139   :  { %2704 = vmatprep.subr.bf16.mxu0 %v2703_v35  ;;  %v678_v18 = vld [vmem:[#allocation5 + $0x1170] sm:$0xff] }
 0x13b   :  { %2386 = vmatpush1.bf16.msra.mxu1 %v2385_v42  ;;  %v329_v42 = vld [vmem:[#allocation5 + $0x688] sm:$0xff] }
 0x13c   :  { %2706 = vmatpush1.bf16.msra.mxu0 %v2705_v44  ;;  %2388 = vmatprep.subr.bf16.mxu1 %v2387_v45  ;;  %v331_v44 = vld [vmem:[#allocation5 + $0x698] sm:$0xff]  ;;  %v649_v45 = vld [vmem:[#allocation5 + $0x1088] sm:$0xff] }
 0x13d   :  { %2708 = vmatprep.subr.bf16.mxu0 %v2707_v50  ;;  %v2407_v50 = vpack.c.bf16 %v331_v44, %v329_v42  ;;  %v2727_v54 = vpack.c.bf16 %v651_v47, %v649_v45  ;;  %v666_v42 = vld [vmem:[#allocation5 + $0x1110] sm:$0xff]  ;;  %v349_v44 = vld [vmem:[#allocation5 + $0x728] sm:$0xff]  ;;  %v351_v45 = vld [vmem:[#allocation5 + $0x738] sm:$0xff] }
 0x13e   :  { %v669_v47 = vld [vmem:[#allocation5 + $0x1128] sm:$0xff]  ;;  %v2427_v43 = vpack.c.bf16 %v351_v45, %v349_v44  ;;  %v686_v44 = vld [vmem:[#allocation5 + $0x11b0] sm:$0xff] }
 0x13f   :  { %2390 = vmatpush1.bf16.msra.mxu1 %v2389_v57  ;;  %v335_v57 = vld [vmem:[#allocation5 + $0x6b8] sm:$0xff]  ;;  %v369_v45 = vld [vmem:[#allocation5 + $0x7c8] sm:$0xff] }
 0x140   :  { %2710 = vmatpush1.bf16.msra.mxu0 %v2709_v58  ;;  %2392 = vmatprep.subr.bf16.mxu1 %v2391_v59  ;;  %v653_v58 = vld [vmem:[#allocation5 + $0x10a8] sm:$0xff]  ;;  %v655_v59 = vld [vmem:[#allocation5 + $0x10b8] sm:$0xff]  ;;  %v2411_v0 = vpack.c.bf16 %v335_v57, %v333_v25  ;;  %v670_v25 = vld [vmem:[#allocation5 + $0x1130] sm:$0xff] }
 0x141   :  { %2712 = vmatprep.subr.bf16.mxu0 %v2711_v1  ;;  %v332_v1 = vld [vmem:[#allocation5 + $0x6a0] sm:$0xff]  ;;  %v2731_v4 = vpack.c.bf16 %v655_v59, %v653_v58  ;;  %v353_v57 = vld [vmem:[#allocation5 + $0x748] sm:$0xff]  ;;  %v355_v58 = vld [vmem:[#allocation5 + $0x758] sm:$0xff] }
 0x142   :  { %1239 = vmatmul.mubr.f32.vlgmr.msra.gmra.mrb[0].mxu1 %v3475_v60  ;;  %v325_v60 = vld [vmem:[#allocation5 + $0x668] sm:$0xff]  ;;  %v2413_v10 = vpack.c.bf16 %v334_v2, %v332_v1  ;;  %v2431_v1 = vpack.c.bf16 %v355_v58, %v353_v57  ;;  %v352_v2 = vld [vmem:[#allocation5 + $0x740] sm:$0xff]  ;;  %v690_v57 = vld [vmem:[#allocation5 + $0x11d0] sm:$0xff] }
 0x143   :  { %2394 = vmatpush1.bf16.msra.mxu1 %v2393_v22  ;;  %1594 = vmatmul.mubr.f32.vlgmr.msra.gmra.mrb[0].mxu0 %v3469_v51  ;;  %v2721_v51 = vpack.c.bf16 %v642_v30, %v640_v28  ;;  %v2403_v35 = vpack.c.bf16 %v327_v31, %v325_v60  ;;  %v339_v22 = vld [vmem:[#allocation5 + $0x6d8] sm:$0xff]  ;;  %v342_v28 = vld [vmem:[#allocation5 + $0x6f0] sm:$0xff]  ;;  %v345_v31 = vld [vmem:[#allocation5 + $0x708] sm:$0xff] }
 0x144   :  { %2714 = vmatpush1.bf16.msra.mxu0 %v2713_v8  ;;  %2396 = vmatprep.subr.bf16.mxu1 %v2395_v9  ;;  %v657_v8 = vld [vmem:[#allocation5 + $0x10c8] sm:$0xff]  ;;  %v659_v9 = vld [vmem:[#allocation5 + $0x10d8] sm:$0xff]  ;;  %v2415_v13 = vpack.c.bf16 %v339_v22, %v337_v6  ;;  %v662_v60 = vld [vmem:[#allocation5 + $0x10f0] sm:$0xff]  ;;  %v2423_v36 = vpack.c.bf16 %v347_v32, %v345_v31 }
 0x145   :  { %2716 = vmatprep.subr.bf16.mxu0 %v2715_v46  ;;  %1309 = vmatprep.mubr.f32.mxu1 %v939_v17  ;;  %v336_v46 = vld [vmem:[#allocation5 + $0x6c0] sm:$0xff]  ;;  %v2735_v16 = vpack.c.bf16 %v659_v9, %v657_v8  ;;  %v658_v17 = vld [vmem:[#allocation5 + $0x10d0] sm:$0xff]  ;;  %v673_v59 = vld [vmem:[#allocation5 + $0x1148] sm:$0xff] }
 0x146   :  { %1664 = vmatprep.mubr.f32.mxu0 %v989_v20  ;;  %v661_v20 = vld [vmem:[#allocation5 + $0x10e8] sm:$0xff]  ;;  %v674_v6 = vld [vmem:[#allocation5 + $0x1150] sm:$0xff]  ;;  %v359_v8 = vld [vmem:[#allocation5 + $0x778] sm:$0xff] }
 0x147   :  { %2398 = vmatpush1.bf16.msra.mxu1 %v2397_v21  ;;  %v663_v21 = vld [vmem:[#allocation5 + $0x10f8] sm:$0xff]  ;;  %v357_v22 = vld [vmem:[#allocation5 + $0x768] sm:$0xff]  ;;  %v682_v31 = vld [vmem:[#allocation5 + $0x1190] sm:$0xff] }
 0x148   :  { %2718 = vmatpush1.bf16.msra.mxu0 %v2717_v23  ;;  %2400 = vmatprep.subr.bf16.mxu1 %v2399_v24  ;;  %v2417_v23 = vpack.c.bf16 %v338_v14, %v336_v46  ;;  %v2737_v24 = vpack.c.bf16 %v658_v17, %v656_v15  ;;  %v2739_v30 = vpack.c.bf16 %v663_v21, %v661_v20  ;;  %v677_v9 = vld [vmem:[#allocation5 + $0x1168] sm:$0xff]  ;;  %v356_v14 = vld [vmem:[#allocation5 + $0x760] sm:$0xff]  ;;  %v358_v15 = vld [vmem:[#allocation5 + $0x770] sm:$0xff] }
 0x149   :  { %2720 = vmatprep.subr.bf16.mxu0 %v2719_v29  ;;  %v660_v29 = vld [vmem:[#allocation5 + $0x10e0] sm:$0xff]  ;;  %v2435_v46 = vpack.c.bf16 %v359_v8, %v357_v22  ;;  %v363_v20 = vld [vmem:[#allocation5 + $0x798] sm:$0xff]  ;;  %v681_v21 = vld [vmem:[#allocation5 + $0x1188] sm:$0xff] }
 0x14a   :  { %v365_v32 = vld [vmem:[#allocation5 + $0x7a8] sm:$0xff]  ;;  %v694_v22 = vld [vmem:[#allocation5 + $0x11f0] sm:$0xff] }
 0x14b   :  { %2402 = vmatpush1.bf16.msra.mxu1 %v2401_v34  ;;  %v667_v34 = vld [vmem:[#allocation5 + $0x1118] sm:$0xff]  ;;  %v373_v58 = vld [vmem:[#allocation5 + $0x7e8] sm:$0xff] }
 0x14c   :  { %2722 = vmatpush1.bf16.msra.mxu0 %v2721_v51  ;;  %2404 = vmatprep.subr.bf16.mxu1 %v2403_v35  ;;  %v2421_v51 = vpack.c.bf16 %v342_v28, %v340_v27  ;;  %v2741_v35 = vpack.c.bf16 %v662_v60, %v660_v29  ;;  %v2743_v41 = vpack.c.bf16 %v667_v34, %v665_v33  ;;  %v360_v28 = vld [vmem:[#allocation5 + $0x780] sm:$0xff]  ;;  %v362_v29 = vld [vmem:[#allocation5 + $0x790] sm:$0xff]  ;;  %v367_v33 = vld [vmem:[#allocation5 + $0x7b8] sm:$0xff] }
 0x14d   :  { %2724 = vmatprep.subr.bf16.mxu0 %v2723_v40  ;;  %v664_v40 = vld [vmem:[#allocation5 + $0x1100] sm:$0xff]  ;;  %v2439_v27 = vpack.c.bf16 %v363_v20, %v361_v19  ;;  %v685_v34 = vld [vmem:[#allocation5 + $0x11a8] sm:$0xff]  ;;  %v698_v20 = vld [vmem:[#allocation5 + $0x1210] sm:$0xff] }
 0x14e   :  { %v377_v8 = vld [vmem:[#allocation5 + $0x808] sm:$0xff] }
 0x14f   :  { %2406 = vmatpush1.bf16.msra.mxu1 %v2405_v48  ;;  %v671_v48 = vld [vmem:[#allocation5 + $0x1138] sm:$0xff] }
 0x150   :  { %2726 = vmatpush1.bf16.msra.mxu0 %v2725_v49  ;;  %2408 = vmatprep.subr.bf16.mxu1 %v2407_v50  ;;  %v2425_v49 = vpack.c.bf16 %v346_v38, %v344_v37  ;;  %v2745_v50 = vpack.c.bf16 %v666_v42, %v664_v40  ;;  %v2747_v55 = vpack.c.bf16 %v671_v48, %v669_v47  ;;  %v364_v38 = vld [vmem:[#allocation5 + $0x7a0] sm:$0xff]  ;;  %v366_v40 = vld [vmem:[#allocation5 + $0x7b0] sm:$0xff]  ;;  %v371_v47 = vld [vmem:[#allocation5 + $0x7d8] sm:$0xff] }
 0x151   :  { %2728 = vmatprep.subr.bf16.mxu0 %v2727_v54  ;;  %v668_v54 = vld [vmem:[#allocation5 + $0x1120] sm:$0xff]  ;;  %v2443_v37 = vpack.c.bf16 %v367_v33, %v365_v32  ;;  %v689_v48 = vld [vmem:[#allocation5 + $0x11c8] sm:$0xff] }
 0x152   :  { %v700_v32 = vld [vmem:[#allocation5 + $0x1220] sm:$0xff] }
 0x153   :  { %2410 = vmatpush1.bf16.msra.mxu1 %v2409_v62  ;;  %v675_v62 = vld [vmem:[#allocation5 + $0x1158] sm:$0xff] }
 0x154   :  { %2730 = vmatpush1.bf16.msra.mxu0 %v2729_v63  ;;  %2412 = vmatprep.subr.bf16.mxu1 %v2411_v0  ;;  %v2429_v63 = vpack.c.bf16 %v350_v53, %v348_v52  ;;  %v2749_v0 = vpack.c.bf16 %v670_v25, %v668_v54  ;;  %v2751_v5 = vpack.c.bf16 %v675_v62, %v673_v59  ;;  %v368_v53 = vld [vmem:[#allocation5 + $0x7c0] sm:$0xff]  ;;  %v370_v54 = vld [vmem:[#allocation5 + $0x7d0] sm:$0xff]  ;;  %v375_v59 = vld [vmem:[#allocation5 + $0x7f8] sm:$0xff] }
 0x155   :  { %2732 = vmatprep.subr.bf16.mxu0 %v2731_v4  ;;  %v672_v4 = vld [vmem:[#allocation5 + $0x1140] sm:$0xff]  ;;  %v2447_v52 = vpack.c.bf16 %v371_v47, %v369_v45  ;;  %v693_v62 = vld [vmem:[#allocation5 + $0x11e8] sm:$0xff]  ;;  %v386_v47 = vld [vmem:[#allocation5 + $0x850] sm:$0xff] }
 0x156   :  { %v384_v45 = vld [vmem:[#allocation5 + $0x840] sm:$0xff] }
 0x157   :  { %2414 = vmatpush1.bf16.msra.mxu1 %v2413_v10  ;;  %v679_v10 = vld [vmem:[#allocation5 + $0x1178] sm:$0xff] }
 0x158   :  { %2734 = vmatpush1.bf16.msra.mxu0 %v2733_v12  ;;  %2416 = vmatprep.subr.bf16.mxu1 %v2415_v13  ;;  %v2433_v12 = vpack.c.bf16 %v354_v3, %v352_v2  ;;  %v2753_v13 = vpack.c.bf16 %v674_v6, %v672_v4  ;;  %v2755_v17 = vpack.c.bf16 %v679_v10, %v677_v9  ;;  %v372_v3 = vld [vmem:[#allocation5 + $0x7e0] sm:$0xff]  ;;  %v374_v4 = vld [vmem:[#allocation5 + $0x7f0] sm:$0xff]  ;;  %v379_v9 = vld [vmem:[#allocation5 + $0x818] sm:$0xff] }
 0x159   :  { %2736 = vmatprep.subr.bf16.mxu0 %v2735_v16  ;;  %v676_v16 = vld [vmem:[#allocation5 + $0x1160] sm:$0xff]  ;;  %v2451_v2 = vpack.c.bf16 %v375_v59, %v373_v58  ;;  %v697_v10 = vld [vmem:[#allocation5 + $0x1208] sm:$0xff] }
 0x15a   :  { %v708_v58 = vld [vmem:[#allocation5 + $0x1260] sm:$0xff] }
 0x15b   :  { %2418 = vmatpush1.bf16.msra.mxu1 %v2417_v23  ;;  %v683_v23 = vld [vmem:[#allocation5 + $0x1198] sm:$0xff] }
 0x15c   :  { %2738 = vmatpush1.bf16.msra.mxu0 %v2737_v24  ;;  %2420 = vmatprep.subr.bf16.mxu1 %v2419_v26  ;;  %v2437_v24 = vpack.c.bf16 %v358_v15, %v356_v14  ;;  %v2757_v26 = vpack.c.bf16 %v678_v18, %v676_v16  ;;  %v2759_v60 = vpack.c.bf16 %v683_v23, %v681_v21  ;;  %v376_v16 = vld [vmem:[#allocation5 + $0x800] sm:$0xff]  ;;  %v381_v21 = vld [vmem:[#allocation5 + $0x828] sm:$0xff]  ;;  %v383_v23 = vld [vmem:[#allocation5 + $0x838] sm:$0xff] }
 0x15d   :  { %2740 = vmatprep.subr.bf16.mxu0 %v2739_v30  ;;  %v680_v30 = vld [vmem:[#allocation5 + $0x1180] sm:$0xff]  ;;  %v2455_v15 = vpack.c.bf16 %v379_v9, %v377_v8 }
 0x15e   :  { %v696_v18 = vld [vmem:[#allocation5 + $0x1200] sm:$0xff] }
 0x15f   :  { %2422 = vmatpush1.bf16.msra.mxu1 %v2421_v51  ;;  %v687_v51 = vld [vmem:[#allocation5 + $0x11b8] sm:$0xff]  ;;  %v712_v8 = vld [vmem:[#allocation5 + $0x1280] sm:$0xff] }
 0x160   :  { %2742 = vmatpush1.bf16.msra.mxu0 %v2741_v35  ;;  %2424 = vmatprep.subr.bf16.mxu1 %v2423_v36  ;;  %v2441_v35 = vpack.c.bf16 %v362_v29, %v360_v28  ;;  %v2761_v36 = vpack.c.bf16 %v682_v31, %v680_v30  ;;  %v2763_v42 = vpack.c.bf16 %v687_v51, %v685_v34  ;;  %v382_v31 = vld [vmem:[#allocation5 + $0x830] sm:$0xff]  ;;  %v385_v51 = vld [vmem:[#allocation5 + $0x848] sm:$0xff] }
 0x161   :  { %2744 = vmatprep.subr.bf16.mxu0 %v2743_v41  ;;  %v684_v41 = vld [vmem:[#allocation5 + $0x11a0] sm:$0xff]  ;;  %v2777_v29 = vpack.c.bf16 %v698_v20, %v696_v18  ;;  %v2459_v30 = vpack.c.bf16 %v383_v23, %v381_v21  ;;  %v702_v34 = vld [vmem:[#allocation5 + $0x1230] sm:$0xff] }
 0x162   :  { %v396_v18 = vld [vmem:[#allocation5 + $0x8a0] sm:$0xff]  ;;  %v718_v23 = vld [vmem:[#allocation5 + $0x12b0] sm:$0xff] }
 0x163   :  { %2426 = vmatpush1.bf16.msra.mxu1 %v2425_v49  ;;  %v691_v49 = vld [vmem:[#allocation5 + $0x11d8] sm:$0xff]  ;;  %v716_v20 = vld [vmem:[#allocation5 + $0x12a0] sm:$0xff] }
 0x164   :  { %2746 = vmatpush1.bf16.msra.mxu0 %v2745_v50  ;;  %2428 = vmatprep.subr.bf16.mxu1 %v2427_v43  ;;  %v2445_v50 = vpack.c.bf16 %v366_v40, %v364_v38  ;;  %v2765_v43 = vpack.c.bf16 %v686_v44, %v684_v41  ;;  %v2767_v25 = vpack.c.bf16 %v691_v49, %v689_v48  ;;  %v707_v38 = vld [vmem:[#allocation5 + $0x1258] sm:$0xff]  ;;  %v704_v48 = vld [vmem:[#allocation5 + $0x1240] sm:$0xff] }
 0x165   :  { %2748 = vmatprep.subr.bf16.mxu0 %v2747_v55  ;;  %v688_v55 = vld [vmem:[#allocation5 + $0x11c0] sm:$0xff] }
 0x167   :  { %2430 = vmatpush1.bf16.msra.mxu1 %v2429_v63  ;;  %v695_v63 = vld [vmem:[#allocation5 + $0x11f8] sm:$0xff] }
 0x168   :  { %2750 = vmatpush1.bf16.msra.mxu0 %v2749_v0  ;;  %2432 = vmatprep.subr.bf16.mxu1 %v2431_v1  ;;  %v2449_v0 = vpack.c.bf16 %v370_v54, %v368_v53  ;;  %v2769_v1 = vpack.c.bf16 %v690_v57, %v688_v55  ;;  %v2771_v6 = vpack.c.bf16 %v695_v63, %v693_v62  ;;  %v711_v53 = vld [vmem:[#allocation5 + $0x1278] sm:$0xff]  ;;  %v390_v57 = vld [vmem:[#allocation5 + $0x870] sm:$0xff]  ;;  %v393_v63 = vld [vmem:[#allocation5 + $0x888] sm:$0xff] }
 0x169   :  { %2752 = vmatprep.subr.bf16.mxu0 %v2751_v5  ;;  %v692_v5 = vld [vmem:[#allocation5 + $0x11e0] sm:$0xff]  ;;  %v2465_v54 = vpack.c.bf16 %v386_v47, %v384_v45  ;;  %v710_v62 = vld [vmem:[#allocation5 + $0x1270] sm:$0xff] }
 0x16a   :  { %v2773_v14 = vpack.c.bf16 %v694_v22, %v692_v5  ;;  %v394_v22 = vld [vmem:[#allocation5 + $0x890] sm:$0xff]  ;;  %v404_v45 = vld [vmem:[#allocation5 + $0x8e0] sm:$0xff] }
 0x16b   :  { %2434 = vmatpush1.bf16.msra.mxu1 %v2433_v12  ;;  %v699_v12 = vld [vmem:[#allocation5 + $0x1218] sm:$0xff]  ;;  %v406_v47 = vld [vmem:[#allocation5 + $0x8f0] sm:$0xff] }
 0x16c   :  { %2754 = vmatpush1.bf16.msra.mxu0 %v2753_v13  ;;  %2436 = vmatprep.subr.bf16.mxu1 %v2435_v46  ;;  %v974_v13 = vcombine.high %v3485_v39, %v3485_v39  ;;  %v2453_v46 = vpack.c.bf16 %v374_v4, %v372_v3  ;;  %v2775_v19 = vpack.c.bf16 %v699_v12, %v697_v10  ;;  %v714_v10 = vld [vmem:[#allocation5 + $0x1290] sm:$0xff]  ;;  %v397_v12 = vld [vmem:[#allocation5 + $0x8a8] sm:$0xff] }
 0x16d   :  { %2756 = vmatprep.subr.bf16.mxu0 %v2755_v17  ;;  %v378_v17 = vld [vmem:[#allocation5 + $0x810] sm:$0xff]  ;;  %v2789_v4 = vpack.c.bf16 %v710_v62, %v708_v58  ;;  %v728_v58 = vld [vmem:[#allocation5 + $0x1300] sm:$0xff] }
 0x16e   :  { %v3505_v39 = vrot.slane %v974_v13, %v3434_v11  ;;  %v2457_v28 = vpack.c.bf16 %v378_v17, %v376_v16  ;;  %v399_v13 = vld [vmem:[#allocation5 + $0x8b8] sm:$0xff]  ;;  %v2793_v16 = vpack.c.bf16 %v714_v10, %v712_v8  ;;  %v730_v62 = vld [vmem:[#allocation5 + $0x1310] sm:$0xff]  ;;  %v732_v8 = vld [vmem:[#allocation5 + $0x1320] sm:$0xff] }
 0x16f   :  { %2438 = vmatpush1.bf16.msra.mxu1 %v2437_v24  ;;  %v3502_v24 = vld.sshfl [vmem:[#allocation2 + $0x10] sm:$0xff pattern:$0x76325410]  ;;  %v2475_v17 = vpack.c.bf16 %v399_v13, %v397_v12  ;;  %v734_v10 = vld [vmem:[#allocation5 + $0x1330] sm:$0xff]  ;;  %v417_v12 = vld [vmem:[#allocation5 + $0x948] sm:$0xff] }
 0x170   :  { %2758 = vmatpush1.bf16.msra.mxu0 %v2757_v26  ;;  %2440 = vmatprep.subr.bf16.mxu1 %v2439_v27  ;;  %v701_v26 = vld [vmem:[#allocation5 + $0x1228] sm:$0xff]  ;;  %v703_v27 = vld [vmem:[#allocation5 + $0x1238] sm:$0xff]  ;;  %v990_v40 = vcombine.high %v3505_v39, %v3505_v39 }
 0x171   :  { %2760 = vmatprep.subr.bf16.mxu0 %v2759_v60  ;;  %v380_v60 = vld [vmem:[#allocation5 + $0x820] sm:$0xff]  ;;  %v2779_v33 = vpack.c.bf16 %v703_v27, %v701_v26  ;;  %v401_v26 = vld [vmem:[#allocation5 + $0x8c8] sm:$0xff]  ;;  %v403_v27 = vld [vmem:[#allocation5 + $0x8d8] sm:$0xff] }
 0x172   :  { %v2461_v41 = vpack.c.bf16 %v382_v31, %v380_v60  ;;  %v2797_v60 = vpack.c.bf16 %v718_v23, %v716_v20  ;;  %v2479_v31 = vpack.c.bf16 %v403_v27, %v401_v26  ;;  %v419_v13 = vld [vmem:[#allocation5 + $0x958] sm:$0xff]  ;;  %v736_v20 = vld [vmem:[#allocation5 + $0x1340] sm:$0xff]  ;;  %v738_v23 = vld [vmem:[#allocation5 + $0x1350] sm:$0xff] }
 0x173   :  { %2442 = vmatpush1.bf16.msra.mxu1 %v2441_v35  ;;  %v387_v35 = vld [vmem:[#allocation5 + $0x858] sm:$0xff]  ;;  %v421_v26 = vld [vmem:[#allocation5 + $0x968] sm:$0xff] }
 0x174   :  { %2762 = vmatpush1.bf16.msra.mxu0 %v2761_v36  ;;  %2444 = vmatprep.subr.bf16.mxu1 %v2443_v37  ;;  %v955_v36 = vcombine.high %v3502_v24, %v3502_v24  ;;  %v705_v37 = vld [vmem:[#allocation5 + $0x1248] sm:$0xff]  ;;  %v2463_v44 = vpack.c.bf16 %v387_v35, %v385_v51  ;;  %v722_v35 = vld [vmem:[#allocation5 + $0x12d0] sm:$0xff]  ;;  %v423_v27 = vld [vmem:[#allocation5 + $0x978] sm:$0xff] }
 0x175   :  { %2764 = vmatprep.subr.bf16.mxu0 %v2763_v42  ;;  %v2781_v42 = vpack.c.bf16 %v702_v34, %v700_v32  ;;  %v2783_v49 = vpack.c.bf16 %v707_v38, %v705_v37  ;;  %v400_v32 = vld [vmem:[#allocation5 + $0x8c0] sm:$0xff]  ;;  %v407_v37 = vld [vmem:[#allocation5 + $0x8f8] sm:$0xff]  ;;  %v725_v38 = vld [vmem:[#allocation5 + $0x12e8] sm:$0xff] }
 0x176   :  { %v720_v34 = vld [vmem:[#allocation5 + $0x12c0] sm:$0xff] }
 0x177   :  { %2446 = vmatpush1.bf16.msra.mxu1 %v2445_v50  ;;  %v706_v50 = vld [vmem:[#allocation5 + $0x1250] sm:$0xff] }
 0x178   :  { %2766 = vmatpush1.bf16.msra.mxu0 %v2765_v43  ;;  %2448 = vmatprep.subr.bf16.mxu1 %v2447_v52  ;;  %v391_v43 = vld [vmem:[#allocation5 + $0x878] sm:$0xff]  ;;  %v709_v52 = vld [vmem:[#allocation5 + $0x1268] sm:$0xff] }
 0x179   :  { %2768 = vmatprep.subr.bf16.mxu0 %v2767_v25  ;;  %v388_v25 = vld [vmem:[#allocation5 + $0x860] sm:$0xff]  ;;  %v2787_v59 = vpack.c.bf16 %v711_v53, %v709_v52  ;;  %v729_v52 = vld [vmem:[#allocation5 + $0x1308] sm:$0xff]  ;;  %v731_v53 = vld [vmem:[#allocation5 + $0x1318] sm:$0xff] }
 0x17a   :  { %v2469_v3 = vpack.c.bf16 %v390_v57, %v388_v25  ;;  %v408_v25 = vld [vmem:[#allocation5 + $0x900] sm:$0xff]  ;;  %v410_v57 = vld [vmem:[#allocation5 + $0x910] sm:$0xff] }
 0x17b   :  { %2450 = vmatpush1.bf16.msra.mxu1 %v2449_v0  ;;  %v395_v0 = vld [vmem:[#allocation5 + $0x898] sm:$0xff] }
 0x17c   :  { %2770 = vmatpush1.bf16.msra.mxu0 %v2769_v1  ;;  %2452 = vmatprep.subr.bf16.mxu1 %v2451_v2  ;;  %v713_v1 = vld [vmem:[#allocation5 + $0x1288] sm:$0xff]  ;;  %v715_v2 = vld [vmem:[#allocation5 + $0x1298] sm:$0xff]  ;;  %v2471_v5 = vpack.c.bf16 %v395_v0, %v393_v63 }
 0x17d   :  { %2772 = vmatprep.subr.bf16.mxu0 %v2771_v6  ;;  %v392_v6 = vld [vmem:[#allocation5 + $0x880] sm:$0xff]  ;;  %v2791_v9 = vpack.c.bf16 %v715_v2, %v713_v1  ;;  %v413_v63 = vld [vmem:[#allocation5 + $0x928] sm:$0xff]  ;;  %v415_v0 = vld [vmem:[#allocation5 + $0x938] sm:$0xff] }
 0x17e   :  { %v733_v1 = vld [vmem:[#allocation5 + $0x1328] sm:$0xff]  ;;  %v735_v2 = vld [vmem:[#allocation5 + $0x1338] sm:$0xff] }
 0x17f   :  { %2454 = vmatpush1.bf16.msra.mxu1 %v2453_v46  ;;  %v717_v46 = vld [vmem:[#allocation5 + $0x12a8] sm:$0xff] }
 0x180   :  { %2774 = vmatpush1.bf16.msra.mxu0 %v2773_v14  ;;  %2456 = vmatprep.subr.bf16.mxu1 %v2455_v15  ;;  %v719_v14 = vld [vmem:[#allocation5 + $0x12b8] sm:$0xff]  ;;  %v2473_v15 = vpack.c.bf16 %v394_v22, %v392_v6  ;;  %v412_v6 = vld [vmem:[#allocation5 + $0x920] sm:$0xff]  ;;  %v414_v22 = vld [vmem:[#allocation5 + $0x930] sm:$0xff] }
 0x181   :  { %2776 = vmatprep.subr.bf16.mxu0 %v2775_v19  ;;  %v398_v19 = vld [vmem:[#allocation5 + $0x8b0] sm:$0xff]  ;;  %v2795_v21 = vpack.c.bf16 %v719_v14, %v717_v46  ;;  %v737_v46 = vld [vmem:[#allocation5 + $0x1348] sm:$0xff]  ;;  %v739_v14 = vld [vmem:[#allocation5 + $0x1358] sm:$0xff] }
 0x182   :  { %1310 = vmatmul.mubr.f32.vlgmr.msra.gmra.mrb[0].mxu1 %v3488_v56  ;;  %v389_v56 = vld [vmem:[#allocation5 + $0x868] sm:$0xff] }
 0x183   :  { %2458 = vmatpush1.bf16.msra.mxu1 %v2457_v28  ;;  %1665 = vmatmul.mubr.f32.vlgmr.msra.gmra.mrb[0].mxu0 %v3492_v7  ;;  %v2785_v7 = vpack.c.bf16 %v706_v50, %v704_v48  ;;  %v2467_v55 = vpack.c.bf16 %v391_v43, %v389_v56  ;;  %v721_v28 = vld [vmem:[#allocation5 + $0x12c8] sm:$0xff]  ;;  %v724_v48 = vld [vmem:[#allocation5 + $0x12e0] sm:$0xff]  ;;  %v726_v50 = vld [vmem:[#allocation5 + $0x12f0] sm:$0xff] }
 0x184   :  { %2778 = vmatpush1.bf16.msra.mxu0 %v2777_v29  ;;  %2460 = vmatprep.subr.bf16.mxu1 %v2459_v30  ;;  %v723_v29 = vld [vmem:[#allocation5 + $0x12d8] sm:$0xff]  ;;  %v2477_v30 = vpack.c.bf16 %v398_v19, %v396_v18  ;;  %v409_v56 = vld [vmem:[#allocation5 + $0x908] sm:$0xff]  ;;  %v416_v18 = vld [vmem:[#allocation5 + $0x940] sm:$0xff] }
 0x185   :  { %2780 = vmatprep.subr.bf16.mxu0 %v2779_v33  ;;  %1380 = vmatprep.mubr.f32.mxu1 %v955_v36  ;;  %v402_v33 = vld [vmem:[#allocation5 + $0x8d0] sm:$0xff]  ;;  %v2799_v51 = vpack.c.bf16 %v723_v29, %v721_v28  ;;  %v405_v36 = vld [vmem:[#allocation5 + $0x8e8] sm:$0xff]  ;;  %v411_v43 = vld [vmem:[#allocation5 + $0x918] sm:$0xff] }
 0x186   :  { %1735 = vmatprep.mubr.f32.mxu0 %v990_v40  ;;  %v727_v40 = vld [vmem:[#allocation5 + $0x12f8] sm:$0xff]  ;;  %v418_v19 = vld [vmem:[#allocation5 + $0x950] sm:$0xff]  ;;  %v741_v28 = vld [vmem:[#allocation5 + $0x1368] sm:$0xff] }
 0x187   :  { %2462 = vmatpush1.bf16.msra.mxu1 %v2461_v41  ;;  %v2481_v41 = vpack.c.bf16 %v402_v33, %v400_v32  ;;  %v743_v29 = vld [vmem:[#allocation5 + $0x1378] sm:$0xff]  ;;  %v420_v32 = vld [vmem:[#allocation5 + $0x960] sm:$0xff]  ;;  %v422_v33 = vld [vmem:[#allocation5 + $0x970] sm:$0xff] }
 0x188   :  { %2782 = vmatpush1.bf16.msra.mxu0 %v2781_v42  ;;  %2464 = vmatprep.subr.bf16.mxu1 %v2463_v44  ;;  %v2801_v42 = vpack.c.bf16 %v722_v35, %v720_v34  ;;  %v2483_v44 = vpack.c.bf16 %v407_v37, %v405_v36  ;;  %v740_v34 = vld [vmem:[#allocation5 + $0x1360] sm:$0xff]  ;;  %v742_v35 = vld [vmem:[#allocation5 + $0x1370] sm:$0xff]  ;;  %v425_v36 = vld [vmem:[#allocation5 + $0x988] sm:$0xff] }
 0x189   :  { %2784 = vmatprep.subr.bf16.mxu0 %v2783_v49  ;;  %v2803_v49 = vpack.c.bf16 %v727_v40, %v725_v38  ;;  %v427_v37 = vld [vmem:[#allocation5 + $0x998] sm:$0xff]  ;;  %v745_v38 = vld [vmem:[#allocation5 + $0x1388] sm:$0xff] }
 0x18a   :  { %v747_v40 = vld [vmem:[#allocation5 + $0x1398] sm:$0xff] }
 0x18b   :  { %2466 = vmatpush1.bf16.msra.mxu1 %v2465_v54  ;;  %v2485_v54 = vpack.c.bf16 %v406_v47, %v404_v45  ;;  %v424_v45 = vld [vmem:[#allocation5 + $0x980] sm:$0xff]  ;;  %v426_v47 = vld [vmem:[#allocation5 + $0x990] sm:$0xff] }
 0x18c   :  { %2786 = vmatpush1.bf16.msra.mxu0 %v2785_v7  ;;  %2468 = vmatprep.subr.bf16.mxu1 %v2467_v55  ;;  %v2805_v7 = vpack.c.bf16 %v726_v50, %v724_v48  ;;  %v2487_v55 = vpack.c.bf16 %v411_v43, %v409_v56  ;;  %v744_v48 = vld [vmem:[#allocation5 + $0x1380] sm:$0xff]  ;;  %v746_v50 = vld [vmem:[#allocation5 + $0x1390] sm:$0xff]  ;;  %v429_v56 = vld [vmem:[#allocation5 + $0x9a8] sm:$0xff] }
 0x18d   :  { %2788 = vmatprep.subr.bf16.mxu0 %v2787_v59  ;;  %v2807_v59 = vpack.c.bf16 %v731_v53, %v729_v52  ;;  %v431_v43 = vld [vmem:[#allocation5 + $0x9b8] sm:$0xff]  ;;  %v749_v52 = vld [vmem:[#allocation5 + $0x13a8] sm:$0xff] }
 0x18e   :  { %v751_v53 = vld [vmem:[#allocation5 + $0x13b8] sm:$0xff] }
 0x18f   :  { %2470 = vmatpush1.bf16.msra.mxu1 %v2469_v3  ;;  %v2489_v3 = vpack.c.bf16 %v410_v57, %v408_v25  ;;  %v428_v25 = vld [vmem:[#allocation5 + $0x9a0] sm:$0xff]  ;;  %v430_v57 = vld [vmem:[#allocation5 + $0x9b0] sm:$0xff] }
 0x190   :  { %2790 = vmatpush1.bf16.msra.mxu0 %v2789_v4  ;;  %2472 = vmatprep.subr.bf16.mxu1 %v2471_v5  ;;  %v2809_v4 = vpack.c.bf16 %v730_v62, %v728_v58  ;;  %v2491_v5 = vpack.c.bf16 %v415_v0, %v413_v63  ;;  %v748_v58 = vld [vmem:[#allocation5 + $0x13a0] sm:$0xff]  ;;  %v750_v62 = vld [vmem:[#allocation5 + $0x13b0] sm:$0xff]  ;;  %v433_v63 = vld [vmem:[#allocation5 + $0x9c8] sm:$0xff] }
 0x191   :  { %2792 = vmatprep.subr.bf16.mxu0 %v2791_v9  ;;  %v2811_v9 = vpack.c.bf16 %v735_v2, %v733_v1  ;;  %v435_v0 = vld [vmem:[#allocation5 + $0x9d8] sm:$0xff]  ;;  %v753_v1 = vld [vmem:[#allocation5 + $0x13c8] sm:$0xff] }
 0x192   :  { %v755_v2 = vld [vmem:[#allocation5 + $0x13d8] sm:$0xff] }
 0x193   :  { %2474 = vmatpush1.bf16.msra.mxu1 %v2473_v15  ;;  %v2493_v15 = vpack.c.bf16 %v414_v22, %v412_v6  ;;  %v432_v6 = vld [vmem:[#allocation5 + $0x9c0] sm:$0xff]  ;;  %v434_v22 = vld [vmem:[#allocation5 + $0x9d0] sm:$0xff] }
 0x194   :  { %2794 = vmatpush1.bf16.msra.mxu0 %v2793_v16  ;;  %2476 = vmatprep.subr.bf16.mxu1 %v2475_v17  ;;  %v2813_v16 = vpack.c.bf16 %v734_v10, %v732_v8  ;;  %v2495_v17 = vpack.c.bf16 %v419_v13, %v417_v12  ;;  %v752_v8 = vld [vmem:[#allocation5 + $0x13c0] sm:$0xff]  ;;  %v754_v10 = vld [vmem:[#allocation5 + $0x13d0] sm:$0xff]  ;;  %v437_v12 = vld [vmem:[#allocation5 + $0x9e8] sm:$0xff] }
 0x195   :  { %2796 = vmatprep.subr.bf16.mxu0 %v2795_v21  ;;  %v2815_v21 = vpack.c.bf16 %v739_v14, %v737_v46  ;;  %v439_v13 = vld [vmem:[#allocation5 + $0x9f8] sm:$0xff]  ;;  %v757_v46 = vld [vmem:[#allocation5 + $0x13e8] sm:$0xff] }
 0x196   :  { %v759_v14 = vld [vmem:[#allocation5 + $0x13f8] sm:$0xff] }
 0x197   :  { %2478 = vmatpush1.bf16.msra.mxu1 %v2477_v30  ;;  %v2497_v30 = vpack.c.bf16 %v418_v19, %v416_v18  ;;  %v436_v18 = vld [vmem:[#allocation5 + $0x9e0] sm:$0xff]  ;;  %v438_v19 = vld [vmem:[#allocation5 + $0x9f0] sm:$0xff] }
 0x198   :  { %2798 = vmatpush1.bf16.msra.mxu0 %v2797_v60  ;;  %2480 = vmatprep.subr.bf16.mxu1 %v2479_v31  ;;  %v2817_v60 = vpack.c.bf16 %v738_v23, %v736_v20  ;;  %v2499_v31 = vpack.c.bf16 %v423_v27, %v421_v26  ;;  %v2835_v20 = vpack.c.bf16 %v759_v14, %v757_v46  ;;  %v758_v23 = vld [vmem:[#allocation5 + $0x13f0] sm:$0xff]  ;;  %v3513_v26 = vld [vmem:[#allocation2 + $0x28] sm:$0xff]  ;;  %v761_v27 = vld [vmem:[#allocation5 + $0x1408] sm:$0xff] }
 0x199   :  { %2800 = vmatprep.subr.bf16.mxu0 %v2799_v51  ;;  %v2819_v51 = vpack.c.bf16 %v743_v29, %v741_v28  ;;  %v763_v28 = vld [vmem:[#allocation5 + $0x1418] sm:$0xff]  ;;  %v2517_v29 = vpack.c.bf16 %v438_v19, %v436_v18  ;;  %v793_v46 = vld [vmem:[#allocation5 + $0x1508] sm:$0xff]  ;;  %v794_v18 = vld [vmem:[#allocation5 + $0x1510] sm:$0xff] }
 0x19a   :  { %v795_v14 = vld [vmem:[#allocation5 + $0x1518] sm:$0xff]  ;;  %v797_v19 = vld [vmem:[#allocation5 + $0x1528] sm:$0xff] }
 0x19b   :  { %2482 = vmatpush1.bf16.msra.mxu1 %v2481_v41  ;;  %v2501_v41 = vpack.c.bf16 %v422_v33, %v420_v32  ;;  %v760_v32 = vld [vmem:[#allocation5 + $0x1400] sm:$0xff]  ;;  %v762_v33 = vld [vmem:[#allocation5 + $0x1410] sm:$0xff] }
 0x19c   :  { %2802 = vmatpush1.bf16.msra.mxu0 %v2801_v42  ;;  %2484 = vmatprep.subr.bf16.mxu1 %v2483_v44  ;;  %v2821_v42 = vpack.c.bf16 %v742_v35, %v740_v34  ;;  %v2503_v44 = vpack.c.bf16 %v427_v37, %v425_v36  ;;  %v765_v34 = vld [vmem:[#allocation5 + $0x1428] sm:$0xff]  ;;  %v2841_v35 = vpack.c.bf16 %v762_v33, %v760_v32  ;;  %v800_v33 = vld [vmem:[#allocation5 + $0x1540] sm:$0xff] }
 0x19d   :  { %2804 = vmatprep.subr.bf16.mxu0 %v2803_v49  ;;  %v2823_v49 = vpack.c.bf16 %v747_v40, %v745_v38  ;;  %v764_v38 = vld [vmem:[#allocation5 + $0x1420] sm:$0xff]  ;;  %v766_v40 = vld [vmem:[#allocation5 + $0x1430] sm:$0xff] }
 0x19f   :  { %2486 = vmatpush1.bf16.msra.mxu1 %v2485_v54  ;;  %v2505_v54 = vpack.c.bf16 %v426_v47, %v424_v45  ;;  %v768_v47 = vld [vmem:[#allocation5 + $0x1440] sm:$0xff] }
 0x1a0   :  { %2806 = vmatpush1.bf16.msra.mxu0 %v2805_v7  ;;  %2488 = vmatprep.subr.bf16.mxu1 %v2487_v55  ;;  %v2825_v7 = vpack.c.bf16 %v746_v50, %v744_v48  ;;  %v2507_v55 = vpack.c.bf16 %v431_v43, %v429_v56  ;;  %v770_v48 = vld [vmem:[#allocation5 + $0x1450] sm:$0xff]  ;;  %v775_v50 = vld [vmem:[#allocation5 + $0x1478] sm:$0xff] }
 0x1a1   :  { %2808 = vmatprep.subr.bf16.mxu0 %v2807_v59  ;;  %v2827_v59 = vpack.c.bf16 %v751_v53, %v749_v52  ;;  %v2849_v56 = vpack.c.bf16 %v770_v48, %v768_v47  ;;  %v772_v52 = vld [vmem:[#allocation5 + $0x1460] sm:$0xff]  ;;  %v774_v53 = vld [vmem:[#allocation5 + $0x1470] sm:$0xff] }
 0x1a2   :  { %v808_v47 = vld [vmem:[#allocation5 + $0x1580] sm:$0xff]  ;;  %v810_v48 = vld [vmem:[#allocation5 + $0x1590] sm:$0xff] }
 0x1a3   :  { %2490 = vmatpush1.bf16.msra.mxu1 %v2489_v3  ;;  %v2509_v3 = vpack.c.bf16 %v430_v57, %v428_v25  ;;  %v778_v25 = vld [vmem:[#allocation5 + $0x1490] sm:$0xff]  ;;  %v781_v57 = vld [vmem:[#allocation5 + $0x14a8] sm:$0xff] }
 0x1a4   :  { %2810 = vmatpush1.bf16.msra.mxu0 %v2809_v4  ;;  %2492 = vmatprep.subr.bf16.mxu1 %v2491_v5  ;;  %v2829_v4 = vpack.c.bf16 %v750_v62, %v748_v58  ;;  %v2511_v5 = vpack.c.bf16 %v435_v0, %v433_v63  ;;  %v783_v58 = vld [vmem:[#allocation5 + $0x14b8] sm:$0xff]  ;;  %v780_v63 = vld [vmem:[#allocation5 + $0x14a0] sm:$0xff]  ;;  %v782_v0 = vld [vmem:[#allocation5 + $0x14b0] sm:$0xff] }
 0x1a5   :  { %2812 = vmatprep.subr.bf16.mxu0 %v2811_v9  ;;  %v2831_v9 = vpack.c.bf16 %v755_v2, %v753_v1  ;;  %v2859_v62 = vpack.c.bf16 %v783_v58, %v781_v57  ;;  %v785_v1 = vld [vmem:[#allocation5 + $0x14c8] sm:$0xff]  ;;  %v787_v2 = vld [vmem:[#allocation5 + $0x14d8] sm:$0xff] }
 0x1a6   :  { %v821_v57 = vld [vmem:[#allocation5 + $0x15e8] sm:$0xff]  ;;  %v823_v58 = vld [vmem:[#allocation5 + $0x15f8] sm:$0xff] }
 0x1a7   :  { %2494 = vmatpush1.bf16.msra.mxu1 %v2493_v15  ;;  %v2513_v15 = vpack.c.bf16 %v434_v22, %v432_v6  ;;  %v786_v6 = vld [vmem:[#allocation5 + $0x14d0] sm:$0xff]  ;;  %v789_v22 = vld [vmem:[#allocation5 + $0x14e8] sm:$0xff] }
 0x1a8   :  { %2814 = vmatpush1.bf16.msra.mxu0 %v2813_v16  ;;  %2496 = vmatprep.subr.bf16.mxu1 %v2495_v17  ;;  %v2833_v16 = vpack.c.bf16 %v754_v10, %v752_v8  ;;  %v2515_v17 = vpack.c.bf16 %v439_v13, %v437_v12  ;;  %v791_v8 = vld [vmem:[#allocation5 + $0x14f8] sm:$0xff]  ;;  %v788_v12 = vld [vmem:[#allocation5 + $0x14e0] sm:$0xff]  ;;  %v790_v13 = vld [vmem:[#allocation5 + $0x14f0] sm:$0xff] }
 0x1a9   :  { %2816 = vmatprep.subr.bf16.mxu0 %v2815_v21  ;;  %v756_v21 = vld [vmem:[#allocation5 + $0x13e0] sm:$0xff]  ;;  %v2867_v10 = vpack.c.bf16 %v791_v8, %v789_v22  ;;  %v826_v8 = vld [vmem:[#allocation5 + $0x1610] sm:$0xff] }
 0x1aa   :  { %v824_v22 = vld [vmem:[#allocation5 + $0x1600] sm:$0xff] }
 0x1ab   :  { %2498 = vmatpush1.bf16.msra.mxu1 %v2497_v30  ;;  %v2837_v30 = vpack.c.bf16 %v758_v23, %v756_v21 }
 0x1ac   :  { %2818 = vmatpush1.bf16.msra.mxu0 %v2817_v60  ;;  %2500 = vmatprep.subr.bf16.mxu1 %v2499_v31  ;;  %v3517_v60 = vrot.slane %v3513_v26, %v3434_v11  ;;  %v2839_v31 = vpack.c.bf16 %v763_v28, %v761_v27  ;;  %v796_v27 = vld [vmem:[#allocation5 + $0x1520] sm:$0xff]  ;;  %v798_v28 = vld [vmem:[#allocation5 + $0x1530] sm:$0xff] }
 0x1ad   :  { %2820 = vmatprep.subr.bf16.mxu0 %v2819_v51  ;;  %v767_v51 = vld [vmem:[#allocation5 + $0x1438] sm:$0xff] }
 0x1ae   :  { %v1006_v36 = vcombine.high %v3517_v60, %v3517_v60  ;;  %v2843_v37 = vpack.c.bf16 %v767_v51, %v765_v34  ;;  %v802_v34 = vld [vmem:[#allocation5 + $0x1550] sm:$0xff]  ;;  %v805_v51 = vld [vmem:[#allocation5 + $0x1568] sm:$0xff] }
 0x1af   :  { %2502 = vmatpush1.bf16.msra.mxu1 %v2501_v41  ;;  %v769_v41 = vld [vmem:[#allocation5 + $0x1448] sm:$0xff] }
 0x1b0   :  { %2822 = vmatpush1.bf16.msra.mxu0 %v2821_v42  ;;  %2504 = vmatprep.subr.bf16.mxu1 %v2503_v44  ;;  %v771_v42 = vld [vmem:[#allocation5 + $0x1458] sm:$0xff]  ;;  %v2845_v44 = vpack.c.bf16 %v766_v40, %v764_v38  ;;  %v804_v38 = vld [vmem:[#allocation5 + $0x1560] sm:$0xff]  ;;  %v806_v40 = vld [vmem:[#allocation5 + $0x1570] sm:$0xff] }
 0x1b1   :  { %2824 = vmatprep.subr.bf16.mxu0 %v2823_v49  ;;  %v2847_v45 = vpack.c.bf16 %v771_v42, %v769_v41  ;;  %v773_v49 = vld [vmem:[#allocation5 + $0x1468] sm:$0xff]  ;;  %v811_v42 = vld [vmem:[#allocation5 + $0x1598] sm:$0xff] }
 0x1b2   :  { %v2851_v43 = vpack.c.bf16 %v775_v50, %v773_v49  ;;  %v809_v41 = vld [vmem:[#allocation5 + $0x1588] sm:$0xff]  ;;  %v815_v50 = vld [vmem:[#allocation5 + $0x15b8] sm:$0xff] }
 0x1b3   :  { %2506 = vmatpush1.bf16.msra.mxu1 %v2505_v54  ;;  %v779_v54 = vld [vmem:[#allocation5 + $0x1498] sm:$0xff]  ;;  %v813_v49 = vld [vmem:[#allocation5 + $0x15a8] sm:$0xff] }
 0x1b4   :  { %2826 = vmatpush1.bf16.msra.mxu0 %v2825_v7  ;;  %2508 = vmatprep.subr.bf16.mxu1 %v2507_v55  ;;  %v2853_v7 = vpack.c.bf16 %v774_v53, %v772_v52  ;;  %v776_v55 = vld [vmem:[#allocation5 + $0x1480] sm:$0xff]  ;;  %v814_v53 = vld [vmem:[#allocation5 + $0x15b0] sm:$0xff] }
 0x1b5   :  { %2828 = vmatprep.subr.bf16.mxu0 %v2827_v59  ;;  %v2857_v59 = vpack.c.bf16 %v778_v25, %v776_v55  ;;  %v812_v52 = vld [vmem:[#allocation5 + $0x15a0] sm:$0xff]  ;;  %v818_v25 = vld [vmem:[#allocation5 + $0x15d0] sm:$0xff] }
 0x1b6   :  { %v816_v55 = vld [vmem:[#allocation5 + $0x15c0] sm:$0xff] }
 0x1b7   :  { %2510 = vmatpush1.bf16.msra.mxu1 %v2509_v3  ;;  %v2861_v3 = vpack.c.bf16 %v782_v0, %v780_v63  ;;  %v2899_v63 = vpack.c.bf16 %v823_v58, %v821_v57  ;;  %v820_v0 = vld [vmem:[#allocation5 + $0x15e0] sm:$0xff] }
 0x1b8   :  { %2830 = vmatpush1.bf16.msra.mxu0 %v2829_v4  ;;  %2512 = vmatprep.subr.bf16.mxu1 %v2511_v5  ;;  %v2863_v4 = vpack.c.bf16 %v787_v2, %v785_v1  ;;  %v784_v5 = vld [vmem:[#allocation5 + $0x14c0] sm:$0xff]  ;;  %v822_v1 = vld [vmem:[#allocation5 + $0x15f0] sm:$0xff]  ;;  %v825_v2 = vld [vmem:[#allocation5 + $0x1608] sm:$0xff] }
 0x1b9   :  { %2832 = vmatprep.subr.bf16.mxu0 %v2831_v9  ;;  %v2865_v9 = vpack.c.bf16 %v786_v6, %v784_v5 }
 0x1bb   :  { %2514 = vmatpush1.bf16.msra.mxu1 %v2513_v15  ;;  %v2869_v15 = vpack.c.bf16 %v790_v13, %v788_v12  ;;  %v2905_v12 = vpack.c.bf16 %v826_v8, %v824_v22  ;;  %v856_v22 = vld [vmem:[#allocation5 + $0x1700] sm:$0xff] }
 0x1bc   :  { %2834 = vmatpush1.bf16.msra.mxu0 %v2833_v16  ;;  %2516 = vmatprep.subr.bf16.mxu1 %v2515_v17  ;;  %v2871_v16 = vpack.c.bf16 %v795_v14, %v793_v46  ;;  %v792_v17 = vld [vmem:[#allocation5 + $0x1500] sm:$0xff]  ;;  %v830_v14 = vld [vmem:[#allocation5 + $0x1630] sm:$0xff] }
 0x1bd   :  { %2836 = vmatprep.subr.bf16.mxu0 %v2835_v20  ;;  %v799_v20 = vld [vmem:[#allocation5 + $0x1538] sm:$0xff]  ;;  %v2873_v21 = vpack.c.bf16 %v794_v18, %v792_v17  ;;  %v828_v46 = vld [vmem:[#allocation5 + $0x1620] sm:$0xff] }
 0x1be   :  { %v2875_v23 = vpack.c.bf16 %v799_v20, %v797_v19  ;;  %v832_v18 = vld [vmem:[#allocation5 + $0x1640] sm:$0xff]  ;;  %v834_v19 = vld [vmem:[#allocation5 + $0x1650] sm:$0xff]  ;;  %v837_v20 = vld [vmem:[#allocation5 + $0x1668] sm:$0xff] }
 0x1bf   :  { %2518 = vmatpush1.bf16.msra.mxu1 %v2517_v29  ;;  %v801_v29 = vld [vmem:[#allocation5 + $0x1548] sm:$0xff] }
 0x1c0   :  { %2838 = vmatpush1.bf16.msra.mxu0 %v2837_v30  ;;  %v803_v30 = vld [vmem:[#allocation5 + $0x1558] sm:$0xff] }
 0x1c1   :  { %2840 = vmatprep.subr.bf16.mxu0 %v2839_v31  ;;  %v2877_v31 = vpack.c.bf16 %v798_v28, %v796_v27  ;;  %v2879_v32 = vpack.c.bf16 %v803_v30, %v801_v29  ;;  %v836_v28 = vld [vmem:[#allocation5 + $0x1660] sm:$0xff]  ;;  %v838_v29 = vld [vmem:[#allocation5 + $0x1670] sm:$0xff]  ;;  %v841_v30 = vld [vmem:[#allocation5 + $0x1688] sm:$0xff] }
 0x1c2   :  { %1381 = vmatmul.mubr.f32.vlgmr.msra.gmra.mrb[0].mxu1 %v3502_v24  ;;  %v777_v24 = vld [vmem:[#allocation5 + $0x1488] sm:$0xff] }
 0x1c3   :  { %1736 = vmatmul.mubr.f32.vlgmr.msra.gmra.mrb[0].mxu0 %v3505_v39  ;;  %v2855_v39 = vpack.c.bf16 %v779_v54, %v777_v24  ;;  %v817_v24 = vld [vmem:[#allocation5 + $0x15c8] sm:$0xff]  ;;  %v819_v54 = vld [vmem:[#allocation5 + $0x15d8] sm:$0xff] }
 0x1c4   :  { %2842 = vmatpush1.bf16.msra.mxu0 %v2841_v35  ;;  %1806 = vmatprep.mubr.f32.mxu0 %v1006_v36  ;;  %v807_v35 = vld [vmem:[#allocation5 + $0x1578] sm:$0xff]  ;;  %v2881_v36 = vpack.c.bf16 %v802_v34, %v800_v33  ;;  %v840_v33 = vld [vmem:[#allocation5 + $0x1680] sm:$0xff]  ;;  %v842_v34 = vld [vmem:[#allocation5 + $0x1690] sm:$0xff] }
 0x1c5   :  { %2844 = vmatprep.subr.bf16.mxu0 %v2843_v37  ;;  %v2883_v37 = vpack.c.bf16 %v807_v35, %v805_v51  ;;  %v845_v51 = vld [vmem:[#allocation5 + $0x16a8] sm:$0xff]  ;;  %v847_v35 = vld [vmem:[#allocation5 + $0x16b8] sm:$0xff] }
 0x1c8   :  { %2846 = vmatpush1.bf16.msra.mxu0 %v2845_v44  ;;  %v2885_v44 = vpack.c.bf16 %v806_v40, %v804_v38  ;;  %v844_v38 = vld [vmem:[#allocation5 + $0x16a0] sm:$0xff]  ;;  %v846_v40 = vld [vmem:[#allocation5 + $0x16b0] sm:$0xff] }
 0x1c9   :  { %2848 = vmatprep.subr.bf16.mxu0 %v2847_v45  ;;  %v2887_v45 = vpack.c.bf16 %v811_v42, %v809_v41  ;;  %v849_v41 = vld [vmem:[#allocation5 + $0x16c8] sm:$0xff]  ;;  %v851_v42 = vld [vmem:[#allocation5 + $0x16d8] sm:$0xff] }
 0x1cc   :  { %2850 = vmatpush1.bf16.msra.mxu0 %v2849_v56  ;;  %v2889_v56 = vpack.c.bf16 %v810_v48, %v808_v47  ;;  %v848_v47 = vld [vmem:[#allocation5 + $0x16c0] sm:$0xff]  ;;  %v850_v48 = vld [vmem:[#allocation5 + $0x16d0] sm:$0xff] }
 0x1cd   :  { %2852 = vmatprep.subr.bf16.mxu0 %v2851_v43  ;;  %v2891_v43 = vpack.c.bf16 %v815_v50, %v813_v49  ;;  %v853_v49 = vld [vmem:[#allocation5 + $0x16e8] sm:$0xff]  ;;  %v855_v50 = vld [vmem:[#allocation5 + $0x16f8] sm:$0xff] }
 0x1ce   :  { %v2931_v57 = vpack.c.bf16 %v855_v50, %v853_v49  ;;  %v1908_v49 = vld [vmem:[#allocation8 + $0xb0] sm:$0xff] }
 0x1d0   :  { %2854 = vmatpush1.bf16.msra.mxu0 %v2853_v7  ;;  %v2893_v7 = vpack.c.bf16 %v814_v53, %v812_v52  ;;  %v1887_v52 = vld [vmem:[#allocation8 + $0x8] sm:$0xff]  ;;  %v1889_v53 = vld [vmem:[#allocation8 + $0x18] sm:$0xff] }
 0x1d1   :  { %2856 = vmatprep.subr.bf16.mxu0 %v2855_v39  ;;  %v2895_v39 = vpack.c.bf16 %v819_v54, %v817_v24  ;;  %v1886_v24 = vld [vmem:[#allocation8] sm:$0xff]  ;;  %v2929_v54 = vpack.c.bf16 %v850_v48, %v848_v47 }
 0x1d2   :  { %v1906_v48 = vld [vmem:[#allocation8 + $0xa0] sm:$0xff] }
 0x1d4   :  { %2858 = vmatpush1.bf16.msra.mxu0 %v2857_v59  ;;  %v2897_v59 = vpack.c.bf16 %v818_v25, %v816_v55  ;;  %v1891_v55 = vld [vmem:[#allocation8 + $0x28] sm:$0xff]  ;;  %v1893_v25 = vld [vmem:[#allocation8 + $0x38] sm:$0xff] }
 0x1d5   :  { %2860 = vmatprep.subr.bf16.mxu0 %v2859_v62  ;;  %v991_v62 = vcombine.high %v3513_v26, %v3513_v26 }
 0x1d7   :  { %v3526_v5 = vrot.slane %v991_v62, %v3434_v11  ;;  %v2909_v11 = vpack.c.bf16 %v830_v14, %v828_v46  ;;  %v1890_v62 = vld [vmem:[#allocation8 + $0x20] sm:$0xff]  ;;  %v1901_v46 = vld [vmem:[#allocation8 + $0x78] sm:$0xff] }
 0x1d8   :  { %2862 = vmatpush1.bf16.msra.mxu0 %v2861_v3  ;;  %v827_v3 = vld [vmem:[#allocation5 + $0x1618] sm:$0xff]  ;;  %v861_v14 = vld [vmem:[#allocation5 + $0x1728] sm:$0xff] }
 0x1d9   :  { %2864 = vmatprep.subr.bf16.mxu0 %v2863_v4  ;;  %v2901_v4 = vpack.c.bf16 %v822_v1, %v820_v0  ;;  %v2903_v6 = vpack.c.bf16 %v827_v3, %v825_v2  ;;  %v1007_v26 = vcombine.high %v3526_v5, %v3526_v5  ;;  %v1895_v0 = vld [vmem:[#allocation8 + $0x48] sm:$0xff]  ;;  %v859_v2 = vld [vmem:[#allocation5 + $0x1718] sm:$0xff] }
 0x1da   :  { %v857_v1 = vld [vmem:[#allocation5 + $0x1708] sm:$0xff]  ;;  %v1897_v3 = vld [vmem:[#allocation8 + $0x58] sm:$0xff] }
 0x1db   :  { %v2975_v8 = vpack.c.bf16 %v1897_v3, %v1895_v0  ;;  %v877_v0 = vld [vmem:[#allocation5 + $0x17a8] sm:$0xff] }
 0x1dc   :  { %2866 = vmatpush1.bf16.msra.mxu0 %v2865_v9  ;;  %v829_v9 = vld [vmem:[#allocation5 + $0x1628] sm:$0xff] }
 0x1dd   :  { %2868 = vmatprep.subr.bf16.mxu0 %v2867_v10  ;;  %v831_v10 = vld [vmem:[#allocation5 + $0x1638] sm:$0xff] }
 0x1de   :  { %v2907_v13 = vpack.c.bf16 %v831_v10, %v829_v9  ;;  %v1894_v9 = vld [vmem:[#allocation8 + $0x40] sm:$0xff]  ;;  %v1896_v10 = vld [vmem:[#allocation8 + $0x50] sm:$0xff] }
 0x1e0   :  { %2870 = vmatpush1.bf16.msra.mxu0 %v2869_v15  ;;  %v833_v15 = vld [vmem:[#allocation5 + $0x1648] sm:$0xff] }
 0x1e1   :  { %2872 = vmatprep.subr.bf16.mxu0 %v2871_v16  ;;  %v835_v16 = vld [vmem:[#allocation5 + $0x1658] sm:$0xff] }
 0x1e2   :  { %v2911_v17 = vpack.c.bf16 %v835_v16, %v833_v15  ;;  %v863_v15 = vld [vmem:[#allocation5 + $0x1738] sm:$0xff]  ;;  %v2977_v16 = vpack.c.bf16 %v1896_v10, %v1894_v9  ;;  %v878_v10 = vld [vmem:[#allocation5 + $0x17b0] sm:$0xff] }
 0x1e4   :  { %2874 = vmatpush1.bf16.msra.mxu0 %v2873_v21  ;;  %v839_v21 = vld [vmem:[#allocation5 + $0x1678] sm:$0xff] }
 0x1e5   :  { %2876 = vmatprep.subr.bf16.mxu0 %v2875_v23  ;;  %v2913_v23 = vpack.c.bf16 %v834_v19, %v832_v18  ;;  %v2915_v27 = vpack.c.bf16 %v839_v21, %v837_v20  ;;  %v1898_v19 = vld [vmem:[#allocation8 + $0x60] sm:$0xff]  ;;  %v1900_v20 = vld [vmem:[#allocation8 + $0x70] sm:$0xff]  ;;  %v2939_v21 = vpack.c.bf16 %v863_v15, %v861_v14 }
 0x1e8   :  { %2878 = vmatpush1.bf16.msra.mxu0 %v2877_v31  ;;  %v843_v31 = vld [vmem:[#allocation5 + $0x1698] sm:$0xff] }
 0x1e9   :  { %2880 = vmatprep.subr.bf16.mxu0 %v2879_v32  ;;  %v2917_v32 = vpack.c.bf16 %v838_v29, %v836_v28  ;;  %v1905_v28 = vld [vmem:[#allocation8 + $0x98] sm:$0xff]  ;;  %v865_v29 = vld [vmem:[#allocation5 + $0x1748] sm:$0xff] }
 0x1ec   :  { %2882 = vmatpush1.bf16.msra.mxu0 %v2881_v36  ;;  %v2921_v36 = vpack.c.bf16 %v842_v34, %v840_v33  ;;  %v1902_v34 = vld [vmem:[#allocation8 + $0x80] sm:$0xff] }
 0x1ed   :  { %2884 = vmatprep.subr.bf16.mxu0 %v2883_v37  ;;  %v2923_v37 = vpack.c.bf16 %v847_v35, %v845_v51  ;;  %v1904_v51 = vld [vmem:[#allocation8 + $0x90] sm:$0xff] }
 0x1f0   :  { %2886 = vmatpush1.bf16.msra.mxu0 %v2885_v44  ;;  %v2925_v44 = vpack.c.bf16 %v846_v40, %v844_v38  ;;  %v1909_v38 = vld [vmem:[#allocation8 + $0xb8] sm:$0xff]  ;;  %v869_v40 = vld [vmem:[#allocation5 + $0x1768] sm:$0xff] }
 0x1f1   :  { %2888 = vmatprep.subr.bf16.mxu0 %v2887_v45  ;;  %v2927_v45 = vpack.c.bf16 %v851_v42, %v849_v41  ;;  %v871_v41 = vld [vmem:[#allocation5 + $0x1778] sm:$0xff]  ;;  %v2985_v42 = vpack.c.bf16 %v1904_v51, %v1902_v34  ;;  %v886_v51 = vld [vmem:[#allocation5 + $0x17f0] sm:$0xff] }
 0x1f2   :  { %v2947_v50 = vpack.c.bf16 %v871_v41, %v869_v40  ;;  %v1926_v41 = vld [vmem:[#allocation8 + $0x140] sm:$0xff] }
 0x1f4   :  { %2890 = vmatpush1.bf16.msra.mxu0 %v2889_v56  ;;  %v852_v56 = vld [vmem:[#allocation5 + $0x16e0] sm:$0xff] }
 0x1f5   :  { %2892 = vmatprep.subr.bf16.mxu0 %v2891_v43  ;;  %v854_v43 = vld [vmem:[#allocation5 + $0x16f0] sm:$0xff] }
 0x1f8   :  { %2894 = vmatpush1.bf16.msra.mxu0 %v2893_v7  ;;  %v2967_v7 = vpack.c.bf16 %v1889_v53, %v1887_v52  ;;  %v1913_v52 = vld [vmem:[#allocation8 + $0xd8] sm:$0xff]  ;;  %v873_v53 = vld [vmem:[#allocation5 + $0x1788] sm:$0xff] }
 0x1f9   :  { %2896 = vmatprep.subr.bf16.mxu0 %v2895_v39  ;;  %v1888_v39 = vld [vmem:[#allocation8 + $0x10] sm:$0xff] }
 0x1fa   :  { %v2969_v58 = vpack.c.bf16 %v1888_v39, %v1886_v24  ;;  %2968 = vmatprep.subr.bf16.mxu1 %v2967_v7  ;;  %v875_v24 = vld [vmem:[#allocation5 + $0x1798] sm:$0xff]  ;;  %v872_v39 = vld [vmem:[#allocation5 + $0x1780] sm:$0xff] }
 0x1fc   :  { %2898 = vmatpush1.bf16.msra.mxu0 %v2897_v59  ;;  %v2971_v59 = vpack.c.bf16 %v1893_v25, %v1891_v55  ;;  %2970 = vmatpush1.bf16.msra.mxu1 %v2969_v58  ;;  %v1910_v25 = vld [vmem:[#allocation8 + $0xc0] sm:$0xff]  ;;  %v2951_v58 = vpack.c.bf16 %v875_v24, %v873_v53 }
 0x1fd   :  { %2900 = vmatprep.subr.bf16.mxu0 %v2899_v63  ;;  %v1892_v63 = vld [vmem:[#allocation8 + $0x30] sm:$0xff]  ;;  %v1934_v24 = vld [vmem:[#allocation8 + $0x180] sm:$0xff] }
 0x1fe   :  { %2972 = vmatprep.subr.bf16.mxu1 %v2971_v59  ;;  %v874_v59 = vld [vmem:[#allocation5 + $0x1790] sm:$0xff] }
 0x1ff   :  { %v2953_v3 = vpack.c.bf16 %v874_v59, %v872_v39  ;;  %v1941_v39 = vld [vmem:[#allocation8 + $0x1b8] sm:$0xff]  ;;  %v1943_v59 = vld [vmem:[#allocation8 + $0x1c8] sm:$0xff] }
 0x200   :  { %2902 = vmatpush1.bf16.msra.mxu0 %v2901_v4  ;;  %v2973_v4 = vpack.c.bf16 %v1892_v63, %v1890_v62  ;;  %v1915_v62 = vld [vmem:[#allocation8 + $0xe8] sm:$0xff]  ;;  %v1917_v63 = vld [vmem:[#allocation8 + $0xf8] sm:$0xff] }
 0x201   :  { %2904 = vmatprep.subr.bf16.mxu0 %v2903_v6  ;;  %v2933_v6 = vpack.c.bf16 %v854_v43, %v852_v56  ;;  %v870_v56 = vld [vmem:[#allocation5 + $0x1770] sm:$0xff] }
 0x202   :  { %2974 = vmatpush1.bf16.msra.mxu1 %v2973_v4  ;;  %v1911_v43 = vld [vmem:[#allocation8 + $0xc8] sm:$0xff]  ;;  %v876_v4 = vld [vmem:[#allocation5 + $0x17a0] sm:$0xff] }
 0x203   :  { %1807 = vmatmul.mubr.f32.vlgmr.msra.gmra.mrb[0].mxu0 %v3517_v60  ;;  %v2919_v60 = vpack.c.bf16 %v843_v31, %v841_v30  ;;  %2976 = vmatprep.subr.bf16.mxu1 %v2975_v8  ;;  %v867_v30 = vld [vmem:[#allocation5 + $0x1758] sm:$0xff]  ;;  %v2981_v31 = vpack.c.bf16 %v1900_v20, %v1898_v19  ;;  %v2991_v55 = vpack.c.bf16 %v1913_v52, %v1911_v43  ;;  %v882_v20 = vld [vmem:[#allocation5 + $0x17d0] sm:$0xff] }
 0x204   :  { %2906 = vmatpush1.bf16.msra.mxu0 %v2905_v12  ;;  %1877 = vmatprep.mubr.f32.mxu0 %v1007_v26  ;;  %v2935_v12 = vpack.c.bf16 %v859_v2, %v857_v1  ;;  %v858_v26 = vld [vmem:[#allocation5 + $0x1710] sm:$0xff]  ;;  %v2943_v35 = vpack.c.bf16 %v867_v30, %v865_v29  ;;  %v879_v1 = vld [vmem:[#allocation5 + $0x17b8] sm:$0xff]  ;;  %v2957_v15 = vpack.c.bf16 %v878_v10, %v876_v4 }
 0x205   :  { %2908 = vmatprep.subr.bf16.mxu0 %v2907_v13  ;;  %v1899_v13 = vld [vmem:[#allocation8 + $0x68] sm:$0xff]  ;;  %v1916_v8 = vld [vmem:[#allocation8 + $0xf0] sm:$0xff]  ;;  %v2955_v9 = vpack.c.bf16 %v879_v1, %v877_v0  ;;  %v1937_v43 = vld [vmem:[#allocation8 + $0x198] sm:$0xff] }
 0x206   :  { %v2979_v18 = vpack.c.bf16 %v1901_v46, %v1899_v13  ;;  %2978 = vmatpush1.bf16.msra.mxu1 %v2977_v16  ;;  %v881_v13 = vld [vmem:[#allocation5 + $0x17c8] sm:$0xff]  ;;  %v883_v46 = vld [vmem:[#allocation5 + $0x17d8] sm:$0xff]  ;;  %v880_v16 = vld [vmem:[#allocation5 + $0x17c0] sm:$0xff] }
 0x207   :  { %v2959_v19 = vpack.c.bf16 %v883_v46, %v881_v13  ;;  %v2961_v30 = vpack.c.bf16 %v882_v20, %v880_v16  ;;  %v1942_v0 = vld [vmem:[#allocation8 + $0x1c0] sm:$0xff]  ;;  %v1944_v1 = vld [vmem:[#allocation8 + $0x1d0] sm:$0xff]  ;;  %v896_v16 = vsub.s32 1, %v3431_v61 }
 0x208   :  { %2910 = vmatpush1.bf16.msra.mxu0 %v2909_v11  ;;  %v2937_v11 = vpack.c.bf16 %v858_v26, %v856_v22  ;;  %2980 = vmatprep.subr.bf16.mxu1 %v2979_v18  ;;  %v1914_v22 = vld [vmem:[#allocation8 + $0xe0] sm:$0xff]  ;;  %v1921_v26 = vld [vmem:[#allocation8 + $0x118] sm:$0xff]  ;;  %v1920_v18 = vld [vmem:[#allocation8 + $0x110] sm:$0xff] }
 0x209   :  { %2912 = vmatprep.subr.bf16.mxu0 %v2911_v17  ;;  %v860_v17 = vld [vmem:[#allocation5 + $0x1720] sm:$0xff]  ;;  %v2997_v14 = vpack.c.bf16 %v1916_v8, %v1914_v22  ;;  %v1948_v10 = vld [vmem:[#allocation8 + $0x1f0] sm:$0xff] }
 0x20a   :  { %2982 = vmatpush1.bf16.msra.mxu1 %v2981_v31  ;;  %v884_v31 = vld [vmem:[#allocation5 + $0x17e0] sm:$0xff]  ;;  %v2052_v13 = vld [vmem:[#allocation11 + $0x88] sm:$0xff] }
 0x20b   :  { %v1949_v22 = vld [vmem:[#allocation8 + $0x1f8] sm:$0xff] }
 0x20c   :  { %2914 = vmatpush1.bf16.msra.mxu0 %v2913_v23  ;;  %v862_v23 = vld [vmem:[#allocation5 + $0x1730] sm:$0xff] }
 0x20d   :  { %2916 = vmatprep.subr.bf16.mxu0 %v2915_v27  ;;  %v1903_v27 = vld [vmem:[#allocation8 + $0x88] sm:$0xff] }
 0x20e   :  { %v2983_v33 = vpack.c.bf16 %v1905_v28, %v1903_v27  ;;  %v885_v27 = vld [vmem:[#allocation5 + $0x17e8] sm:$0xff]  ;;  %v887_v28 = vld [vmem:[#allocation5 + $0x17f8] sm:$0xff] }
 0x20f   :  { %v2963_v34 = vpack.c.bf16 %v887_v28, %v885_v27  ;;  %v2035_v27 = vld [vmem:[#allocation11] sm:$0xff]  ;;  %v2036_v28 = vld [vmem:[#allocation11 + $0x8] sm:$0xff] }
 0x210   :  { %2918 = vmatpush1.bf16.msra.mxu0 %v2917_v32  ;;  %v2941_v32 = vpack.c.bf16 %v862_v23, %v860_v17  ;;  %2984 = vmatprep.subr.bf16.mxu1 %v2983_v33  ;;  %v1918_v17 = vld [vmem:[#allocation8 + $0x100] sm:$0xff]  ;;  %v1925_v23 = vld [vmem:[#allocation8 + $0x138] sm:$0xff]  ;;  %v1924_v33 = vld [vmem:[#allocation8 + $0x130] sm:$0xff] }
 0x211   :  { %2920 = vmatprep.subr.bf16.mxu0 %v2919_v60  ;;  %v864_v60 = vld [vmem:[#allocation5 + $0x1740] sm:$0xff]  ;;  %2986 = vmatpush1.bf16.msra.mxu1 %v2985_v42  ;;  %v3001_v29 = vpack.c.bf16 %v1920_v18, %v1918_v17  ;;  %v1928_v42 = vld [vmem:[#allocation8 + $0x150] sm:$0xff] }
 0x214   :  { %2922 = vmatpush1.bf16.msra.mxu0 %v2921_v36  ;;  %v866_v36 = vld [vmem:[#allocation5 + $0x1750] sm:$0xff] }
 0x215   :  { %2924 = vmatprep.subr.bf16.mxu0 %v2923_v37  ;;  %v1907_v37 = vld [vmem:[#allocation8 + $0xa8] sm:$0xff] }
 0x216   :  { %v2987_v47 = vpack.c.bf16 %v1909_v38, %v1907_v37  ;;  %v2965_v38 = vpack.c.bf16 %v886_v51, %v884_v31  ;;  %v2054_v31 = vld [vmem:[#allocation11 + $0x98] sm:$0xff]  ;;  %v2037_v51 = vld [vmem:[#allocation11 + $0x10] sm:$0xff] }
 0x218   :  { %2926 = vmatpush1.bf16.msra.mxu0 %v2925_v44  ;;  %v2945_v44 = vpack.c.bf16 %v866_v36, %v864_v60  ;;  %2988 = vmatprep.subr.bf16.mxu1 %v2987_v47  ;;  %v1922_v60 = vld [vmem:[#allocation8 + $0x120] sm:$0xff]  ;;  %v1929_v36 = vld [vmem:[#allocation8 + $0x158] sm:$0xff]  ;;  %v3009_v47 = vpack.c.bf16 %v1928_v42, %v1926_v41  ;;  %v2040_v42 = vld [vmem:[#allocation11 + $0x28] sm:$0xff] }
 0x219   :  { %2928 = vmatprep.subr.bf16.mxu0 %v2927_v45  ;;  %v868_v45 = vld [vmem:[#allocation5 + $0x1760] sm:$0xff]  ;;  %v3005_v37 = vpack.c.bf16 %v1924_v33, %v1922_v60  ;;  %v3033_v60 = vpack.c.bf16 %v2036_v28, %v2035_v27 }
 0x21a   :  { %v2949_v7 = vpack.c.bf16 %v870_v56, %v868_v45  ;;  %v1933_v45 = vld [vmem:[#allocation8 + $0x178] sm:$0xff]  ;;  %v1935_v56 = vld [vmem:[#allocation8 + $0x188] sm:$0xff] }
 0x21b   :  { %v3015_v53 = vpack.c.bf16 %v1937_v43, %v1935_v56  ;;  %v2039_v41 = vld [vmem:[#allocation11 + $0x20] sm:$0xff]  ;;  %v2060_v43 = vld [vmem:[#allocation11 + $0xc8] sm:$0xff] }
 0x21c   :  { %2930 = vmatpush1.bf16.msra.mxu0 %v2929_v54  ;;  %v2989_v54 = vpack.c.bf16 %v1908_v49, %v1906_v48  ;;  %v1930_v49 = vld [vmem:[#allocation8 + $0x160] sm:$0xff] }
 0x21d   :  { %2932 = vmatprep.subr.bf16.mxu0 %v2931_v57  ;;  %v1912_v57 = vld [vmem:[#allocation8 + $0xd0] sm:$0xff]  ;;  %v2059_v56 = vld [vmem:[#allocation11 + $0xc0] sm:$0xff] }
 0x21e   :  { %2990 = vmatpush1.bf16.msra.mxu1 %v2989_v54  ;;  %v2993_v2 = vpack.c.bf16 %v1912_v57, %v1910_v25  ;;  %v1936_v54 = vld [vmem:[#allocation8 + $0x190] sm:$0xff]  ;;  %v1938_v57 = vld [vmem:[#allocation8 + $0x1a0] sm:$0xff] }
 0x21f   :  { %2992 = vmatprep.subr.bf16.mxu1 %v2991_v55  ;;  %v3017_v55 = vpack.c.bf16 %v1936_v54, %v1934_v24  ;;  %v2043_v24 = vld [vmem:[#allocation11 + $0x40] sm:$0xff]  ;;  %v2044_v54 = vld [vmem:[#allocation11 + $0x48] sm:$0xff] }
 0x220   :  { %2934 = vmatpush1.bf16.msra.mxu0 %v2933_v6  ;;  %v2995_v6 = vpack.c.bf16 %v1917_v63, %v1915_v62  ;;  %v1945_v62 = vld [vmem:[#allocation8 + $0x1d8] sm:$0xff] }
 0x221   :  { %2936 = vmatprep.subr.bf16.mxu0 %v2935_v12  ;;  %v1919_v12 = vld [vmem:[#allocation8 + $0x108] sm:$0xff] }
 0x222   :  { %2994 = vmatpush1.bf16.msra.mxu1 %v2993_v2  ;;  %v3025_v2 = vpack.c.bf16 %v1944_v1, %v1942_v0  ;;  %v2047_v0 = vld [vmem:[#allocation11 + $0x60] sm:$0xff]  ;;  %v2048_v1 = vld [vmem:[#allocation11 + $0x68] sm:$0xff] }
 0x223   :  { %2996 = vmatprep.subr.bf16.mxu1 %v2995_v6  ;;  %v1947_v6 = vld [vmem:[#allocation8 + $0x1e8] sm:$0xff] }
 0x224   :  { %2938 = vmatpush1.bf16.msra.mxu0 %v2937_v11  ;;  %v2999_v11 = vpack.c.bf16 %v1921_v26, %v1919_v12  ;;  %v3027_v8 = vpack.c.bf16 %v1949_v22, %v1947_v6  ;;  %v2051_v26 = vld [vmem:[#allocation11 + $0x80] sm:$0xff]  ;;  %v2049_v22 = vld [vmem:[#allocation11 + $0x70] sm:$0xff] }
 0x225   :  { %2940 = vmatprep.subr.bf16.mxu0 %v2939_v21  ;;  %v1923_v21 = vld [vmem:[#allocation8 + $0x128] sm:$0xff]  ;;  %v3031_v46 = vpack.c.bf16 %v2052_v13, %v2051_v26 }
 0x226   :  { %2998 = vmatpush1.bf16.msra.mxu1 %v2997_v14  ;;  %v892_v14 = vsub.s32 0, %v3431_v61 }
 0x227   :  { %3000 = vmatprep.subr.bf16.mxu1 %v2999_v11 }
 0x228   :  { %2942 = vmatpush1.bf16.msra.mxu0 %v2941_v32  ;;  %v3003_v32 = vpack.c.bf16 %v1925_v23, %v1923_v21 }
 0x229   :  { %2944 = vmatprep.subr.bf16.mxu0 %v2943_v35  ;;  %v1927_v35 = vld [vmem:[#allocation8 + $0x148] sm:$0xff] }
 0x22a   :  { %3002 = vmatpush1.bf16.msra.mxu1 %v3001_v29  ;;  %v3007_v40 = vpack.c.bf16 %v1929_v36, %v1927_v35  ;;  %v2038_v35 = vld [vmem:[#allocation11 + $0x18] sm:$0xff]  ;;  %v2055_v36 = vld [vmem:[#allocation11 + $0xa0] sm:$0xff] }
 0x22b   :  { %3004 = vmatprep.subr.bf16.mxu1 %v3003_v32 }
 0x22c   :  { %2946 = vmatpush1.bf16.msra.mxu0 %v2945_v44  ;;  %v1931_v44 = vld [vmem:[#allocation8 + $0x168] sm:$0xff] }
 0x22d   :  { %2948 = vmatprep.subr.bf16.mxu0 %v2947_v50  ;;  %v3011_v48 = vpack.c.bf16 %v1933_v45, %v1931_v44  ;;  %v1932_v50 = vld [vmem:[#allocation8 + $0x170] sm:$0xff]  ;;  %v2058_v45 = vld [vmem:[#allocation11 + $0xb8] sm:$0xff] }
 0x22e   :  { %3006 = vmatpush1.bf16.msra.mxu1 %v3005_v37  ;;  %v3013_v52 = vpack.c.bf16 %v1932_v50, %v1930_v49  ;;  %v2056_v37 = vld [vmem:[#allocation11 + $0xa8] sm:$0xff]  ;;  %v2057_v44 = vld [vmem:[#allocation11 + $0xb0] sm:$0xff]  ;;  %v2042_v50 = vld [vmem:[#allocation11 + $0x38] sm:$0xff] }
 0x22f   :  { %3008 = vmatprep.subr.bf16.mxu1 %v3007_v40  ;;  %v3039_v40 = vpack.c.bf16 %v2056_v37, %v2055_v36  ;;  %v2041_v49 = vld [vmem:[#allocation11 + $0x30] sm:$0xff] }
 0x230   :  { %2950 = vmatpush1.bf16.msra.mxu0 %v2949_v7  ;;  %v1939_v7 = vld [vmem:[#allocation8 + $0x1a8] sm:$0xff] }
 0x231   :  { %2952 = vmatprep.subr.bf16.mxu0 %v2951_v58  ;;  %v3019_v25 = vpack.c.bf16 %v1941_v39, %v1939_v7  ;;  %v1940_v58 = vld [vmem:[#allocation8 + $0x1b0] sm:$0xff]  ;;  %v2062_v39 = vld [vmem:[#allocation11 + $0xd8] sm:$0xff] }
 0x232   :  { %3010 = vmatpush1.bf16.msra.mxu1 %v3009_v47  ;;  %v3021_v63 = vpack.c.bf16 %v1940_v58, %v1938_v57  ;;  %v3041_v47 = vpack.c.bf16 %v2040_v42, %v2039_v41  ;;  %v2061_v7 = vld [vmem:[#allocation11 + $0xd0] sm:$0xff]  ;;  %v2046_v58 = vld [vmem:[#allocation11 + $0x58] sm:$0xff] }
 0x233   :  { %3012 = vmatprep.subr.bf16.mxu1 %v3011_v48  ;;  %v3043_v48 = vpack.c.bf16 %v2058_v45, %v2057_v44  ;;  %v2045_v57 = vld [vmem:[#allocation11 + $0x50] sm:$0xff] }
 0x234   :  { %2954 = vmatpush1.bf16.msra.mxu0 %v2953_v3 }
 0x235   :  { %2956 = vmatprep.subr.bf16.mxu0 %v2955_v9  ;;  %v1946_v9 = vld [vmem:[#allocation8 + $0x1e0] sm:$0xff] }
 0x236   :  { %3014 = vmatpush1.bf16.msra.mxu1 %v3013_v52  ;;  %v3029_v12 = vpack.c.bf16 %v1948_v10, %v1946_v9  ;;  %v3045_v52 = vpack.c.bf16 %v2042_v50, %v2041_v49  ;;  %v1950_v10 = vld [vmem:[#allocation10] sm:$0x3] }
 0x237   :  { %3016 = vmatprep.subr.bf16.mxu1 %v3015_v53  ;;  %v3047_v53 = vpack.c.bf16 %v2060_v43, %v2059_v56  ;;  %v1959_v26 = vrot.slane %v1950_v10, %v896_v16 }
 0x238   :  { %2958 = vmatpush1.bf16.msra.mxu0 %v2957_v15  ;;  %v888_v15 = vld [vmem:[#allocation7] sm:$0x3] }
 0x239   :  { %2960 = vmatprep.subr.bf16.mxu0 %v2959_v19  ;;  %v893_v11 = vrot.slane %v888_v15, %v892_v14  ;;  %v897_v17 = vrot.slane %v888_v15, %v896_v16 }
 0x23a   :  { %3018 = vmatpush1.bf16.msra.mxu1 %v3017_v55  ;;  %v3049_v55 = vpack.c.bf16 %v2044_v54, %v2043_v24 }
 0x23b   :  { %3020 = vmatprep.subr.bf16.mxu1 %v3019_v25  ;;  %v3051_v25 = vpack.c.bf16 %v2062_v39, %v2061_v7 }
 0x23c   :  { %2962 = vmatpush1.bf16.msra.mxu0 %v2961_v30  ;;  %v2053_v30 = vld [vmem:[#allocation11 + $0x90] sm:$0xff] }
 0x23d   :  { %2964 = vmatprep.subr.bf16.mxu0 %v2963_v34  ;;  %v3035_v34 = vpack.c.bf16 %v2054_v31, %v2053_v30 }
 0x23e   :  { %3022 = vmatpush1.bf16.msra.mxu1 %v3021_v63  ;;  %v3053_v63 = vpack.c.bf16 %v2046_v58, %v2045_v57 }
 0x240   :  { %2966 = vmatpush1.bf16.msra.mxu0 %v2965_v38  ;;  %v3037_v38 = vpack.c.bf16 %v2038_v35, %v2037_v51 }
 0x243   :  { %1878 = vmatmul.mubr.f32.vlgmr.msra.gmra.mrb[0].mxu0 %v3526_v5  ;;  %v3023_v5 = vpack.c.bf16 %v1945_v62, %v1943_v59  ;;  %v2063_v59 = vld [vmem:[#allocation11 + $0xe0] sm:$0xff]  ;;  %v2064_v62 = vld [vmem:[#allocation11 + $0xe8] sm:$0xff] }
 0x245   :  { %3024 = vmatprep.subr.bf16.mxu1 %v3023_v5  ;;  %v3055_v5 = vpack.c.bf16 %v2064_v62, %v2063_v59 }
 0x246   :  { %3026 = vmatpush1.bf16.msra.mxu1 %v3025_v2  ;;  %v3057_v2 = vpack.c.bf16 %v2048_v1, %v2047_v0 }
 0x247   :  { %3028 = vmatprep.subr.bf16.mxu1 %v3027_v8  ;;  %v2050_v8 = vld [vmem:[#allocation11 + $0x78] sm:$0xff] }
 0x248   :  { %v3061_v9 = vpack.c.bf16 %v2050_v8, %v2049_v22 }
 0x24a   :  { %3030 = vmatpush1.bf16.msra.mxu1 %v3029_v12  ;;  %v1955_v12 = vrot.slane %v1950_v10, %v892_v14 }
 0x24b   :  { %3032 = vmatprep.subr.bf16.mxu1 %v3031_v46 }
 0x295   :  { %v1382_v3 = vpop.f32.mrb[0].mxu1 }
 0x296   :  { %v1384_v4 = vpop.f32.mrb[1].mxu1  ;;  %v3063_v18 = vadd.f32 %v1382_v3, %v893_v11  ;;  %v2065_v3 = vld [vmem:[#allocation11 + $0xf0] sm:$0xff] }
 0x297   :  { %v3065_v19 = vadd.f32 %v1384_v4, %v897_v17  ;;  %v2066_v4 = vld [vmem:[#allocation11 + $0xf8] sm:$0xff] }
 0x298   :  { %v3059_v6 = vpack.c.bf16 %v2066_v4, %v2065_v3 }
 0x316   :  { %v1879_v20 = vpop.f32.mrb[0].mxu0 }
 0x317   :  { %v3064_v21 = vadd.f32 %v3063_v18, %v1879_v20  ;;  %v1881_v23 = vpop.f32.mrb[1].mxu0  ;;  %v2163_v20 = vld [vmem:[#allocation13] ss:$0 sm:$0xff] }
 0x318   :  { %v3066_v29 = vadd.f32 %v3065_v19, %v1881_v23 }
 0x319   :  { %v1884_v33 = vmax.f32 %v3064_v21, 0.0 }
 0x31a   :  { %v1885_v32 = vmax.f32 %v3066_v29, 0.0 }
 0x31c   :  { %2026 = vmatprep.mubr.f32.mxu1 %v1885_v32 }
 0x31d   :  { %2027 = vmatmul.mubr.f32.vlgmr.msra.gmra.mrb[2].mxu1 %v1884_v33 }
 0x31e   :  { %3034 = vmatpush3.bf16.msra.mxu1 %v3033_v60 }
 0x31f   :  { %3036 = vmatprep.subr.bf16.mxu1 %v3035_v34 }
 0x322   :  { %3038 = vmatpush3.bf16.msra.mxu1 %v3037_v38 }
 0x323   :  { %3040 = vmatprep.subr.bf16.mxu1 %v3039_v40 }
 0x326   :  { %3042 = vmatpush3.bf16.msra.mxu1 %v3041_v47 }
 0x327   :  { %3044 = vmatprep.subr.bf16.mxu1 %v3043_v48 }
 0x32a   :  { %3046 = vmatpush3.bf16.msra.mxu1 %v3045_v52 }
 0x32b   :  { %3048 = vmatprep.subr.bf16.mxu1 %v3047_v53 }
 0x32e   :  { %3050 = vmatpush3.bf16.msra.mxu1 %v3049_v55 }
 0x32f   :  { %3052 = vmatprep.subr.bf16.mxu1 %v3051_v25 }
 0x332   :  { %3054 = vmatpush3.bf16.msra.mxu1 %v3053_v63 }
 0x333   :  { %3056 = vmatprep.subr.bf16.mxu1 %v3055_v5 }
 0x336   :  { %3058 = vmatpush3.bf16.msra.mxu1 %v3057_v2 }
 0x337   :  { %3060 = vmatprep.subr.bf16.mxu1 %v3059_v6 }
 0x33a   :  { %3062 = vmatpush3.bf16.msra.mxu1 %v3061_v9 }
 0x3f0   :  { %v2028_v13 = vpop.f32.mrb[2].mxu1 }
 0x3f1   :  { %v2029_v46 = vadd.f32 %v2028_v13, %v1955_v12  ;;  %v2030_v15 = vpop.f32.mrb[3].mxu1 }
 0x3f2   :  { %v2031_v11 = vadd.f32 %v2030_v15, %v1959_v26 }
 0x3f3   :  { %v2033_v18 = vmax.f32 %v2029_v46, 0.0 }
 0x3f4   :  { %v2034_v17 = vmax.f32 %v2031_v11, 0.0 }
 0x3f6   :  { %2138 = vmatprep.mubr.f32.mxu1 %v2034_v17 }
 0x3f7   :  { %2139 = vmatmul.mubr.f32.vlgmr.msra.gmra.mrb[4].mxu1 %v2033_v18 }
 0x4ca   :  { %v2196_v19 = vpop.f32.mrb[4].mxu1 }
 0x4cb   :  { %v2197_v21 = vpop.f32.mrb[5].mxu1 }
 0x4cc   :  { %v2198_v23 = vadd.f32 %v2197_v21, %v2196_v19 }
 0x4ce   :  { %v2141_v27 = vadd.f32 %v2198_v23, %v2163_v20 }
 0x4d0   :  { %2144 = vst [vmem:[#allocation14] sm:$0x3] %v2141_v27 }
 0x4d1   :  { %3273 = shalt.err (!%p3270_p4)
}
 0x4d2   :  { %s3274_s11 = scalar_lea.hbm %s3561_s7, 32 }
 0x4d3   :  { %p3275_p5 = scmp.ne.s32.totalorder %s3561_s7, %s3274_s11  ;;  %p3278_p6 = scmp.lt.u32.totalorder %s3274_s11, %s3561_s7 }
 0x4d5   :  { %p3280_p7 = pnand %p3278_p6, %p3275_p5 }
 0x4d7   :  { %3283 = shalt.err (!%p3280_p7)
}
 0x4d8   :  { %2154 = dma.vmem_to_hbm [thread:$0]  %s2152_s13, 32, %s3561_s7, [#allocation4]  }
 0x4d9   :  { %3292 = dma.done.wait [#allocation4], 32  }
 0x4da   :  { %3293 = vsyncadd [#allocation4], 4294967264 }
 0x4db   :  { %2158 = vsyncpa [#allocation3], 1 }
 0x4dc   :  { %2159 = vsyncpa [#allocation6], 1 }
 0x4dd   :  { %2160 = vsyncpa [#allocation9], 1 }
 0x4de   :  { %2161 = vsyncpa [#allocation12], 1 }
 0x4df   :  { %2162 = vsyncpa [#allocation4], 1 }

// kernel: tpu_custom_call.1
= control target key start
LH: loop header
LB: loop body
LE: loop exit
PB: predicated region body
PF: predicated region fallthrough
CT: control target
= control target key end

     0   :  { %12 = vsyncpa [#allocation3], 0  ;;  %s3554_s0 = inlined_call_operand.hbm [shape: f32[2,3072], index: 0, kind: input, shape index: {}]   ;;  %s3555_s1 = inlined_call_operand.hbm [shape: f32[3072,256], index: 1, kind: input, shape index: {}]   ;;  %s3556_s2 = inlined_call_operand.hbm [shape: f32[1,256], index: 2, kind: input, shape index: {}]   ;;  %s3557_s3 = inlined_call_operand.hbm [shape: f32[256,256], index: 3, kind: input, shape index: {}]   ;;  %s3558_s4 = inlined_call_operand.hbm [shape: f32[1,256], index: 4, kind: input, shape index: {}]   ;;  %s3559_s5 = inlined_call_operand.hbm [shape: f32[256,128], index: 5, kind: input, shape index: {}]   ;;  %s3560_s6 = inlined_call_operand.hbm [shape: f32[1,128], index: 6, kind: input, shape index: {}]   ;;  %s3561_s7 = inlined_call_operand.hbm [shape: f32[2,128], index: 7, kind: output, shape index: {}]  }
   0x1   :  { %13 = vsyncpa [#allocation6], 0 }
   0x2   :  { %14 = vsyncpa [#allocation9], 0 }
   0x3   :  { %15 = vsyncpa [#allocation12], 0 }
   0x4   :  { %16 = vsyncpa [#allocation4], 0  ;;  %s3294_s24 = smov [#allocation5]   ;;  %s3108_s28 = scalar_lea.hbm %s3555_s1, 98304 }
   0x5   :  { %s32_s25 = sshll.u32 %s3294_s24, 4  ;;  %p3109_p0 = scmp.ne.s32.totalorder %s3555_s1, %s3108_s28  ;;  %s33_s25 = int_to_ptr.vmem [resolvable:$true] %s32_s25 }
   0x6   :  { %p3112_p1 = scmp.lt.u32.totalorder %s3108_s28, %s3555_s1 }
   0x8   :  { %p3114_p2 = pnand %p3112_p1, %p3109_p0 }
   0xa   :  { %3117 = shalt.err (!%p3114_p2)
}
   0xb   :  { %s3118_s10 = scalar_lea.vmem %s33_s25, 98304  ;;  %p3123_p4 = scmp.lt.s32.totalorder %s33_s25, %s33_s25 }
   0xc   :  { %p3119_p3 = scmp.ne.s32.totalorder %s33_s25, %s3118_s10  ;;  %p3124_p5 = scmp.lt.s32.totalorder %s3118_s10, %s3118_s10 }
   0xe   :  { %p3125_p6 = por %p3124_p5, %p3123_p4 }
  0x10   :  { %p3126_p7 = pnand %p3125_p6, %p3119_p3 }
  0x12   :  { %3129 = shalt.err (!%p3126_p7)
}
  0x13   :  { %s3295_s11 = smov 256   ;;  %s3296_s12 = smov 16  }
  0x14   :  { %38 = dma.hbm_to_vmem [thread:$0]  %s3555_s1, 98304, %s33_s25, [#allocation6], %s3295_s11, %s3295_s11, %s3296_s12  }
  0x15   :  { %s3297_s15 = smov [#allocation8]   ;;  %s3298_s17 = smov [#allocation11]  }
  0x16   :  { %s54_s16 = sshll.u32 %s3297_s15, 4  ;;  %s76_s18 = sshll.u32 %s3298_s17, 4  ;;  %s55_s16 = int_to_ptr.vmem [resolvable:$true] %s54_s16  ;;  %s77_s18 = int_to_ptr.vmem [resolvable:$true] %s76_s18 }
  0x17   :  { %s3130_s21 = scalar_lea.hbm %s3557_s3, 8192 }
  0x18   :  { %p3131_p8 = scmp.ne.s32.totalorder %s3557_s3, %s3130_s21  ;;  %p3134_p9 = scmp.lt.u32.totalorder %s3130_s21, %s3557_s3 }
  0x1a   :  { %p3136_p10 = pnand %p3134_p9, %p3131_p8 }
  0x1c   :  { %3139 = shalt.err (!%p3136_p10)
}
  0x1d   :  { %s3140_s1 = scalar_lea.vmem %s55_s16, 8192  ;;  %p3145_p12 = scmp.lt.s32.totalorder %s55_s16, %s55_s16 }
  0x1e   :  { %p3141_p11 = scmp.ne.s32.totalorder %s55_s16, %s3140_s1  ;;  %p3146_p13 = scmp.lt.s32.totalorder %s3140_s1, %s3140_s1 }
  0x20   :  { %p3147_p0 = por %p3146_p13, %p3145_p12 }
  0x22   :  { %p3148_p1 = pnand %p3147_p0, %p3141_p11 }
  0x24   :  { %3151 = shalt.err (!%p3148_p1)
}
  0x25   :  { %60 = dma.hbm_to_vmem [thread:$0]  %s3557_s3, 8192, %s55_s16, [#allocation9], %s3295_s11, %s3295_s11, %s3296_s12  }
  0x26   :  { %s3152_s30 = scalar_lea.hbm %s3559_s5, 4096 }
  0x27   :  { %p3153_p2 = scmp.ne.s32.totalorder %s3559_s5, %s3152_s30  ;;  %p3156_p3 = scmp.lt.u32.totalorder %s3152_s30, %s3559_s5 }
  0x29   :  { %p3158_p4 = pnand %p3156_p3, %p3153_p2 }
  0x2b   :  { %3161 = shalt.err (!%p3158_p4)
}
  0x2c   :  { %s3162_s14 = scalar_lea.vmem %s77_s18, 4096  ;;  %p3167_p6 = scmp.lt.s32.totalorder %s77_s18, %s77_s18 }
  0x2d   :  { %p3163_p5 = scmp.ne.s32.totalorder %s77_s18, %s3162_s14  ;;  %p3168_p7 = scmp.lt.s32.totalorder %s3162_s14, %s3162_s14 }
  0x2f   :  { %p3169_p8 = por %p3168_p7, %p3167_p6 }
  0x31   :  { %p3170_p9 = pnand %p3169_p8, %p3163_p5 }
  0x33   :  { %3173 = shalt.err (!%p3170_p9)
}
  0x34   :  { %s3299_s3 = smov 128   ;;  %s3300_s11 = smov 8  }
  0x35   :  { %82 = dma.hbm_to_vmem [thread:$0]  %s3559_s5, 4096, %s77_s18, [#allocation12], %s3299_s3, %s3299_s3, %s3300_s11  }
  0x36   :  { %s3301_s16 = smov [#allocation2]   ;;  %s3302_s19 = smov [#allocation7]  }
  0x37   :  { %s23_s17 = sshll.u32 %s3301_s16, 4  ;;  %s45_s20 = sshll.u32 %s3302_s19, 4  ;;  %s24_s17 = int_to_ptr.vmem [resolvable:$true] %s23_s17  ;;  %s46_s20 = int_to_ptr.vmem [resolvable:$true] %s45_s20 }
  0x38   :  { %s3174_s23 = scalar_lea.hbm %s3554_s0, 768 }
  0x39   :  { %p3175_p10 = scmp.ne.s32.totalorder %s3554_s0, %s3174_s23  ;;  %p3178_p11 = scmp.lt.u32.totalorder %s3174_s23, %s3554_s0 }
  0x3b   :  { %p3180_p12 = pnand %p3178_p11, %p3175_p10 }
  0x3d   :  { %3183 = shalt.err (!%p3180_p12)
}
  0x3e   :  { %s3184_s5 = scalar_lea.vmem %s24_s17, 768  ;;  %p3189_p0 = scmp.lt.s32.totalorder %s24_s17, %s24_s17 }
  0x3f   :  { %p3185_p13 = scmp.ne.s32.totalorder %s24_s17, %s3184_s5  ;;  %p3190_p1 = scmp.lt.s32.totalorder %s3184_s5, %s3184_s5 }
  0x41   :  { %p3191_p2 = por %p3190_p1, %p3189_p0 }
  0x43   :  { %p3192_p3 = pnand %p3191_p2, %p3185_p13 }
  0x45   :  { %3195 = shalt.err (!%p3192_p3)
}
  0x46   :  { %26 = dma.hbm_to_vmem [thread:$0]  %s3554_s0, 768, %s24_s17, [#allocation3]  }
  0x47   :  { %s3196_s30 = scalar_lea.hbm %s3556_s2, 32 }
  0x48   :  { %p3197_p4 = scmp.ne.s32.totalorder %s3556_s2, %s3196_s30  ;;  %p3200_p5 = scmp.lt.u32.totalorder %s3196_s30, %s3556_s2 }
  0x4a   :  { %p3202_p6 = pnand %p3200_p5, %p3197_p4 }
  0x4c   :  { %3205 = shalt.err (!%p3202_p6)
}
  0x4d   :  { %s3206_s14 = scalar_lea.vmem %s46_s20, 32  ;;  %p3211_p8 = scmp.lt.s32.totalorder %s46_s20, %s46_s20 }
  0x4e   :  { %p3207_p7 = scmp.ne.s32.totalorder %s46_s20, %s3206_s14  ;;  %p3212_p9 = scmp.lt.s32.totalorder %s3206_s14, %s3206_s14 }
  0x50   :  { %p3213_p10 = por %p3212_p9, %p3211_p8 }
  0x52   :  { %p3214_p11 = pnand %p3213_p10, %p3207_p7 }
  0x54   :  { %3217 = shalt.err (!%p3214_p11)
}
  0x55   :  { %48 = dma.hbm_to_vmem [thread:$0]  %s3556_s2, 32, %s46_s20, [#allocation6]  }
  0x56   :  { %s3303_s11 = smov [#allocation10]   ;;  %s3304_s15 = smov [#allocation13]  }
  0x57   :  { %s67_s12 = sshll.u32 %s3303_s11, 4  ;;  %s89_s16 = sshll.u32 %s3304_s15, 4  ;;  %s68_s12 = int_to_ptr.vmem [resolvable:$true] %s67_s12  ;;  %s90_s16 = int_to_ptr.vmem [resolvable:$true] %s89_s16 }
  0x58   :  { %s3218_s21 = scalar_lea.hbm %s3558_s4, 32 }
  0x59   :  { %p3219_p12 = scmp.ne.s32.totalorder %s3558_s4, %s3218_s21  ;;  %p3222_p13 = scmp.lt.u32.totalorder %s3218_s21, %s3558_s4 }
  0x5b   :  { %p3224_p0 = pnand %p3222_p13, %p3219_p12 }
  0x5d   :  { %3227 = shalt.err (!%p3224_p0)
}
  0x5e   :  { %s3228_s2 = scalar_lea.vmem %s68_s12, 32  ;;  %p3233_p2 = scmp.lt.s32.totalorder %s68_s12, %s68_s12 }
  0x5f   :  { %p3229_p1 = scmp.ne.s32.totalorder %s68_s12, %s3228_s2  ;;  %p3234_p3 = scmp.lt.s32.totalorder %s3228_s2, %s3228_s2 }
  0x61   :  { %p3235_p4 = por %p3234_p3, %p3233_p2 }
  0x63   :  { %p3236_p5 = pnand %p3235_p4, %p3229_p1 }
  0x65   :  { %3239 = shalt.err (!%p3236_p5)
}
  0x66   :  { %70 = dma.hbm_to_vmem [thread:$0]  %s3558_s4, 32, %s68_s12, [#allocation9]  }
  0x67   :  { %s3240_s18 = scalar_lea.hbm %s3560_s6, 16 }
  0x68   :  { %p3241_p6 = scmp.ne.s32.totalorder %s3560_s6, %s3240_s18  ;;  %p3244_p7 = scmp.lt.u32.totalorder %s3240_s18, %s3560_s6 }
  0x6a   :  { %p3246_p8 = pnand %p3244_p7, %p3241_p6 }
  0x6c   :  { %3249 = shalt.err (!%p3246_p8)
}
  0x6d   :  { %s3250_s8 = scalar_lea.vmem %s90_s16, 16  ;;  %s3254_s9 = scalar_lea.vmem %s90_s16, 32 }
  0x6e   :  { %p3251_p9 = scmp.ne.s32.totalorder %s90_s16, %s3250_s8  ;;  %p3255_p10 = scmp.lt.s32.totalorder %s90_s16, %s90_s16 }
  0x6f   :  { %p3256_p11 = scmp.lt.s32.totalorder %s3254_s9, %s3250_s8 }
  0x71   :  { %p3257_p12 = por %p3256_p11, %p3255_p10 }
  0x73   :  { %p3258_p13 = pnand %p3257_p12, %p3251_p9 }
  0x75   :  { %3261 = shalt.err (!%p3258_p13)
}
  0x76   :  { %92 = dma.hbm_to_vmem [thread:$0]  %s3560_s6, 16, %s90_s16, [#allocation12]  }
  0x77   :  { %3284 = dma.done.wait [#allocation3], 768  }
  0x78   :  { %3285 = vsyncadd [#allocation3], 4294966528 }
  0x79   :  { %3286 = dma.done.wait [#allocation6], 98336  }
  0x7a   :  { %3287 = vsyncadd [#allocation6], 4294868960 }
  0x7b   :  { %3288 = dma.done.wait [#allocation9], 8224  }
  0x7c   :  { %3289 = vsyncadd [#allocation9], 4294959072 }
  0x7d   :  { %3290 = dma.done.wait [#allocation12], 4112  }
  0x7e   :  { %3291 = vsyncadd [#allocation12], 4294963184  ;;  %v121_v0 = vld [vmem:[#allocation5 + $0x8] sm:$0xff]  ;;  %v123_v1 = vld [vmem:[#allocation5 + $0x18] sm:$0xff]  ;;  %s3306_s6 = smov [#allocation14]  }
  0x7f   :  { %v441_v2 = vld [vmem:[#allocation5 + $0xa08] sm:$0xff]  ;;  %v2199_v3 = vpack.c.bf16 %v123_v1, %v121_v0  ;;  %v443_v4 = vld [vmem:[#allocation5 + $0xa18] sm:$0xff]  ;;  %v120_v5 = vld [vmem:[#allocation5] sm:$0xff]  ;;  %s2151_s13 = sshll.u32 %s3306_s6, 4  ;;  %s2152_s13 = int_to_ptr.vmem [resolvable:$true] %s2151_s13 }
  0x80   :  { %v122_v6 = vld [vmem:[#allocation5 + $0x10] sm:$0xff]  ;;  %v2519_v7 = vpack.c.bf16 %v443_v4, %v441_v2  ;;  %v440_v9 = vld [vmem:[#allocation5 + $0xa00] sm:$0xff]  ;;  %v125_v11 = vld [vmem:[#allocation5 + $0x28] sm:$0xff]  ;;  %s3262_s14 = scalar_lea.vmem %s2152_s13, 32  ;;  %p3267_p1 = scmp.lt.s32.totalorder %s2152_s13, %s2152_s13 }
  0x81   :  { %v2201_v8 = vpack.c.bf16 %v122_v6, %v120_v5  ;;  %v442_v10 = vld [vmem:[#allocation5 + $0xa10] sm:$0xff]  ;;  %2200 = vmatprep.subr.bf16.mxu1 %v2199_v3  ;;  %v127_v13 = vld [vmem:[#allocation5 + $0x38] sm:$0xff]  ;;  %v445_v14 = vld [vmem:[#allocation5 + $0xa28] sm:$0xff]  ;;  %p3263_p0 = scmp.ne.s32.totalorder %s2152_s13, %s3262_s14  ;;  %p3268_p2 = scmp.lt.s32.totalorder %s3262_s14, %s3262_s14 }
  0x82   :  { %v2521_v12 = vpack.c.bf16 %v442_v10, %v440_v9  ;;  %v447_v15 = vld [vmem:[#allocation5 + $0xa38] sm:$0xff]  ;;  %2520 = vmatprep.subr.bf16.mxu0 %v2519_v7  ;;  %v2203_v16 = vpack.c.bf16 %v127_v13, %v125_v11  ;;  %v124_v18 = vld [vmem:[#allocation5 + $0x20] sm:$0xff]  ;;  %v126_v19 = vld [vmem:[#allocation5 + $0x30] sm:$0xff] }
  0x83   :  { %2202 = vmatpush1.bf16.msra.mxu1 %v2201_v8  ;;  %v2523_v17 = vpack.c.bf16 %v447_v15, %v445_v14  ;;  %v444_v20 = vld [vmem:[#allocation5 + $0xa20] sm:$0xff]  ;;  %v2205_v21 = vpack.c.bf16 %v126_v19, %v124_v18  ;;  %v446_v22 = vld [vmem:[#allocation5 + $0xa30] sm:$0xff]  ;;  %v129_v23 = vld [vmem:[#allocation5 + $0x48] sm:$0xff]  ;;  %p3269_p3 = por %p3268_p2, %p3267_p1 }
  0x84   :  { %2522 = vmatpush1.bf16.msra.mxu0 %v2521_v12  ;;  %v131_v24 = vld [vmem:[#allocation5 + $0x58] sm:$0xff]  ;;  %2204 = vmatprep.subr.bf16.mxu1 %v2203_v16  ;;  %v2525_v25 = vpack.c.bf16 %v446_v22, %v444_v20  ;;  %v449_v27 = vld [vmem:[#allocation5 + $0xa48] sm:$0xff]  ;;  %v128_v29 = vld [vmem:[#allocation5 + $0x40] sm:$0xff] }
  0x85   :  { %2524 = vmatprep.subr.bf16.mxu0 %v2523_v17  ;;  %v2207_v26 = vpack.c.bf16 %v131_v24, %v129_v23  ;;  %v451_v28 = vld [vmem:[#allocation5 + $0xa58] sm:$0xff]  ;;  %v130_v31 = vld [vmem:[#allocation5 + $0x50] sm:$0xff]  ;;  %v448_v32 = vld [vmem:[#allocation5 + $0xa40] sm:$0xff]  ;;  %p3270_p4 = pnand %p3269_p3, %p3263_p0 }
  0x86   :  { %v2527_v30 = vpack.c.bf16 %v451_v28, %v449_v27  ;;  %v450_v33 = vld [vmem:[#allocation5 + $0xa50] sm:$0xff]  ;;  %v2209_v34 = vpack.c.bf16 %v130_v31, %v128_v29  ;;  %v133_v35 = vld [vmem:[#allocation5 + $0x68] sm:$0xff]  ;;  %v135_v36 = vld [vmem:[#allocation5 + $0x78] sm:$0xff] }
  0x87   :  { %2206 = vmatpush1.bf16.msra.mxu1 %v2205_v21  ;;  %v453_v37 = vld [vmem:[#allocation5 + $0xa68] sm:$0xff]  ;;  %v2529_v38 = vpack.c.bf16 %v450_v33, %v448_v32  ;;  %v2211_v39 = vpack.c.bf16 %v135_v36, %v133_v35  ;;  %v455_v40 = vld [vmem:[#allocation5 + $0xa78] sm:$0xff]  ;;  %v132_v41 = vld [vmem:[#allocation5 + $0x60] sm:$0xff] }
  0x88   :  { %2526 = vmatpush1.bf16.msra.mxu0 %v2525_v25  ;;  %2208 = vmatprep.subr.bf16.mxu1 %v2207_v26  ;;  %v134_v42 = vld [vmem:[#allocation5 + $0x70] sm:$0xff]  ;;  %v2531_v43 = vpack.c.bf16 %v455_v40, %v453_v37  ;;  %v452_v44 = vld [vmem:[#allocation5 + $0xa60] sm:$0xff]  ;;  %v137_v46 = vld [vmem:[#allocation5 + $0x88] sm:$0xff] }
  0x89   :  { %2528 = vmatprep.subr.bf16.mxu0 %v2527_v30  ;;  %v454_v45 = vld [vmem:[#allocation5 + $0xa70] sm:$0xff]  ;;  %v139_v47 = vld [vmem:[#allocation5 + $0x98] sm:$0xff]  ;;  %v457_v48 = vld [vmem:[#allocation5 + $0xa88] sm:$0xff]  ;;  %v2213_v50 = vpack.c.bf16 %v134_v42, %v132_v41 }
  0x8a   :  { %v459_v49 = vld [vmem:[#allocation5 + $0xa98] sm:$0xff]  ;;  %v2533_v51 = vpack.c.bf16 %v454_v45, %v452_v44  ;;  %v2215_v52 = vpack.c.bf16 %v139_v47, %v137_v46  ;;  %v136_v53 = vld [vmem:[#allocation5 + $0x80] sm:$0xff]  ;;  %v138_v54 = vld [vmem:[#allocation5 + $0x90] sm:$0xff]  ;;  %v890_v46 = vlaneseq  ;;  %v3305_v47 = vmov 1983009808  }
  0x8b   :  { %2210 = vmatpush1.bf16.msra.mxu1 %v2209_v34  ;;  %v456_v55 = vld [vmem:[#allocation5 + $0xa80] sm:$0xff]  ;;  %v2535_v56 = vpack.c.bf16 %v459_v49, %v457_v48  ;;  %v458_v57 = vld [vmem:[#allocation5 + $0xa90] sm:$0xff]  ;;  %v141_v58 = vld [vmem:[#allocation5 + $0xa8] sm:$0xff]  ;;  %v2217_v62 = vpack.c.bf16 %v138_v54, %v136_v53  ;;  %v908_v48 = vunpack.c.l.s4 %v3305_v47 }
  0x8c   :  { %2530 = vmatpush1.bf16.msra.mxu0 %v2529_v38  ;;  %2212 = vmatprep.subr.bf16.mxu1 %v2211_v39  ;;  %v143_v59 = vld [vmem:[#allocation5 + $0xb8] sm:$0xff]  ;;  %v461_v60 = vld [vmem:[#allocation5 + $0xaa8] sm:$0xff]  ;;  %v2537_v63 = vpack.c.bf16 %v458_v57, %v456_v55  ;;  %v140_v1 = vld [vmem:[#allocation5 + $0xa0] sm:$0xff] }
  0x8d   :  { %2532 = vmatprep.subr.bf16.mxu0 %v2531_v43  ;;  %v463_v61 = vld [vmem:[#allocation5 + $0xab8] sm:$0xff]  ;;  %v2219_v0 = vpack.c.bf16 %v143_v59, %v141_v58  ;;  %v142_v2 = vld [vmem:[#allocation5 + $0xb0] sm:$0xff]  ;;  %v460_v3 = vld [vmem:[#allocation5 + $0xaa0] sm:$0xff] }
  0x8e   :  { %v2539_v4 = vpack.c.bf16 %v463_v61, %v461_v60  ;;  %v462_v5 = vld [vmem:[#allocation5 + $0xab0] sm:$0xff]  ;;  %v145_v6 = vld [vmem:[#allocation5 + $0xc8] sm:$0xff]  ;;  %v147_v7 = vld [vmem:[#allocation5 + $0xd8] sm:$0xff]  ;;  %v2221_v10 = vpack.c.bf16 %v142_v2, %v140_v1  ;;  %v3431_v61 = vshrl.u32 %v890_v46, 7 }
  0x8f   :  { %2214 = vmatpush1.bf16.msra.mxu1 %v2213_v50  ;;  %v465_v8 = vld [vmem:[#allocation5 + $0xac8] sm:$0xff]  ;;  %v467_v9 = vld [vmem:[#allocation5 + $0xad8] sm:$0xff]  ;;  %v2541_v11 = vpack.c.bf16 %v462_v5, %v460_v3  ;;  %v2223_v12 = vpack.c.bf16 %v147_v7, %v145_v6  ;;  %v144_v13 = vld [vmem:[#allocation5 + $0xc0] sm:$0xff] }
  0x90   :  { %2534 = vmatpush1.bf16.msra.mxu0 %v2533_v51  ;;  %2216 = vmatprep.subr.bf16.mxu1 %v2215_v52  ;;  %v146_v14 = vld [vmem:[#allocation5 + $0xd0] sm:$0xff]  ;;  %v464_v15 = vld [vmem:[#allocation5 + $0xac0] sm:$0xff]  ;;  %v2543_v16 = vpack.c.bf16 %v467_v9, %v465_v8  ;;  %v149_v18 = vld [vmem:[#allocation5 + $0xe8] sm:$0xff] }
  0x91   :  { %2536 = vmatprep.subr.bf16.mxu0 %v2535_v56  ;;  %v466_v17 = vld [vmem:[#allocation5 + $0xad0] sm:$0xff]  ;;  %v151_v19 = vld [vmem:[#allocation5 + $0xf8] sm:$0xff]  ;;  %v469_v20 = vld [vmem:[#allocation5 + $0xae8] sm:$0xff]  ;;  %v2225_v22 = vpack.c.bf16 %v146_v14, %v144_v13 }
  0x92   :  { %v471_v21 = vld [vmem:[#allocation5 + $0xaf8] sm:$0xff]  ;;  %v2545_v23 = vpack.c.bf16 %v466_v17, %v464_v15  ;;  %v2227_v24 = vpack.c.bf16 %v151_v19, %v149_v18  ;;  %v148_v25 = vld [vmem:[#allocation5 + $0xe0] sm:$0xff]  ;;  %v150_v26 = vld [vmem:[#allocation5 + $0xf0] sm:$0xff] }
  0x93   :  { %2218 = vmatpush1.bf16.msra.mxu1 %v2217_v62  ;;  %v468_v27 = vld [vmem:[#allocation5 + $0xae0] sm:$0xff]  ;;  %v2547_v28 = vpack.c.bf16 %v471_v21, %v469_v20  ;;  %v470_v29 = vld [vmem:[#allocation5 + $0xaf0] sm:$0xff]  ;;  %v153_v30 = vld [vmem:[#allocation5 + $0x108] sm:$0xff]  ;;  %v2229_v34 = vpack.c.bf16 %v150_v26, %v148_v25  ;;  %v909_v62 = vunpack.c.0.s8 %v908_v48 }
  0x94   :  { %2538 = vmatpush1.bf16.msra.mxu0 %v2537_v63  ;;  %2220 = vmatprep.subr.bf16.mxu1 %v2219_v0  ;;  %v155_v31 = vld [vmem:[#allocation5 + $0x118] sm:$0xff]  ;;  %v473_v32 = vld [vmem:[#allocation5 + $0xb08] sm:$0xff]  ;;  %v2549_v35 = vpack.c.bf16 %v470_v29, %v468_v27  ;;  %v152_v37 = vld [vmem:[#allocation5 + $0x100] sm:$0xff] }
  0x95   :  { %2540 = vmatprep.subr.bf16.mxu0 %v2539_v4  ;;  %v475_v33 = vld [vmem:[#allocation5 + $0xb18] sm:$0xff]  ;;  %v2231_v36 = vpack.c.bf16 %v155_v31, %v153_v30  ;;  %v154_v38 = vld [vmem:[#allocation5 + $0x110] sm:$0xff]  ;;  %v472_v39 = vld [vmem:[#allocation5 + $0xb00] sm:$0xff] }
  0x96   :  { %v2551_v40 = vpack.c.bf16 %v475_v33, %v473_v32  ;;  %v474_v41 = vld [vmem:[#allocation5 + $0xb10] sm:$0xff]  ;;  %v157_v42 = vld [vmem:[#allocation5 + $0x128] sm:$0xff]  ;;  %v159_v43 = vld [vmem:[#allocation5 + $0x138] sm:$0xff]  ;;  %v2233_v49 = vpack.c.bf16 %v154_v38, %v152_v37 }
  0x97   :  { %2222 = vmatpush1.bf16.msra.mxu1 %v2221_v10  ;;  %v477_v44 = vld [vmem:[#allocation5 + $0xb28] sm:$0xff]  ;;  %v479_v45 = vld [vmem:[#allocation5 + $0xb38] sm:$0xff]  ;;  %v2553_v50 = vpack.c.bf16 %v474_v41, %v472_v39  ;;  %v2235_v51 = vpack.c.bf16 %v159_v43, %v157_v42  ;;  %v156_v52 = vld [vmem:[#allocation5 + $0x120] sm:$0xff] }
  0x98   :  { %2542 = vmatpush1.bf16.msra.mxu0 %v2541_v11  ;;  %2224 = vmatprep.subr.bf16.mxu1 %v2223_v12  ;;  %v158_v53 = vld [vmem:[#allocation5 + $0x130] sm:$0xff]  ;;  %v476_v54 = vld [vmem:[#allocation5 + $0xb20] sm:$0xff]  ;;  %v2555_v55 = vpack.c.bf16 %v479_v45, %v477_v44  ;;  %v161_v57 = vld [vmem:[#allocation5 + $0x148] sm:$0xff]  ;;  %v3434_v11 = vsub.s32 %v909_v62, %v3431_v61 }
  0x99   :  { %2544 = vmatprep.subr.bf16.mxu0 %v2543_v16  ;;  %v478_v56 = vld [vmem:[#allocation5 + $0xb30] sm:$0xff]  ;;  %v163_v58 = vld [vmem:[#allocation5 + $0x158] sm:$0xff]  ;;  %v481_v59 = vld [vmem:[#allocation5 + $0xb48] sm:$0xff]  ;;  %v2237_v63 = vpack.c.bf16 %v158_v53, %v156_v52 }
  0x9a   :  { %v483_v60 = vld [vmem:[#allocation5 + $0xb58] sm:$0xff]  ;;  %v2557_v0 = vpack.c.bf16 %v478_v56, %v476_v54  ;;  %v2239_v1 = vpack.c.bf16 %v163_v58, %v161_v57  ;;  %v160_v2 = vld [vmem:[#allocation5 + $0x140] sm:$0xff]  ;;  %v162_v3 = vld [vmem:[#allocation5 + $0x150] sm:$0xff] }
  0x9b   :  { %2226 = vmatpush1.bf16.msra.mxu1 %v2225_v22  ;;  %v480_v4 = vld [vmem:[#allocation5 + $0xb40] sm:$0xff]  ;;  %v2559_v5 = vpack.c.bf16 %v483_v60, %v481_v59  ;;  %v482_v6 = vld [vmem:[#allocation5 + $0xb50] sm:$0xff]  ;;  %v165_v7 = vld [vmem:[#allocation5 + $0x168] sm:$0xff]  ;;  %v2241_v12 = vpack.c.bf16 %v162_v3, %v160_v2 }
  0x9c   :  { %2546 = vmatpush1.bf16.msra.mxu0 %v2545_v23  ;;  %2228 = vmatprep.subr.bf16.mxu1 %v2227_v24  ;;  %v167_v8 = vld [vmem:[#allocation5 + $0x178] sm:$0xff]  ;;  %v485_v9 = vld [vmem:[#allocation5 + $0xb68] sm:$0xff]  ;;  %v164_v13 = vld [vmem:[#allocation5 + $0x160] sm:$0xff]  ;;  %v2561_v14 = vpack.c.bf16 %v482_v6, %v480_v4 }
  0x9d   :  { %2548 = vmatprep.subr.bf16.mxu0 %v2547_v28  ;;  %v487_v10 = vld [vmem:[#allocation5 + $0xb78] sm:$0xff]  ;;  %v2243_v15 = vpack.c.bf16 %v167_v8, %v165_v7  ;;  %v166_v16 = vld [vmem:[#allocation5 + $0x170] sm:$0xff]  ;;  %v484_v17 = vld [vmem:[#allocation5 + $0xb60] sm:$0xff] }
  0x9e   :  { %v486_v18 = vld [vmem:[#allocation5 + $0xb70] sm:$0xff]  ;;  %v2563_v19 = vpack.c.bf16 %v487_v10, %v485_v9  ;;  %v169_v20 = vld [vmem:[#allocation5 + $0x188] sm:$0xff]  ;;  %v171_v21 = vld [vmem:[#allocation5 + $0x198] sm:$0xff]  ;;  %v2245_v27 = vpack.c.bf16 %v166_v16, %v164_v13 }
  0x9f   :  { %2230 = vmatpush1.bf16.msra.mxu1 %v2229_v34  ;;  %v3436_v22 = vld [vmem:[#allocation2] sm:$0xff]  ;;  %v489_v23 = vld [vmem:[#allocation5 + $0xb88] sm:$0xff]  ;;  %v491_v24 = vld [vmem:[#allocation5 + $0xb98] sm:$0xff]  ;;  %v2565_v29 = vpack.c.bf16 %v486_v18, %v484_v17  ;;  %v2247_v30 = vpack.c.bf16 %v171_v21, %v169_v20 }
  0xa0   :  { %2550 = vmatpush1.bf16.msra.mxu0 %v2549_v35  ;;  %2232 = vmatprep.subr.bf16.mxu1 %v2231_v36  ;;  %v3440_v25 = vrot.slane %v3436_v22, %v3434_v11  ;;  %v116_v26 = vld [vmem:[#allocation2 + $0x10] sm:$0xff]  ;;  %v170_v32 = vld [vmem:[#allocation5 + $0x190] sm:$0xff]  ;;  %v2567_v35 = vpack.c.bf16 %v491_v24, %v489_v23  ;;  %v173_v37 = vld [vmem:[#allocation5 + $0x1a8] sm:$0xff]  ;;  %v906_v13 = vcombine.high %v3436_v22, %v3436_v22 }
  0xa1   :  { %2552 = vmatprep.subr.bf16.mxu0 %v2551_v40  ;;  %v940_v28 = vcombine.high %v116_v26, %v116_v26  ;;  %v168_v31 = vld [vmem:[#allocation5 + $0x180] sm:$0xff]  ;;  %v490_v36 = vld [vmem:[#allocation5 + $0xb90] sm:$0xff]  ;;  %v175_v38 = vld [vmem:[#allocation5 + $0x1b8] sm:$0xff] }
  0xa2   :  { %v488_v33 = vld [vmem:[#allocation5 + $0xb80] sm:$0xff]  ;;  %v921_v34 = vcombine.high %v3440_v25, %v3440_v25  ;;  %v493_v40 = vld [vmem:[#allocation5 + $0xba8] sm:$0xff]  ;;  %v495_v41 = vld [vmem:[#allocation5 + $0xbb8] sm:$0xff]  ;;  %v2249_v42 = vpack.c.bf16 %v170_v32, %v168_v31  ;;  %v2251_v45 = vpack.c.bf16 %v175_v38, %v173_v37  ;;  %v3452_v22 = vrot.slane %v906_v13, %v3434_v11 }
  0xa3   :  { %2234 = vmatpush1.bf16.msra.mxu1 %v2233_v49  ;;  %v3445_v39 = vrot.slane %v940_v28, %v3434_v11  ;;  %v2569_v44 = vpack.c.bf16 %v490_v36, %v488_v33  ;;  %v172_v46 = vld [vmem:[#allocation5 + $0x1a0] sm:$0xff]  ;;  %v174_v47 = vld [vmem:[#allocation5 + $0x1b0] sm:$0xff]  ;;  %v2571_v49 = vpack.c.bf16 %v495_v41, %v493_v40  ;;  %v179_v52 = vld [vmem:[#allocation5 + $0x1d8] sm:$0xff] }
  0xa4   :  { %2554 = vmatpush1.bf16.msra.mxu0 %v2553_v50  ;;  %2236 = vmatprep.subr.bf16.mxu1 %v2235_v51  ;;  %v492_v48 = vld [vmem:[#allocation5 + $0xba0] sm:$0xff]  ;;  %v494_v50 = vld [vmem:[#allocation5 + $0xbb0] sm:$0xff]  ;;  %v177_v51 = vld [vmem:[#allocation5 + $0x1c8] sm:$0xff] }
  0xa5   :  { %2556 = vmatprep.subr.bf16.mxu0 %v2555_v55  ;;  %1096 = vmatprep.mubr.f32.mxu1 %v921_v34  ;;  %v956_v43 = vcombine.high %v3445_v39, %v3445_v39  ;;  %v497_v53 = vld [vmem:[#allocation5 + $0xbc8] sm:$0xff]  ;;  %v499_v54 = vld [vmem:[#allocation5 + $0xbd8] sm:$0xff]  ;;  %v2253_v55 = vpack.c.bf16 %v174_v47, %v172_v46  ;;  %v2573_v56 = vpack.c.bf16 %v494_v50, %v492_v48  ;;  %v176_v58 = vld [vmem:[#allocation5 + $0x1c0] sm:$0xff] }
  0xa6   :  { %v2255_v57 = vpack.c.bf16 %v179_v52, %v177_v51  ;;  %v178_v59 = vld [vmem:[#allocation5 + $0x1d0] sm:$0xff]  ;;  %v496_v60 = vld [vmem:[#allocation5 + $0xbc0] sm:$0xff]  ;;  %v2575_v62 = vpack.c.bf16 %v499_v54, %v497_v53  ;;  %v501_v2 = vld [vmem:[#allocation5 + $0xbe8] sm:$0xff] }
  0xa7   :  { %2238 = vmatpush1.bf16.msra.mxu1 %v2237_v63  ;;  %1451 = vmatprep.mubr.f32.mxu0 %v956_v43  ;;  %v498_v63 = vld [vmem:[#allocation5 + $0xbd0] sm:$0xff]  ;;  %v503_v3 = vld [vmem:[#allocation5 + $0xbf8] sm:$0xff]  ;;  %v2257_v4 = vpack.c.bf16 %v178_v59, %v176_v58  ;;  %v180_v7 = vld [vmem:[#allocation5 + $0x1e0] sm:$0xff]  ;;  %v922_v43 = vcombine.high %v3452_v22, %v3452_v22 }
  0xa8   :  { %2558 = vmatpush1.bf16.msra.mxu0 %v2557_v0  ;;  %2240 = vmatprep.subr.bf16.mxu1 %v2239_v1  ;;  %v181_v0 = vld [vmem:[#allocation5 + $0x1e8] sm:$0xff]  ;;  %v183_v1 = vld [vmem:[#allocation5 + $0x1f8] sm:$0xff]  ;;  %v182_v8 = vld [vmem:[#allocation5 + $0x1f0] sm:$0xff]  ;;  %v2579_v10 = vpack.c.bf16 %v503_v3, %v501_v2 }
  0xa9   :  { %2560 = vmatprep.subr.bf16.mxu0 %v2559_v5  ;;  %v2577_v5 = vpack.c.bf16 %v498_v63, %v496_v60  ;;  %v2259_v6 = vpack.c.bf16 %v183_v1, %v181_v0  ;;  %v500_v9 = vld [vmem:[#allocation5 + $0xbe0] sm:$0xff]  ;;  %v505_v16 = vld [vmem:[#allocation5 + $0xc08] sm:$0xff]  ;;  %v507_v17 = vld [vmem:[#allocation5 + $0xc18] sm:$0xff]  ;;  %v2261_v18 = vpack.c.bf16 %v182_v8, %v180_v7 }
  0xaa   :  { %v184_v21 = vld [vmem:[#allocation5 + $0x200] sm:$0xff]  ;;  %v186_v23 = vld [vmem:[#allocation5 + $0x210] sm:$0xff]  ;;  %v2583_v26 = vpack.c.bf16 %v507_v17, %v505_v16  ;;  %v189_v28 = vld [vmem:[#allocation5 + $0x228] sm:$0xff] }
  0xab   :  { %2242 = vmatpush1.bf16.msra.mxu1 %v2241_v12  ;;  %v502_v12 = vld [vmem:[#allocation5 + $0xbf0] sm:$0xff]  ;;  %v504_v24 = vld [vmem:[#allocation5 + $0xc00] sm:$0xff]  ;;  %v511_v31 = vld [vmem:[#allocation5 + $0xc38] sm:$0xff]  ;;  %v2265_v32 = vpack.c.bf16 %v186_v23, %v184_v21 }
  0xac   :  { %2562 = vmatpush1.bf16.msra.mxu0 %v2561_v14  ;;  %2244 = vmatprep.subr.bf16.mxu1 %v2243_v15  ;;  %v185_v14 = vld [vmem:[#allocation5 + $0x208] sm:$0xff]  ;;  %v187_v15 = vld [vmem:[#allocation5 + $0x218] sm:$0xff]  ;;  %v190_v36 = vld [vmem:[#allocation5 + $0x230] sm:$0xff] }
  0xad   :  { %2564 = vmatprep.subr.bf16.mxu0 %v2563_v19  ;;  %v2581_v19 = vpack.c.bf16 %v502_v12, %v500_v9  ;;  %v2263_v20 = vpack.c.bf16 %v187_v15, %v185_v14  ;;  %v508_v37 = vld [vmem:[#allocation5 + $0xc20] sm:$0xff]  ;;  %v510_v40 = vld [vmem:[#allocation5 + $0xc30] sm:$0xff]  ;;  %v193_v41 = vld [vmem:[#allocation5 + $0x248] sm:$0xff] }
  0xae   :  { %v2589_v47 = vpack.c.bf16 %v510_v40, %v508_v37  ;;  %v194_v50 = vld [vmem:[#allocation5 + $0x250] sm:$0xff]  ;;  %v512_v51 = vld [vmem:[#allocation5 + $0xc40] sm:$0xff]  ;;  %v197_v54 = vld [vmem:[#allocation5 + $0x268] sm:$0xff] }
  0xaf   :  { %2246 = vmatpush1.bf16.msra.mxu1 %v2245_v27  ;;  %v506_v27 = vld [vmem:[#allocation5 + $0xc10] sm:$0xff]  ;;  %v196_v59 = vld [vmem:[#allocation5 + $0x260] sm:$0xff]  ;;  %v201_v1 = vld [vmem:[#allocation5 + $0x288] sm:$0xff] }
  0xb0   :  { %2566 = vmatpush1.bf16.msra.mxu0 %v2565_v29  ;;  %2248 = vmatprep.subr.bf16.mxu1 %v2247_v30  ;;  %v191_v29 = vld [vmem:[#allocation5 + $0x238] sm:$0xff]  ;;  %v509_v30 = vld [vmem:[#allocation5 + $0xc28] sm:$0xff]  ;;  %v2585_v33 = vpack.c.bf16 %v506_v27, %v504_v24  ;;  %v514_v53 = vld [vmem:[#allocation5 + $0xc50] sm:$0xff] }
  0xb1   :  { %2568 = vmatprep.subr.bf16.mxu0 %v2567_v35  ;;  %v2267_v34 = vpack.c.bf16 %v191_v29, %v189_v28  ;;  %v188_v35 = vld [vmem:[#allocation5 + $0x220] sm:$0xff]  ;;  %v2587_v38 = vpack.c.bf16 %v511_v31, %v509_v30  ;;  %v198_v60 = vld [vmem:[#allocation5 + $0x270] sm:$0xff]  ;;  %v203_v2 = vld [vmem:[#allocation5 + $0x298] sm:$0xff] }
  0xb2   :  { %v2269_v46 = vpack.c.bf16 %v190_v36, %v188_v35  ;;  %v518_v0 = vld [vmem:[#allocation5 + $0xc70] sm:$0xff]  ;;  %v521_v3 = vld [vmem:[#allocation5 + $0xc88] sm:$0xff]  ;;  %v2279_v7 = vpack.c.bf16 %v203_v2, %v201_v1  ;;  %v200_v8 = vld [vmem:[#allocation5 + $0x280] sm:$0xff] }
  0xb3   :  { %2250 = vmatpush1.bf16.msra.mxu1 %v2249_v42  ;;  %v195_v42 = vld [vmem:[#allocation5 + $0x258] sm:$0xff]  ;;  %v202_v9 = vld [vmem:[#allocation5 + $0x290] sm:$0xff]  ;;  %v205_v14 = vld [vmem:[#allocation5 + $0x2a8] sm:$0xff] }
  0xb4   :  { %2570 = vmatpush1.bf16.msra.mxu0 %v2569_v44  ;;  %2252 = vmatprep.subr.bf16.mxu1 %v2251_v45  ;;  %v513_v44 = vld [vmem:[#allocation5 + $0xc48] sm:$0xff]  ;;  %v515_v45 = vld [vmem:[#allocation5 + $0xc58] sm:$0xff]  ;;  %v2271_v48 = vpack.c.bf16 %v195_v42, %v193_v41  ;;  %v522_v13 = vld [vmem:[#allocation5 + $0xc90] sm:$0xff] }
  0xb5   :  { %2572 = vmatprep.subr.bf16.mxu0 %v2571_v49  ;;  %v192_v49 = vld [vmem:[#allocation5 + $0x240] sm:$0xff]  ;;  %v2591_v52 = vpack.c.bf16 %v515_v45, %v513_v44  ;;  %v207_v15 = vld [vmem:[#allocation5 + $0x2b8] sm:$0xff]  ;;  %v525_v16 = vld [vmem:[#allocation5 + $0xca8] sm:$0xff] }
  0xb6   :  { %v527_v17 = vld [vmem:[#allocation5 + $0xcb8] sm:$0xff]  ;;  %v204_v21 = vld [vmem:[#allocation5 + $0x2a0] sm:$0xff]  ;;  %v206_v23 = vld [vmem:[#allocation5 + $0x2b0] sm:$0xff] }
  0xb7   :  { %2254 = vmatpush1.bf16.msra.mxu1 %v2253_v55  ;;  %v199_v55 = vld [vmem:[#allocation5 + $0x278] sm:$0xff]  ;;  %v524_v24 = vld [vmem:[#allocation5 + $0xca0] sm:$0xff]  ;;  %v526_v27 = vld [vmem:[#allocation5 + $0xcb0] sm:$0xff] }
  0xb8   :  { %2574 = vmatpush1.bf16.msra.mxu0 %v2573_v56  ;;  %2256 = vmatprep.subr.bf16.mxu1 %v2255_v57  ;;  %v519_v56 = vld [vmem:[#allocation5 + $0xc78] sm:$0xff]  ;;  %v2273_v57 = vpack.c.bf16 %v194_v50, %v192_v49  ;;  %v2275_v58 = vpack.c.bf16 %v199_v55, %v197_v54  ;;  %v209_v28 = vld [vmem:[#allocation5 + $0x2c8] sm:$0xff]  ;;  %v210_v36 = vld [vmem:[#allocation5 + $0x2d0] sm:$0xff] }
  0xb9   :  { %2576 = vmatprep.subr.bf16.mxu0 %v2575_v62  ;;  %v516_v62 = vld [vmem:[#allocation5 + $0xc60] sm:$0xff]  ;;  %v211_v29 = vld [vmem:[#allocation5 + $0x2d8] sm:$0xff]  ;;  %v529_v30 = vld [vmem:[#allocation5 + $0xcc8] sm:$0xff] }
  0xba   :  { %v531_v31 = vld [vmem:[#allocation5 + $0xcd8] sm:$0xff]  ;;  %v2287_v35 = vpack.c.bf16 %v211_v29, %v209_v28  ;;  %v528_v37 = vld [vmem:[#allocation5 + $0xcc0] sm:$0xff]  ;;  %v213_v41 = vld [vmem:[#allocation5 + $0x2e8] sm:$0xff] }
  0xbb   :  { %2258 = vmatpush1.bf16.msra.mxu1 %v2257_v4  ;;  %v523_v4 = vld [vmem:[#allocation5 + $0xc98] sm:$0xff]  ;;  %v2607_v40 = vpack.c.bf16 %v531_v31, %v529_v30  ;;  %v533_v44 = vld [vmem:[#allocation5 + $0xce8] sm:$0xff]  ;;  %v212_v50 = vld [vmem:[#allocation5 + $0x2e0] sm:$0xff] }
  0xbc   :  { %2578 = vmatpush1.bf16.msra.mxu0 %v2577_v5  ;;  %2260 = vmatprep.subr.bf16.mxu1 %v2259_v6  ;;  %v2277_v5 = vpack.c.bf16 %v198_v60, %v196_v59  ;;  %v2597_v6 = vpack.c.bf16 %v518_v0, %v516_v62  ;;  %v2599_v12 = vpack.c.bf16 %v523_v4, %v521_v3  ;;  %v215_v42 = vld [vmem:[#allocation5 + $0x2f8] sm:$0xff]  ;;  %v534_v55 = vld [vmem:[#allocation5 + $0xcf0] sm:$0xff]  ;;  %v216_v62 = vld [vmem:[#allocation5 + $0x300] sm:$0xff] }
  0xbd   :  { %2580 = vmatprep.subr.bf16.mxu0 %v2579_v10  ;;  %v520_v10 = vld [vmem:[#allocation5 + $0xc80] sm:$0xff]  ;;  %v535_v45 = vld [vmem:[#allocation5 + $0xcf8] sm:$0xff]  ;;  %v2291_v49 = vpack.c.bf16 %v215_v42, %v213_v41  ;;  %v538_v2 = vld [vmem:[#allocation5 + $0xd10] sm:$0xff] }
  0xbe   :  { %v2611_v54 = vpack.c.bf16 %v535_v45, %v533_v44  ;;  %v536_v0 = vld [vmem:[#allocation5 + $0xd00] sm:$0xff]  ;;  %v221_v3 = vld [vmem:[#allocation5 + $0x328] sm:$0xff]  ;;  %v223_v4 = vld [vmem:[#allocation5 + $0x338] sm:$0xff] }
  0xbf   :  { %2262 = vmatpush1.bf16.msra.mxu1 %v2261_v18  ;;  %v2281_v18 = vpack.c.bf16 %v202_v9, %v200_v8  ;;  %v2617_v8 = vpack.c.bf16 %v538_v2, %v536_v0  ;;  %v2299_v9 = vpack.c.bf16 %v223_v4, %v221_v3  ;;  %v546_v29 = vld [vmem:[#allocation5 + $0xd50] sm:$0xff]  ;;  %v229_v30 = vld [vmem:[#allocation5 + $0x368] sm:$0xff]  ;;  %v231_v31 = vld [vmem:[#allocation5 + $0x378] sm:$0xff] }
  0xc0   :  { %2582 = vmatpush1.bf16.msra.mxu0 %v2581_v19  ;;  %2264 = vmatprep.subr.bf16.mxu1 %v2263_v20  ;;  %v2601_v19 = vpack.c.bf16 %v522_v13, %v520_v10  ;;  %v2283_v20 = vpack.c.bf16 %v207_v15, %v205_v14  ;;  %v220_v10 = vld [vmem:[#allocation5 + $0x320] sm:$0xff]  ;;  %v542_v15 = vld [vmem:[#allocation5 + $0xd30] sm:$0xff]  ;;  %v233_v44 = vld [vmem:[#allocation5 + $0x388] sm:$0xff] }
  0xc1   :  { %2584 = vmatprep.subr.bf16.mxu0 %v2583_v26  ;;  %v2603_v26 = vpack.c.bf16 %v527_v17, %v525_v16  ;;  %v540_v13 = vld [vmem:[#allocation5 + $0xd20] sm:$0xff]  ;;  %v225_v16 = vld [vmem:[#allocation5 + $0x348] sm:$0xff]  ;;  %v227_v17 = vld [vmem:[#allocation5 + $0x358] sm:$0xff] }
  0xc2   :  { %1097 = vmatmul.mubr.f32.vlgmr.msra.gmra.mrb[0].mxu1 %v3440_v25  ;;  %v517_v25 = vld [vmem:[#allocation5 + $0xc68] sm:$0xff]  ;;  %v550_v42 = vld [vmem:[#allocation5 + $0xd70] sm:$0xff]  ;;  %v235_v45 = vld [vmem:[#allocation5 + $0x398] sm:$0xff] }
  0xc3   :  { %2266 = vmatpush1.bf16.msra.mxu1 %v2265_v32  ;;  %1452 = vmatmul.mubr.f32.vlgmr.msra.gmra.mrb[0].mxu0 %v3445_v39  ;;  %v2593_v39 = vpack.c.bf16 %v514_v53, %v512_v51  ;;  %v2595_v63 = vpack.c.bf16 %v519_v56, %v517_v25  ;;  %v2285_v32 = vpack.c.bf16 %v206_v23, %v204_v21  ;;  %v214_v51 = vld [vmem:[#allocation5 + $0x2f0] sm:$0xff]  ;;  %v217_v25 = vld [vmem:[#allocation5 + $0x308] sm:$0xff]  ;;  %v219_v56 = vld [vmem:[#allocation5 + $0x318] sm:$0xff] }
  0xc4   :  { %2586 = vmatpush1.bf16.msra.mxu0 %v2585_v33  ;;  %2268 = vmatprep.subr.bf16.mxu1 %v2267_v34  ;;  %v208_v33 = vld [vmem:[#allocation5 + $0x2c0] sm:$0xff]  ;;  %v2605_v34 = vpack.c.bf16 %v526_v27, %v524_v24  ;;  %v2295_v60 = vpack.c.bf16 %v219_v56, %v217_v25  ;;  %v2621_v21 = vpack.c.bf16 %v542_v15, %v540_v13  ;;  %v554_v25 = vld [vmem:[#allocation5 + $0xd90] sm:$0xff]  ;;  %v237_v56 = vld [vmem:[#allocation5 + $0x3a8] sm:$0xff] }
  0xc5   :  { %2588 = vmatprep.subr.bf16.mxu0 %v2587_v38  ;;  %1167 = vmatprep.mubr.f32.mxu1 %v922_v43  ;;  %v530_v38 = vld [vmem:[#allocation5 + $0xcd0] sm:$0xff]  ;;  %v3458_v43 = vld [vmem:[#allocation2 + $0x18] sm:$0xff]  ;;  %v2303_v23 = vpack.c.bf16 %v227_v17, %v225_v16  ;;  %v224_v24 = vld [vmem:[#allocation5 + $0x340] sm:$0xff] }
  0xc6   :  { %v544_v27 = vld [vmem:[#allocation5 + $0xd40] sm:$0xff]  ;;  %v238_v0 = vld [vmem:[#allocation5 + $0x3b0] sm:$0xff]  ;;  %v241_v4 = vld [vmem:[#allocation5 + $0x3c8] sm:$0xff] }
  0xc7   :  { %2270 = vmatpush1.bf16.msra.mxu1 %v2269_v46  ;;  %v3462_v46 = vrot.slane %v3458_v43, %v3434_v11  ;;  %v558_v3 = vld [vmem:[#allocation5 + $0xdb0] sm:$0xff]  ;;  %v245_v17 = vld [vmem:[#allocation5 + $0x3e8] sm:$0xff] }
  0xc8   :  { %2590 = vmatpush1.bf16.msra.mxu0 %v2589_v47  ;;  %2272 = vmatprep.subr.bf16.mxu1 %v2271_v48  ;;  %v2289_v47 = vpack.c.bf16 %v210_v36, %v208_v33  ;;  %v2609_v48 = vpack.c.bf16 %v530_v38, %v528_v37  ;;  %v551_v33 = vld [vmem:[#allocation5 + $0xd78] sm:$0xff]  ;;  %v2307_v36 = vpack.c.bf16 %v231_v31, %v229_v30  ;;  %v228_v37 = vld [vmem:[#allocation5 + $0x360] sm:$0xff]  ;;  %v230_v38 = vld [vmem:[#allocation5 + $0x370] sm:$0xff] }
  0xc9   :  { %2592 = vmatprep.subr.bf16.mxu0 %v2591_v52  ;;  %v532_v52 = vld [vmem:[#allocation5 + $0xce0] sm:$0xff]  ;;  %v972_v53 = vcombine.high %v3462_v46, %v3462_v46  ;;  %v242_v13 = vld [vmem:[#allocation5 + $0x3d0] sm:$0xff]  ;;  %v249_v31 = vld [vmem:[#allocation5 + $0x408] sm:$0xff] }
  0xca   :  { %v2613_v59 = vpack.c.bf16 %v534_v55, %v532_v52  ;;  %v232_v52 = vld [vmem:[#allocation5 + $0x380] sm:$0xff]  ;;  %v562_v16 = vld [vmem:[#allocation5 + $0xdd0] sm:$0xff] }
  0xcb   :  { %2274 = vmatpush1.bf16.msra.mxu1 %v2273_v57  ;;  %v537_v57 = vld [vmem:[#allocation5 + $0xd08] sm:$0xff]  ;;  %1522 = vmatprep.mubr.f32.mxu0 %v972_v53  ;;  %v234_v53 = vld [vmem:[#allocation5 + $0x390] sm:$0xff] }
  0xcc   :  { %2594 = vmatpush1.bf16.msra.mxu0 %v2593_v39  ;;  %2276 = vmatprep.subr.bf16.mxu1 %v2275_v58  ;;  %v539_v39 = vld [vmem:[#allocation5 + $0xd18] sm:$0xff]  ;;  %v2293_v58 = vpack.c.bf16 %v214_v51, %v212_v50  ;;  %v2311_v51 = vpack.c.bf16 %v235_v45, %v233_v44  ;;  %v566_v30 = vld [vmem:[#allocation5 + $0xdf0] sm:$0xff] }
  0xcd   :  { %2596 = vmatprep.subr.bf16.mxu0 %v2595_v63  ;;  %v218_v63 = vld [vmem:[#allocation5 + $0x310] sm:$0xff]  ;;  %v2615_v1 = vpack.c.bf16 %v539_v39, %v537_v57  ;;  %v239_v57 = vld [vmem:[#allocation5 + $0x3b8] sm:$0xff]  ;;  %v557_v39 = vld [vmem:[#allocation5 + $0xda8] sm:$0xff] }
  0xce   :  { %v570_v45 = vld [vmem:[#allocation5 + $0xe10] sm:$0xff] }
  0xcf   :  { %2278 = vmatpush1.bf16.msra.mxu1 %v2277_v5  ;;  %v541_v5 = vld [vmem:[#allocation5 + $0xd28] sm:$0xff] }
  0xd0   :  { %2598 = vmatpush1.bf16.msra.mxu0 %v2597_v6  ;;  %2280 = vmatprep.subr.bf16.mxu1 %v2279_v7  ;;  %v543_v6 = vld [vmem:[#allocation5 + $0xd38] sm:$0xff]  ;;  %v2297_v7 = vpack.c.bf16 %v218_v63, %v216_v62  ;;  %v2315_v62 = vpack.c.bf16 %v239_v57, %v237_v56  ;;  %v236_v63 = vld [vmem:[#allocation5 + $0x3a0] sm:$0xff] }
  0xd1   :  { %2600 = vmatprep.subr.bf16.mxu0 %v2599_v12  ;;  %v222_v12 = vld [vmem:[#allocation5 + $0x330] sm:$0xff]  ;;  %v2619_v14 = vpack.c.bf16 %v543_v6, %v541_v5  ;;  %v243_v5 = vld [vmem:[#allocation5 + $0x3d8] sm:$0xff]  ;;  %v561_v6 = vld [vmem:[#allocation5 + $0xdc8] sm:$0xff] }
  0xd2   :  { %v3471_v56 = vld [vmem:[#allocation2 + $0x8] sm:$0xff] }
  0xd3   :  { %2282 = vmatpush1.bf16.msra.mxu1 %v2281_v18  ;;  %v545_v18 = vld [vmem:[#allocation5 + $0xd48] sm:$0xff] }
  0xd4   :  { %2602 = vmatpush1.bf16.msra.mxu0 %v2601_v19  ;;  %2284 = vmatprep.subr.bf16.mxu1 %v2283_v20  ;;  %v547_v19 = vld [vmem:[#allocation5 + $0xd58] sm:$0xff]  ;;  %v2301_v20 = vpack.c.bf16 %v222_v12, %v220_v10  ;;  %v2319_v10 = vpack.c.bf16 %v243_v5, %v241_v4  ;;  %v240_v12 = vld [vmem:[#allocation5 + $0x3c0] sm:$0xff] }
  0xd5   :  { %2604 = vmatprep.subr.bf16.mxu0 %v2603_v26  ;;  %v226_v26 = vld [vmem:[#allocation5 + $0x350] sm:$0xff]  ;;  %v2623_v28 = vpack.c.bf16 %v547_v19, %v545_v18  ;;  %v247_v18 = vld [vmem:[#allocation5 + $0x3f8] sm:$0xff]  ;;  %v565_v19 = vld [vmem:[#allocation5 + $0xde8] sm:$0xff] }
  0xd6   :  { %v256_v5 = vld [vmem:[#allocation5 + $0x440] sm:$0xff] }
  0xd7   :  { %2286 = vmatpush1.bf16.msra.mxu1 %v2285_v32  ;;  %v549_v32 = vld [vmem:[#allocation5 + $0xd68] sm:$0xff] }
  0xd8   :  { %2606 = vmatpush1.bf16.msra.mxu0 %v2605_v34  ;;  %2288 = vmatprep.subr.bf16.mxu1 %v2287_v35  ;;  %v2305_v34 = vpack.c.bf16 %v226_v26, %v224_v24  ;;  %v2625_v35 = vpack.c.bf16 %v546_v29, %v544_v27  ;;  %v2627_v41 = vpack.c.bf16 %v551_v33, %v549_v32  ;;  %v244_v26 = vld [vmem:[#allocation5 + $0x3e0] sm:$0xff]  ;;  %v246_v27 = vld [vmem:[#allocation5 + $0x3f0] sm:$0xff]  ;;  %v251_v32 = vld [vmem:[#allocation5 + $0x418] sm:$0xff] }
  0xd9   :  { %2608 = vmatprep.subr.bf16.mxu0 %v2607_v40  ;;  %v548_v40 = vld [vmem:[#allocation5 + $0xd60] sm:$0xff]  ;;  %v2323_v24 = vpack.c.bf16 %v247_v18, %v245_v17  ;;  %v569_v33 = vld [vmem:[#allocation5 + $0xe08] sm:$0xff]  ;;  %v262_v17 = vld [vmem:[#allocation5 + $0x470] sm:$0xff] }
  0xda   :  { %v2629_v50 = vpack.c.bf16 %v550_v42, %v548_v40  ;;  %v248_v40 = vld [vmem:[#allocation5 + $0x400] sm:$0xff] }
  0xdb   :  { %2290 = vmatpush1.bf16.msra.mxu1 %v2289_v47  ;;  %v553_v47 = vld [vmem:[#allocation5 + $0xd88] sm:$0xff]  ;;  %v568_v42 = vld [vmem:[#allocation5 + $0xe00] sm:$0xff] }
  0xdc   :  { %2610 = vmatpush1.bf16.msra.mxu0 %v2609_v48  ;;  %2292 = vmatprep.subr.bf16.mxu1 %v2291_v49  ;;  %v555_v48 = vld [vmem:[#allocation5 + $0xd98] sm:$0xff]  ;;  %v2309_v49 = vpack.c.bf16 %v230_v38, %v228_v37  ;;  %v2327_v38 = vpack.c.bf16 %v251_v32, %v249_v31  ;;  %v580_v18 = vld [vmem:[#allocation5 + $0xe60] sm:$0xff]  ;;  %v266_v31 = vld [vmem:[#allocation5 + $0x490] sm:$0xff] }
  0xdd   :  { %2612 = vmatprep.subr.bf16.mxu0 %v2611_v54  ;;  %v552_v54 = vld [vmem:[#allocation5 + $0xd80] sm:$0xff]  ;;  %v2631_v55 = vpack.c.bf16 %v555_v48, %v553_v47  ;;  %v253_v47 = vld [vmem:[#allocation5 + $0x428] sm:$0xff]  ;;  %v255_v48 = vld [vmem:[#allocation5 + $0x438] sm:$0xff] }
  0xde   :  { %v584_v32 = vld [vmem:[#allocation5 + $0xe80] sm:$0xff] }
  0xdf   :  { %2294 = vmatpush1.bf16.msra.mxu1 %v2293_v58  ;;  %v559_v58 = vld [vmem:[#allocation5 + $0xdb8] sm:$0xff] }
  0xe0   :  { %2614 = vmatpush1.bf16.msra.mxu0 %v2613_v59  ;;  %2296 = vmatprep.subr.bf16.mxu1 %v2295_v60  ;;  %v2313_v59 = vpack.c.bf16 %v234_v53, %v232_v52  ;;  %v2633_v60 = vpack.c.bf16 %v554_v25, %v552_v54  ;;  %v2635_v2 = vpack.c.bf16 %v559_v58, %v557_v39  ;;  %v252_v52 = vld [vmem:[#allocation5 + $0x420] sm:$0xff]  ;;  %v574_v39 = vld [vmem:[#allocation5 + $0xe30] sm:$0xff]  ;;  %v257_v58 = vld [vmem:[#allocation5 + $0x448] sm:$0xff] }
  0xe1   :  { %2616 = vmatprep.subr.bf16.mxu0 %v2615_v1  ;;  %v556_v1 = vld [vmem:[#allocation5 + $0xda0] sm:$0xff]  ;;  %v2649_v53 = vpack.c.bf16 %v570_v45, %v568_v42  ;;  %v2331_v54 = vpack.c.bf16 %v255_v48, %v253_v47  ;;  %v270_v45 = vld [vmem:[#allocation5 + $0x4b0] sm:$0xff] }
  0xe2   :  { %v572_v25 = vld [vmem:[#allocation5 + $0xe20] sm:$0xff] }
  0xe3   :  { %2298 = vmatpush1.bf16.msra.mxu1 %v2297_v7  ;;  %v563_v7 = vld [vmem:[#allocation5 + $0xdd8] sm:$0xff]  ;;  %v588_v47 = vld [vmem:[#allocation5 + $0xea0] sm:$0xff] }
  0xe4   :  { %2618 = vmatpush1.bf16.msra.mxu0 %v2617_v8  ;;  %2300 = vmatprep.subr.bf16.mxu1 %v2299_v9  ;;  %v2317_v8 = vpack.c.bf16 %v238_v0, %v236_v63  ;;  %v2637_v9 = vpack.c.bf16 %v558_v3, %v556_v1  ;;  %v2639_v15 = vpack.c.bf16 %v563_v7, %v561_v6  ;;  %v579_v63 = vld [vmem:[#allocation5 + $0xe58] sm:$0xff]  ;;  %v258_v6 = vld [vmem:[#allocation5 + $0x450] sm:$0xff]  ;;  %v576_v7 = vld [vmem:[#allocation5 + $0xe40] sm:$0xff] }
  0xe5   :  { %2620 = vmatprep.subr.bf16.mxu0 %v2619_v14  ;;  %v560_v14 = vld [vmem:[#allocation5 + $0xdc0] sm:$0xff]  ;;  %v2653_v3 = vpack.c.bf16 %v574_v39, %v572_v25  ;;  %v274_v39 = vld [vmem:[#allocation5 + $0x4d0] sm:$0xff] }
  0xe7   :  { %2302 = vmatpush1.bf16.msra.mxu1 %v2301_v20  ;;  %v567_v20 = vld [vmem:[#allocation5 + $0xdf8] sm:$0xff] }
  0xe8   :  { %2622 = vmatpush1.bf16.msra.mxu0 %v2621_v21  ;;  %2304 = vmatprep.subr.bf16.mxu1 %v2303_v23  ;;  %v2321_v21 = vpack.c.bf16 %v242_v13, %v240_v12  ;;  %v2641_v23 = vpack.c.bf16 %v562_v16, %v560_v14  ;;  %v2643_v29 = vpack.c.bf16 %v567_v20, %v565_v19  ;;  %v581_v12 = vld [vmem:[#allocation5 + $0xe68] sm:$0xff]  ;;  %v583_v13 = vld [vmem:[#allocation5 + $0xe78] sm:$0xff]  ;;  %v260_v16 = vld [vmem:[#allocation5 + $0x460] sm:$0xff] }
  0xe9   :  { %2624 = vmatprep.subr.bf16.mxu0 %v2623_v28  ;;  %v564_v28 = vld [vmem:[#allocation5 + $0xde0] sm:$0xff]  ;;  %v2659_v19 = vpack.c.bf16 %v583_v13, %v581_v12  ;;  %v582_v20 = vld [vmem:[#allocation5 + $0xe70] sm:$0xff]  ;;  %v283_v12 = vld [vmem:[#allocation5 + $0x518] sm:$0xff] }
  0xea   :  { %v2645_v37 = vpack.c.bf16 %v566_v30, %v564_v28  ;;  %v2661_v28 = vpack.c.bf16 %v582_v20, %v580_v18  ;;  %v264_v30 = vld [vmem:[#allocation5 + $0x480] sm:$0xff]  ;;  %v601_v13 = vld [vmem:[#allocation5 + $0xf08] sm:$0xff]  ;;  %v282_v18 = vld [vmem:[#allocation5 + $0x510] sm:$0xff] }
  0xeb   :  { %2306 = vmatpush1.bf16.msra.mxu1 %v2305_v34  ;;  %v571_v34 = vld [vmem:[#allocation5 + $0xe18] sm:$0xff] }
  0xec   :  { %2626 = vmatpush1.bf16.msra.mxu0 %v2625_v35  ;;  %2308 = vmatprep.subr.bf16.mxu1 %v2307_v36  ;;  %v957_v35 = vcombine.high %v3458_v43, %v3458_v43  ;;  %v2325_v36 = vpack.c.bf16 %v246_v27, %v244_v26  ;;  %v2647_v44 = vpack.c.bf16 %v571_v34, %v569_v33  ;;  %v587_v26 = vld [vmem:[#allocation5 + $0xe98] sm:$0xff]  ;;  %v586_v34 = vld [vmem:[#allocation5 + $0xe90] sm:$0xff] }
  0xed   :  { %2628 = vmatprep.subr.bf16.mxu0 %v2627_v41  ;;  %v250_v41 = vld [vmem:[#allocation5 + $0x410] sm:$0xff]  ;;  %v2341_v27 = vpack.c.bf16 %v262_v17, %v260_v16  ;;  %v280_v17 = vld [vmem:[#allocation5 + $0x500] sm:$0xff] }
  0xee   :  { %v2329_v43 = vpack.c.bf16 %v250_v41, %v248_v40  ;;  %v2345_v40 = vpack.c.bf16 %v266_v31, %v264_v30  ;;  %v2665_v41 = vpack.c.bf16 %v586_v34, %v584_v32  ;;  %v284_v31 = vld [vmem:[#allocation5 + $0x520] sm:$0xff]  ;;  %v286_v32 = vld [vmem:[#allocation5 + $0x530] sm:$0xff] }
  0xef   :  { %2310 = vmatpush1.bf16.msra.mxu1 %v2309_v49  ;;  %v573_v49 = vld [vmem:[#allocation5 + $0xe28] sm:$0xff] }
  0xf0   :  { %2630 = vmatpush1.bf16.msra.mxu0 %v2629_v50  ;;  %2312 = vmatprep.subr.bf16.mxu1 %v2311_v51  ;;  %v575_v50 = vld [vmem:[#allocation5 + $0xe38] sm:$0xff]  ;;  %v3469_v51 = vrot.slane %v957_v35, %v3434_v11  ;;  %v269_v35 = vld [vmem:[#allocation5 + $0x4a8] sm:$0xff] }
  0xf1   :  { %2632 = vmatprep.subr.bf16.mxu0 %v2631_v55  ;;  %v254_v55 = vld [vmem:[#allocation5 + $0x430] sm:$0xff]  ;;  %v2651_v57 = vpack.c.bf16 %v575_v50, %v573_v49  ;;  %v273_v50 = vld [vmem:[#allocation5 + $0x4c8] sm:$0xff] }
  0xf2   :  { %v973_v0 = vcombine.high %v3469_v51, %v3469_v51  ;;  %v2333_v1 = vpack.c.bf16 %v254_v55, %v252_v52  ;;  %v590_v49 = vld [vmem:[#allocation5 + $0xeb0] sm:$0xff]  ;;  %v593_v52 = vld [vmem:[#allocation5 + $0xec8] sm:$0xff] }
  0xf3   :  { %2314 = vmatpush1.bf16.msra.mxu1 %v2313_v59  ;;  %v259_v59 = vld [vmem:[#allocation5 + $0x458] sm:$0xff]  ;;  %v2669_v55 = vpack.c.bf16 %v590_v49, %v588_v47  ;;  %v290_v47 = vld [vmem:[#allocation5 + $0x550] sm:$0xff] }
  0xf4   :  { %2634 = vmatpush1.bf16.msra.mxu0 %v2633_v60  ;;  %2316 = vmatprep.subr.bf16.mxu1 %v2315_v62  ;;  %v3475_v60 = vrot.slane %v3471_v56, %v3434_v11  ;;  %v577_v62 = vld [vmem:[#allocation5 + $0xe48] sm:$0xff]  ;;  %v2335_v4 = vpack.c.bf16 %v259_v59, %v257_v58  ;;  %v592_v58 = vld [vmem:[#allocation5 + $0xec0] sm:$0xff] }
  0xf5   :  { %2636 = vmatprep.subr.bf16.mxu0 %v2635_v2 }
  0xf6   :  { %v938_v2 = vcombine.high %v3475_v60, %v3475_v60 }
  0xf7   :  { %2318 = vmatpush1.bf16.msra.mxu1 %v2317_v8  ;;  %v578_v8 = vld [vmem:[#allocation5 + $0xe50] sm:$0xff] }
  0xf8   :  { %2638 = vmatpush1.bf16.msra.mxu0 %v2637_v9  ;;  %2320 = vmatprep.subr.bf16.mxu1 %v2319_v10  ;;  %v261_v9 = vld [vmem:[#allocation5 + $0x468] sm:$0xff]  ;;  %v263_v10 = vld [vmem:[#allocation5 + $0x478] sm:$0xff]  ;;  %v2657_v14 = vpack.c.bf16 %v578_v8, %v576_v7  ;;  %v278_v7 = vld [vmem:[#allocation5 + $0x4f0] sm:$0xff] }
  0xf9   :  { %2640 = vmatprep.subr.bf16.mxu0 %v2639_v15  ;;  %v2339_v15 = vpack.c.bf16 %v263_v10, %v261_v9  ;;  %v598_v9 = vld [vmem:[#allocation5 + $0xef0] sm:$0xff]  ;;  %v281_v10 = vld [vmem:[#allocation5 + $0x508] sm:$0xff] }
  0xfa   :  { %v2359_v16 = vpack.c.bf16 %v283_v12, %v281_v10  ;;  %v618_v10 = vld [vmem:[#allocation5 + $0xf90] sm:$0xff]  ;;  %v301_v12 = vld [vmem:[#allocation5 + $0x5a8] sm:$0xff] }
  0xfb   :  { %2322 = vmatpush1.bf16.msra.mxu1 %v2321_v21  ;;  %v265_v21 = vld [vmem:[#allocation5 + $0x488] sm:$0xff] }
  0xfc   :  { %2642 = vmatpush1.bf16.msra.mxu0 %v2641_v23  ;;  %2324 = vmatprep.subr.bf16.mxu1 %v2323_v24  ;;  %v267_v23 = vld [vmem:[#allocation5 + $0x498] sm:$0xff]  ;;  %v585_v24 = vld [vmem:[#allocation5 + $0xe88] sm:$0xff] }
  0xfd   :  { %2644 = vmatprep.subr.bf16.mxu0 %v2643_v29  ;;  %v2343_v29 = vpack.c.bf16 %v267_v23, %v265_v21  ;;  %v2663_v33 = vpack.c.bf16 %v587_v26, %v585_v24  ;;  %v602_v21 = vld [vmem:[#allocation5 + $0xf10] sm:$0xff]  ;;  %v285_v23 = vld [vmem:[#allocation5 + $0x528] sm:$0xff]  ;;  %v287_v24 = vld [vmem:[#allocation5 + $0x538] sm:$0xff] }
  0xfe   :  { %v605_v26 = vld [vmem:[#allocation5 + $0xf28] sm:$0xff]  ;;  %v2363_v30 = vpack.c.bf16 %v287_v24, %v285_v23  ;;  %v622_v23 = vld [vmem:[#allocation5 + $0xfb0] sm:$0xff] }
  0xff   :  { %2326 = vmatpush1.bf16.msra.mxu1 %v2325_v36  ;;  %v271_v36 = vld [vmem:[#allocation5 + $0x4b8] sm:$0xff]  ;;  %v305_v24 = vld [vmem:[#allocation5 + $0x5c8] sm:$0xff] }
 0x100   :  { %2646 = vmatpush1.bf16.msra.mxu0 %v2645_v37  ;;  %2328 = vmatprep.subr.bf16.mxu1 %v2327_v38  ;;  %v589_v37 = vld [vmem:[#allocation5 + $0xea8] sm:$0xff]  ;;  %v591_v38 = vld [vmem:[#allocation5 + $0xeb8] sm:$0xff]  ;;  %v2347_v42 = vpack.c.bf16 %v271_v36, %v269_v35  ;;  %v606_v35 = vld [vmem:[#allocation5 + $0xf30] sm:$0xff] }
 0x101   :  { %2648 = vmatprep.subr.bf16.mxu0 %v2647_v44  ;;  %v268_v44 = vld [vmem:[#allocation5 + $0x4a0] sm:$0xff]  ;;  %v2667_v48 = vpack.c.bf16 %v591_v38, %v589_v37  ;;  %v289_v36 = vld [vmem:[#allocation5 + $0x548] sm:$0xff]  ;;  %v291_v37 = vld [vmem:[#allocation5 + $0x558] sm:$0xff] }
 0x102   :  { %1168 = vmatmul.mubr.f32.vlgmr.msra.gmra.mrb[0].mxu1 %v3452_v22  ;;  %v2655_v22 = vpack.c.bf16 %v579_v63, %v577_v62  ;;  %v594_v62 = vld [vmem:[#allocation5 + $0xed0] sm:$0xff]  ;;  %v277_v63 = vld [vmem:[#allocation5 + $0x4e8] sm:$0xff] }
 0x103   :  { %2330 = vmatpush1.bf16.msra.mxu1 %v2329_v43  ;;  %1523 = vmatmul.mubr.f32.vlgmr.msra.gmra.mrb[0].mxu0 %v3462_v46  ;;  %v2337_v46 = vpack.c.bf16 %v258_v6, %v256_v5  ;;  %v275_v43 = vld [vmem:[#allocation5 + $0x4d8] sm:$0xff]  ;;  %v276_v6 = vld [vmem:[#allocation5 + $0x4e0] sm:$0xff]  ;;  %v609_v38 = vld [vmem:[#allocation5 + $0xf48] sm:$0xff] }
 0x104   :  { %2650 = vmatpush1.bf16.msra.mxu0 %v2649_v53  ;;  %2332 = vmatprep.subr.bf16.mxu1 %v2331_v54  ;;  %v595_v53 = vld [vmem:[#allocation5 + $0xed8] sm:$0xff]  ;;  %v2349_v54 = vpack.c.bf16 %v270_v45, %v268_v44  ;;  %v2351_v25 = vpack.c.bf16 %v275_v43, %v273_v50  ;;  %v2367_v44 = vpack.c.bf16 %v291_v37, %v289_v36  ;;  %v288_v45 = vld [vmem:[#allocation5 + $0x540] sm:$0xff]  ;;  %v610_v50 = vld [vmem:[#allocation5 + $0xf50] sm:$0xff] }
 0x105   :  { %2652 = vmatprep.subr.bf16.mxu0 %v2651_v57  ;;  %1238 = vmatprep.mubr.f32.mxu1 %v938_v2  ;;  %v272_v57 = vld [vmem:[#allocation5 + $0x4c0] sm:$0xff]  ;;  %v2671_v59 = vpack.c.bf16 %v595_v53, %v593_v52  ;;  %v599_v2 = vld [vmem:[#allocation5 + $0xef8] sm:$0xff]  ;;  %v293_v43 = vld [vmem:[#allocation5 + $0x568] sm:$0xff] }
 0x106   :  { %1593 = vmatprep.mubr.f32.mxu0 %v973_v0  ;;  %v279_v0 = vld [vmem:[#allocation5 + $0x4f8] sm:$0xff]  ;;  %v613_v53 = vld [vmem:[#allocation5 + $0xf68] sm:$0xff]  ;;  %v626_v36 = vld [vmem:[#allocation5 + $0xfd0] sm:$0xff] }
 0x107   :  { %2334 = vmatpush1.bf16.msra.mxu1 %v2333_v1  ;;  %v597_v1 = vld [vmem:[#allocation5 + $0xee8] sm:$0xff]  ;;  %v2355_v5 = vpack.c.bf16 %v279_v0, %v277_v63  ;;  %v295_v52 = vld [vmem:[#allocation5 + $0x578] sm:$0xff]  ;;  %v614_v63 = vld [vmem:[#allocation5 + $0xf70] sm:$0xff] }
 0x108   :  { %2654 = vmatpush1.bf16.msra.mxu0 %v2653_v3  ;;  %2336 = vmatprep.subr.bf16.mxu1 %v2335_v4  ;;  %v2353_v3 = vpack.c.bf16 %v274_v39, %v272_v57  ;;  %v2673_v4 = vpack.c.bf16 %v594_v62, %v592_v58  ;;  %v2675_v8 = vpack.c.bf16 %v599_v2, %v597_v1  ;;  %v292_v39 = vld [vmem:[#allocation5 + $0x560] sm:$0xff]  ;;  %v294_v58 = vld [vmem:[#allocation5 + $0x570] sm:$0xff]  ;;  %v297_v0 = vld [vmem:[#allocation5 + $0x588] sm:$0xff] }
 0x109   :  { %2656 = vmatprep.subr.bf16.mxu0 %v2655_v22  ;;  %v596_v22 = vld [vmem:[#allocation5 + $0xee0] sm:$0xff]  ;;  %v2371_v57 = vpack.c.bf16 %v295_v52, %v293_v43  ;;  %v299_v1 = vld [vmem:[#allocation5 + $0x598] sm:$0xff]  ;;  %v617_v2 = vld [vmem:[#allocation5 + $0xf88] sm:$0xff] }
 0x10a   :  { %v309_v37 = vld [vmem:[#allocation5 + $0x5e8] sm:$0xff]  ;;  %v630_v43 = vld [vmem:[#allocation5 + $0xff0] sm:$0xff] }
 0x10b   :  { %2338 = vmatpush1.bf16.msra.mxu1 %v2337_v46  ;;  %v603_v46 = vld [vmem:[#allocation5 + $0xf18] sm:$0xff]  ;;  %v313_v52 = vld [vmem:[#allocation5 + $0x608] sm:$0xff] }
 0x10c   :  { %2658 = vmatpush1.bf16.msra.mxu0 %v2657_v14  ;;  %2340 = vmatprep.subr.bf16.mxu1 %v2339_v15  ;;  %v2357_v14 = vpack.c.bf16 %v278_v7, %v276_v6  ;;  %v2677_v15 = vpack.c.bf16 %v598_v9, %v596_v22  ;;  %v2679_v20 = vpack.c.bf16 %v603_v46, %v601_v13  ;;  %v296_v7 = vld [vmem:[#allocation5 + $0x580] sm:$0xff]  ;;  %v298_v22 = vld [vmem:[#allocation5 + $0x590] sm:$0xff]  ;;  %v303_v13 = vld [vmem:[#allocation5 + $0x5b8] sm:$0xff] }
 0x10d   :  { %2660 = vmatprep.subr.bf16.mxu0 %v2659_v19  ;;  %v600_v19 = vld [vmem:[#allocation5 + $0xf00] sm:$0xff]  ;;  %v2375_v6 = vpack.c.bf16 %v299_v1, %v297_v0  ;;  %v621_v46 = vld [vmem:[#allocation5 + $0xfa8] sm:$0xff] }
 0x10e   :  { %v632_v0 = vld [vmem:[#allocation5 + $0x1000] sm:$0xff] }
 0x10f   :  { %2342 = vmatpush1.bf16.msra.mxu1 %v2341_v27  ;;  %v607_v27 = vld [vmem:[#allocation5 + $0xf38] sm:$0xff] }
 0x110   :  { %2662 = vmatpush1.bf16.msra.mxu0 %v2661_v28  ;;  %2344 = vmatprep.subr.bf16.mxu1 %v2343_v29  ;;  %v2361_v28 = vpack.c.bf16 %v282_v18, %v280_v17  ;;  %v2681_v29 = vpack.c.bf16 %v602_v21, %v600_v19  ;;  %v2683_v34 = vpack.c.bf16 %v607_v27, %v605_v26  ;;  %v300_v18 = vld [vmem:[#allocation5 + $0x5a0] sm:$0xff]  ;;  %v302_v19 = vld [vmem:[#allocation5 + $0x5b0] sm:$0xff]  ;;  %v307_v26 = vld [vmem:[#allocation5 + $0x5d8] sm:$0xff] }
 0x111   :  { %2664 = vmatprep.subr.bf16.mxu0 %v2663_v33  ;;  %v604_v33 = vld [vmem:[#allocation5 + $0xf20] sm:$0xff]  ;;  %v2379_v17 = vpack.c.bf16 %v303_v13, %v301_v12  ;;  %v625_v27 = vld [vmem:[#allocation5 + $0xfc8] sm:$0xff]  ;;  %v318_v12 = vld [vmem:[#allocation5 + $0x630] sm:$0xff] }
 0x112   :  { %v636_v13 = vld [vmem:[#allocation5 + $0x1020] sm:$0xff] }
 0x113   :  { %2346 = vmatpush1.bf16.msra.mxu1 %v2345_v40  ;;  %v611_v40 = vld [vmem:[#allocation5 + $0xf58] sm:$0xff] }
 0x114   :  { %2666 = vmatpush1.bf16.msra.mxu0 %v2665_v41  ;;  %2348 = vmatprep.subr.bf16.mxu1 %v2347_v42  ;;  %v2365_v41 = vpack.c.bf16 %v286_v32, %v284_v31  ;;  %v2685_v42 = vpack.c.bf16 %v606_v35, %v604_v33  ;;  %v2687_v49 = vpack.c.bf16 %v611_v40, %v609_v38  ;;  %v304_v32 = vld [vmem:[#allocation5 + $0x5c0] sm:$0xff]  ;;  %v306_v33 = vld [vmem:[#allocation5 + $0x5d0] sm:$0xff]  ;;  %v311_v38 = vld [vmem:[#allocation5 + $0x5f8] sm:$0xff] }
 0x115   :  { %2668 = vmatprep.subr.bf16.mxu0 %v2667_v48  ;;  %v608_v48 = vld [vmem:[#allocation5 + $0xf40] sm:$0xff]  ;;  %v2383_v31 = vpack.c.bf16 %v307_v26, %v305_v24  ;;  %v629_v40 = vld [vmem:[#allocation5 + $0xfe8] sm:$0xff] }
 0x116   :  { %v320_v26 = vld [vmem:[#allocation5 + $0x640] sm:$0xff] }
 0x117   :  { %2350 = vmatpush1.bf16.msra.mxu1 %v2349_v54  ;;  %v615_v54 = vld [vmem:[#allocation5 + $0xf78] sm:$0xff] }
 0x118   :  { %2670 = vmatpush1.bf16.msra.mxu0 %v2669_v55  ;;  %2352 = vmatprep.subr.bf16.mxu1 %v2351_v25  ;;  %v2369_v55 = vpack.c.bf16 %v290_v47, %v288_v45  ;;  %v2689_v25 = vpack.c.bf16 %v610_v50, %v608_v48  ;;  %v2691_v62 = vpack.c.bf16 %v615_v54, %v613_v53  ;;  %v308_v47 = vld [vmem:[#allocation5 + $0x5e0] sm:$0xff]  ;;  %v310_v48 = vld [vmem:[#allocation5 + $0x5f0] sm:$0xff]  ;;  %v315_v53 = vld [vmem:[#allocation5 + $0x618] sm:$0xff] }
 0x119   :  { %2672 = vmatprep.subr.bf16.mxu0 %v2671_v59  ;;  %v612_v59 = vld [vmem:[#allocation5 + $0xf60] sm:$0xff]  ;;  %v2387_v45 = vpack.c.bf16 %v311_v38, %v309_v37  ;;  %v923_v54 = vcombine.high %v3471_v56, %v3471_v56  ;;  %v326_v37 = vld [vmem:[#allocation5 + $0x670] sm:$0xff] }
 0x11a   :  { %v644_v38 = vld [vmem:[#allocation5 + $0x1060] sm:$0xff] }
 0x11b   :  { %2354 = vmatpush1.bf16.msra.mxu1 %v2353_v3  ;;  %v619_v3 = vld [vmem:[#allocation5 + $0xf98] sm:$0xff]  ;;  %v3488_v56 = vrot.slane %v923_v54, %v3434_v11 }
 0x11c   :  { %2674 = vmatpush1.bf16.msra.mxu0 %v2673_v4  ;;  %2356 = vmatprep.subr.bf16.mxu1 %v2355_v5  ;;  %v2373_v4 = vpack.c.bf16 %v294_v58, %v292_v39  ;;  %v2693_v5 = vpack.c.bf16 %v614_v63, %v612_v59  ;;  %v2695_v9 = vpack.c.bf16 %v619_v3, %v617_v2  ;;  %v3485_v39 = vld [vmem:[#allocation2 + $0x20] sm:$0xff]  ;;  %v317_v3 = vld [vmem:[#allocation5 + $0x628] sm:$0xff] }
 0x11d   :  { %2676 = vmatprep.subr.bf16.mxu0 %v2675_v8  ;;  %v616_v8 = vld [vmem:[#allocation5 + $0xf80] sm:$0xff]  ;;  %v2391_v59 = vpack.c.bf16 %v315_v53, %v313_v52  ;;  %v314_v63 = vld [vmem:[#allocation5 + $0x610] sm:$0xff] }
 0x11e   :  { %v634_v2 = vld [vmem:[#allocation5 + $0x1010] sm:$0xff]  ;;  %v648_v53 = vld [vmem:[#allocation5 + $0x1080] sm:$0xff] }
 0x11f   :  { %2358 = vmatpush1.bf16.msra.mxu1 %v2357_v14  ;;  %v623_v14 = vld [vmem:[#allocation5 + $0xfb8] sm:$0xff]  ;;  %v330_v52 = vld [vmem:[#allocation5 + $0x690] sm:$0xff] }
 0x120   :  { %2678 = vmatpush1.bf16.msra.mxu0 %v2677_v15  ;;  %2360 = vmatprep.subr.bf16.mxu1 %v2359_v16  ;;  %v2377_v15 = vpack.c.bf16 %v298_v22, %v296_v7  ;;  %v2697_v16 = vpack.c.bf16 %v618_v10, %v616_v8  ;;  %v2699_v21 = vpack.c.bf16 %v623_v14, %v621_v46  ;;  %v316_v10 = vld [vmem:[#allocation5 + $0x620] sm:$0xff]  ;;  %v638_v14 = vld [vmem:[#allocation5 + $0x1030] sm:$0xff] }
 0x121   :  { %2680 = vmatprep.subr.bf16.mxu0 %v2679_v20  ;;  %v620_v20 = vld [vmem:[#allocation5 + $0xfa0] sm:$0xff]  ;;  %v3492_v7 = vrot.slane %v3485_v39, %v3434_v11  ;;  %v2713_v8 = vpack.c.bf16 %v634_v2, %v632_v0  ;;  %v334_v2 = vld [vmem:[#allocation5 + $0x6b0] sm:$0xff] }
 0x123   :  { %2362 = vmatpush1.bf16.msra.mxu1 %v2361_v28  ;;  %v627_v28 = vld [vmem:[#allocation5 + $0xfd8] sm:$0xff] }
 0x124   :  { %2682 = vmatpush1.bf16.msra.mxu0 %v2681_v29  ;;  %2364 = vmatprep.subr.bf16.mxu1 %v2363_v30  ;;  %v2381_v29 = vpack.c.bf16 %v302_v19, %v300_v18  ;;  %v2701_v30 = vpack.c.bf16 %v622_v23, %v620_v20  ;;  %v2703_v35 = vpack.c.bf16 %v627_v28, %v625_v27  ;;  %v641_v18 = vld [vmem:[#allocation5 + $0x1048] sm:$0xff]  ;;  %v643_v19 = vld [vmem:[#allocation5 + $0x1058] sm:$0xff]  ;;  %v322_v27 = vld [vmem:[#allocation5 + $0x650] sm:$0xff] }
 0x125   :  { %2684 = vmatprep.subr.bf16.mxu0 %v2683_v34  ;;  %v624_v34 = vld [vmem:[#allocation5 + $0xfc0] sm:$0xff]  ;;  %v989_v20 = vcombine.high %v3492_v7, %v3492_v7  ;;  %v2717_v23 = vpack.c.bf16 %v638_v14, %v636_v13  ;;  %v338_v14 = vld [vmem:[#allocation5 + $0x6d0] sm:$0xff] }
 0x126   :  { %v640_v28 = vld [vmem:[#allocation5 + $0x1040] sm:$0xff] }
 0x127   :  { %2366 = vmatpush1.bf16.msra.mxu1 %v2365_v41  ;;  %v631_v41 = vld [vmem:[#allocation5 + $0xff8] sm:$0xff] }
 0x128   :  { %2686 = vmatpush1.bf16.msra.mxu0 %v2685_v42  ;;  %2368 = vmatprep.subr.bf16.mxu1 %v2367_v44  ;;  %v2385_v42 = vpack.c.bf16 %v306_v33, %v304_v32  ;;  %v2705_v44 = vpack.c.bf16 %v626_v36, %v624_v34  ;;  %v2707_v50 = vpack.c.bf16 %v631_v41, %v629_v40  ;;  %v645_v32 = vld [vmem:[#allocation5 + $0x1068] sm:$0xff]  ;;  %v647_v33 = vld [vmem:[#allocation5 + $0x1078] sm:$0xff]  ;;  %v324_v36 = vld [vmem:[#allocation5 + $0x660] sm:$0xff] }
 0x129   :  { %2688 = vmatprep.subr.bf16.mxu0 %v2687_v49  ;;  %v628_v49 = vld [vmem:[#allocation5 + $0xfe0] sm:$0xff]  ;;  %v2401_v34 = vpack.c.bf16 %v322_v27, %v320_v26  ;;  %v2723_v40 = vpack.c.bf16 %v647_v33, %v645_v32  ;;  %v646_v41 = vld [vmem:[#allocation5 + $0x1070] sm:$0xff]  ;;  %v347_v32 = vld [vmem:[#allocation5 + $0x718] sm:$0xff] }
 0x12a   :  { %v2709_v58 = vpack.c.bf16 %v630_v43, %v628_v49  ;;  %v2725_v49 = vpack.c.bf16 %v646_v41, %v644_v38  ;;  %v328_v43 = vld [vmem:[#allocation5 + $0x680] sm:$0xff]  ;;  %v665_v33 = vld [vmem:[#allocation5 + $0x1108] sm:$0xff]  ;;  %v346_v38 = vld [vmem:[#allocation5 + $0x710] sm:$0xff] }
 0x12b   :  { %2370 = vmatpush1.bf16.msra.mxu1 %v2369_v55  ;;  %v633_v55 = vld [vmem:[#allocation5 + $0x1008] sm:$0xff]  ;;  %v340_v27 = vld [vmem:[#allocation5 + $0x6e0] sm:$0xff] }
 0x12c   :  { %2690 = vmatpush1.bf16.msra.mxu0 %v2689_v25  ;;  %2372 = vmatprep.subr.bf16.mxu1 %v2371_v57  ;;  %v635_v25 = vld [vmem:[#allocation5 + $0x1018] sm:$0xff]  ;;  %v2389_v57 = vpack.c.bf16 %v310_v48, %v308_v47  ;;  %v2405_v48 = vpack.c.bf16 %v326_v37, %v324_v36  ;;  %v344_v37 = vld [vmem:[#allocation5 + $0x700] sm:$0xff] }
 0x12d   :  { %2692 = vmatprep.subr.bf16.mxu0 %v2691_v62  ;;  %v312_v62 = vld [vmem:[#allocation5 + $0x600] sm:$0xff]  ;;  %v2711_v1 = vpack.c.bf16 %v635_v25, %v633_v55  ;;  %v651_v47 = vld [vmem:[#allocation5 + $0x1098] sm:$0xff]  ;;  %v650_v55 = vld [vmem:[#allocation5 + $0x1090] sm:$0xff] }
 0x12e   :  { %v2393_v22 = vpack.c.bf16 %v314_v63, %v312_v62  ;;  %v333_v25 = vld [vmem:[#allocation5 + $0x6a8] sm:$0xff]  ;;  %v2409_v62 = vpack.c.bf16 %v330_v52, %v328_v43  ;;  %v2729_v63 = vpack.c.bf16 %v650_v55, %v648_v53  ;;  %v348_v52 = vld [vmem:[#allocation5 + $0x720] sm:$0xff]  ;;  %v350_v53 = vld [vmem:[#allocation5 + $0x730] sm:$0xff] }
 0x12f   :  { %2374 = vmatpush1.bf16.msra.mxu1 %v2373_v4  ;;  %v319_v4 = vld [vmem:[#allocation5 + $0x638] sm:$0xff] }
 0x130   :  { %2694 = vmatpush1.bf16.msra.mxu0 %v2693_v5  ;;  %2376 = vmatprep.subr.bf16.mxu1 %v2375_v6  ;;  %v637_v5 = vld [vmem:[#allocation5 + $0x1028] sm:$0xff]  ;;  %v639_v6 = vld [vmem:[#allocation5 + $0x1038] sm:$0xff] }
 0x131   :  { %2696 = vmatprep.subr.bf16.mxu0 %v2695_v9  ;;  %v2395_v9 = vpack.c.bf16 %v319_v4, %v317_v3  ;;  %v2715_v46 = vpack.c.bf16 %v639_v6, %v637_v5  ;;  %v652_v3 = vld [vmem:[#allocation5 + $0x10a0] sm:$0xff]  ;;  %v654_v5 = vld [vmem:[#allocation5 + $0x10b0] sm:$0xff]  ;;  %v337_v6 = vld [vmem:[#allocation5 + $0x6c8] sm:$0xff] }
 0x133   :  { %2378 = vmatpush1.bf16.msra.mxu1 %v2377_v15  ;;  %v321_v15 = vld [vmem:[#allocation5 + $0x648] sm:$0xff] }
 0x134   :  { %2698 = vmatpush1.bf16.msra.mxu0 %v2697_v16  ;;  %2380 = vmatprep.subr.bf16.mxu1 %v2379_v17  ;;  %v323_v16 = vld [vmem:[#allocation5 + $0x658] sm:$0xff]  ;;  %v939_v17 = vcombine.high %v3488_v56, %v3488_v56 }
 0x135   :  { %2700 = vmatprep.subr.bf16.mxu0 %v2699_v21  ;;  %v2397_v21 = vpack.c.bf16 %v318_v12, %v316_v10  ;;  %v2399_v24 = vpack.c.bf16 %v323_v16, %v321_v15  ;;  %v2733_v12 = vpack.c.bf16 %v654_v5, %v652_v3  ;;  %v656_v15 = vld [vmem:[#allocation5 + $0x10c0] sm:$0xff]  ;;  %v354_v3 = vld [vmem:[#allocation5 + $0x750] sm:$0xff] }
 0x137   :  { %2382 = vmatpush1.bf16.msra.mxu1 %v2381_v29  ;;  %v2719_v29 = vpack.c.bf16 %v643_v19, %v641_v18  ;;  %v341_v18 = vld [vmem:[#allocation5 + $0x6e8] sm:$0xff]  ;;  %v343_v19 = vld [vmem:[#allocation5 + $0x6f8] sm:$0xff] }
 0x138   :  { %2702 = vmatpush1.bf16.msra.mxu0 %v2701_v30  ;;  %2384 = vmatprep.subr.bf16.mxu1 %v2383_v31  ;;  %v642_v30 = vld [vmem:[#allocation5 + $0x1050] sm:$0xff]  ;;  %v327_v31 = vld [vmem:[#allocation5 + $0x678] sm:$0xff]  ;;  %v2419_v26 = vpack.c.bf16 %v343_v19, %v341_v18  ;;  %v361_v19 = vld [vmem:[#allocation5 + $0x788] sm:$0xff] }
 0x139   :  { %2704 = vmatprep.subr.bf16.mxu0 %v2703_v35  ;;  %v678_v18 = vld [vmem:[#allocation5 + $0x1170] sm:$0xff] }
 0x13b   :  { %2386 = vmatpush1.bf16.msra.mxu1 %v2385_v42  ;;  %v329_v42 = vld [vmem:[#allocation5 + $0x688] sm:$0xff] }
 0x13c   :  { %2706 = vmatpush1.bf16.msra.mxu0 %v2705_v44  ;;  %2388 = vmatprep.subr.bf16.mxu1 %v2387_v45  ;;  %v331_v44 = vld [vmem:[#allocation5 + $0x698] sm:$0xff]  ;;  %v649_v45 = vld [vmem:[#allocation5 + $0x1088] sm:$0xff] }
 0x13d   :  { %2708 = vmatprep.subr.bf16.mxu0 %v2707_v50  ;;  %v2407_v50 = vpack.c.bf16 %v331_v44, %v329_v42  ;;  %v2727_v54 = vpack.c.bf16 %v651_v47, %v649_v45  ;;  %v666_v42 = vld [vmem:[#allocation5 + $0x1110] sm:$0xff]  ;;  %v349_v44 = vld [vmem:[#allocation5 + $0x728] sm:$0xff]  ;;  %v351_v45 = vld [vmem:[#allocation5 + $0x738] sm:$0xff] }
 0x13e   :  { %v669_v47 = vld [vmem:[#allocation5 + $0x1128] sm:$0xff]  ;;  %v2427_v43 = vpack.c.bf16 %v351_v45, %v349_v44  ;;  %v686_v44 = vld [vmem:[#allocation5 + $0x11b0] sm:$0xff] }
 0x13f   :  { %2390 = vmatpush1.bf16.msra.mxu1 %v2389_v57  ;;  %v335_v57 = vld [vmem:[#allocation5 + $0x6b8] sm:$0xff]  ;;  %v369_v45 = vld [vmem:[#allocation5 + $0x7c8] sm:$0xff] }
 0x140   :  { %2710 = vmatpush1.bf16.msra.mxu0 %v2709_v58  ;;  %2392 = vmatprep.subr.bf16.mxu1 %v2391_v59  ;;  %v653_v58 = vld [vmem:[#allocation5 + $0x10a8] sm:$0xff]  ;;  %v655_v59 = vld [vmem:[#allocation5 + $0x10b8] sm:$0xff]  ;;  %v2411_v0 = vpack.c.bf16 %v335_v57, %v333_v25  ;;  %v670_v25 = vld [vmem:[#allocation5 + $0x1130] sm:$0xff] }
 0x141   :  { %2712 = vmatprep.subr.bf16.mxu0 %v2711_v1  ;;  %v332_v1 = vld [vmem:[#allocation5 + $0x6a0] sm:$0xff]  ;;  %v2731_v4 = vpack.c.bf16 %v655_v59, %v653_v58  ;;  %v353_v57 = vld [vmem:[#allocation5 + $0x748] sm:$0xff]  ;;  %v355_v58 = vld [vmem:[#allocation5 + $0x758] sm:$0xff] }
 0x142   :  { %1239 = vmatmul.mubr.f32.vlgmr.msra.gmra.mrb[0].mxu1 %v3475_v60  ;;  %v325_v60 = vld [vmem:[#allocation5 + $0x668] sm:$0xff]  ;;  %v2413_v10 = vpack.c.bf16 %v334_v2, %v332_v1  ;;  %v2431_v1 = vpack.c.bf16 %v355_v58, %v353_v57  ;;  %v352_v2 = vld [vmem:[#allocation5 + $0x740] sm:$0xff]  ;;  %v690_v57 = vld [vmem:[#allocation5 + $0x11d0] sm:$0xff] }
 0x143   :  { %2394 = vmatpush1.bf16.msra.mxu1 %v2393_v22  ;;  %1594 = vmatmul.mubr.f32.vlgmr.msra.gmra.mrb[0].mxu0 %v3469_v51  ;;  %v2721_v51 = vpack.c.bf16 %v642_v30, %v640_v28  ;;  %v2403_v35 = vpack.c.bf16 %v327_v31, %v325_v60  ;;  %v339_v22 = vld [vmem:[#allocation5 + $0x6d8] sm:$0xff]  ;;  %v342_v28 = vld [vmem:[#allocation5 + $0x6f0] sm:$0xff]  ;;  %v345_v31 = vld [vmem:[#allocation5 + $0x708] sm:$0xff] }
 0x144   :  { %2714 = vmatpush1.bf16.msra.mxu0 %v2713_v8  ;;  %2396 = vmatprep.subr.bf16.mxu1 %v2395_v9  ;;  %v657_v8 = vld [vmem:[#allocation5 + $0x10c8] sm:$0xff]  ;;  %v659_v9 = vld [vmem:[#allocation5 + $0x10d8] sm:$0xff]  ;;  %v2415_v13 = vpack.c.bf16 %v339_v22, %v337_v6  ;;  %v662_v60 = vld [vmem:[#allocation5 + $0x10f0] sm:$0xff]  ;;  %v2423_v36 = vpack.c.bf16 %v347_v32, %v345_v31 }
 0x145   :  { %2716 = vmatprep.subr.bf16.mxu0 %v2715_v46  ;;  %1309 = vmatprep.mubr.f32.mxu1 %v939_v17  ;;  %v336_v46 = vld [vmem:[#allocation5 + $0x6c0] sm:$0xff]  ;;  %v2735_v16 = vpack.c.bf16 %v659_v9, %v657_v8  ;;  %v658_v17 = vld [vmem:[#allocation5 + $0x10d0] sm:$0xff]  ;;  %v673_v59 = vld [vmem:[#allocation5 + $0x1148] sm:$0xff] }
 0x146   :  { %1664 = vmatprep.mubr.f32.mxu0 %v989_v20  ;;  %v661_v20 = vld [vmem:[#allocation5 + $0x10e8] sm:$0xff]  ;;  %v674_v6 = vld [vmem:[#allocation5 + $0x1150] sm:$0xff]  ;;  %v359_v8 = vld [vmem:[#allocation5 + $0x778] sm:$0xff] }
 0x147   :  { %2398 = vmatpush1.bf16.msra.mxu1 %v2397_v21  ;;  %v663_v21 = vld [vmem:[#allocation5 + $0x10f8] sm:$0xff]  ;;  %v357_v22 = vld [vmem:[#allocation5 + $0x768] sm:$0xff]  ;;  %v682_v31 = vld [vmem:[#allocation5 + $0x1190] sm:$0xff] }
 0x148   :  { %2718 = vmatpush1.bf16.msra.mxu0 %v2717_v23  ;;  %2400 = vmatprep.subr.bf16.mxu1 %v2399_v24  ;;  %v2417_v23 = vpack.c.bf16 %v338_v14, %v336_v46  ;;  %v2737_v24 = vpack.c.bf16 %v658_v17, %v656_v15  ;;  %v2739_v30 = vpack.c.bf16 %v663_v21, %v661_v20  ;;  %v677_v9 = vld [vmem:[#allocation5 + $0x1168] sm:$0xff]  ;;  %v356_v14 = vld [vmem:[#allocation5 + $0x760] sm:$0xff]  ;;  %v358_v15 = vld [vmem:[#allocation5 + $0x770] sm:$0xff] }
 0x149   :  { %2720 = vmatprep.subr.bf16.mxu0 %v2719_v29  ;;  %v660_v29 = vld [vmem:[#allocation5 + $0x10e0] sm:$0xff]  ;;  %v2435_v46 = vpack.c.bf16 %v359_v8, %v357_v22  ;;  %v363_v20 = vld [vmem:[#allocation5 + $0x798] sm:$0xff]  ;;  %v681_v21 = vld [vmem:[#allocation5 + $0x1188] sm:$0xff] }
 0x14a   :  { %v365_v32 = vld [vmem:[#allocation5 + $0x7a8] sm:$0xff]  ;;  %v694_v22 = vld [vmem:[#allocation5 + $0x11f0] sm:$0xff] }
 0x14b   :  { %2402 = vmatpush1.bf16.msra.mxu1 %v2401_v34  ;;  %v667_v34 = vld [vmem:[#allocation5 + $0x1118] sm:$0xff]  ;;  %v373_v58 = vld [vmem:[#allocation5 + $0x7e8] sm:$0xff] }
 0x14c   :  { %2722 = vmatpush1.bf16.msra.mxu0 %v2721_v51  ;;  %2404 = vmatprep.subr.bf16.mxu1 %v2403_v35  ;;  %v2421_v51 = vpack.c.bf16 %v342_v28, %v340_v27  ;;  %v2741_v35 = vpack.c.bf16 %v662_v60, %v660_v29  ;;  %v2743_v41 = vpack.c.bf16 %v667_v34, %v665_v33  ;;  %v360_v28 = vld [vmem:[#allocation5 + $0x780] sm:$0xff]  ;;  %v362_v29 = vld [vmem:[#allocation5 + $0x790] sm:$0xff]  ;;  %v367_v33 = vld [vmem:[#allocation5 + $0x7b8] sm:$0xff] }
 0x14d   :  { %2724 = vmatprep.subr.bf16.mxu0 %v2723_v40  ;;  %v664_v40 = vld [vmem:[#allocation5 + $0x1100] sm:$0xff]  ;;  %v2439_v27 = vpack.c.bf16 %v363_v20, %v361_v19  ;;  %v685_v34 = vld [vmem:[#allocation5 + $0x11a8] sm:$0xff]  ;;  %v698_v20 = vld [vmem:[#allocation5 + $0x1210] sm:$0xff] }
 0x14e   :  { %v377_v8 = vld [vmem:[#allocation5 + $0x808] sm:$0xff] }
 0x14f   :  { %2406 = vmatpush1.bf16.msra.mxu1 %v2405_v48  ;;  %v671_v48 = vld [vmem:[#allocation5 + $0x1138] sm:$0xff] }
 0x150   :  { %2726 = vmatpush1.bf16.msra.mxu0 %v2725_v49  ;;  %2408 = vmatprep.subr.bf16.mxu1 %v2407_v50  ;;  %v2425_v49 = vpack.c.bf16 %v346_v38, %v344_v37  ;;  %v2745_v50 = vpack.c.bf16 %v666_v42, %v664_v40  ;;  %v2747_v55 = vpack.c.bf16 %v671_v48, %v669_v47  ;;  %v364_v38 = vld [vmem:[#allocation5 + $0x7a0] sm:$0xff]  ;;  %v366_v40 = vld [vmem:[#allocation5 + $0x7b0] sm:$0xff]  ;;  %v371_v47 = vld [vmem:[#allocation5 + $0x7d8] sm:$0xff] }
 0x151   :  { %2728 = vmatprep.subr.bf16.mxu0 %v2727_v54  ;;  %v668_v54 = vld [vmem:[#allocation5 + $0x1120] sm:$0xff]  ;;  %v2443_v37 = vpack.c.bf16 %v367_v33, %v365_v32  ;;  %v689_v48 = vld [vmem:[#allocation5 + $0x11c8] sm:$0xff] }
 0x152   :  { %v700_v32 = vld [vmem:[#allocation5 + $0x1220] sm:$0xff] }
 0x153   :  { %2410 = vmatpush1.bf16.msra.mxu1 %v2409_v62  ;;  %v675_v62 = vld [vmem:[#allocation5 + $0x1158] sm:$0xff] }
 0x154   :  { %2730 = vmatpush1.bf16.msra.mxu0 %v2729_v63  ;;  %2412 = vmatprep.subr.bf16.mxu1 %v2411_v0  ;;  %v2429_v63 = vpack.c.bf16 %v350_v53, %v348_v52  ;;  %v2749_v0 = vpack.c.bf16 %v670_v25, %v668_v54  ;;  %v2751_v5 = vpack.c.bf16 %v675_v62, %v673_v59  ;;  %v368_v53 = vld [vmem:[#allocation5 + $0x7c0] sm:$0xff]  ;;  %v370_v54 = vld [vmem:[#allocation5 + $0x7d0] sm:$0xff]  ;;  %v375_v59 = vld [vmem:[#allocation5 + $0x7f8] sm:$0xff] }
 0x155   :  { %2732 = vmatprep.subr.bf16.mxu0 %v2731_v4  ;;  %v672_v4 = vld [vmem:[#allocation5 + $0x1140] sm:$0xff]  ;;  %v2447_v52 = vpack.c.bf16 %v371_v47, %v369_v45  ;;  %v693_v62 = vld [vmem:[#allocation5 + $0x11e8] sm:$0xff]  ;;  %v386_v47 = vld [vmem:[#allocation5 + $0x850] sm:$0xff] }
 0x156   :  { %v384_v45 = vld [vmem:[#allocation5 + $0x840] sm:$0xff] }
 0x157   :  { %2414 = vmatpush1.bf16.msra.mxu1 %v2413_v10  ;;  %v679_v10 = vld [vmem:[#allocation5 + $0x1178] sm:$0xff] }
 0x158   :  { %2734 = vmatpush1.bf16.msra.mxu0 %v2733_v12  ;;  %2416 = vmatprep.subr.bf16.mxu1 %v2415_v13  ;;  %v2433_v12 = vpack.c.bf16 %v354_v3, %v352_v2  ;;  %v2753_v13 = vpack.c.bf16 %v674_v6, %v672_v4  ;;  %v2755_v17 = vpack.c.bf16 %v679_v10, %v677_v9  ;;  %v372_v3 = vld [vmem:[#allocation5 + $0x7e0] sm:$0xff]  ;;  %v374_v4 = vld [vmem:[#allocation5 + $0x7f0] sm:$0xff]  ;;  %v379_v9 = vld [vmem:[#allocation5 + $0x818] sm:$0xff] }
 0x159   :  { %2736 = vmatprep.subr.bf16.mxu0 %v2735_v16  ;;  %v676_v16 = vld [vmem:[#allocation5 + $0x1160] sm:$0xff]  ;;  %v2451_v2 = vpack.c.bf16 %v375_v59, %v373_v58  ;;  %v697_v10 = vld [vmem:[#allocation5 + $0x1208] sm:$0xff] }
 0x15a   :  { %v708_v58 = vld [vmem:[#allocation5 + $0x1260] sm:$0xff] }
 0x15b   :  { %2418 = vmatpush1.bf16.msra.mxu1 %v2417_v23  ;;  %v683_v23 = vld [vmem:[#allocation5 + $0x1198] sm:$0xff] }
 0x15c   :  { %2738 = vmatpush1.bf16.msra.mxu0 %v2737_v24  ;;  %2420 = vmatprep.subr.bf16.mxu1 %v2419_v26  ;;  %v2437_v24 = vpack.c.bf16 %v358_v15, %v356_v14  ;;  %v2757_v26 = vpack.c.bf16 %v678_v18, %v676_v16  ;;  %v2759_v60 = vpack.c.bf16 %v683_v23, %v681_v21  ;;  %v376_v16 = vld [vmem:[#allocation5 + $0x800] sm:$0xff]  ;;  %v381_v21 = vld [vmem:[#allocation5 + $0x828] sm:$0xff]  ;;  %v383_v23 = vld [vmem:[#allocation5 + $0x838] sm:$0xff] }
 0x15d   :  { %2740 = vmatprep.subr.bf16.mxu0 %v2739_v30  ;;  %v680_v30 = vld [vmem:[#allocation5 + $0x1180] sm:$0xff]  ;;  %v2455_v15 = vpack.c.bf16 %v379_v9, %v377_v8 }
 0x15e   :  { %v696_v18 = vld [vmem:[#allocation5 + $0x1200] sm:$0xff] }
 0x15f   :  { %2422 = vmatpush1.bf16.msra.mxu1 %v2421_v51  ;;  %v687_v51 = vld [vmem:[#allocation5 + $0x11b8] sm:$0xff]  ;;  %v712_v8 = vld [vmem:[#allocation5 + $0x1280] sm:$0xff] }
 0x160   :  { %2742 = vmatpush1.bf16.msra.mxu0 %v2741_v35  ;;  %2424 = vmatprep.subr.bf16.mxu1 %v2423_v36  ;;  %v2441_v35 = vpack.c.bf16 %v362_v29, %v360_v28  ;;  %v2761_v36 = vpack.c.bf16 %v682_v31, %v680_v30  ;;  %v2763_v42 = vpack.c.bf16 %v687_v51, %v685_v34  ;;  %v382_v31 = vld [vmem:[#allocation5 + $0x830] sm:$0xff]  ;;  %v385_v51 = vld [vmem:[#allocation5 + $0x848] sm:$0xff] }
 0x161   :  { %2744 = vmatprep.subr.bf16.mxu0 %v2743_v41  ;;  %v684_v41 = vld [vmem:[#allocation5 + $0x11a0] sm:$0xff]  ;;  %v2777_v29 = vpack.c.bf16 %v698_v20, %v696_v18  ;;  %v2459_v30 = vpack.c.bf16 %v383_v23, %v381_v21  ;;  %v702_v34 = vld [vmem:[#allocation5 + $0x1230] sm:$0xff] }
 0x162   :  { %v396_v18 = vld [vmem:[#allocation5 + $0x8a0] sm:$0xff]  ;;  %v718_v23 = vld [vmem:[#allocation5 + $0x12b0] sm:$0xff] }
 0x163   :  { %2426 = vmatpush1.bf16.msra.mxu1 %v2425_v49  ;;  %v691_v49 = vld [vmem:[#allocation5 + $0x11d8] sm:$0xff]  ;;  %v716_v20 = vld [vmem:[#allocation5 + $0x12a0] sm:$0xff] }
 0x164   :  { %2746 = vmatpush1.bf16.msra.mxu0 %v2745_v50  ;;  %2428 = vmatprep.subr.bf16.mxu1 %v2427_v43  ;;  %v2445_v50 = vpack.c.bf16 %v366_v40, %v364_v38  ;;  %v2765_v43 = vpack.c.bf16 %v686_v44, %v684_v41  ;;  %v2767_v25 = vpack.c.bf16 %v691_v49, %v689_v48  ;;  %v707_v38 = vld [vmem:[#allocation5 + $0x1258] sm:$0xff]  ;;  %v704_v48 = vld [vmem:[#allocation5 + $0x1240] sm:$0xff] }
 0x165   :  { %2748 = vmatprep.subr.bf16.mxu0 %v2747_v55  ;;  %v688_v55 = vld [vmem:[#allocation5 + $0x11c0] sm:$0xff] }
 0x167   :  { %2430 = vmatpush1.bf16.msra.mxu1 %v2429_v63  ;;  %v695_v63 = vld [vmem:[#allocation5 + $0x11f8] sm:$0xff] }
 0x168   :  { %2750 = vmatpush1.bf16.msra.mxu0 %v2749_v0  ;;  %2432 = vmatprep.subr.bf16.mxu1 %v2431_v1  ;;  %v2449_v0 = vpack.c.bf16 %v370_v54, %v368_v53  ;;  %v2769_v1 = vpack.c.bf16 %v690_v57, %v688_v55  ;;  %v2771_v6 = vpack.c.bf16 %v695_v63, %v693_v62  ;;  %v711_v53 = vld [vmem:[#allocation5 + $0x1278] sm:$0xff]  ;;  %v390_v57 = vld [vmem:[#allocation5 + $0x870] sm:$0xff]  ;;  %v393_v63 = vld [vmem:[#allocation5 + $0x888] sm:$0xff] }
 0x169   :  { %2752 = vmatprep.subr.bf16.mxu0 %v2751_v5  ;;  %v692_v5 = vld [vmem:[#allocation5 + $0x11e0] sm:$0xff]  ;;  %v2465_v54 = vpack.c.bf16 %v386_v47, %v384_v45  ;;  %v710_v62 = vld [vmem:[#allocation5 + $0x1270] sm:$0xff] }
 0x16a   :  { %v2773_v14 = vpack.c.bf16 %v694_v22, %v692_v5  ;;  %v394_v22 = vld [vmem:[#allocation5 + $0x890] sm:$0xff]  ;;  %v404_v45 = vld [vmem:[#allocation5 + $0x8e0] sm:$0xff] }
 0x16b   :  { %2434 = vmatpush1.bf16.msra.mxu1 %v2433_v12  ;;  %v699_v12 = vld [vmem:[#allocation5 + $0x1218] sm:$0xff]  ;;  %v406_v47 = vld [vmem:[#allocation5 + $0x8f0] sm:$0xff] }
 0x16c   :  { %2754 = vmatpush1.bf16.msra.mxu0 %v2753_v13  ;;  %2436 = vmatprep.subr.bf16.mxu1 %v2435_v46  ;;  %v974_v13 = vcombine.high %v3485_v39, %v3485_v39  ;;  %v2453_v46 = vpack.c.bf16 %v374_v4, %v372_v3  ;;  %v2775_v19 = vpack.c.bf16 %v699_v12, %v697_v10  ;;  %v714_v10 = vld [vmem:[#allocation5 + $0x1290] sm:$0xff]  ;;  %v397_v12 = vld [vmem:[#allocation5 + $0x8a8] sm:$0xff] }
 0x16d   :  { %2756 = vmatprep.subr.bf16.mxu0 %v2755_v17  ;;  %v378_v17 = vld [vmem:[#allocation5 + $0x810] sm:$0xff]  ;;  %v2789_v4 = vpack.c.bf16 %v710_v62, %v708_v58  ;;  %v728_v58 = vld [vmem:[#allocation5 + $0x1300] sm:$0xff] }
 0x16e   :  { %v3505_v39 = vrot.slane %v974_v13, %v3434_v11  ;;  %v2457_v28 = vpack.c.bf16 %v378_v17, %v376_v16  ;;  %v399_v13 = vld [vmem:[#allocation5 + $0x8b8] sm:$0xff]  ;;  %v2793_v16 = vpack.c.bf16 %v714_v10, %v712_v8  ;;  %v730_v62 = vld [vmem:[#allocation5 + $0x1310] sm:$0xff]  ;;  %v732_v8 = vld [vmem:[#allocation5 + $0x1320] sm:$0xff] }
 0x16f   :  { %2438 = vmatpush1.bf16.msra.mxu1 %v2437_v24  ;;  %v3502_v24 = vld.sshfl [vmem:[#allocation2 + $0x10] sm:$0xff pattern:$0x76325410]  ;;  %v2475_v17 = vpack.c.bf16 %v399_v13, %v397_v12  ;;  %v734_v10 = vld [vmem:[#allocation5 + $0x1330] sm:$0xff]  ;;  %v417_v12 = vld [vmem:[#allocation5 + $0x948] sm:$0xff] }
 0x170   :  { %2758 = vmatpush1.bf16.msra.mxu0 %v2757_v26  ;;  %2440 = vmatprep.subr.bf16.mxu1 %v2439_v27  ;;  %v701_v26 = vld [vmem:[#allocation5 + $0x1228] sm:$0xff]  ;;  %v703_v27 = vld [vmem:[#allocation5 + $0x1238] sm:$0xff]  ;;  %v990_v40 = vcombine.high %v3505_v39, %v3505_v39 }
 0x171   :  { %2760 = vmatprep.subr.bf16.mxu0 %v2759_v60  ;;  %v380_v60 = vld [vmem:[#allocation5 + $0x820] sm:$0xff]  ;;  %v2779_v33 = vpack.c.bf16 %v703_v27, %v701_v26  ;;  %v401_v26 = vld [vmem:[#allocation5 + $0x8c8] sm:$0xff]  ;;  %v403_v27 = vld [vmem:[#allocation5 + $0x8d8] sm:$0xff] }
 0x172   :  { %v2461_v41 = vpack.c.bf16 %v382_v31, %v380_v60  ;;  %v2797_v60 = vpack.c.bf16 %v718_v23, %v716_v20  ;;  %v2479_v31 = vpack.c.bf16 %v403_v27, %v401_v26  ;;  %v419_v13 = vld [vmem:[#allocation5 + $0x958] sm:$0xff]  ;;  %v736_v20 = vld [vmem:[#allocation5 + $0x1340] sm:$0xff]  ;;  %v738_v23 = vld [vmem:[#allocation5 + $0x1350] sm:$0xff] }
 0x173   :  { %2442 = vmatpush1.bf16.msra.mxu1 %v2441_v35  ;;  %v387_v35 = vld [vmem:[#allocation5 + $0x858] sm:$0xff]  ;;  %v421_v26 = vld [vmem:[#allocation5 + $0x968] sm:$0xff] }
 0x174   :  { %2762 = vmatpush1.bf16.msra.mxu0 %v2761_v36  ;;  %2444 = vmatprep.subr.bf16.mxu1 %v2443_v37  ;;  %v955_v36 = vcombine.high %v3502_v24, %v3502_v24  ;;  %v705_v37 = vld [vmem:[#allocation5 + $0x1248] sm:$0xff]  ;;  %v2463_v44 = vpack.c.bf16 %v387_v35, %v385_v51  ;;  %v722_v35 = vld [vmem:[#allocation5 + $0x12d0] sm:$0xff]  ;;  %v423_v27 = vld [vmem:[#allocation5 + $0x978] sm:$0xff] }
 0x175   :  { %2764 = vmatprep.subr.bf16.mxu0 %v2763_v42  ;;  %v2781_v42 = vpack.c.bf16 %v702_v34, %v700_v32  ;;  %v2783_v49 = vpack.c.bf16 %v707_v38, %v705_v37  ;;  %v400_v32 = vld [vmem:[#allocation5 + $0x8c0] sm:$0xff]  ;;  %v407_v37 = vld [vmem:[#allocation5 + $0x8f8] sm:$0xff]  ;;  %v725_v38 = vld [vmem:[#allocation5 + $0x12e8] sm:$0xff] }
 0x176   :  { %v720_v34 = vld [vmem:[#allocation5 + $0x12c0] sm:$0xff] }
 0x177   :  { %2446 = vmatpush1.bf16.msra.mxu1 %v2445_v50  ;;  %v706_v50 = vld [vmem:[#allocation5 + $0x1250] sm:$0xff] }
 0x178   :  { %2766 = vmatpush1.bf16.msra.mxu0 %v2765_v43  ;;  %2448 = vmatprep.subr.bf16.mxu1 %v2447_v52  ;;  %v391_v43 = vld [vmem:[#allocation5 + $0x878] sm:$0xff]  ;;  %v709_v52 = vld [vmem:[#allocation5 + $0x1268] sm:$0xff] }
 0x179   :  { %2768 = vmatprep.subr.bf16.mxu0 %v2767_v25  ;;  %v388_v25 = vld [vmem:[#allocation5 + $0x860] sm:$0xff]  ;;  %v2787_v59 = vpack.c.bf16 %v711_v53, %v709_v52  ;;  %v729_v52 = vld [vmem:[#allocation5 + $0x1308] sm:$0xff]  ;;  %v731_v53 = vld [vmem:[#allocation5 + $0x1318] sm:$0xff] }
 0x17a   :  { %v2469_v3 = vpack.c.bf16 %v390_v57, %v388_v25  ;;  %v408_v25 = vld [vmem:[#allocation5 + $0x900] sm:$0xff]  ;;  %v410_v57 = vld [vmem:[#allocation5 + $0x910] sm:$0xff] }
 0x17b   :  { %2450 = vmatpush1.bf16.msra.mxu1 %v2449_v0  ;;  %v395_v0 = vld [vmem:[#allocation5 + $0x898] sm:$0xff] }
 0x17c   :  { %2770 = vmatpush1.bf16.msra.mxu0 %v2769_v1  ;;  %2452 = vmatprep.subr.bf16.mxu1 %v2451_v2  ;;  %v713_v1 = vld [vmem:[#allocation5 + $0x1288] sm:$0xff]  ;;  %v715_v2 = vld [vmem:[#allocation5 + $0x1298] sm:$0xff]  ;;  %v2471_v5 = vpack.c.bf16 %v395_v0, %v393_v63 }
 0x17d   :  { %2772 = vmatprep.subr.bf16.mxu0 %v2771_v6  ;;  %v392_v6 = vld [vmem:[#allocation5 + $0x880] sm:$0xff]  ;;  %v2791_v9 = vpack.c.bf16 %v715_v2, %v713_v1  ;;  %v413_v63 = vld [vmem:[#allocation5 + $0x928] sm:$0xff]  ;;  %v415_v0 = vld [vmem:[#allocation5 + $0x938] sm:$0xff] }
 0x17e   :  { %v733_v1 = vld [vmem:[#allocation5 + $0x1328] sm:$0xff]  ;;  %v735_v2 = vld [vmem:[#allocation5 + $0x1338] sm:$0xff] }
 0x17f   :  { %2454 = vmatpush1.bf16.msra.mxu1 %v2453_v46  ;;  %v717_v46 = vld [vmem:[#allocation5 + $0x12a8] sm:$0xff] }
 0x180   :  { %2774 = vmatpush1.bf16.msra.mxu0 %v2773_v14  ;;  %2456 = vmatprep.subr.bf16.mxu1 %v2455_v15  ;;  %v719_v14 = vld [vmem:[#allocation5 + $0x12b8] sm:$0xff]  ;;  %v2473_v15 = vpack.c.bf16 %v394_v22, %v392_v6  ;;  %v412_v6 = vld [vmem:[#allocation5 + $0x920] sm:$0xff]  ;;  %v414_v22 = vld [vmem:[#allocation5 + $0x930] sm:$0xff] }
 0x181   :  { %2776 = vmatprep.subr.bf16.mxu0 %v2775_v19  ;;  %v398_v19 = vld [vmem:[#allocation5 + $0x8b0] sm:$0xff]  ;;  %v2795_v21 = vpack.c.bf16 %v719_v14, %v717_v46  ;;  %v737_v46 = vld [vmem:[#allocation5 + $0x1348] sm:$0xff]  ;;  %v739_v14 = vld [vmem:[#allocation5 + $0x1358] sm:$0xff] }
 0x182   :  { %1310 = vmatmul.mubr.f32.vlgmr.msra.gmra.mrb[0].mxu1 %v3488_v56  ;;  %v389_v56 = vld [vmem:[#allocation5 + $0x868] sm:$0xff] }
 0x183   :  { %2458 = vmatpush1.bf16.msra.mxu1 %v2457_v28  ;;  %1665 = vmatmul.mubr.f32.vlgmr.msra.gmra.mrb[0].mxu0 %v3492_v7  ;;  %v2785_v7 = vpack.c.bf16 %v706_v50, %v704_v48  ;;  %v2467_v55 = vpack.c.bf16 %v391_v43, %v389_v56  ;;  %v721_v28 = vld [vmem:[#allocation5 + $0x12c8] sm:$0xff]  ;;  %v724_v48 = vld [vmem:[#allocation5 + $0x12e0] sm:$0xff]  ;;  %v726_v50 = vld [vmem:[#allocation5 + $0x12f0] sm:$0xff] }
 0x184   :  { %2778 = vmatpush1.bf16.msra.mxu0 %v2777_v29  ;;  %2460 = vmatprep.subr.bf16.mxu1 %v2459_v30  ;;  %v723_v29 = vld [vmem:[#allocation5 + $0x12d8] sm:$0xff]  ;;  %v2477_v30 = vpack.c.bf16 %v398_v19, %v396_v18  ;;  %v409_v56 = vld [vmem:[#allocation5 + $0x908] sm:$0xff]  ;;  %v416_v18 = vld [vmem:[#allocation5 + $0x940] sm:$0xff] }
 0x185   :  { %2780 = vmatprep.subr.bf16.mxu0 %v2779_v33  ;;  %1380 = vmatprep.mubr.f32.mxu1 %v955_v36  ;;  %v402_v33 = vld [vmem:[#allocation5 + $0x8d0] sm:$0xff]  ;;  %v2799_v51 = vpack.c.bf16 %v723_v29, %v721_v28  ;;  %v405_v36 = vld [vmem:[#allocation5 + $0x8e8] sm:$0xff]  ;;  %v411_v43 = vld [vmem:[#allocation5 + $0x918] sm:$0xff] }
 0x186   :  { %1735 = vmatprep.mubr.f32.mxu0 %v990_v40  ;;  %v727_v40 = vld [vmem:[#allocation5 + $0x12f8] sm:$0xff]  ;;  %v418_v19 = vld [vmem:[#allocation5 + $0x950] sm:$0xff]  ;;  %v741_v28 = vld [vmem:[#allocation5 + $0x1368] sm:$0xff] }
 0x187   :  { %2462 = vmatpush1.bf16.msra.mxu1 %v2461_v41  ;;  %v2481_v41 = vpack.c.bf16 %v402_v33, %v400_v32  ;;  %v743_v29 = vld [vmem:[#allocation5 + $0x1378] sm:$0xff]  ;;  %v420_v32 = vld [vmem:[#allocation5 + $0x960] sm:$0xff]  ;;  %v422_v33 = vld [vmem:[#allocation5 + $0x970] sm:$0xff] }
 0x188   :  { %2782 = vmatpush1.bf16.msra.mxu0 %v2781_v42  ;;  %2464 = vmatprep.subr.bf16.mxu1 %v2463_v44  ;;  %v2801_v42 = vpack.c.bf16 %v722_v35, %v720_v34  ;;  %v2483_v44 = vpack.c.bf16 %v407_v37, %v405_v36  ;;  %v740_v34 = vld [vmem:[#allocation5 + $0x1360] sm:$0xff]  ;;  %v742_v35 = vld [vmem:[#allocation5 + $0x1370] sm:$0xff]  ;;  %v425_v36 = vld [vmem:[#allocation5 + $0x988] sm:$0xff] }
 0x189   :  { %2784 = vmatprep.subr.bf16.mxu0 %v2783_v49  ;;  %v2803_v49 = vpack.c.bf16 %v727_v40, %v725_v38  ;;  %v427_v37 = vld [vmem:[#allocation5 + $0x998] sm:$0xff]  ;;  %v745_v38 = vld [vmem:[#allocation5 + $0x1388] sm:$0xff] }
 0x18a   :  { %v747_v40 = vld [vmem:[#allocation5 + $0x1398] sm:$0xff] }
 0x18b   :  { %2466 = vmatpush1.bf16.msra.mxu1 %v2465_v54  ;;  %v2485_v54 = vpack.c.bf16 %v406_v47, %v404_v45  ;;  %v424_v45 = vld [vmem:[#allocation5 + $0x980] sm:$0xff]  ;;  %v426_v47 = vld [vmem:[#allocation5 + $0x990] sm:$0xff] }
 0x18c   :  { %2786 = vmatpush1.bf16.msra.mxu0 %v2785_v7  ;;  %2468 = vmatprep.subr.bf16.mxu1 %v2467_v55  ;;  %v2805_v7 = vpack.c.bf16 %v726_v50, %v724_v48  ;;  %v2487_v55 = vpack.c.bf16 %v411_v43, %v409_v56  ;;  %v744_v48 = vld [vmem:[#allocation5 + $0x1380] sm:$0xff]  ;;  %v746_v50 = vld [vmem:[#allocation5 + $0x1390] sm:$0xff]  ;;  %v429_v56 = vld [vmem:[#allocation5 + $0x9a8] sm:$0xff] }
 0x18d   :  { %2788 = vmatprep.subr.bf16.mxu0 %v2787_v59  ;;  %v2807_v59 = vpack.c.bf16 %v731_v53, %v729_v52  ;;  %v431_v43 = vld [vmem:[#allocation5 + $0x9b8] sm:$0xff]  ;;  %v749_v52 = vld [vmem:[#allocation5 + $0x13a8] sm:$0xff] }
 0x18e   :  { %v751_v53 = vld [vmem:[#allocation5 + $0x13b8] sm:$0xff] }
 0x18f   :  { %2470 = vmatpush1.bf16.msra.mxu1 %v2469_v3  ;;  %v2489_v3 = vpack.c.bf16 %v410_v57, %v408_v25  ;;  %v428_v25 = vld [vmem:[#allocation5 + $0x9a0] sm:$0xff]  ;;  %v430_v57 = vld [vmem:[#allocation5 + $0x9b0] sm:$0xff] }
 0x190   :  { %2790 = vmatpush1.bf16.msra.mxu0 %v2789_v4  ;;  %2472 = vmatprep.subr.bf16.mxu1 %v2471_v5  ;;  %v2809_v4 = vpack.c.bf16 %v730_v62, %v728_v58  ;;  %v2491_v5 = vpack.c.bf16 %v415_v0, %v413_v63  ;;  %v748_v58 = vld [vmem:[#allocation5 + $0x13a0] sm:$0xff]  ;;  %v750_v62 = vld [vmem:[#allocation5 + $0x13b0] sm:$0xff]  ;;  %v433_v63 = vld [vmem:[#allocation5 + $0x9c8] sm:$0xff] }
 0x191   :  { %2792 = vmatprep.subr.bf16.mxu0 %v2791_v9  ;;  %v2811_v9 = vpack.c.bf16 %v735_v2, %v733_v1  ;;  %v435_v0 = vld [vmem:[#allocation5 + $0x9d8] sm:$0xff]  ;;  %v753_v1 = vld [vmem:[#allocation5 + $0x13c8] sm:$0xff] }
 0x192   :  { %v755_v2 = vld [vmem:[#allocation5 + $0x13d8] sm:$0xff] }
 0x193   :  { %2474 = vmatpush1.bf16.msra.mxu1 %v2473_v15  ;;  %v2493_v15 = vpack.c.bf16 %v414_v22, %v412_v6  ;;  %v432_v6 = vld [vmem:[#allocation5 + $0x9c0] sm:$0xff]  ;;  %v434_v22 = vld [vmem:[#allocation5 + $0x9d0] sm:$0xff] }
 0x194   :  { %2794 = vmatpush1.bf16.msra.mxu0 %v2793_v16  ;;  %2476 = vmatprep.subr.bf16.mxu1 %v2475_v17  ;;  %v2813_v16 = vpack.c.bf16 %v734_v10, %v732_v8  ;;  %v2495_v17 = vpack.c.bf16 %v419_v13, %v417_v12  ;;  %v752_v8 = vld [vmem:[#allocation5 + $0x13c0] sm:$0xff]  ;;  %v754_v10 = vld [vmem:[#allocation5 + $0x13d0] sm:$0xff]  ;;  %v437_v12 = vld [vmem:[#allocation5 + $0x9e8] sm:$0xff] }
 0x195   :  { %2796 = vmatprep.subr.bf16.mxu0 %v2795_v21  ;;  %v2815_v21 = vpack.c.bf16 %v739_v14, %v737_v46  ;;  %v439_v13 = vld [vmem:[#allocation5 + $0x9f8] sm:$0xff]  ;;  %v757_v46 = vld [vmem:[#allocation5 + $0x13e8] sm:$0xff] }
 0x196   :  { %v759_v14 = vld [vmem:[#allocation5 + $0x13f8] sm:$0xff] }
 0x197   :  { %2478 = vmatpush1.bf16.msra.mxu1 %v2477_v30  ;;  %v2497_v30 = vpack.c.bf16 %v418_v19, %v416_v18  ;;  %v436_v18 = vld [vmem:[#allocation5 + $0x9e0] sm:$0xff]  ;;  %v438_v19 = vld [vmem:[#allocation5 + $0x9f0] sm:$0xff] }
 0x198   :  { %2798 = vmatpush1.bf16.msra.mxu0 %v2797_v60  ;;  %2480 = vmatprep.subr.bf16.mxu1 %v2479_v31  ;;  %v2817_v60 = vpack.c.bf16 %v738_v23, %v736_v20  ;;  %v2499_v31 = vpack.c.bf16 %v423_v27, %v421_v26  ;;  %v2835_v20 = vpack.c.bf16 %v759_v14, %v757_v46  ;;  %v758_v23 = vld [vmem:[#allocation5 + $0x13f0] sm:$0xff]  ;;  %v3513_v26 = vld [vmem:[#allocation2 + $0x28] sm:$0xff]  ;;  %v761_v27 = vld [vmem:[#allocation5 + $0x1408] sm:$0xff] }
 0x199   :  { %2800 = vmatprep.subr.bf16.mxu0 %v2799_v51  ;;  %v2819_v51 = vpack.c.bf16 %v743_v29, %v741_v28  ;;  %v763_v28 = vld [vmem:[#allocation5 + $0x1418] sm:$0xff]  ;;  %v2517_v29 = vpack.c.bf16 %v438_v19, %v436_v18  ;;  %v793_v46 = vld [vmem:[#allocation5 + $0x1508] sm:$0xff]  ;;  %v794_v18 = vld [vmem:[#allocation5 + $0x1510] sm:$0xff] }
 0x19a   :  { %v795_v14 = vld [vmem:[#allocation5 + $0x1518] sm:$0xff]  ;;  %v797_v19 = vld [vmem:[#allocation5 + $0x1528] sm:$0xff] }
 0x19b   :  { %2482 = vmatpush1.bf16.msra.mxu1 %v2481_v41  ;;  %v2501_v41 = vpack.c.bf16 %v422_v33, %v420_v32  ;;  %v760_v32 = vld [vmem:[#allocation5 + $0x1400] sm:$0xff]  ;;  %v762_v33 = vld [vmem:[#allocation5 + $0x1410] sm:$0xff] }
 0x19c   :  { %2802 = vmatpush1.bf16.msra.mxu0 %v2801_v42  ;;  %2484 = vmatprep.subr.bf16.mxu1 %v2483_v44  ;;  %v2821_v42 = vpack.c.bf16 %v742_v35, %v740_v34  ;;  %v2503_v44 = vpack.c.bf16 %v427_v37, %v425_v36  ;;  %v765_v34 = vld [vmem:[#allocation5 + $0x1428] sm:$0xff]  ;;  %v2841_v35 = vpack.c.bf16 %v762_v33, %v760_v32  ;;  %v800_v33 = vld [vmem:[#allocation5 + $0x1540] sm:$0xff] }
 0x19d   :  { %2804 = vmatprep.subr.bf16.mxu0 %v2803_v49  ;;  %v2823_v49 = vpack.c.bf16 %v747_v40, %v745_v38  ;;  %v764_v38 = vld [vmem:[#allocation5 + $0x1420] sm:$0xff]  ;;  %v766_v40 = vld [vmem:[#allocation5 + $0x1430] sm:$0xff] }
 0x19f   :  { %2486 = vmatpush1.bf16.msra.mxu1 %v2485_v54  ;;  %v2505_v54 = vpack.c.bf16 %v426_v47, %v424_v45  ;;  %v768_v47 = vld [vmem:[#allocation5 + $0x1440] sm:$0xff] }
 0x1a0   :  { %2806 = vmatpush1.bf16.msra.mxu0 %v2805_v7  ;;  %2488 = vmatprep.subr.bf16.mxu1 %v2487_v55  ;;  %v2825_v7 = vpack.c.bf16 %v746_v50, %v744_v48  ;;  %v2507_v55 = vpack.c.bf16 %v431_v43, %v429_v56  ;;  %v770_v48 = vld [vmem:[#allocation5 + $0x1450] sm:$0xff]  ;;  %v775_v50 = vld [vmem:[#allocation5 + $0x1478] sm:$0xff] }
 0x1a1   :  { %2808 = vmatprep.subr.bf16.mxu0 %v2807_v59  ;;  %v2827_v59 = vpack.c.bf16 %v751_v53, %v749_v52  ;;  %v2849_v56 = vpack.c.bf16 %v770_v48, %v768_v47  ;;  %v772_v52 = vld [vmem:[#allocation5 + $0x1460] sm:$0xff]  ;;  %v774_v53 = vld [vmem:[#allocation5 + $0x1470] sm:$0xff] }
 0x1a2   :  { %v808_v47 = vld [vmem:[#allocation5 + $0x1580] sm:$0xff]  ;;  %v810_v48 = vld [vmem:[#allocation5 + $0x1590] sm:$0xff] }
 0x1a3   :  { %2490 = vmatpush1.bf16.msra.mxu1 %v2489_v3  ;;  %v2509_v3 = vpack.c.bf16 %v430_v57, %v428_v25  ;;  %v778_v25 = vld [vmem:[#allocation5 + $0x1490] sm:$0xff]  ;;  %v781_v57 = vld [vmem:[#allocation5 + $0x14a8] sm:$0xff] }
 0x1a4   :  { %2810 = vmatpush1.bf16.msra.mxu0 %v2809_v4  ;;  %2492 = vmatprep.subr.bf16.mxu1 %v2491_v5  ;;  %v2829_v4 = vpack.c.bf16 %v750_v62, %v748_v58  ;;  %v2511_v5 = vpack.c.bf16 %v435_v0, %v433_v63  ;;  %v783_v58 = vld [vmem:[#allocation5 + $0x14b8] sm:$0xff]  ;;  %v780_v63 = vld [vmem:[#allocation5 + $0x14a0] sm:$0xff]  ;;  %v782_v0 = vld [vmem:[#allocation5 + $0x14b0] sm:$0xff] }
 0x1a5   :  { %2812 = vmatprep.subr.bf16.mxu0 %v2811_v9  ;;  %v2831_v9 = vpack.c.bf16 %v755_v2, %v753_v1  ;;  %v2859_v62 = vpack.c.bf16 %v783_v58, %v781_v57  ;;  %v785_v1 = vld [vmem:[#allocation5 + $0x14c8] sm:$0xff]  ;;  %v787_v2 = vld [vmem:[#allocation5 + $0x14d8] sm:$0xff] }
 0x1a6   :  { %v821_v57 = vld [vmem:[#allocation5 + $0x15e8] sm:$0xff]  ;;  %v823_v58 = vld [vmem:[#allocation5 + $0x15f8] sm:$0xff] }
 0x1a7   :  { %2494 = vmatpush1.bf16.msra.mxu1 %v2493_v15  ;;  %v2513_v15 = vpack.c.bf16 %v434_v22, %v432_v6  ;;  %v786_v6 = vld [vmem:[#allocation5 + $0x14d0] sm:$0xff]  ;;  %v789_v22 = vld [vmem:[#allocation5 + $0x14e8] sm:$0xff] }
 0x1a8   :  { %2814 = vmatpush1.bf16.msra.mxu0 %v2813_v16  ;;  %2496 = vmatprep.subr.bf16.mxu1 %v2495_v17  ;;  %v2833_v16 = vpack.c.bf16 %v754_v10, %v752_v8  ;;  %v2515_v17 = vpack.c.bf16 %v439_v13, %v437_v12  ;;  %v791_v8 = vld [vmem:[#allocation5 + $0x14f8] sm:$0xff]  ;;  %v788_v12 = vld [vmem:[#allocation5 + $0x14e0] sm:$0xff]  ;;  %v790_v13 = vld [vmem:[#allocation5 + $0x14f0] sm:$0xff] }
 0x1a9   :  { %2816 = vmatprep.subr.bf16.mxu0 %v2815_v21  ;;  %v756_v21 = vld [vmem:[#allocation5 + $0x13e0] sm:$0xff]  ;;  %v2867_v10 = vpack.c.bf16 %v791_v8, %v789_v22  ;;  %v826_v8 = vld [vmem:[#allocation5 + $0x1610] sm:$0xff] }
 0x1aa   :  { %v824_v22 = vld [vmem:[#allocation5 + $0x1600] sm:$0xff] }
 0x1ab   :  { %2498 = vmatpush1.bf16.msra.mxu1 %v2497_v30  ;;  %v2837_v30 = vpack.c.bf16 %v758_v23, %v756_v21 }
 0x1ac   :  { %2818 = vmatpush1.bf16.msra.mxu0 %v2817_v60  ;;  %2500 = vmatprep.subr.bf16.mxu1 %v2499_v31  ;;  %v3517_v60 = vrot.slane %v3513_v26, %v3434_v11  ;;  %v2839_v31 = vpack.c.bf16 %v763_v28, %v761_v27  ;;  %v796_v27 = vld [vmem:[#allocation5 + $0x1520] sm:$0xff]  ;;  %v798_v28 = vld [vmem:[#allocation5 + $0x1530] sm:$0xff] }
 0x1ad   :  { %2820 = vmatprep.subr.bf16.mxu0 %v2819_v51  ;;  %v767_v51 = vld [vmem:[#allocation5 + $0x1438] sm:$0xff] }
 0x1ae   :  { %v1006_v36 = vcombine.high %v3517_v60, %v3517_v60  ;;  %v2843_v37 = vpack.c.bf16 %v767_v51, %v765_v34  ;;  %v802_v34 = vld [vmem:[#allocation5 + $0x1550] sm:$0xff]  ;;  %v805_v51 = vld [vmem:[#allocation5 + $0x1568] sm:$0xff] }
 0x1af   :  { %2502 = vmatpush1.bf16.msra.mxu1 %v2501_v41  ;;  %v769_v41 = vld [vmem:[#allocation5 + $0x1448] sm:$0xff] }
 0x1b0   :  { %2822 = vmatpush1.bf16.msra.mxu0 %v2821_v42  ;;  %2504 = vmatprep.subr.bf16.mxu1 %v2503_v44  ;;  %v771_v42 = vld [vmem:[#allocation5 + $0x1458] sm:$0xff]  ;;  %v2845_v44 = vpack.c.bf16 %v766_v40, %v764_v38  ;;  %v804_v38 = vld [vmem:[#allocation5 + $0x1560] sm:$0xff]  ;;  %v806_v40 = vld [vmem:[#allocation5 + $0x1570] sm:$0xff] }
 0x1b1   :  { %2824 = vmatprep.subr.bf16.mxu0 %v2823_v49  ;;  %v2847_v45 = vpack.c.bf16 %v771_v42, %v769_v41  ;;  %v773_v49 = vld [vmem:[#allocation5 + $0x1468] sm:$0xff]  ;;  %v811_v42 = vld [vmem:[#allocation5 + $0x1598] sm:$0xff] }
 0x1b2   :  { %v2851_v43 = vpack.c.bf16 %v775_v50, %v773_v49  ;;  %v809_v41 = vld [vmem:[#allocation5 + $0x1588] sm:$0xff]  ;;  %v815_v50 = vld [vmem:[#allocation5 + $0x15b8] sm:$0xff] }
 0x1b3   :  { %2506 = vmatpush1.bf16.msra.mxu1 %v2505_v54  ;;  %v779_v54 = vld [vmem:[#allocation5 + $0x1498] sm:$0xff]  ;;  %v813_v49 = vld [vmem:[#allocation5 + $0x15a8] sm:$0xff] }
 0x1b4   :  { %2826 = vmatpush1.bf16.msra.mxu0 %v2825_v7  ;;  %2508 = vmatprep.subr.bf16.mxu1 %v2507_v55  ;;  %v2853_v7 = vpack.c.bf16 %v774_v53, %v772_v52  ;;  %v776_v55 = vld [vmem:[#allocation5 + $0x1480] sm:$0xff]  ;;  %v814_v53 = vld [vmem:[#allocation5 + $0x15b0] sm:$0xff] }
 0x1b5   :  { %2828 = vmatprep.subr.bf16.mxu0 %v2827_v59  ;;  %v2857_v59 = vpack.c.bf16 %v778_v25, %v776_v55  ;;  %v812_v52 = vld [vmem:[#allocation5 + $0x15a0] sm:$0xff]  ;;  %v818_v25 = vld [vmem:[#allocation5 + $0x15d0] sm:$0xff] }
 0x1b6   :  { %v816_v55 = vld [vmem:[#allocation5 + $0x15c0] sm:$0xff] }
 0x1b7   :  { %2510 = vmatpush1.bf16.msra.mxu1 %v2509_v3  ;;  %v2861_v3 = vpack.c.bf16 %v782_v0, %v780_v63  ;;  %v2899_v63 = vpack.c.bf16 %v823_v58, %v821_v57  ;;  %v820_v0 = vld [vmem:[#allocation5 + $0x15e0] sm:$0xff] }
 0x1b8   :  { %2830 = vmatpush1.bf16.msra.mxu0 %v2829_v4  ;;  %2512 = vmatprep.subr.bf16.mxu1 %v2511_v5  ;;  %v2863_v4 = vpack.c.bf16 %v787_v2, %v785_v1  ;;  %v784_v5 = vld [vmem:[#allocation5 + $0x14c0] sm:$0xff]  ;;  %v822_v1 = vld [vmem:[#allocation5 + $0x15f0] sm:$0xff]  ;;  %v825_v2 = vld [vmem:[#allocation5 + $0x1608] sm:$0xff] }
 0x1b9   :  { %2832 = vmatprep.subr.bf16.mxu0 %v2831_v9  ;;  %v2865_v9 = vpack.c.bf16 %v786_v6, %v784_v5 }
 0x1bb   :  { %2514 = vmatpush1.bf16.msra.mxu1 %v2513_v15  ;;  %v2869_v15 = vpack.c.bf16 %v790_v13, %v788_v12  ;;  %v2905_v12 = vpack.c.bf16 %v826_v8, %v824_v22  ;;  %v856_v22 = vld [vmem:[#allocation5 + $0x1700] sm:$0xff] }
 0x1bc   :  { %2834 = vmatpush1.bf16.msra.mxu0 %v2833_v16  ;;  %2516 = vmatprep.subr.bf16.mxu1 %v2515_v17  ;;  %v2871_v16 = vpack.c.bf16 %v795_v14, %v793_v46  ;;  %v792_v17 = vld [vmem:[#allocation5 + $0x1500] sm:$0xff]  ;;  %v830_v14 = vld [vmem:[#allocation5 + $0x1630] sm:$0xff] }
 0x1bd   :  { %2836 = vmatprep.subr.bf16.mxu0 %v2835_v20  ;;  %v799_v20 = vld [vmem:[#allocation5 + $0x1538] sm:$0xff]  ;;  %v2873_v21 = vpack.c.bf16 %v794_v18, %v792_v17  ;;  %v828_v46 = vld [vmem:[#allocation5 + $0x1620] sm:$0xff] }
 0x1be   :  { %v2875_v23 = vpack.c.bf16 %v799_v20, %v797_v19  ;;  %v832_v18 = vld [vmem:[#allocation5 + $0x1640] sm:$0xff]  ;;  %v834_v19 = vld [vmem:[#allocation5 + $0x1650] sm:$0xff]  ;;  %v837_v20 = vld [vmem:[#allocation5 + $0x1668] sm:$0xff] }
 0x1bf   :  { %2518 = vmatpush1.bf16.msra.mxu1 %v2517_v29  ;;  %v801_v29 = vld [vmem:[#allocation5 + $0x1548] sm:$0xff] }
 0x1c0   :  { %2838 = vmatpush1.bf16.msra.mxu0 %v2837_v30  ;;  %v803_v30 = vld [vmem:[#allocation5 + $0x1558] sm:$0xff] }
 0x1c1   :  { %2840 = vmatprep.subr.bf16.mxu0 %v2839_v31  ;;  %v2877_v31 = vpack.c.bf16 %v798_v28, %v796_v27  ;;  %v2879_v32 = vpack.c.bf16 %v803_v30, %v801_v29  ;;  %v836_v28 = vld [vmem:[#allocation5 + $0x1660] sm:$0xff]  ;;  %v838_v29 = vld [vmem:[#allocation5 + $0x1670] sm:$0xff]  ;;  %v841_v30 = vld [vmem:[#allocation5 + $0x1688] sm:$0xff] }
 0x1c2   :  { %1381 = vmatmul.mubr.f32.vlgmr.msra.gmra.mrb[0].mxu1 %v3502_v24  ;;  %v777_v24 = vld [vmem:[#allocation5 + $0x1488] sm:$0xff] }
 0x1c3   :  { %1736 = vmatmul.mubr.f32.vlgmr.msra.gmra.mrb[0].mxu0 %v3505_v39  ;;  %v2855_v39 = vpack.c.bf16 %v779_v54, %v777_v24  ;;  %v817_v24 = vld [vmem:[#allocation5 + $0x15c8] sm:$0xff]  ;;  %v819_v54 = vld [vmem:[#allocation5 + $0x15d8] sm:$0xff] }
 0x1c4   :  { %2842 = vmatpush1.bf16.msra.mxu0 %v2841_v35  ;;  %1806 = vmatprep.mubr.f32.mxu0 %v1006_v36  ;;  %v807_v35 = vld [vmem:[#allocation5 + $0x1578] sm:$0xff]  ;;  %v2881_v36 = vpack.c.bf16 %v802_v34, %v800_v33  ;;  %v840_v33 = vld [vmem:[#allocation5 + $0x1680] sm:$0xff]  ;;  %v842_v34 = vld [vmem:[#allocation5 + $0x1690] sm:$0xff] }
 0x1c5   :  { %2844 = vmatprep.subr.bf16.mxu0 %v2843_v37  ;;  %v2883_v37 = vpack.c.bf16 %v807_v35, %v805_v51  ;;  %v845_v51 = vld [vmem:[#allocation5 + $0x16a8] sm:$0xff]  ;;  %v847_v35 = vld [vmem:[#allocation5 + $0x16b8] sm:$0xff] }
 0x1c8   :  { %2846 = vmatpush1.bf16.msra.mxu0 %v2845_v44  ;;  %v2885_v44 = vpack.c.bf16 %v806_v40, %v804_v38  ;;  %v844_v38 = vld [vmem:[#allocation5 + $0x16a0] sm:$0xff]  ;;  %v846_v40 = vld [vmem:[#allocation5 + $0x16b0] sm:$0xff] }
 0x1c9   :  { %2848 = vmatprep.subr.bf16.mxu0 %v2847_v45  ;;  %v2887_v45 = vpack.c.bf16 %v811_v42, %v809_v41  ;;  %v849_v41 = vld [vmem:[#allocation5 + $0x16c8] sm:$0xff]  ;;  %v851_v42 = vld [vmem:[#allocation5 + $0x16d8] sm:$0xff] }
 0x1cc   :  { %2850 = vmatpush1.bf16.msra.mxu0 %v2849_v56  ;;  %v2889_v56 = vpack.c.bf16 %v810_v48, %v808_v47  ;;  %v848_v47 = vld [vmem:[#allocation5 + $0x16c0] sm:$0xff]  ;;  %v850_v48 = vld [vmem:[#allocation5 + $0x16d0] sm:$0xff] }
 0x1cd   :  { %2852 = vmatprep.subr.bf16.mxu0 %v2851_v43  ;;  %v2891_v43 = vpack.c.bf16 %v815_v50, %v813_v49  ;;  %v853_v49 = vld [vmem:[#allocation5 + $0x16e8] sm:$0xff]  ;;  %v855_v50 = vld [vmem:[#allocation5 + $0x16f8] sm:$0xff] }
 0x1ce   :  { %v2931_v57 = vpack.c.bf16 %v855_v50, %v853_v49  ;;  %v1908_v49 = vld [vmem:[#allocation8 + $0xb0] sm:$0xff] }
 0x1d0   :  { %2854 = vmatpush1.bf16.msra.mxu0 %v2853_v7  ;;  %v2893_v7 = vpack.c.bf16 %v814_v53, %v812_v52  ;;  %v1887_v52 = vld [vmem:[#allocation8 + $0x8] sm:$0xff]  ;;  %v1889_v53 = vld [vmem:[#allocation8 + $0x18] sm:$0xff] }
 0x1d1   :  { %2856 = vmatprep.subr.bf16.mxu0 %v2855_v39  ;;  %v2895_v39 = vpack.c.bf16 %v819_v54, %v817_v24  ;;  %v1886_v24 = vld [vmem:[#allocation8] sm:$0xff]  ;;  %v2929_v54 = vpack.c.bf16 %v850_v48, %v848_v47 }
 0x1d2   :  { %v1906_v48 = vld [vmem:[#allocation8 + $0xa0] sm:$0xff] }
 0x1d4   :  { %2858 = vmatpush1.bf16.msra.mxu0 %v2857_v59  ;;  %v2897_v59 = vpack.c.bf16 %v818_v25, %v816_v55  ;;  %v1891_v55 = vld [vmem:[#allocation8 + $0x28] sm:$0xff]  ;;  %v1893_v25 = vld [vmem:[#allocation8 + $0x38] sm:$0xff] }
 0x1d5   :  { %2860 = vmatprep.subr.bf16.mxu0 %v2859_v62  ;;  %v991_v62 = vcombine.high %v3513_v26, %v3513_v26 }
 0x1d7   :  { %v3526_v5 = vrot.slane %v991_v62, %v3434_v11  ;;  %v2909_v11 = vpack.c.bf16 %v830_v14, %v828_v46  ;;  %v1890_v62 = vld [vmem:[#allocation8 + $0x20] sm:$0xff]  ;;  %v1901_v46 = vld [vmem:[#allocation8 + $0x78] sm:$0xff] }
 0x1d8   :  { %2862 = vmatpush1.bf16.msra.mxu0 %v2861_v3  ;;  %v827_v3 = vld [vmem:[#allocation5 + $0x1618] sm:$0xff]  ;;  %v861_v14 = vld [vmem:[#allocation5 + $0x1728] sm:$0xff] }
 0x1d9   :  { %2864 = vmatprep.subr.bf16.mxu0 %v2863_v4  ;;  %v2901_v4 = vpack.c.bf16 %v822_v1, %v820_v0  ;;  %v2903_v6 = vpack.c.bf16 %v827_v3, %v825_v2  ;;  %v1007_v26 = vcombine.high %v3526_v5, %v3526_v5  ;;  %v1895_v0 = vld [vmem:[#allocation8 + $0x48] sm:$0xff]  ;;  %v859_v2 = vld [vmem:[#allocation5 + $0x1718] sm:$0xff] }
 0x1da   :  { %v857_v1 = vld [vmem:[#allocation5 + $0x1708] sm:$0xff]  ;;  %v1897_v3 = vld [vmem:[#allocation8 + $0x58] sm:$0xff] }
 0x1db   :  { %v2975_v8 = vpack.c.bf16 %v1897_v3, %v1895_v0  ;;  %v877_v0 = vld [vmem:[#allocation5 + $0x17a8] sm:$0xff] }
 0x1dc   :  { %2866 = vmatpush1.bf16.msra.mxu0 %v2865_v9  ;;  %v829_v9 = vld [vmem:[#allocation5 + $0x1628] sm:$0xff] }
 0x1dd   :  { %2868 = vmatprep.subr.bf16.mxu0 %v2867_v10  ;;  %v831_v10 = vld [vmem:[#allocation5 + $0x1638] sm:$0xff] }
 0x1de   :  { %v2907_v13 = vpack.c.bf16 %v831_v10, %v829_v9  ;;  %v1894_v9 = vld [vmem:[#allocation8 + $0x40] sm:$0xff]  ;;  %v1896_v10 = vld [vmem:[#allocation8 + $0x50] sm:$0xff] }
 0x1e0   :  { %2870 = vmatpush1.bf16.msra.mxu0 %v2869_v15  ;;  %v833_v15 = vld [vmem:[#allocation5 + $0x1648] sm:$0xff] }
 0x1e1   :  { %2872 = vmatprep.subr.bf16.mxu0 %v2871_v16  ;;  %v835_v16 = vld [vmem:[#allocation5 + $0x1658] sm:$0xff] }
 0x1e2   :  { %v2911_v17 = vpack.c.bf16 %v835_v16, %v833_v15  ;;  %v863_v15 = vld [vmem:[#allocation5 + $0x1738] sm:$0xff]  ;;  %v2977_v16 = vpack.c.bf16 %v1896_v10, %v1894_v9  ;;  %v878_v10 = vld [vmem:[#allocation5 + $0x17b0] sm:$0xff] }
 0x1e4   :  { %2874 = vmatpush1.bf16.msra.mxu0 %v2873_v21  ;;  %v839_v21 = vld [vmem:[#allocation5 + $0x1678] sm:$0xff] }
 0x1e5   :  { %2876 = vmatprep.subr.bf16.mxu0 %v2875_v23  ;;  %v2913_v23 = vpack.c.bf16 %v834_v19, %v832_v18  ;;  %v2915_v27 = vpack.c.bf16 %v839_v21, %v837_v20  ;;  %v1898_v19 = vld [vmem:[#allocation8 + $0x60] sm:$0xff]  ;;  %v1900_v20 = vld [vmem:[#allocation8 + $0x70] sm:$0xff]  ;;  %v2939_v21 = vpack.c.bf16 %v863_v15, %v861_v14 }
 0x1e8   :  { %2878 = vmatpush1.bf16.msra.mxu0 %v2877_v31  ;;  %v843_v31 = vld [vmem:[#allocation5 + $0x1698] sm:$0xff] }
 0x1e9   :  { %2880 = vmatprep.subr.bf16.mxu0 %v2879_v32  ;;  %v2917_v32 = vpack.c.bf16 %v838_v29, %v836_v28  ;;  %v1905_v28 = vld [vmem:[#allocation8 + $0x98] sm:$0xff]  ;;  %v865_v29 = vld [vmem:[#allocation5 + $0x1748] sm:$0xff] }
 0x1ec   :  { %2882 = vmatpush1.bf16.msra.mxu0 %v2881_v36  ;;  %v2921_v36 = vpack.c.bf16 %v842_v34, %v840_v33  ;;  %v1902_v34 = vld [vmem:[#allocation8 + $0x80] sm:$0xff] }
 0x1ed   :  { %2884 = vmatprep.subr.bf16.mxu0 %v2883_v37  ;;  %v2923_v37 = vpack.c.bf16 %v847_v35, %v845_v51  ;;  %v1904_v51 = vld [vmem:[#allocation8 + $0x90] sm:$0xff] }
 0x1f0   :  { %2886 = vmatpush1.bf16.msra.mxu0 %v2885_v44  ;;  %v2925_v44 = vpack.c.bf16 %v846_v40, %v844_v38  ;;  %v1909_v38 = vld [vmem:[#allocation8 + $0xb8] sm:$0xff]  ;;  %v869_v40 = vld [vmem:[#allocation5 + $0x1768] sm:$0xff] }
 0x1f1   :  { %2888 = vmatprep.subr.bf16.mxu0 %v2887_v45  ;;  %v2927_v45 = vpack.c.bf16 %v851_v42, %v849_v41  ;;  %v871_v41 = vld [vmem:[#allocation5 + $0x1778] sm:$0xff]  ;;  %v2985_v42 = vpack.c.bf16 %v1904_v51, %v1902_v34  ;;  %v886_v51 = vld [vmem:[#allocation5 + $0x17f0] sm:$0xff] }
 0x1f2   :  { %v2947_v50 = vpack.c.bf16 %v871_v41, %v869_v40  ;;  %v1926_v41 = vld [vmem:[#allocation8 + $0x140] sm:$0xff] }
 0x1f4   :  { %2890 = vmatpush1.bf16.msra.mxu0 %v2889_v56  ;;  %v852_v56 = vld [vmem:[#allocation5 + $0x16e0] sm:$0xff] }
 0x1f5   :  { %2892 = vmatprep.subr.bf16.mxu0 %v2891_v43  ;;  %v854_v43 = vld [vmem:[#allocation5 + $0x16f0] sm:$0xff] }
 0x1f8   :  { %2894 = vmatpush1.bf16.msra.mxu0 %v2893_v7  ;;  %v2967_v7 = vpack.c.bf16 %v1889_v53, %v1887_v52  ;;  %v1913_v52 = vld [vmem:[#allocation8 + $0xd8] sm:$0xff]  ;;  %v873_v53 = vld [vmem:[#allocation5 + $0x1788] sm:$0xff] }
 0x1f9   :  { %2896 = vmatprep.subr.bf16.mxu0 %v2895_v39  ;;  %v1888_v39 = vld [vmem:[#allocation8 + $0x10] sm:$0xff] }
 0x1fa   :  { %v2969_v58 = vpack.c.bf16 %v1888_v39, %v1886_v24  ;;  %2968 = vmatprep.subr.bf16.mxu1 %v2967_v7  ;;  %v875_v24 = vld [vmem:[#allocation5 + $0x1798] sm:$0xff]  ;;  %v872_v39 = vld [vmem:[#allocation5 + $0x1780] sm:$0xff] }
 0x1fc   :  { %2898 = vmatpush1.bf16.msra.mxu0 %v2897_v59  ;;  %v2971_v59 = vpack.c.bf16 %v1893_v25, %v1891_v55  ;;  %2970 = vmatpush1.bf16.msra.mxu1 %v2969_v58  ;;  %v1910_v25 = vld [vmem:[#allocation8 + $0xc0] sm:$0xff]  ;;  %v2951_v58 = vpack.c.bf16 %v875_v24, %v873_v53 }
 0x1fd   :  { %2900 = vmatprep.subr.bf16.mxu0 %v2899_v63  ;;  %v1892_v63 = vld [vmem:[#allocation8 + $0x30] sm:$0xff]  ;;  %v1934_v24 = vld [vmem:[#allocation8 + $0x180] sm:$0xff] }
 0x1fe   :  { %2972 = vmatprep.subr.bf16.mxu1 %v2971_v59  ;;  %v874_v59 = vld [vmem:[#allocation5 + $0x1790] sm:$0xff] }
 0x1ff   :  { %v2953_v3 = vpack.c.bf16 %v874_v59, %v872_v39  ;;  %v1941_v39 = vld [vmem:[#allocation8 + $0x1b8] sm:$0xff]  ;;  %v1943_v59 = vld [vmem:[#allocation8 + $0x1c8] sm:$0xff] }
 0x200   :  { %2902 = vmatpush1.bf16.msra.mxu0 %v2901_v4  ;;  %v2973_v4 = vpack.c.bf16 %v1892_v63, %v1890_v62  ;;  %v1915_v62 = vld [vmem:[#allocation8 + $0xe8] sm:$0xff]  ;;  %v1917_v63 = vld [vmem:[#allocation8 + $0xf8] sm:$0xff] }
 0x201   :  { %2904 = vmatprep.subr.bf16.mxu0 %v2903_v6  ;;  %v2933_v6 = vpack.c.bf16 %v854_v43, %v852_v56  ;;  %v870_v56 = vld [vmem:[#allocation5 + $0x1770] sm:$0xff] }
 0x202   :  { %2974 = vmatpush1.bf16.msra.mxu1 %v2973_v4  ;;  %v1911_v43 = vld [vmem:[#allocation8 + $0xc8] sm:$0xff]  ;;  %v876_v4 = vld [vmem:[#allocation5 + $0x17a0] sm:$0xff] }
 0x203   :  { %1807 = vmatmul.mubr.f32.vlgmr.msra.gmra.mrb[0].mxu0 %v3517_v60  ;;  %v2919_v60 = vpack.c.bf16 %v843_v31, %v841_v30  ;;  %2976 = vmatprep.subr.bf16.mxu1 %v2975_v8  ;;  %v867_v30 = vld [vmem:[#allocation5 + $0x1758] sm:$0xff]  ;;  %v2981_v31 = vpack.c.bf16 %v1900_v20, %v1898_v19  ;;  %v2991_v55 = vpack.c.bf16 %v1913_v52, %v1911_v43  ;;  %v882_v20 = vld [vmem:[#allocation5 + $0x17d0] sm:$0xff] }
 0x204   :  { %2906 = vmatpush1.bf16.msra.mxu0 %v2905_v12  ;;  %1877 = vmatprep.mubr.f32.mxu0 %v1007_v26  ;;  %v2935_v12 = vpack.c.bf16 %v859_v2, %v857_v1  ;;  %v858_v26 = vld [vmem:[#allocation5 + $0x1710] sm:$0xff]  ;;  %v2943_v35 = vpack.c.bf16 %v867_v30, %v865_v29  ;;  %v879_v1 = vld [vmem:[#allocation5 + $0x17b8] sm:$0xff]  ;;  %v2957_v15 = vpack.c.bf16 %v878_v10, %v876_v4 }
 0x205   :  { %2908 = vmatprep.subr.bf16.mxu0 %v2907_v13  ;;  %v1899_v13 = vld [vmem:[#allocation8 + $0x68] sm:$0xff]  ;;  %v1916_v8 = vld [vmem:[#allocation8 + $0xf0] sm:$0xff]  ;;  %v2955_v9 = vpack.c.bf16 %v879_v1, %v877_v0  ;;  %v1937_v43 = vld [vmem:[#allocation8 + $0x198] sm:$0xff] }
 0x206   :  { %v2979_v18 = vpack.c.bf16 %v1901_v46, %v1899_v13  ;;  %2978 = vmatpush1.bf16.msra.mxu1 %v2977_v16  ;;  %v881_v13 = vld [vmem:[#allocation5 + $0x17c8] sm:$0xff]  ;;  %v883_v46 = vld [vmem:[#allocation5 + $0x17d8] sm:$0xff]  ;;  %v880_v16 = vld [vmem:[#allocation5 + $0x17c0] sm:$0xff] }
 0x207   :  { %v2959_v19 = vpack.c.bf16 %v883_v46, %v881_v13  ;;  %v2961_v30 = vpack.c.bf16 %v882_v20, %v880_v16  ;;  %v1942_v0 = vld [vmem:[#allocation8 + $0x1c0] sm:$0xff]  ;;  %v1944_v1 = vld [vmem:[#allocation8 + $0x1d0] sm:$0xff]  ;;  %v896_v16 = vsub.s32 1, %v3431_v61 }
 0x208   :  { %2910 = vmatpush1.bf16.msra.mxu0 %v2909_v11  ;;  %v2937_v11 = vpack.c.bf16 %v858_v26, %v856_v22  ;;  %2980 = vmatprep.subr.bf16.mxu1 %v2979_v18  ;;  %v1914_v22 = vld [vmem:[#allocation8 + $0xe0] sm:$0xff]  ;;  %v1921_v26 = vld [vmem:[#allocation8 + $0x118] sm:$0xff]  ;;  %v1920_v18 = vld [vmem:[#allocation8 + $0x110] sm:$0xff] }
 0x209   :  { %2912 = vmatprep.subr.bf16.mxu0 %v2911_v17  ;;  %v860_v17 = vld [vmem:[#allocation5 + $0x1720] sm:$0xff]  ;;  %v2997_v14 = vpack.c.bf16 %v1916_v8, %v1914_v22  ;;  %v1948_v10 = vld [vmem:[#allocation8 + $0x1f0] sm:$0xff] }
 0x20a   :  { %2982 = vmatpush1.bf16.msra.mxu1 %v2981_v31  ;;  %v884_v31 = vld [vmem:[#allocation5 + $0x17e0] sm:$0xff]  ;;  %v2052_v13 = vld [vmem:[#allocation11 + $0x88] sm:$0xff] }
 0x20b   :  { %v1949_v22 = vld [vmem:[#allocation8 + $0x1f8] sm:$0xff] }
 0x20c   :  { %2914 = vmatpush1.bf16.msra.mxu0 %v2913_v23  ;;  %v862_v23 = vld [vmem:[#allocation5 + $0x1730] sm:$0xff] }
 0x20d   :  { %2916 = vmatprep.subr.bf16.mxu0 %v2915_v27  ;;  %v1903_v27 = vld [vmem:[#allocation8 + $0x88] sm:$0xff] }
 0x20e   :  { %v2983_v33 = vpack.c.bf16 %v1905_v28, %v1903_v27  ;;  %v885_v27 = vld [vmem:[#allocation5 + $0x17e8] sm:$0xff]  ;;  %v887_v28 = vld [vmem:[#allocation5 + $0x17f8] sm:$0xff] }
 0x20f   :  { %v2963_v34 = vpack.c.bf16 %v887_v28, %v885_v27  ;;  %v2035_v27 = vld [vmem:[#allocation11] sm:$0xff]  ;;  %v2036_v28 = vld [vmem:[#allocation11 + $0x8] sm:$0xff] }
 0x210   :  { %2918 = vmatpush1.bf16.msra.mxu0 %v2917_v32  ;;  %v2941_v32 = vpack.c.bf16 %v862_v23, %v860_v17  ;;  %2984 = vmatprep.subr.bf16.mxu1 %v2983_v33  ;;  %v1918_v17 = vld [vmem:[#allocation8 + $0x100] sm:$0xff]  ;;  %v1925_v23 = vld [vmem:[#allocation8 + $0x138] sm:$0xff]  ;;  %v1924_v33 = vld [vmem:[#allocation8 + $0x130] sm:$0xff] }
 0x211   :  { %2920 = vmatprep.subr.bf16.mxu0 %v2919_v60  ;;  %v864_v60 = vld [vmem:[#allocation5 + $0x1740] sm:$0xff]  ;;  %2986 = vmatpush1.bf16.msra.mxu1 %v2985_v42  ;;  %v3001_v29 = vpack.c.bf16 %v1920_v18, %v1918_v17  ;;  %v1928_v42 = vld [vmem:[#allocation8 + $0x150] sm:$0xff] }
 0x214   :  { %2922 = vmatpush1.bf16.msra.mxu0 %v2921_v36  ;;  %v866_v36 = vld [vmem:[#allocation5 + $0x1750] sm:$0xff] }
 0x215   :  { %2924 = vmatprep.subr.bf16.mxu0 %v2923_v37  ;;  %v1907_v37 = vld [vmem:[#allocation8 + $0xa8] sm:$0xff] }
 0x216   :  { %v2987_v47 = vpack.c.bf16 %v1909_v38, %v1907_v37  ;;  %v2965_v38 = vpack.c.bf16 %v886_v51, %v884_v31  ;;  %v2054_v31 = vld [vmem:[#allocation11 + $0x98] sm:$0xff]  ;;  %v2037_v51 = vld [vmem:[#allocation11 + $0x10] sm:$0xff] }
 0x218   :  { %2926 = vmatpush1.bf16.msra.mxu0 %v2925_v44  ;;  %v2945_v44 = vpack.c.bf16 %v866_v36, %v864_v60  ;;  %2988 = vmatprep.subr.bf16.mxu1 %v2987_v47  ;;  %v1922_v60 = vld [vmem:[#allocation8 + $0x120] sm:$0xff]  ;;  %v1929_v36 = vld [vmem:[#allocation8 + $0x158] sm:$0xff]  ;;  %v3009_v47 = vpack.c.bf16 %v1928_v42, %v1926_v41  ;;  %v2040_v42 = vld [vmem:[#allocation11 + $0x28] sm:$0xff] }
 0x219   :  { %2928 = vmatprep.subr.bf16.mxu0 %v2927_v45  ;;  %v868_v45 = vld [vmem:[#allocation5 + $0x1760] sm:$0xff]  ;;  %v3005_v37 = vpack.c.bf16 %v1924_v33, %v1922_v60  ;;  %v3033_v60 = vpack.c.bf16 %v2036_v28, %v2035_v27 }
 0x21a   :  { %v2949_v7 = vpack.c.bf16 %v870_v56, %v868_v45  ;;  %v1933_v45 = vld [vmem:[#allocation8 + $0x178] sm:$0xff]  ;;  %v1935_v56 = vld [vmem:[#allocation8 + $0x188] sm:$0xff] }
 0x21b   :  { %v3015_v53 = vpack.c.bf16 %v1937_v43, %v1935_v56  ;;  %v2039_v41 = vld [vmem:[#allocation11 + $0x20] sm:$0xff]  ;;  %v2060_v43 = vld [vmem:[#allocation11 + $0xc8] sm:$0xff] }
 0x21c   :  { %2930 = vmatpush1.bf16.msra.mxu0 %v2929_v54  ;;  %v2989_v54 = vpack.c.bf16 %v1908_v49, %v1906_v48  ;;  %v1930_v49 = vld [vmem:[#allocation8 + $0x160] sm:$0xff] }
 0x21d   :  { %2932 = vmatprep.subr.bf16.mxu0 %v2931_v57  ;;  %v1912_v57 = vld [vmem:[#allocation8 + $0xd0] sm:$0xff]  ;;  %v2059_v56 = vld [vmem:[#allocation11 + $0xc0] sm:$0xff] }
 0x21e   :  { %2990 = vmatpush1.bf16.msra.mxu1 %v2989_v54  ;;  %v2993_v2 = vpack.c.bf16 %v1912_v57, %v1910_v25  ;;  %v1936_v54 = vld [vmem:[#allocation8 + $0x190] sm:$0xff]  ;;  %v1938_v57 = vld [vmem:[#allocation8 + $0x1a0] sm:$0xff] }
 0x21f   :  { %2992 = vmatprep.subr.bf16.mxu1 %v2991_v55  ;;  %v3017_v55 = vpack.c.bf16 %v1936_v54, %v1934_v24  ;;  %v2043_v24 = vld [vmem:[#allocation11 + $0x40] sm:$0xff]  ;;  %v2044_v54 = vld [vmem:[#allocation11 + $0x48] sm:$0xff] }
 0x220   :  { %2934 = vmatpush1.bf16.msra.mxu0 %v2933_v6  ;;  %v2995_v6 = vpack.c.bf16 %v1917_v63, %v1915_v62  ;;  %v1945_v62 = vld [vmem:[#allocation8 + $0x1d8] sm:$0xff] }
 0x221   :  { %2936 = vmatprep.subr.bf16.mxu0 %v2935_v12  ;;  %v1919_v12 = vld [vmem:[#allocation8 + $0x108] sm:$0xff] }
 0x222   :  { %2994 = vmatpush1.bf16.msra.mxu1 %v2993_v2  ;;  %v3025_v2 = vpack.c.bf16 %v1944_v1, %v1942_v0  ;;  %v2047_v0 = vld [vmem:[#allocation11 + $0x60] sm:$0xff]  ;;  %v2048_v1 = vld [vmem:[#allocation11 + $0x68] sm:$0xff] }
 0x223   :  { %2996 = vmatprep.subr.bf16.mxu1 %v2995_v6  ;;  %v1947_v6 = vld [vmem:[#allocation8 + $0x1e8] sm:$0xff] }
 0x224   :  { %2938 = vmatpush1.bf16.msra.mxu0 %v2937_v11  ;;  %v2999_v11 = vpack.c.bf16 %v1921_v26, %v1919_v12  ;;  %v3027_v8 = vpack.c.bf16 %v1949_v22, %v1947_v6  ;;  %v2051_v26 = vld [vmem:[#allocation11 + $0x80] sm:$0xff]  ;;  %v2049_v22 = vld [vmem:[#allocation11 + $0x70] sm:$0xff] }
 0x225   :  { %2940 = vmatprep.subr.bf16.mxu0 %v2939_v21  ;;  %v1923_v21 = vld [vmem:[#allocation8 + $0x128] sm:$0xff]  ;;  %v3031_v46 = vpack.c.bf16 %v2052_v13, %v2051_v26 }
 0x226   :  { %2998 = vmatpush1.bf16.msra.mxu1 %v2997_v14  ;;  %v892_v14 = vsub.s32 0, %v3431_v61 }
 0x227   :  { %3000 = vmatprep.subr.bf16.mxu1 %v2999_v11 }
 0x228   :  { %2942 = vmatpush1.bf16.msra.mxu0 %v2941_v32  ;;  %v3003_v32 = vpack.c.bf16 %v1925_v23, %v1923_v21 }
 0x229   :  { %2944 = vmatprep.subr.bf16.mxu0 %v2943_v35  ;;  %v1927_v35 = vld [vmem:[#allocation8 + $0x148] sm:$0xff] }
 0x22a   :  { %3002 = vmatpush1.bf16.msra.mxu1 %v3001_v29  ;;  %v3007_v40 = vpack.c.bf16 %v1929_v36, %v1927_v35  ;;  %v2038_v35 = vld [vmem:[#allocation11 + $0x18] sm:$0xff]  ;;  %v2055_v36 = vld [vmem:[#allocation11 + $0xa0] sm:$0xff] }
 0x22b   :  { %3004 = vmatprep.subr.bf16.mxu1 %v3003_v32 }
 0x22c   :  { %2946 = vmatpush1.bf16.msra.mxu0 %v2945_v44  ;;  %v1931_v44 = vld [vmem:[#allocation8 + $0x168] sm:$0xff] }
 0x22d   :  { %2948 = vmatprep.subr.bf16.mxu0 %v2947_v50  ;;  %v3011_v48 = vpack.c.bf16 %v1933_v45, %v1931_v44  ;;  %v1932_v50 = vld [vmem:[#allocation8 + $0x170] sm:$0xff]  ;;  %v2058_v45 = vld [vmem:[#allocation11 + $0xb8] sm:$0xff] }
 0x22e   :  { %3006 = vmatpush1.bf16.msra.mxu1 %v3005_v37  ;;  %v3013_v52 = vpack.c.bf16 %v1932_v50, %v1930_v49  ;;  %v2056_v37 = vld [vmem:[#allocation11 + $0xa8] sm:$0xff]  ;;  %v2057_v44 = vld [vmem:[#allocation11 + $0xb0] sm:$0xff]  ;;  %v2042_v50 = vld [vmem:[#allocation11 + $0x38] sm:$0xff] }
 0x22f   :  { %3008 = vmatprep.subr.bf16.mxu1 %v3007_v40  ;;  %v3039_v40 = vpack.c.bf16 %v2056_v37, %v2055_v36  ;;  %v2041_v49 = vld [vmem:[#allocation11 + $0x30] sm:$0xff] }
 0x230   :  { %2950 = vmatpush1.bf16.msra.mxu0 %v2949_v7  ;;  %v1939_v7 = vld [vmem:[#allocation8 + $0x1a8] sm:$0xff] }
 0x231   :  { %2952 = vmatprep.subr.bf16.mxu0 %v2951_v58  ;;  %v3019_v25 = vpack.c.bf16 %v1941_v39, %v1939_v7  ;;  %v1940_v58 = vld [vmem:[#allocation8 + $0x1b0] sm:$0xff]  ;;  %v2062_v39 = vld [vmem:[#allocation11 + $0xd8] sm:$0xff] }
 0x232   :  { %3010 = vmatpush1.bf16.msra.mxu1 %v3009_v47  ;;  %v3021_v63 = vpack.c.bf16 %v1940_v58, %v1938_v57  ;;  %v3041_v47 = vpack.c.bf16 %v2040_v42, %v2039_v41  ;;  %v2061_v7 = vld [vmem:[#allocation11 + $0xd0] sm:$0xff]  ;;  %v2046_v58 = vld [vmem:[#allocation11 + $0x58] sm:$0xff] }
 0x233   :  { %3012 = vmatprep.subr.bf16.mxu1 %v3011_v48  ;;  %v3043_v48 = vpack.c.bf16 %v2058_v45, %v2057_v44  ;;  %v2045_v57 = vld [vmem:[#allocation11 + $0x50] sm:$0xff] }
 0x234   :  { %2954 = vmatpush1.bf16.msra.mxu0 %v2953_v3 }
 0x235   :  { %2956 = vmatprep.subr.bf16.mxu0 %v2955_v9  ;;  %v1946_v9 = vld [vmem:[#allocation8 + $0x1e0] sm:$0xff] }
 0x236   :  { %3014 = vmatpush1.bf16.msra.mxu1 %v3013_v52  ;;  %v3029_v12 = vpack.c.bf16 %v1948_v10, %v1946_v9  ;;  %v3045_v52 = vpack.c.bf16 %v2042_v50, %v2041_v49  ;;  %v1950_v10 = vld [vmem:[#allocation10] sm:$0x3] }
 0x237   :  { %3016 = vmatprep.subr.bf16.mxu1 %v3015_v53  ;;  %v3047_v53 = vpack.c.bf16 %v2060_v43, %v2059_v56  ;;  %v1959_v26 = vrot.slane %v1950_v10, %v896_v16 }
 0x238   :  { %2958 = vmatpush1.bf16.msra.mxu0 %v2957_v15  ;;  %v888_v15 = vld [vmem:[#allocation7] sm:$0x3] }
 0x239   :  { %2960 = vmatprep.subr.bf16.mxu0 %v2959_v19  ;;  %v893_v11 = vrot.slane %v888_v15, %v892_v14  ;;  %v897_v17 = vrot.slane %v888_v15, %v896_v16 }
 0x23a   :  { %3018 = vmatpush1.bf16.msra.mxu1 %v3017_v55  ;;  %v3049_v55 = vpack.c.bf16 %v2044_v54, %v2043_v24 }
 0x23b   :  { %3020 = vmatprep.subr.bf16.mxu1 %v3019_v25  ;;  %v3051_v25 = vpack.c.bf16 %v2062_v39, %v2061_v7 }
 0x23c   :  { %2962 = vmatpush1.bf16.msra.mxu0 %v2961_v30  ;;  %v2053_v30 = vld [vmem:[#allocation11 + $0x90] sm:$0xff] }
 0x23d   :  { %2964 = vmatprep.subr.bf16.mxu0 %v2963_v34  ;;  %v3035_v34 = vpack.c.bf16 %v2054_v31, %v2053_v30 }
 0x23e   :  { %3022 = vmatpush1.bf16.msra.mxu1 %v3021_v63  ;;  %v3053_v63 = vpack.c.bf16 %v2046_v58, %v2045_v57 }
 0x240   :  { %2966 = vmatpush1.bf16.msra.mxu0 %v2965_v38  ;;  %v3037_v38 = vpack.c.bf16 %v2038_v35, %v2037_v51 }
 0x243   :  { %1878 = vmatmul.mubr.f32.vlgmr.msra.gmra.mrb[0].mxu0 %v3526_v5  ;;  %v3023_v5 = vpack.c.bf16 %v1945_v62, %v1943_v59  ;;  %v2063_v59 = vld [vmem:[#allocation11 + $0xe0] sm:$0xff]  ;;  %v2064_v62 = vld [vmem:[#allocation11 + $0xe8] sm:$0xff] }
 0x245   :  { %3024 = vmatprep.subr.bf16.mxu1 %v3023_v5  ;;  %v3055_v5 = vpack.c.bf16 %v2064_v62, %v2063_v59 }
 0x246   :  { %3026 = vmatpush1.bf16.msra.mxu1 %v3025_v2  ;;  %v3057_v2 = vpack.c.bf16 %v2048_v1, %v2047_v0 }
 0x247   :  { %3028 = vmatprep.subr.bf16.mxu1 %v3027_v8  ;;  %v2050_v8 = vld [vmem:[#allocation11 + $0x78] sm:$0xff] }
 0x248   :  { %v3061_v9 = vpack.c.bf16 %v2050_v8, %v2049_v22 }
 0x24a   :  { %3030 = vmatpush1.bf16.msra.mxu1 %v3029_v12  ;;  %v1955_v12 = vrot.slane %v1950_v10, %v892_v14 }
 0x24b   :  { %3032 = vmatprep.subr.bf16.mxu1 %v3031_v46 }
 0x295   :  { %v1382_v3 = vpop.f32.mrb[0].mxu1 }
 0x296   :  { %v1384_v4 = vpop.f32.mrb[1].mxu1  ;;  %v3063_v18 = vadd.f32 %v1382_v3, %v893_v11  ;;  %v2065_v3 = vld [vmem:[#allocation11 + $0xf0] sm:$0xff] }
 0x297   :  { %v3065_v19 = vadd.f32 %v1384_v4, %v897_v17  ;;  %v2066_v4 = vld [vmem:[#allocation11 + $0xf8] sm:$0xff] }
 0x298   :  { %v3059_v6 = vpack.c.bf16 %v2066_v4, %v2065_v3 }
 0x316   :  { %v1879_v20 = vpop.f32.mrb[0].mxu0 }
 0x317   :  { %v3064_v21 = vadd.f32 %v3063_v18, %v1879_v20  ;;  %v1881_v23 = vpop.f32.mrb[1].mxu0  ;;  %v2163_v20 = vld [vmem:[#allocation13] ss:$0 sm:$0xff] }
 0x318   :  { %v3066_v29 = vadd.f32 %v3065_v19, %v1881_v23 }
 0x319   :  { %v1884_v33 = vmax.f32 %v3064_v21, 0.0 }
 0x31a   :  { %v1885_v32 = vmax.f32 %v3066_v29, 0.0 }
 0x31c   :  { %2026 = vmatprep.mubr.f32.mxu1 %v1885_v32 }
 0x31d   :  { %2027 = vmatmul.mubr.f32.vlgmr.msra.gmra.mrb[2].mxu1 %v1884_v33 }
 0x31e   :  { %3034 = vmatpush3.bf16.msra.mxu1 %v3033_v60 }
 0x31f   :  { %3036 = vmatprep.subr.bf16.mxu1 %v3035_v34 }
 0x322   :  { %3038 = vmatpush3.bf16.msra.mxu1 %v3037_v38 }
 0x323   :  { %3040 = vmatprep.subr.bf16.mxu1 %v3039_v40 }
 0x326   :  { %3042 = vmatpush3.bf16.msra.mxu1 %v3041_v47 }
 0x327   :  { %3044 = vmatprep.subr.bf16.mxu1 %v3043_v48 }
 0x32a   :  { %3046 = vmatpush3.bf16.msra.mxu1 %v3045_v52 }
 0x32b   :  { %3048 = vmatprep.subr.bf16.mxu1 %v3047_v53 }
 0x32e   :  { %3050 = vmatpush3.bf16.msra.mxu1 %v3049_v55 }
 0x32f   :  { %3052 = vmatprep.subr.bf16.mxu1 %v3051_v25 }
 0x332   :  { %3054 = vmatpush3.bf16.msra.mxu1 %v3053_v63 }
 0x333   :  { %3056 = vmatprep.subr.bf16.mxu1 %v3055_v5 }
 0x336   :  { %3058 = vmatpush3.bf16.msra.mxu1 %v3057_v2 }
 0x337   :  { %3060 = vmatprep.subr.bf16.mxu1 %v3059_v6 }
 0x33a   :  { %3062 = vmatpush3.bf16.msra.mxu1 %v3061_v9 }
 0x3f0   :  { %v2028_v13 = vpop.f32.mrb[2].mxu1 }
 0x3f1   :  { %v2029_v46 = vadd.f32 %v2028_v13, %v1955_v12  ;;  %v2030_v15 = vpop.f32.mrb[3].mxu1 }
 0x3f2   :  { %v2031_v11 = vadd.f32 %v2030_v15, %v1959_v26 }
 0x3f3   :  { %v2033_v18 = vmax.f32 %v2029_v46, 0.0 }
 0x3f4   :  { %v2034_v17 = vmax.f32 %v2031_v11, 0.0 }
 0x3f6   :  { %2138 = vmatprep.mubr.f32.mxu1 %v2034_v17 }
 0x3f7   :  { %2139 = vmatmul.mubr.f32.vlgmr.msra.gmra.mrb[4].mxu1 %v2033_v18 }
 0x4ca   :  { %v2196_v19 = vpop.f32.mrb[4].mxu1 }
 0x4cb   :  { %v2197_v21 = vpop.f32.mrb[5].mxu1 }
 0x4cc   :  { %v2198_v23 = vadd.f32 %v2197_v21, %v2196_v19 }
 0x4ce   :  { %v2141_v27 = vadd.f32 %v2198_v23, %v2163_v20 }
 0x4d0   :  { %2144 = vst [vmem:[#allocation14] sm:$0x3] %v2141_v27 }
 0x4d1   :  { %3273 = shalt.err (!%p3270_p4)
}
 0x4d2   :  { %s3274_s11 = scalar_lea.hbm %s3561_s7, 32 }
 0x4d3   :  { %p3275_p5 = scmp.ne.s32.totalorder %s3561_s7, %s3274_s11  ;;  %p3278_p6 = scmp.lt.u32.totalorder %s3274_s11, %s3561_s7 }
 0x4d5   :  { %p3280_p7 = pnand %p3278_p6, %p3275_p5 }
 0x4d7   :  { %3283 = shalt.err (!%p3280_p7)
}
 0x4d8   :  { %2154 = dma.vmem_to_hbm [thread:$0]  %s2152_s13, 32, %s3561_s7, [#allocation4]  }
 0x4d9   :  { %3292 = dma.done.wait [#allocation4], 32  }
 0x4da   :  { %3293 = vsyncadd [#allocation4], 4294967264 }
 0x4db   :  { %2158 = vsyncpa [#allocation3], 1 }
 0x4dc   :  { %2159 = vsyncpa [#allocation6], 1 }
 0x4dd   :  { %2160 = vsyncpa [#allocation9], 1 }
 0x4de   :  { %2161 = vsyncpa [#allocation12], 1 }
 0x4df   :  { %2162 = vsyncpa [#allocation4], 1 }

</bundles_post_ra>
